<compile_context>
chip_gen: v6e
topology: v6e:2x2x1
jax: 0.10.0
libtpu: 0.0.40
codegen_flags: <defaults>
</compile_context>

<pallas_src>
from functools import partial

import jax
import jax.numpy as jnp
from jax import lax
from jax.experimental import pallas as pl
from jax.experimental.pallas import tpu as pltpu


# ---------------------------------------------------------------------------
# Fused Pallas kernel
# ---------------------------------------------------------------------------
def _lenet_fused_kernel(p1_ref, w1_ref, b1_ref, w2_ref, b2_ref,
                        wf1_ref, bf1_ref, wf2_ref, bf2_ref,
                        wo_ref, bo_ref, o_ref,
                        patches2_ref, flat_ref, *, n):
    f32 = jnp.float32

    # ---- conv1: (4*n*144, 25) @ (25, 6) + b, ReLU ------------------------
    y1 = jnp.dot(p1_ref[...], w1_ref[...], preferred_element_type=f32)
    y1 = jnp.maximum(y1 + b1_ref[...], 0.0)

    # ---- pool1: patch rows were pre-grouped into the 4 quadrants of each
    #      2x2 window, so the pool is a max of 4 contiguous (n*144, 6) blocks.
    blk = n * 144
    p1 = jnp.maximum(jnp.maximum(y1[0:blk], y1[blk:2 * blk]),
                     jnp.maximum(y1[2 * blk:3 * blk], y1[3 * blk:4 * blk]))
    p1 = p1.reshape(n, 12, 12, 6)                      # NHWC, rows (n, ho, wo)

    # ---- conv2 im2col into VMEM scratch: columns ordered (di, dj, ci) ----
    for di in range(5):
        for dj in range(5):
            c0 = (di * 5 + dj) * 6
            patches2_ref[:, c0:c0 + 6] = (
                p1[:, di:di + 8, dj:dj + 8, :].reshape(n * 64, 6))

    # ---- conv2: (n*64, 150) @ (150, 12) + b, ReLU ------------------------
    y2 = jnp.dot(patches2_ref[...], w2_ref[...], preferred_element_type=f32)
    y2 = jnp.maximum(y2 + b2_ref[...], 0.0)

    # ---- pool2 (2x2, stride 2): W-pairs on a tiny sublane dim, H-pairs on
    #      a leading dim (both reductions stay in vregs).
    t = jnp.max(y2.reshape(n, 8, 4, 2, 12), axis=3)    # (n, 8, 4, 12)
    p2 = jnp.max(t.reshape(n, 4, 2, 4, 12), axis=2)    # (n, 4, 4, 12) NHWC

    # ---- flatten (h, w, c) into VMEM scratch; fc1 weight rows were permuted
    #      at init to this NHWC order (matches PyTorch's NCHW flatten).
    for h in range(4):
        for w in range(4):
            s = h * 4 + w
            flat_ref[:, s * 12:(s + 1) * 12] = p2[:, h, w, :]

    # ---- fc stack (hidden dims zero-padded to 128 at init) ---------------
    h1 = jnp.dot(flat_ref[...], wf1_ref[...], preferred_element_type=f32)
    h1 = jnp.maximum(h1 + bf1_ref[...], 0.0)
    h2 = jnp.dot(h1, wf2_ref[...], preferred_element_type=f32)
    h2 = jnp.maximum(h2 + bf2_ref[...], 0.0)
    o_ref[...] = (jnp.dot(h2, wo_ref[...], preferred_element_type=f32)
                  + bo_ref[...]).astype(o_ref.dtype)


# ---------------------------------------------------------------------------
# Wrapper glue
# ---------------------------------------------------------------------------
def _conv1_patches(x):
    """x:(N,1,28,28) -> (4*N*144, 25) im2col patches.

    Rows are grouped by the 2x2-pool quadrant (qh, qw) and, within a quadrant,
    ordered (n, ho//2, wo//2); columns ordered (di, dj).  Single XLA gather +
    reshape/transpose (replaces the old 25-slice Python loop)."""
    n = x.shape[0]
    xi = x[:, 0]                                               # (N, 28, 28)
    ho = jnp.arange(24)
    wo = jnp.arange(24)
    di = jnp.arange(5)
    dj = jnp.arange(5)
    hidx = ho[:, None, None, None] + di[None, None, :, None]   # (24,1,5,1)
    widx = wo[None, :, None, None] + dj[None, None, None, :]   # (1,24,1,5)
    p = xi[:, hidx, widx]                                      # (N,24,24,5,5)
    p = p.reshape(n, 12, 2, 12, 2, 25)                         # split 2x2 pairs
    p = p.transpose(2, 4, 0, 1, 3, 5)                          # (qh,qw,n,h2,w2,f)
    return p.reshape(4 * n * 144, 25)


def prepare_params(p):
    """One-time packing of PyTorch-layout params into kernel layout."""
    f32 = jnp.float32
    kp = {}
    kp["w1"] = p["conv1_w"].reshape(6, 25).T.astype(f32)                # (25,6)
    kp["b1"] = p["conv1_b"].reshape(1, 6).astype(f32)
    kp["w2"] = (p["conv2_w"].transpose(2, 3, 1, 0)                      # (di,dj,ci,co)
                .reshape(150, 12).astype(f32))
    kp["b2"] = p["conv2_b"].reshape(1, 12).astype(f32)
    # fc1: reorder input features from NCHW flatten (c*16+h*4+w) to the
    # kernel's NHWC flatten ((h*4+w)*12+c), transpose to (K,N), pad N->128.
    wf1 = (p["fc1_w"].reshape(120, 12, 4, 4)
           .transpose(2, 3, 1, 0).reshape(192, 120))
    kp["wf1"] = jnp.pad(wf1, ((0, 0), (0, 8))).astype(f32)              # (192,128)
    kp["bf1"] = jnp.pad(p["fc1_b"], (0, 8)).reshape(1, 128).astype(f32)
    kp["wf2"] = jnp.pad(p["fc2_w"].T, ((0, 8), (0, 68))).astype(f32)    # (128,128)
    kp["bf2"] = jnp.pad(p["fc2_b"], (0, 68)).reshape(1, 128).astype(f32)
    kp["wo"] = jnp.pad(p["out_w"].T, ((0, 68), (0, 0))).astype(f32)     # (128,10)
    kp["bo"] = p["out_b"].reshape(1, 10).astype(f32)
    return kp


@jax.jit
def network_forward(kp, x):
    n = x.shape[0]
    patches1 = _conv1_patches(x.astype(jnp.float32))
    vmem = pl.BlockSpec(memory_space=pltpu.MemorySpace.VMEM)
    return pl.pallas_call(
        partial(_lenet_fused_kernel, n=n),
        out_shape=jax.ShapeDtypeStruct((n, 10), jnp.float32),
        in_specs=[vmem] * 11,
        out_specs=vmem,
        scratch_shapes=[
            pltpu.VMEM((n * 64, 150), jnp.float32),   # conv2 im2col patches
            pltpu.VMEM((n, 192), jnp.float32),        # flattened fc1 input
        ],
    )(patches1, kp["w1"], kp["b1"], kp["w2"], kp["b2"],
      kp["wf1"], kp["bf1"], kp["wf2"], kp["bf2"], kp["wo"], kp["bo"])


# ---------------------------------------------------------------------------
# PyTorch-equivalent params + pure-JAX reference
# ---------------------------------------------------------------------------
def init_params(key):
    def uniform(k, shape, fan_in):
        bound = 1.0 / jnp.sqrt(jnp.float32(fan_in))
        return jax.random.uniform(k, shape, jnp.float32, -bound, bound)

    ks = jax.random.split(key, 10)
    return {
        "conv1_w": uniform(ks[0], (6, 1, 5, 5), 25),
        "conv1_b": uniform(ks[1], (6,), 25),
        "conv2_w": uniform(ks[2], (12, 6, 5, 5), 150),
        "conv2_b": uniform(ks[3], (12,), 150),
        "fc1_w": uniform(ks[4], (120, 192), 192),
        "fc1_b": uniform(ks[5], (120,), 192),
        "fc2_w": uniform(ks[6], (60, 120), 120),
        "fc2_b": uniform(ks[7], (60,), 120),
        "out_w": uniform(ks[8], (10, 60), 60),
        "out_b": uniform(ks[9], (10,), 60),
    }


def reference_forward(params, t):
    def conv(x, w, b):
        y = lax.conv_general_dilated(x, w, (1, 1), "VALID",
                                     dimension_numbers=("NCHW", "OIHW", "NCHW"))
        return y + b.reshape(1, -1, 1, 1)

    def pool(x):
        return lax.reduce_window(x, -jnp.inf, lax.max,
                                 (1, 1, 2, 2), (1, 1, 2, 2), "VALID")

    t = pool(jax.nn.relu(conv(t, params["conv1_w"], params["conv1_b"])))
    t = pool(jax.nn.relu(conv(t, params["conv2_w"], params["conv2_b"])))
    t = t.reshape(-1, 192)
    t = jax.nn.relu(t @ params["fc1_w"].T + params["fc1_b"])
    t = jax.nn.relu(t @ params["fc2_w"].T + params["fc2_b"])
    return t @ params["out_w"].T + params["out_b"]


if __name__ == "__main__":
    key = jax.random.PRNGKey(0)
    k_param, k_x = jax.random.split(key)
    params = init_params(k_param)
    kparams = prepare_params(params)          # one-time weight packing
    # architecture requires 28x28 single-channel input (flatten is 12*4*4)
    x = jax.random.normal(k_x, (2, 1, 28, 28), jnp.float32)

    out = jax.block_until_ready(network_forward(kparams, x))
    ref = jax.block_until_ready(reference_forward(params, x))

    assert out.shape == (2, 10), out.shape
    assert jnp.allclose(out, ref, rtol=1e-4, atol=1e-4), \
        f"max abs err {jnp.max(jnp.abs(out - ref))}"
    print("KERNEL_OK")
</pallas_src>

<mosaic_0001>
module attributes {stable_mosaic.version = 11 : i64} {
  func.func @_lenet_fused_kernel(%arg0: memref<1152x25xf32, #tpu.memory_space<vmem>>, %arg1: memref<25x6xf32, #tpu.memory_space<vmem>>, %arg2: memref<1x6xf32, #tpu.memory_space<vmem>>, %arg3: memref<150x12xf32, #tpu.memory_space<vmem>>, %arg4: memref<1x12xf32, #tpu.memory_space<vmem>>, %arg5: memref<192x128xf32, #tpu.memory_space<vmem>>, %arg6: memref<1x128xf32, #tpu.memory_space<vmem>>, %arg7: memref<128x128xf32, #tpu.memory_space<vmem>>, %arg8: memref<1x128xf32, #tpu.memory_space<vmem>>, %arg9: memref<128x10xf32, #tpu.memory_space<vmem>>, %arg10: memref<1x10xf32, #tpu.memory_space<vmem>>, %arg11: memref<2x10xf32, #tpu.memory_space<vmem>>, %arg12: memref<128x150xf32, #tpu.memory_space<vmem>>, %arg13: memref<2x192xf32, #tpu.memory_space<vmem>>) attributes {dimension_semantics = [], scalar_prefetch = 0 : i64, scratch_operands = 2 : i64, tpu.core_type = #tpu.core_type<tc>} {
    %c0 = arith.constant 0 : index
    %c0_0 = arith.constant 0 : index
    %0 = vector.load %arg0[%c0, %c0_0] : memref<1152x25xf32, #tpu.memory_space<vmem>>, vector<1152x25xf32>
    %c0_1 = arith.constant 0 : index
    %c0_2 = arith.constant 0 : index
    %1 = vector.load %arg1[%c0_1, %c0_2] : memref<25x6xf32, #tpu.memory_space<vmem>>, vector<25x6xf32>
    %cst = arith.constant dense<0.000000e+00> : vector<1152x6xf32>
    %2 = tpu.matmul %0, %1, %cst {dimension_numbers = #tpu.dot_dimension_numbers<[1], [0], [0], [1], [0, 0, 1, 1], [], []>} : vector<1152x25xf32>, vector<25x6xf32>, vector<1152x6xf32> -> vector<1152x6xf32>
    %c0_3 = arith.constant 0 : index
    %c0_4 = arith.constant 0 : index
    %3 = vector.load %arg2[%c0_3, %c0_4] : memref<1x6xf32, #tpu.memory_space<vmem>>, vector<1x6xf32>
    %4 = vector.broadcast %3 : vector<1x6xf32> to vector<1152x6xf32>
    %5 = arith.addf %2, %4 : vector<1152x6xf32>
    %cst_5 = arith.constant 0.000000e+00 : f32
    %6 = vector.broadcast %cst_5 : f32 to vector<1152x6xf32>
    %7 = arith.maximumf %5, %6 : vector<1152x6xf32>
    %8 = vector.extract_strided_slice %7 {offsets = [0, 0], sizes = [288, 6], strides = [1, 1]} : vector<1152x6xf32> to vector<288x6xf32>
    %9 = vector.extract_strided_slice %7 {offsets = [288, 0], sizes = [288, 6], strides = [1, 1]} : vector<1152x6xf32> to vector<288x6xf32>
    %10 = arith.maximumf %8, %9 : vector<288x6xf32>
    %11 = vector.extract_strided_slice %7 {offsets = [576, 0], sizes = [288, 6], strides = [1, 1]} : vector<1152x6xf32> to vector<288x6xf32>
    %12 = vector.extract_strided_slice %7 {offsets = [864, 0], sizes = [288, 6], strides = [1, 1]} : vector<1152x6xf32> to vector<288x6xf32>
    %13 = arith.maximumf %11, %12 : vector<288x6xf32>
    %14 = arith.maximumf %10, %13 : vector<288x6xf32>
    %15 = vector.shape_cast %14 : vector<288x6xf32> to vector<2x12x12x6xf32>
    %16 = vector.extract_strided_slice %15 {offsets = [0, 0, 0, 0], sizes = [2, 8, 8, 6], strides = [1, 1, 1, 1]} : vector<2x12x12x6xf32> to vector<2x8x8x6xf32>
    %17 = vector.shape_cast %16 : vector<2x8x8x6xf32> to vector<128x6xf32>
    %c0_6 = arith.constant 0 : index
    %c0_7 = arith.constant 0 : index
    %18 = vector.load %arg12[%c0_6, %c0_7] : memref<128x150xf32, #tpu.memory_space<vmem>>, vector<128x6xf32>
    tpu.vector_store %arg12[%c0_6, %c0_7], %17 {strides = array<i32>} : memref<128x150xf32, #tpu.memory_space<vmem>>, vector<128x6xf32>,
    %19 = vector.extract_strided_slice %15 {offsets = [0, 0, 1, 0], sizes = [2, 8, 8, 6], strides = [1, 1, 1, 1]} : vector<2x12x12x6xf32> to vector<2x8x8x6xf32>
    %20 = vector.shape_cast %19 : vector<2x8x8x6xf32> to vector<128x6xf32>
    %c0_8 = arith.constant 0 : index
    %c6 = arith.constant 6 : index
    %21 = vector.load %arg12[%c0_8, %c6] : memref<128x150xf32, #tpu.memory_space<vmem>>, vector<128x6xf32>
    tpu.vector_store %arg12[%c0_8, %c6], %20 {strides = array<i32>} : memref<128x150xf32, #tpu.memory_space<vmem>>, vector<128x6xf32>,
    %22 = vector.extract_strided_slice %15 {offsets = [0, 0, 2, 0], sizes = [2, 8, 8, 6], strides = [1, 1, 1, 1]} : vector<2x12x12x6xf32> to vector<2x8x8x6xf32>
    %23 = vector.shape_cast %22 : vector<2x8x8x6xf32> to vector<128x6xf32>
    %c0_9 = arith.constant 0 : index
    %c12 = arith.constant 12 : index
    %24 = vector.load %arg12[%c0_9, %c12] : memref<128x150xf32, #tpu.memory_space<vmem>>, vector<128x6xf32>
    tpu.vector_store %arg12[%c0_9, %c12], %23 {strides = array<i32>} : memref<128x150xf32, #tpu.memory_space<vmem>>, vector<128x6xf32>,
    %25 = vector.extract_strided_slice %15 {offsets = [0, 0, 3, 0], sizes = [2, 8, 8, 6], strides = [1, 1, 1, 1]} : vector<2x12x12x6xf32> to vector<2x8x8x6xf32>
    %26 = vector.shape_cast %25 : vector<2x8x8x6xf32> to vector<128x6xf32>
    %c0_10 = arith.constant 0 : index
    %c18 = arith.constant 18 : index
    %27 = vector.load %arg12[%c0_10, %c18] : memref<128x150xf32, #tpu.memory_space<vmem>>, vector<128x6xf32>
    tpu.vector_store %arg12[%c0_10, %c18], %26 {strides = array<i32>} : memref<128x150xf32, #tpu.memory_space<vmem>>, vector<128x6xf32>,
    %28 = vector.extract_strided_slice %15 {offsets = [0, 0, 4, 0], sizes = [2, 8, 8, 6], strides = [1, 1, 1, 1]} : vector<2x12x12x6xf32> to vector<2x8x8x6xf32>
    %29 = vector.shape_cast %28 : vector<2x8x8x6xf32> to vector<128x6xf32>
    %c0_11 = arith.constant 0 : index
    %c24 = arith.constant 24 : index
    %30 = vector.load %arg12[%c0_11, %c24] : memref<128x150xf32, #tpu.memory_space<vmem>>, vector<128x6xf32>
    tpu.vector_store %arg12[%c0_11, %c24], %29 {strides = array<i32>} : memref<128x150xf32, #tpu.memory_space<vmem>>, vector<128x6xf32>,
    %31 = vector.extract_strided_slice %15 {offsets = [0, 1, 0, 0], sizes = [2, 8, 8, 6], strides = [1, 1, 1, 1]} : vector<2x12x12x6xf32> to vector<2x8x8x6xf32>
    %32 = vector.shape_cast %31 : vector<2x8x8x6xf32> to vector<128x6xf32>
    %c0_12 = arith.constant 0 : index
    %c30 = arith.constant 30 : index
    %33 = vector.load %arg12[%c0_12, %c30] : memref<128x150xf32, #tpu.memory_space<vmem>>, vector<128x6xf32>
    tpu.vector_store %arg12[%c0_12, %c30], %32 {strides = array<i32>} : memref<128x150xf32, #tpu.memory_space<vmem>>, vector<128x6xf32>,
    %34 = vector.extract_strided_slice %15 {offsets = [0, 1, 1, 0], sizes = [2, 8, 8, 6], strides = [1, 1, 1, 1]} : vector<2x12x12x6xf32> to vector<2x8x8x6xf32>
    %35 = vector.shape_cast %34 : vector<2x8x8x6xf32> to vector<128x6xf32>
    %c0_13 = arith.constant 0 : index
    %c36 = arith.constant 36 : index
    %36 = vector.load %arg12[%c0_13, %c36] : memref<128x150xf32, #tpu.memory_space<vmem>>, vector<128x6xf32>
    tpu.vector_store %arg12[%c0_13, %c36], %35 {strides = array<i32>} : memref<128x150xf32, #tpu.memory_space<vmem>>, vector<128x6xf32>,
    %37 = vector.extract_strided_slice %15 {offsets = [0, 1, 2, 0], sizes = [2, 8, 8, 6], strides = [1, 1, 1, 1]} : vector<2x12x12x6xf32> to vector<2x8x8x6xf32>
    %38 = vector.shape_cast %37 : vector<2x8x8x6xf32> to vector<128x6xf32>
    %c0_14 = arith.constant 0 : index
    %c42 = arith.constant 42 : index
    %39 = vector.load %arg12[%c0_14, %c42] : memref<128x150xf32, #tpu.memory_space<vmem>>, vector<128x6xf32>
    tpu.vector_store %arg12[%c0_14, %c42], %38 {strides = array<i32>} : memref<128x150xf32, #tpu.memory_space<vmem>>, vector<128x6xf32>,
    %40 = vector.extract_strided_slice %15 {offsets = [0, 1, 3, 0], sizes = [2, 8, 8, 6], strides = [1, 1, 1, 1]} : vector<2x12x12x6xf32> to vector<2x8x8x6xf32>
    %41 = vector.shape_cast %40 : vector<2x8x8x6xf32> to vector<128x6xf32>
    %c0_15 = arith.constant 0 : index
    %c48 = arith.constant 48 : index
    %42 = vector.load %arg12[%c0_15, %c48] : memref<128x150xf32, #tpu.memory_space<vmem>>, vector<128x6xf32>
    tpu.vector_store %arg12[%c0_15, %c48], %41 {strides = array<i32>} : memref<128x150xf32, #tpu.memory_space<vmem>>, vector<128x6xf32>,
    %43 = vector.extract_strided_slice %15 {offsets = [0, 1, 4, 0], sizes = [2, 8, 8, 6], strides = [1, 1, 1, 1]} : vector<2x12x12x6xf32> to vector<2x8x8x6xf32>
    %44 = vector.shape_cast %43 : vector<2x8x8x6xf32> to vector<128x6xf32>
    %c0_16 = arith.constant 0 : index
    %c54 = arith.constant 54 : index
    %45 = vector.load %arg12[%c0_16, %c54] : memref<128x150xf32, #tpu.memory_space<vmem>>, vector<128x6xf32>
    tpu.vector_store %arg12[%c0_16, %c54], %44 {strides = array<i32>} : memref<128x150xf32, #tpu.memory_space<vmem>>, vector<128x6xf32>,
    %46 = vector.extract_strided_slice %15 {offsets = [0, 2, 0, 0], sizes = [2, 8, 8, 6], strides = [1, 1, 1, 1]} : vector<2x12x12x6xf32> to vector<2x8x8x6xf32>
    %47 = vector.shape_cast %46 : vector<2x8x8x6xf32> to vector<128x6xf32>
    %c0_17 = arith.constant 0 : index
    %c60 = arith.constant 60 : index
    %48 = vector.load %arg12[%c0_17, %c60] : memref<128x150xf32, #tpu.memory_space<vmem>>, vector<128x6xf32>
    tpu.vector_store %arg12[%c0_17, %c60], %47 {strides = array<i32>} : memref<128x150xf32, #tpu.memory_space<vmem>>, vector<128x6xf32>,
    %49 = vector.extract_strided_slice %15 {offsets = [0, 2, 1, 0], sizes = [2, 8, 8, 6], strides = [1, 1, 1, 1]} : vector<2x12x12x6xf32> to vector<2x8x8x6xf32>
    %50 = vector.shape_cast %49 : vector<2x8x8x6xf32> to vector<128x6xf32>
    %c0_18 = arith.constant 0 : index
    %c66 = arith.constant 66 : index
    %51 = vector.load %arg12[%c0_18, %c66] : memref<128x150xf32, #tpu.memory_space<vmem>>, vector<128x6xf32>
    tpu.vector_store %arg12[%c0_18, %c66], %50 {strides = array<i32>} : memref<128x150xf32, #tpu.memory_space<vmem>>, vector<128x6xf32>,
    %52 = vector.extract_strided_slice %15 {offsets = [0, 2, 2, 0], sizes = [2, 8, 8, 6], strides = [1, 1, 1, 1]} : vector<2x12x12x6xf32> to vector<2x8x8x6xf32>
    %53 = vector.shape_cast %52 : vector<2x8x8x6xf32> to vector<128x6xf32>
    %c0_19 = arith.constant 0 : index
    %c72 = arith.constant 72 : index
    %54 = vector.load %arg12[%c0_19, %c72] : memref<128x150xf32, #tpu.memory_space<vmem>>, vector<128x6xf32>
    tpu.vector_store %arg12[%c0_19, %c72], %53 {strides = array<i32>} : memref<128x150xf32, #tpu.memory_space<vmem>>, vector<128x6xf32>,
    %55 = vector.extract_strided_slice %15 {offsets = [0, 2, 3, 0], sizes = [2, 8, 8, 6], strides = [1, 1, 1, 1]} : vector<2x12x12x6xf32> to vector<2x8x8x6xf32>
    %56 = vector.shape_cast %55 : vector<2x8x8x6xf32> to vector<128x6xf32>
    %c0_20 = arith.constant 0 : index
    %c78 = arith.constant 78 : index
    %57 = vector.load %arg12[%c0_20, %c78] : memref<128x150xf32, #tpu.memory_space<vmem>>, vector<128x6xf32>
    tpu.vector_store %arg12[%c0_20, %c78], %56 {strides = array<i32>} : memref<128x150xf32, #tpu.memory_space<vmem>>, vector<128x6xf32>,
    %58 = vector.extract_strided_slice %15 {offsets = [0, 2, 4, 0], sizes = [2, 8, 8, 6], strides = [1, 1, 1, 1]} : vector<2x12x12x6xf32> to vector<2x8x8x6xf32>
    %59 = vector.shape_cast %58 : vector<2x8x8x6xf32> to vector<128x6xf32>
    %c0_21 = arith.constant 0 : index
    %c84 = arith.constant 84 : index
    %60 = vector.load %arg12[%c0_21, %c84] : memref<128x150xf32, #tpu.memory_space<vmem>>, vector<128x6xf32>
    tpu.vector_store %arg12[%c0_21, %c84], %59 {strides = array<i32>} : memref<128x150xf32, #tpu.memory_space<vmem>>, vector<128x6xf32>,
    %61 = vector.extract_strided_slice %15 {offsets = [0, 3, 0, 0], sizes = [2, 8, 8, 6], strides = [1, 1, 1, 1]} : vector<2x12x12x6xf32> to vector<2x8x8x6xf32>
    %62 = vector.shape_cast %61 : vector<2x8x8x6xf32> to vector<128x6xf32>
    %c0_22 = arith.constant 0 : index
    %c90 = arith.constant 90 : index
    %63 = vector.load %arg12[%c0_22, %c90] : memref<128x150xf32, #tpu.memory_space<vmem>>, vector<128x6xf32>
    tpu.vector_store %arg12[%c0_22, %c90], %62 {strides = array<i32>} : memref<128x150xf32, #tpu.memory_space<vmem>>, vector<128x6xf32>,
    %64 = vector.extract_strided_slice %15 {offsets = [0, 3, 1, 0], sizes = [2, 8, 8, 6], strides = [1, 1, 1, 1]} : vector<2x12x12x6xf32> to vector<2x8x8x6xf32>
    %65 = vector.shape_cast %64 : vector<2x8x8x6xf32> to vector<128x6xf32>
    %c0_23 = arith.constant 0 : index
    %c96 = arith.constant 96 : index
    %66 = vector.load %arg12[%c0_23, %c96] : memref<128x150xf32, #tpu.memory_space<vmem>>, vector<128x6xf32>
    tpu.vector_store %arg12[%c0_23, %c96], %65 {strides = array<i32>} : memref<128x150xf32, #tpu.memory_space<vmem>>, vector<128x6xf32>,
    %67 = vector.extract_strided_slice %15 {offsets = [0, 3, 2, 0], sizes = [2, 8, 8, 6], strides = [1, 1, 1, 1]} : vector<2x12x12x6xf32> to vector<2x8x8x6xf32>
    %68 = vector.shape_cast %67 : vector<2x8x8x6xf32> to vector<128x6xf32>
    %c0_24 = arith.constant 0 : index
    %c102 = arith.constant 102 : index
    %69 = vector.load %arg12[%c0_24, %c102] : memref<128x150xf32, #tpu.memory_space<vmem>>, vector<128x6xf32>
    tpu.vector_store %arg12[%c0_24, %c102], %68 {strides = array<i32>} : memref<128x150xf32, #tpu.memory_space<vmem>>, vector<128x6xf32>,
    %70 = vector.extract_strided_slice %15 {offsets = [0, 3, 3, 0], sizes = [2, 8, 8, 6], strides = [1, 1, 1, 1]} : vector<2x12x12x6xf32> to vector<2x8x8x6xf32>
    %71 = vector.shape_cast %70 : vector<2x8x8x6xf32> to vector<128x6xf32>
    %c0_25 = arith.constant 0 : index
    %c108 = arith.constant 108 : index
    %72 = vector.load %arg12[%c0_25, %c108] : memref<128x150xf32, #tpu.memory_space<vmem>>, vector<128x6xf32>
    tpu.vector_store %arg12[%c0_25, %c108], %71 {strides = array<i32>} : memref<128x150xf32, #tpu.memory_space<vmem>>, vector<128x6xf32>,
    %73 = vector.extract_strided_slice %15 {offsets = [0, 3, 4, 0], sizes = [2, 8, 8, 6], strides = [1, 1, 1, 1]} : vector<2x12x12x6xf32> to vector<2x8x8x6xf32>
    %74 = vector.shape_cast %73 : vector<2x8x8x6xf32> to vector<128x6xf32>
    %c0_26 = arith.constant 0 : index
    %c114 = arith.constant 114 : index
    %75 = vector.load %arg12[%c0_26, %c114] : memref<128x150xf32, #tpu.memory_space<vmem>>, vector<128x6xf32>
    tpu.vector_store %arg12[%c0_26, %c114], %74 {strides = array<i32>} : memref<128x150xf32, #tpu.memory_space<vmem>>, vector<128x6xf32>,
    %76 = vector.extract_strided_slice %15 {offsets = [0, 4, 0, 0], sizes = [2, 8, 8, 6], strides = [1, 1, 1, 1]} : vector<2x12x12x6xf32> to vector<2x8x8x6xf32>
    %77 = vector.shape_cast %76 : vector<2x8x8x6xf32> to vector<128x6xf32>
    %c0_27 = arith.constant 0 : index
    %c120 = arith.constant 120 : index
    %78 = vector.load %arg12[%c0_27, %c120] : memref<128x150xf32, #tpu.memory_space<vmem>>, vector<128x6xf32>
    tpu.vector_store %arg12[%c0_27, %c120], %77 {strides = array<i32>} : memref<128x150xf32, #tpu.memory_space<vmem>>, vector<128x6xf32>,
    %79 = vector.extract_strided_slice %15 {offsets = [0, 4, 1, 0], sizes = [2, 8, 8, 6], strides = [1, 1, 1, 1]} : vector<2x12x12x6xf32> to vector<2x8x8x6xf32>
    %80 = vector.shape_cast %79 : vector<2x8x8x6xf32> to vector<128x6xf32>
    %c0_28 = arith.constant 0 : index
    %c126 = arith.constant 126 : index
    %81 = vector.load %arg12[%c0_28, %c126] : memref<128x150xf32, #tpu.memory_space<vmem>>, vector<128x6xf32>
    tpu.vector_store %arg12[%c0_28, %c126], %80 {strides = array<i32>} : memref<128x150xf32, #tpu.memory_space<vmem>>, vector<128x6xf32>,
    %82 = vector.extract_strided_slice %15 {offsets = [0, 4, 2, 0], sizes = [2, 8, 8, 6], strides = [1, 1, 1, 1]} : vector<2x12x12x6xf32> to vector<2x8x8x6xf32>
    %83 = vector.shape_cast %82 : vector<2x8x8x6xf32> to vector<128x6xf32>
    %c0_29 = arith.constant 0 : index
    %c132 = arith.constant 132 : index
    %84 = vector.load %arg12[%c0_29, %c132] : memref<128x150xf32, #tpu.memory_space<vmem>>, vector<128x6xf32>
    tpu.vector_store %arg12[%c0_29, %c132], %83 {strides = array<i32>} : memref<128x150xf32, #tpu.memory_space<vmem>>, vector<128x6xf32>,
    %85 = vector.extract_strided_slice %15 {offsets = [0, 4, 3, 0], sizes = [2, 8, 8, 6], strides = [1, 1, 1, 1]} : vector<2x12x12x6xf32> to vector<2x8x8x6xf32>
    %86 = vector.shape_cast %85 : vector<2x8x8x6xf32> to vector<128x6xf32>
    %c0_30 = arith.constant 0 : index
    %c138 = arith.constant 138 : index
    %87 = vector.load %arg12[%c0_30, %c138] : memref<128x150xf32, #tpu.memory_space<vmem>>, vector<128x6xf32>
    tpu.vector_store %arg12[%c0_30, %c138], %86 {strides = array<i32>} : memref<128x150xf32, #tpu.memory_space<vmem>>, vector<128x6xf32>,
    %88 = vector.extract_strided_slice %15 {offsets = [0, 4, 4, 0], sizes = [2, 8, 8, 6], strides = [1, 1, 1, 1]} : vector<2x12x12x6xf32> to vector<2x8x8x6xf32>
    %89 = vector.shape_cast %88 : vector<2x8x8x6xf32> to vector<128x6xf32>
    %c0_31 = arith.constant 0 : index
    %c144 = arith.constant 144 : index
    %90 = vector.load %arg12[%c0_31, %c144] : memref<128x150xf32, #tpu.memory_space<vmem>>, vector<128x6xf32>
    tpu.vector_store %arg12[%c0_31, %c144], %89 {strides = array<i32>} : memref<128x150xf32, #tpu.memory_space<vmem>>, vector<128x6xf32>,
    %c0_32 = arith.constant 0 : index
    %c0_33 = arith.constant 0 : index
    %91 = vector.load %arg12[%c0_32, %c0_33] : memref<128x150xf32, #tpu.memory_space<vmem>>, vector<128x150xf32>
    %c0_34 = arith.constant 0 : index
    %c0_35 = arith.constant 0 : index
    %92 = vector.load %arg3[%c0_34, %c0_35] : memref<150x12xf32, #tpu.memory_space<vmem>>, vector<150x12xf32>
    %cst_36 = arith.constant dense<0.000000e+00> : vector<128x12xf32>
    %93 = tpu.matmul %91, %92, %cst_36 {dimension_numbers = #tpu.dot_dimension_numbers<[1], [0], [0], [1], [0, 0, 1, 1], [], []>} : vector<128x150xf32>, vector<150x12xf32>, vector<128x12xf32> -> vector<128x12xf32>
    %c0_37 = arith.constant 0 : index
    %c0_38 = arith.constant 0 : index
    %94 = vector.load %arg4[%c0_37, %c0_38] : memref<1x12xf32, #tpu.memory_space<vmem>>, vector<1x12xf32>
    %95 = vector.broadcast %94 : vector<1x12xf32> to vector<128x12xf32>
    %96 = arith.addf %93, %95 : vector<128x12xf32>
    %cst_39 = arith.constant 0.000000e+00 : f32
    %97 = vector.broadcast %cst_39 : f32 to vector<128x12xf32>
    %98 = arith.maximumf %96, %97 : vector<128x12xf32>
    %99 = vector.shape_cast %98 : vector<128x12xf32> to vector<2x8x4x2x12xf32>
    %cst_40 = arith.constant dense<0xFF800000> : vector<2x8x4x12xf32>
    %100 = vector.multi_reduction <maximumf>, %99, %cst_40 [3] : vector<2x8x4x2x12xf32> to vector<2x8x4x12xf32>
    %101 = vector.shape_cast %100 : vector<2x8x4x12xf32> to vector<2x4x2x4x12xf32>
    %cst_41 = arith.constant dense<0xFF800000> : vector<2x4x4x12xf32>
    %102 = vector.multi_reduction <maximumf>, %101, %cst_41 [2] : vector<2x4x2x4x12xf32> to vector<2x4x4x12xf32>
    %103 = vector.extract_strided_slice %102 {offsets = [0, 0, 0, 0], sizes = [2, 1, 1, 12], strides = [1, 1, 1, 1]} : vector<2x4x4x12xf32> to vector<2x1x1x12xf32>
    %104 = vector.shape_cast %103 : vector<2x1x1x12xf32> to vector<2x12xf32>
    %c0_42 = arith.constant 0 : index
    %c0_43 = arith.constant 0 : index
    %105 = vector.load %arg13[%c0_42, %c0_43] : memref<2x192xf32, #tpu.memory_space<vmem>>, vector<2x12xf32>
    tpu.vector_store %arg13[%c0_42, %c0_43], %104 {strides = array<i32>} : memref<2x192xf32, #tpu.memory_space<vmem>>, vector<2x12xf32>,
    %106 = vector.extract_strided_slice %102 {offsets = [0, 0, 1, 0], sizes = [2, 1, 1, 12], strides = [1, 1, 1, 1]} : vector<2x4x4x12xf32> to vector<2x1x1x12xf32>
    %107 = vector.shape_cast %106 : vector<2x1x1x12xf32> to vector<2x12xf32>
    %c0_44 = arith.constant 0 : index
    %c12_45 = arith.constant 12 : index
    %108 = vector.load %arg13[%c0_44, %c12_45] : memref<2x192xf32, #tpu.memory_space<vmem>>, vector<2x12xf32>
    tpu.vector_store %arg13[%c0_44, %c12_45], %107 {strides = array<i32>} : memref<2x192xf32, #tpu.memory_space<vmem>>, vector<2x12xf32>,
    %109 = vector.extract_strided_slice %102 {offsets = [0, 0, 2, 0], sizes = [2, 1, 1, 12], strides = [1, 1, 1, 1]} : vector<2x4x4x12xf32> to vector<2x1x1x12xf32>
    %110 = vector.shape_cast %109 : vector<2x1x1x12xf32> to vector<2x12xf32>
    %c0_46 = arith.constant 0 : index
    %c24_47 = arith.constant 24 : index
    %111 = vector.load %arg13[%c0_46, %c24_47] : memref<2x192xf32, #tpu.memory_space<vmem>>, vector<2x12xf32>
    tpu.vector_store %arg13[%c0_46, %c24_47], %110 {strides = array<i32>} : memref<2x192xf32, #tpu.memory_space<vmem>>, vector<2x12xf32>,
    %112 = vector.extract_strided_slice %102 {offsets = [0, 0, 3, 0], sizes = [2, 1, 1, 12], strides = [1, 1, 1, 1]} : vector<2x4x4x12xf32> to vector<2x1x1x12xf32>
    %113 = vector.shape_cast %112 : vector<2x1x1x12xf32> to vector<2x12xf32>
    %c0_48 = arith.constant 0 : index
    %c36_49 = arith.constant 36 : index
    %114 = vector.load %arg13[%c0_48, %c36_49] : memref<2x192xf32, #tpu.memory_space<vmem>>, vector<2x12xf32>
    tpu.vector_store %arg13[%c0_48, %c36_49], %113 {strides = array<i32>} : memref<2x192xf32, #tpu.memory_space<vmem>>, vector<2x12xf32>,
    %115 = vector.extract_strided_slice %102 {offsets = [0, 1, 0, 0], sizes = [2, 1, 1, 12], strides = [1, 1, 1, 1]} : vector<2x4x4x12xf32> to vector<2x1x1x12xf32>
    %116 = vector.shape_cast %115 : vector<2x1x1x12xf32> to vector<2x12xf32>
    %c0_50 = arith.constant 0 : index
    %c48_51 = arith.constant 48 : index
    %117 = vector.load %arg13[%c0_50, %c48_51] : memref<2x192xf32, #tpu.memory_space<vmem>>, vector<2x12xf32>
    tpu.vector_store %arg13[%c0_50, %c48_51], %116 {strides = array<i32>} : memref<2x192xf32, #tpu.memory_space<vmem>>, vector<2x12xf32>,
    %118 = vector.extract_strided_slice %102 {offsets = [0, 1, 1, 0], sizes = [2, 1, 1, 12], strides = [1, 1, 1, 1]} : vector<2x4x4x12xf32> to vector<2x1x1x12xf32>
    %119 = vector.shape_cast %118 : vector<2x1x1x12xf32> to vector<2x12xf32>
    %c0_52 = arith.constant 0 : index
    %c60_53 = arith.constant 60 : index
    %120 = vector.load %arg13[%c0_52, %c60_53] : memref<2x192xf32, #tpu.memory_space<vmem>>, vector<2x12xf32>
    tpu.vector_store %arg13[%c0_52, %c60_53], %119 {strides = array<i32>} : memref<2x192xf32, #tpu.memory_space<vmem>>, vector<2x12xf32>,
    %121 = vector.extract_strided_slice %102 {offsets = [0, 1, 2, 0], sizes = [2, 1, 1, 12], strides = [1, 1, 1, 1]} : vector<2x4x4x12xf32> to vector<2x1x1x12xf32>
    %122 = vector.shape_cast %121 : vector<2x1x1x12xf32> to vector<2x12xf32>
    %c0_54 = arith.constant 0 : index
    %c72_55 = arith.constant 72 : index
    %123 = vector.load %arg13[%c0_54, %c72_55] : memref<2x192xf32, #tpu.memory_space<vmem>>, vector<2x12xf32>
    tpu.vector_store %arg13[%c0_54, %c72_55], %122 {strides = array<i32>} : memref<2x192xf32, #tpu.memory_space<vmem>>, vector<2x12xf32>,
    %124 = vector.extract_strided_slice %102 {offsets = [0, 1, 3, 0], sizes = [2, 1, 1, 12], strides = [1, 1, 1, 1]} : vector<2x4x4x12xf32> to vector<2x1x1x12xf32>
    %125 = vector.shape_cast %124 : vector<2x1x1x12xf32> to vector<2x12xf32>
    %c0_56 = arith.constant 0 : index
    %c84_57 = arith.constant 84 : index
    %126 = vector.load %arg13[%c0_56, %c84_57] : memref<2x192xf32, #tpu.memory_space<vmem>>, vector<2x12xf32>
    tpu.vector_store %arg13[%c0_56, %c84_57], %125 {strides = array<i32>} : memref<2x192xf32, #tpu.memory_space<vmem>>, vector<2x12xf32>,
    %127 = vector.extract_strided_slice %102 {offsets = [0, 2, 0, 0], sizes = [2, 1, 1, 12], strides = [1, 1, 1, 1]} : vector<2x4x4x12xf32> to vector<2x1x1x12xf32>
    %128 = vector.shape_cast %127 : vector<2x1x1x12xf32> to vector<2x12xf32>
    %c0_58 = arith.constant 0 : index
    %c96_59 = arith.constant 96 : index
    %129 = vector.load %arg13[%c0_58, %c96_59] : memref<2x192xf32, #tpu.memory_space<vmem>>, vector<2x12xf32>
    tpu.vector_store %arg13[%c0_58, %c96_59], %128 {strides = array<i32>} : memref<2x192xf32, #tpu.memory_space<vmem>>, vector<2x12xf32>,
    %130 = vector.extract_strided_slice %102 {offsets = [0, 2, 1, 0], sizes = [2, 1, 1, 12], strides = [1, 1, 1, 1]} : vector<2x4x4x12xf32> to vector<2x1x1x12xf32>
    %131 = vector.shape_cast %130 : vector<2x1x1x12xf32> to vector<2x12xf32>
    %c0_60 = arith.constant 0 : index
    %c108_61 = arith.constant 108 : index
    %132 = vector.load %arg13[%c0_60, %c108_61] : memref<2x192xf32, #tpu.memory_space<vmem>>, vector<2x12xf32>
    tpu.vector_store %arg13[%c0_60, %c108_61], %131 {strides = array<i32>} : memref<2x192xf32, #tpu.memory_space<vmem>>, vector<2x12xf32>,
    %133 = vector.extract_strided_slice %102 {offsets = [0, 2, 2, 0], sizes = [2, 1, 1, 12], strides = [1, 1, 1, 1]} : vector<2x4x4x12xf32> to vector<2x1x1x12xf32>
    %134 = vector.shape_cast %133 : vector<2x1x1x12xf32> to vector<2x12xf32>
    %c0_62 = arith.constant 0 : index
    %c120_63 = arith.constant 120 : index
    %135 = vector.load %arg13[%c0_62, %c120_63] : memref<2x192xf32, #tpu.memory_space<vmem>>, vector<2x12xf32>
    tpu.vector_store %arg13[%c0_62, %c120_63], %134 {strides = array<i32>} : memref<2x192xf32, #tpu.memory_space<vmem>>, vector<2x12xf32>,
    %136 = vector.extract_strided_slice %102 {offsets = [0, 2, 3, 0], sizes = [2, 1, 1, 12], strides = [1, 1, 1, 1]} : vector<2x4x4x12xf32> to vector<2x1x1x12xf32>
    %137 = vector.shape_cast %136 : vector<2x1x1x12xf32> to vector<2x12xf32>
    %c0_64 = arith.constant 0 : index
    %c132_65 = arith.constant 132 : index
    %138 = vector.load %arg13[%c0_64, %c132_65] : memref<2x192xf32, #tpu.memory_space<vmem>>, vector<2x12xf32>
    tpu.vector_store %arg13[%c0_64, %c132_65], %137 {strides = array<i32>} : memref<2x192xf32, #tpu.memory_space<vmem>>, vector<2x12xf32>,
    %139 = vector.extract_strided_slice %102 {offsets = [0, 3, 0, 0], sizes = [2, 1, 1, 12], strides = [1, 1, 1, 1]} : vector<2x4x4x12xf32> to vector<2x1x1x12xf32>
    %140 = vector.shape_cast %139 : vector<2x1x1x12xf32> to vector<2x12xf32>
    %c0_66 = arith.constant 0 : index
    %c144_67 = arith.constant 144 : index
    %141 = vector.load %arg13[%c0_66, %c144_67] : memref<2x192xf32, #tpu.memory_space<vmem>>, vector<2x12xf32>
    tpu.vector_store %arg13[%c0_66, %c144_67], %140 {strides = array<i32>} : memref<2x192xf32, #tpu.memory_space<vmem>>, vector<2x12xf32>,
    %142 = vector.extract_strided_slice %102 {offsets = [0, 3, 1, 0], sizes = [2, 1, 1, 12], strides = [1, 1, 1, 1]} : vector<2x4x4x12xf32> to vector<2x1x1x12xf32>
    %143 = vector.shape_cast %142 : vector<2x1x1x12xf32> to vector<2x12xf32>
    %c0_68 = arith.constant 0 : index
    %c156 = arith.constant 156 : index
    %144 = vector.load %arg13[%c0_68, %c156] : memref<2x192xf32, #tpu.memory_space<vmem>>, vector<2x12xf32>
    tpu.vector_store %arg13[%c0_68, %c156], %143 {strides = array<i32>} : memref<2x192xf32, #tpu.memory_space<vmem>>, vector<2x12xf32>,
    %145 = vector.extract_strided_slice %102 {offsets = [0, 3, 2, 0], sizes = [2, 1, 1, 12], strides = [1, 1, 1, 1]} : vector<2x4x4x12xf32> to vector<2x1x1x12xf32>
    %146 = vector.shape_cast %145 : vector<2x1x1x12xf32> to vector<2x12xf32>
    %c0_69 = arith.constant 0 : index
    %c168 = arith.constant 168 : index
    %147 = vector.load %arg13[%c0_69, %c168] : memref<2x192xf32, #tpu.memory_space<vmem>>, vector<2x12xf32>
    tpu.vector_store %arg13[%c0_69, %c168], %146 {strides = array<i32>} : memref<2x192xf32, #tpu.memory_space<vmem>>, vector<2x12xf32>,
    %148 = vector.extract_strided_slice %102 {offsets = [0, 3, 3, 0], sizes = [2, 1, 1, 12], strides = [1, 1, 1, 1]} : vector<2x4x4x12xf32> to vector<2x1x1x12xf32>
    %149 = vector.shape_cast %148 : vector<2x1x1x12xf32> to vector<2x12xf32>
    %c0_70 = arith.constant 0 : index
    %c180 = arith.constant 180 : index
    %150 = vector.load %arg13[%c0_70, %c180] : memref<2x192xf32, #tpu.memory_space<vmem>>, vector<2x12xf32>
    tpu.vector_store %arg13[%c0_70, %c180], %149 {strides = array<i32>} : memref<2x192xf32, #tpu.memory_space<vmem>>, vector<2x12xf32>,
    %c0_71 = arith.constant 0 : index
    %c0_72 = arith.constant 0 : index
    %151 = vector.load %arg13[%c0_71, %c0_72] : memref<2x192xf32, #tpu.memory_space<vmem>>, vector<2x192xf32>
    %c0_73 = arith.constant 0 : index
    %c0_74 = arith.constant 0 : index
    %152 = vector.load %arg5[%c0_73, %c0_74] : memref<192x128xf32, #tpu.memory_space<vmem>>, vector<192x128xf32>
    %cst_75 = arith.constant dense<0.000000e+00> : vector<2x128xf32>
    %153 = tpu.matmul %151, %152, %cst_75 {dimension_numbers = #tpu.dot_dimension_numbers<[1], [0], [0], [1], [0, 0, 1, 1], [], []>} : vector<2x192xf32>, vector<192x128xf32>, vector<2x128xf32> -> vector<2x128xf32>
    %c0_76 = arith.constant 0 : index
    %c0_77 = arith.constant 0 : index
    %154 = vector.load %arg6[%c0_76, %c0_77] : memref<1x128xf32, #tpu.memory_space<vmem>>, vector<1x128xf32>
    %155 = vector.broadcast %154 : vector<1x128xf32> to vector<2x128xf32>
    %156 = arith.addf %153, %155 : vector<2x128xf32>
    %cst_78 = arith.constant 0.000000e+00 : f32
    %157 = vector.broadcast %cst_78 : f32 to vector<2x128xf32>
    %158 = arith.maximumf %156, %157 : vector<2x128xf32>
    %c0_79 = arith.constant 0 : index
    %c0_80 = arith.constant 0 : index
    %159 = vector.load %arg7[%c0_79, %c0_80] : memref<128x128xf32, #tpu.memory_space<vmem>>, vector<128x128xf32>
    %cst_81 = arith.constant dense<0.000000e+00> : vector<2x128xf32>
    %160 = tpu.matmul %158, %159, %cst_81 {dimension_numbers = #tpu.dot_dimension_numbers<[1], [0], [0], [1], [0, 0, 1, 1], [], []>} : vector<2x128xf32>, vector<128x128xf32>, vector<2x128xf32> -> vector<2x128xf32>
    %c0_82 = arith.constant 0 : index
    %c0_83 = arith.constant 0 : index
    %161 = vector.load %arg8[%c0_82, %c0_83] : memref<1x128xf32, #tpu.memory_space<vmem>>, vector<1x128xf32>
    %162 = vector.broadcast %161 : vector<1x128xf32> to vector<2x128xf32>
    %163 = arith.addf %160, %162 : vector<2x128xf32>
    %cst_84 = arith.constant 0.000000e+00 : f32
    %164 = vector.broadcast %cst_84 : f32 to vector<2x128xf32>
    %165 = arith.maximumf %163, %164 : vector<2x128xf32>
    %c0_85 = arith.constant 0 : index
    %c0_86 = arith.constant 0 : index
    %166 = vector.load %arg9[%c0_85, %c0_86] : memref<128x10xf32, #tpu.memory_space<vmem>>, vector<128x10xf32>
    %cst_87 = arith.constant dense<0.000000e+00> : vector<2x10xf32>
    %167 = tpu.matmul %165, %166, %cst_87 {dimension_numbers = #tpu.dot_dimension_numbers<[1], [0], [0], [1], [0, 0, 1, 1], [], []>} : vector<2x128xf32>, vector<128x10xf32>, vector<2x10xf32> -> vector<2x10xf32>
    %c0_88 = arith.constant 0 : index
    %c0_89 = arith.constant 0 : index
    %168 = vector.load %arg10[%c0_88, %c0_89] : memref<1x10xf32, #tpu.memory_space<vmem>>, vector<1x10xf32>
    %169 = vector.broadcast %168 : vector<1x10xf32> to vector<2x10xf32>
    %170 = arith.addf %167, %169 : vector<2x10xf32>
    %c0_90 = arith.constant 0 : index
    %c0_91 = arith.constant 0 : index
    %171 = vector.load %arg11[%c0_90, %c0_91] : memref<2x10xf32, #tpu.memory_space<vmem>>, vector<2x10xf32>
    tpu.vector_store %arg11[%c0_90, %c0_91], %170 {strides = array<i32>} : memref<2x10xf32, #tpu.memory_space<vmem>>, vector<2x10xf32>,
    return
  }
}

</mosaic_0001>

<bundles_post_ra>
// kernel: network_forward.1
= control target key start
LH: loop header
LB: loop body
LE: loop exit
PB: predicated region body
PF: predicated region fallthrough
CT: control target
= control target key end

     0   :  { %vm627_vm0 = vcmask 1040384   ;;  %vm194_vm1 = vcmask 203776   ;;  %s11351_s0 = inlined_call_operand.vmem [shape: f32[1152,25], index: 0, kind: input, shape index: {}]   ;;  %s11352_s1 = inlined_call_operand.vmem [shape: f32[25,6], index: 1, kind: input, shape index: {}]   ;;  %s11353_s2 = inlined_call_operand.vmem [shape: f32[1,6], index: 2, kind: input, shape index: {}]   ;;  %s11354_s3 = inlined_call_operand.vmem [shape: f32[150,12], index: 3, kind: input, shape index: {}]   ;;  %s11355_s4 = inlined_call_operand.vmem [shape: f32[1,12], index: 4, kind: input, shape index: {}]   ;;  %s11356_s5 = inlined_call_operand.vmem [shape: f32[192,128], index: 5, kind: input, shape index: {}]   ;;  %s11357_s6 = inlined_call_operand.vmem [shape: f32[1,128], index: 6, kind: input, shape index: {}]   ;;  %s11358_s7 = inlined_call_operand.vmem [shape: f32[128,128], index: 7, kind: input, shape index: {}]   ;;  %s11359_s8 = inlined_call_operand.vmem [shape: f32[1,128], index: 8, kind: input, shape index: {}]   ;;  %s11360_s9 = inlined_call_operand.vmem [shape: f32[128,10], index: 9, kind: input, shape index: {}]   ;;  %s11361_s10 = inlined_call_operand.vmem [shape: f32[1,10], index: 10, kind: input, shape index: {}]   ;;  %s11362_s11 = inlined_call_operand.hbm [shape: f32[2,10], index: 11, kind: output, shape index: {}]  }
   0x1   :  { %v186_v0 = vld [vmem:[%s11352_s1 + $0x18] sm:$0x1]  ;;  %v185_v1 = vld [vmem:[%s11352_s1 + $0x10] sm:$0xff]  ;;  %v39_v2 = vld [vmem:[%s11351_s0] sm:$0xff] }
   0x2   :  { %6349 = vmatprep.subr.msk.mxu0 %vm627_vm0, %v186_v0  ;;  %6643 = vmatprep.subr.msk.mxu1 %vm627_vm0, %v186_v0  ;;  %v184_v3 = vld [vmem:[%s11352_s1 + $0x8] sm:$0xff]  ;;  %v183_v4 = vld [vmem:[%s11352_s1] sm:$0xff]  ;;  %v41_v6 = vld [vmem:[%s11351_s0 + $0x10] sm:$0xff] }
   0x3   :  { %6350 = vmatpush3.msk.msra.mxu0 %vm627_vm0, %v186_v0  ;;  %6357 = vmatprep.mubr.msk.f32.mxu0 %vm194_vm1, %v39_v2  ;;  %v40_v5 = vld [vmem:[%s11351_s0 + $0x8] sm:$0xff]  ;;  %v42_v7 = vld [vmem:[%s11351_s0 + $0x18] sm:$0xff]  ;;  %v43_v8 = vld [vmem:[%s11351_s0 + $0x20] sm:$0xff] }
   0x4   :  { %6351 = vmatprep.subr.mxu0 %v185_v1  ;;  %6647 = vmatpush3.msk.msra.mxu1 %vm627_vm0, %v186_v0  ;;  %v145_v9 = vld [vmem:[%s11351_s0 + $0x350] sm:$0xff]  ;;  %v146_v10 = vld [vmem:[%s11351_s0 + $0x358] sm:$0xff]  ;;  %v44_v11 = vld [vmem:[%s11351_s0 + $0x28] sm:$0xff] }
   0x5   :  { %6352 = vmatpush3.msra.mxu0 %v185_v1  ;;  %6644 = vmatprep.subr.mxu1 %v185_v1  ;;  %v147_v12 = vld [vmem:[%s11351_s0 + $0x360] sm:$0xff]  ;;  %v45_v13 = vld [vmem:[%s11351_s0 + $0x30] sm:$0xff]  ;;  %v148_v14 = vld [vmem:[%s11351_s0 + $0x368] sm:$0xff] }
   0x6   :  { %6353 = vmatprep.subr.mxu0 %v184_v3  ;;  %6648 = vmatpush3.msra.mxu1 %v185_v1  ;;  %v149_v15 = vld [vmem:[%s11351_s0 + $0x370] sm:$0xff]  ;;  %v46_v16 = vld [vmem:[%s11351_s0 + $0x38] sm:$0xff]  ;;  %v47_v17 = vld [vmem:[%s11351_s0 + $0x40] sm:$0xff] }
   0x7   :  { %6354 = vmatpush3.msra.mxu0 %v184_v3  ;;  %6645 = vmatprep.subr.mxu1 %v184_v3  ;;  %v150_v18 = vld [vmem:[%s11351_s0 + $0x378] sm:$0xff]  ;;  %v151_v19 = vld [vmem:[%s11351_s0 + $0x380] sm:$0xff]  ;;  %v48_v20 = vld [vmem:[%s11351_s0 + $0x48] sm:$0xff] }
   0x8   :  { %6355 = vmatprep.subr.mxu0 %v183_v4  ;;  %6649 = vmatpush3.msra.mxu1 %v184_v3  ;;  %v49_v21 = vld [vmem:[%s11351_s0 + $0x50] sm:$0xff]  ;;  %v152_v22 = vld [vmem:[%s11351_s0 + $0x388] sm:$0xff]  ;;  %v50_v24 = vld [vmem:[%s11351_s0 + $0x58] sm:$0xff] }
   0x9   :  { %6356 = vmatpush3.msra.mxu0 %v183_v4  ;;  %6646 = vmatprep.subr.mxu1 %v183_v4  ;;  %v153_v23 = vld [vmem:[%s11351_s0 + $0x390] sm:$0xff]  ;;  %v51_v25 = vld [vmem:[%s11351_s0 + $0x60] sm:$0xff]  ;;  %v154_v26 = vld [vmem:[%s11351_s0 + $0x398] sm:$0xff] }
   0xa   :  { %6358 = vmatmul.mubr.msk.f32.vlgmr.msra.gmra.mxu0 %vm194_vm1, %v40_v5  ;;  %6650 = vmatpush3.msra.mxu1 %v183_v4  ;;  %v155_v27 = vld [vmem:[%s11351_s0 + $0x3a0] sm:$0xff]  ;;  %v52_v28 = vld [vmem:[%s11351_s0 + $0x68] sm:$0xff]  ;;  %v53_v29 = vld [vmem:[%s11351_s0 + $0x70] sm:$0xff] }
   0xb   :  { %6360 = vmatprep.mubr.msk.f32.mxu0 %vm194_vm1, %v41_v6  ;;  %6516 = vmatprep.mubr.msk.f32.mxu1 %vm194_vm1, %v145_v9  ;;  %v156_v30 = vld [vmem:[%s11351_s0 + $0x3a8] sm:$0xff]  ;;  %v157_v31 = vld [vmem:[%s11351_s0 + $0x3b0] sm:$0xff]  ;;  %v54_v32 = vld [vmem:[%s11351_s0 + $0x78] sm:$0xff] }
   0xc   :  { %6517 = vmatmul.mubr.msk.f32.vlgmr.msra.gmra.mxu1 %vm194_vm1, %v146_v10  ;;  %v55_v33 = vld [vmem:[%s11351_s0 + $0x80] sm:$0xff]  ;;  %v158_v34 = vld [vmem:[%s11351_s0 + $0x3b8] sm:$0xff]  ;;  %v56_v36 = vld [vmem:[%s11351_s0 + $0x88] sm:$0xff] }
   0xd   :  { %6519 = vmatprep.mubr.msk.f32.mxu1 %vm194_vm1, %v147_v12  ;;  %v159_v35 = vld [vmem:[%s11351_s0 + $0x3c0] sm:$0xff]  ;;  %v57_v37 = vld [vmem:[%s11351_s0 + $0x90] sm:$0xff]  ;;  %v160_v38 = vld [vmem:[%s11351_s0 + $0x3c8] sm:$0xff] }
   0xe   :  { %6361 = vmatmul.mubr.msk.f32.gmra.mxu0 %vm194_vm1, %v42_v7  ;;  %v161_v39 = vld [vmem:[%s11351_s0 + $0x3d0] sm:$0xff]  ;;  %v58_v40 = vld [vmem:[%s11351_s0 + $0x98] sm:$0xff] }
   0xf   :  { %6363 = vmatprep.mubr.msk.f32.mxu0 %vm194_vm1, %v43_v8 }
  0x10   :  { %6520 = vmatmul.mubr.msk.f32.gmra.mxu1 %vm194_vm1, %v148_v14 }
  0x11   :  { %6522 = vmatprep.mubr.msk.f32.mxu1 %vm194_vm1, %v149_v15 }
  0x12   :  { %6364 = vmatmul.mubr.msk.f32.gmra.mxu0 %vm194_vm1, %v44_v11 }
  0x13   :  { %6366 = vmatprep.mubr.msk.f32.mxu0 %vm194_vm1, %v45_v13 }
  0x14   :  { %6523 = vmatmul.mubr.msk.f32.gmra.mxu1 %vm194_vm1, %v150_v18 }
  0x15   :  { %6525 = vmatprep.mubr.msk.f32.mxu1 %vm194_vm1, %v151_v19 }
  0x16   :  { %6367 = vmatmul.mubr.msk.f32.gmra.mxu0 %vm194_vm1, %v46_v16 }
  0x17   :  { %6369 = vmatprep.mubr.msk.f32.mxu0 %vm194_vm1, %v47_v17 }
  0x18   :  { %6526 = vmatmul.mubr.msk.f32.gmra.mxu1 %vm194_vm1, %v152_v22 }
  0x19   :  { %6528 = vmatprep.mubr.msk.f32.mxu1 %vm194_vm1, %v153_v23 }
  0x1a   :  { %6370 = vmatmul.mubr.msk.f32.gmra.mxu0 %vm194_vm1, %v48_v20 }
  0x1b   :  { %6372 = vmatprep.mubr.msk.f32.mxu0 %vm194_vm1, %v49_v21 }
  0x1c   :  { %6529 = vmatmul.mubr.msk.f32.gmra.mxu1 %vm194_vm1, %v154_v26 }
  0x1d   :  { %6531 = vmatprep.mubr.msk.f32.mxu1 %vm194_vm1, %v155_v27 }
  0x1e   :  { %6373 = vmatmul.mubr.msk.f32.gmra.mxu0 %vm194_vm1, %v50_v24 }
  0x1f   :  { %6375 = vmatprep.mubr.msk.f32.mxu0 %vm194_vm1, %v51_v25 }
  0x20   :  { %6532 = vmatmul.mubr.msk.f32.gmra.mxu1 %vm194_vm1, %v156_v30 }
  0x21   :  { %6534 = vmatprep.mubr.msk.f32.mxu1 %vm194_vm1, %v157_v31 }
  0x22   :  { %6376 = vmatmul.mubr.msk.f32.gmra.mxu0 %vm194_vm1, %v52_v28 }
  0x23   :  { %6378 = vmatprep.mubr.msk.f32.mxu0 %vm194_vm1, %v53_v29 }
  0x24   :  { %6535 = vmatmul.mubr.msk.f32.gmra.mxu1 %vm194_vm1, %v158_v34 }
  0x25   :  { %6537 = vmatprep.mubr.msk.f32.mxu1 %vm194_vm1, %v159_v35 }
  0x26   :  { %6379 = vmatmul.mubr.msk.f32.gmra.mxu0 %vm194_vm1, %v54_v32 }
  0x27   :  { %6381 = vmatprep.mubr.msk.f32.mxu0 %vm194_vm1, %v55_v33 }
  0x2a   :  { %6382 = vmatmul.mubr.msk.f32.gmra.mxu0 %vm194_vm1, %v56_v36 }
  0x2b   :  { %6384 = vmatprep.mubr.msk.f32.mxu0 %vm194_vm1, %v57_v37 }
  0x2c   :  { %16 = vsyncpa [#allocation5], 0  ;;  %v59_v41 = vld [vmem:[%s11351_s0 + $0xa0] sm:$0xff]  ;;  %6538 = vmatmul.mubr.msk.f32.gmra.mxu1 %vm194_vm1, %v160_v38  ;;  %v162_v42 = vld [vmem:[%s11351_s0 + $0x3d8] sm:$0xff]  ;;  %vm2181_vm2 = vcmask 1044484   ;;  %vm1789_vm3 = vcmask 1042432  }
  0x2d   :  { %6540 = vmatprep.mubr.msk.f32.mxu1 %vm194_vm1, %v161_v39  ;;  %v163_v43 = vld [vmem:[%s11351_s0 + $0x3e0] sm:$0xff]  ;;  %v60_v44 = vld [vmem:[%s11351_s0 + $0xa8] sm:$0xff]  ;;  %v61_v45 = vld [vmem:[%s11351_s0 + $0xb0] sm:$0xff]  ;;  %vm1790_vm4 = vcmask 1046532   ;;  %vm1985_vm5 = vcmask 1041408   ;;  %vm1986_vm6 = vcmask 1045508  }
  0x2e   :  { %6385 = vmatmul.mubr.msk.f32.gmra.mxu0 %vm194_vm1, %v58_v40  ;;  %v164_v46 = vld [vmem:[%s11351_s0 + $0x3e8] sm:$0xff]  ;;  %v165_v47 = vld [vmem:[%s11351_s0 + $0x3f0] sm:$0xff]  ;;  %v62_v48 = vld [vmem:[%s11351_s0 + $0xb8] sm:$0xff]  ;;  %s11478_s14 = smov 24   ;;  %vm1772_vm7 = vcmask 48128   ;;  %s11426_s15 = smov 30  }
  0x2f   :  { %6387 = vmatprep.mubr.msk.f32.mxu0 %vm194_vm1, %v59_v41  ;;  %v63_v49 = vld [vmem:[%s11351_s0 + $0xc0] sm:$0xff]  ;;  %v166_v50 = vld [vmem:[%s11351_s0 + $0x3f8] sm:$0xff]  ;;  %v64_v52 = vld [vmem:[%s11351_s0 + $0xc8] sm:$0xff]  ;;  %s11499_s16 = smov 54   ;;  %s11424_s17 = smov 60   ;;  %vm11474_vm11 = vcmask 97328  }
  0x30   :  { %6541 = vmatmul.mubr.msk.f32.gmra.mxu1 %vm194_vm1, %v162_v42  ;;  %v167_v51 = vld [vmem:[%s11351_s0 + $0x400] sm:$0xff]  ;;  %v65_v53 = vld [vmem:[%s11351_s0 + $0xd0] sm:$0xff]  ;;  %v168_v54 = vld [vmem:[%s11351_s0 + $0x408] sm:$0xff]  ;;  %s6711_s18 = smov 6   ;;  %s6712_s19 = smov 18   ;;  %vm11488_vm12 = vcmask 146528  }
  0x31   :  { %6543 = vmatprep.mubr.msk.f32.mxu1 %vm194_vm1, %v163_v43  ;;  %v169_v55 = vld [vmem:[%s11351_s0 + $0x410] sm:$0xff]  ;;  %v66_v56 = vld [vmem:[%s11351_s0 + $0xd8] sm:$0xff]  ;;  %v67_v57 = vld [vmem:[%s11351_s0 + $0xe0] sm:$0xff]  ;;  %s6713_s20 = smov 12   ;;  %s6714_s21 = smov 84   ;;  %vm11475_vm13 = vcmask 195728  }
  0x32   :  { %6388 = vmatmul.mubr.msk.f32.gmra.mxu0 %vm194_vm1, %v60_v44  ;;  %v170_v58 = vld [vmem:[%s11351_s0 + $0x418] sm:$0xff]  ;;  %v171_v59 = vld [vmem:[%s11351_s0 + $0x420] sm:$0xff]  ;;  %v68_v60 = vld [vmem:[%s11351_s0 + $0xe8] sm:$0xff]  ;;  %s11497_s22 = smov 36   ;;  %s11491_s23 = smov 114   ;;  %vm11471_vm14 = vcmask 244928  }
  0x33   :  { %6390 = vmatprep.mubr.msk.f32.mxu0 %vm194_vm1, %v61_v45  ;;  %v69_v61 = vld [vmem:[%s11351_s0 + $0xf0] sm:$0xff]  ;;  %v172_v62 = vld [vmem:[%s11351_s0 + $0x428] sm:$0xff]  ;;  %v70_v0 = vld [vmem:[%s11351_s0 + $0xf8] sm:$0xff]  ;;  %s6717_s24 = smov 42   ;;  %s6718_s25 = smov 48   ;;  %vm11472_vm15 = vcmask 294128  }
  0x34   :  { %6544 = vmatmul.mubr.msk.f32.gmra.mxu1 %vm194_vm1, %v164_v46  ;;  %v173_v63 = vld [vmem:[%s11351_s0 + $0x430] sm:$0xff]  ;;  %v71_v1 = vld [vmem:[%s11351_s0 + $0x100] sm:$0xff]  ;;  %v174_v2 = vld [vmem:[%s11351_s0 + $0x438] sm:$0xff]  ;;  %s11505_s28 = smov 72   ;;  %s11502_s29 = smov 78  }
  0x35   :  { %6546 = vmatprep.mubr.msk.f32.mxu1 %vm194_vm1, %v165_v47  ;;  %v175_v3 = vld [vmem:[%s11351_s0 + $0x440] sm:$0xff]  ;;  %v72_v4 = vld [vmem:[%s11351_s0 + $0x108] sm:$0xff]  ;;  %v73_v5 = vld [vmem:[%s11351_s0 + $0x110] sm:$0xff]  ;;  %s6722_s30 = smov 66   ;;  %s6723_s1 = smov 96  }
  0x36   :  { %6391 = vmatmul.mubr.msk.f32.gmra.mxu0 %vm194_vm1, %v62_v48  ;;  %v176_v6 = vld [vmem:[%s11351_s0 + $0x448] sm:$0xff]  ;;  %v177_v7 = vld [vmem:[%s11351_s0 + $0x450] sm:$0xff]  ;;  %v74_v8 = vld [vmem:[%s11351_s0 + $0x118] sm:$0xff]  ;;  %s11495_s12 = smov 102   ;;  %s11398_s13 = smov 108  }
  0x37   :  { %6393 = vmatprep.mubr.msk.f32.mxu0 %vm194_vm1, %v63_v49  ;;  %v75_v9 = vld [vmem:[%s11351_s0 + $0x120] sm:$0xff]  ;;  %v178_v10 = vld [vmem:[%s11351_s0 + $0x458] sm:$0xff]  ;;  %v76_v12 = vld [vmem:[%s11351_s0 + $0x128] sm:$0xff]  ;;  %s11428_s26 = smov 120   ;;  %s11722_s27 = smov 30  }
  0x38   :  { %6547 = vmatmul.mubr.msk.f32.gmra.mxu1 %vm194_vm1, %v166_v50  ;;  %v179_v11 = vld [vmem:[%s11351_s0 + $0x460] sm:$0xff]  ;;  %v77_v13 = vld [vmem:[%s11351_s0 + $0x130] sm:$0xff]  ;;  %v180_v14 = vld [vmem:[%s11351_s0 + $0x468] sm:$0xff] }
  0x39   :  { %6549 = vmatprep.mubr.msk.f32.mxu1 %vm194_vm1, %v167_v51  ;;  %v181_v15 = vld [vmem:[%s11351_s0 + $0x470] sm:$0xff]  ;;  %v78_v16 = vld [vmem:[%s11351_s0 + $0x138] sm:$0xff]  ;;  %v79_v17 = vld [vmem:[%s11351_s0 + $0x140] sm:$0xff] }
  0x3a   :  { %6394 = vmatmul.mubr.msk.f32.gmra.mxu0 %vm194_vm1, %v64_v52  ;;  %v182_v18 = vld [vmem:[%s11351_s0 + $0x478] sm:$0xff]  ;;  %v80_v19 = vld [vmem:[%s11351_s0 + $0x148] sm:$0xff]  ;;  %v81_v20 = vld [vmem:[%s11351_s0 + $0x150] sm:$0xff] }
  0x3b   :  { %6396 = vmatprep.mubr.msk.f32.mxu0 %vm194_vm1, %v65_v53  ;;  %v82_v21 = vld [vmem:[%s11351_s0 + $0x158] sm:$0xff]  ;;  %v83_v22 = vld [vmem:[%s11351_s0 + $0x160] sm:$0xff]  ;;  %v84_v23 = vld [vmem:[%s11351_s0 + $0x168] sm:$0xff] }
  0x3c   :  { %6550 = vmatmul.mubr.msk.f32.gmra.mxu1 %vm194_vm1, %v168_v54  ;;  %v85_v24 = vld [vmem:[%s11351_s0 + $0x170] sm:$0xff]  ;;  %v86_v25 = vld [vmem:[%s11351_s0 + $0x178] sm:$0xff]  ;;  %v87_v26 = vld [vmem:[%s11351_s0 + $0x180] sm:$0xff] }
  0x3d   :  { %6552 = vmatprep.mubr.msk.f32.mxu1 %vm194_vm1, %v169_v55  ;;  %v88_v27 = vld [vmem:[%s11351_s0 + $0x188] sm:$0xff]  ;;  %v89_v28 = vld [vmem:[%s11351_s0 + $0x190] sm:$0xff]  ;;  %v90_v29 = vld [vmem:[%s11351_s0 + $0x198] sm:$0xff] }
  0x3e   :  { %6397 = vmatmul.mubr.msk.f32.gmra.mxu0 %vm194_vm1, %v66_v56  ;;  %v91_v30 = vld [vmem:[%s11351_s0 + $0x1a0] sm:$0xff]  ;;  %v92_v31 = vld [vmem:[%s11351_s0 + $0x1a8] sm:$0xff]  ;;  %v93_v32 = vld [vmem:[%s11351_s0 + $0x1b0] sm:$0xff] }
  0x3f   :  { %6399 = vmatprep.mubr.msk.f32.mxu0 %vm194_vm1, %v67_v57  ;;  %v94_v33 = vld [vmem:[%s11351_s0 + $0x1b8] sm:$0xff]  ;;  %v95_v34 = vld [vmem:[%s11351_s0 + $0x1c0] sm:$0xff]  ;;  %v96_v35 = vld [vmem:[%s11351_s0 + $0x1c8] sm:$0xff] }
  0x40   :  { %6553 = vmatmul.mubr.msk.f32.gmra.mxu1 %vm194_vm1, %v170_v58  ;;  %v97_v36 = vld [vmem:[%s11351_s0 + $0x1d0] sm:$0xff]  ;;  %v98_v37 = vld [vmem:[%s11351_s0 + $0x1d8] sm:$0xff]  ;;  %v99_v38 = vld [vmem:[%s11351_s0 + $0x1e0] sm:$0xff] }
  0x41   :  { %6555 = vmatprep.mubr.msk.f32.mxu1 %vm194_vm1, %v171_v59  ;;  %v100_v39 = vld [vmem:[%s11351_s0 + $0x1e8] sm:$0xff]  ;;  %v101_v40 = vld [vmem:[%s11351_s0 + $0x1f0] sm:$0xff]  ;;  %v102_v41 = vld [vmem:[%s11351_s0 + $0x1f8] sm:$0xff] }
  0x42   :  { %6400 = vmatmul.mubr.msk.f32.gmra.mxu0 %vm194_vm1, %v68_v60  ;;  %v103_v42 = vld [vmem:[%s11351_s0 + $0x200] sm:$0xff]  ;;  %v104_v43 = vld [vmem:[%s11351_s0 + $0x208] sm:$0xff]  ;;  %v105_v44 = vld [vmem:[%s11351_s0 + $0x210] sm:$0xff] }
  0x43   :  { %6402 = vmatprep.mubr.msk.f32.mxu0 %vm194_vm1, %v69_v61  ;;  %v106_v45 = vld [vmem:[%s11351_s0 + $0x218] sm:$0xff]  ;;  %v107_v46 = vld [vmem:[%s11351_s0 + $0x220] sm:$0xff]  ;;  %v108_v47 = vld [vmem:[%s11351_s0 + $0x228] sm:$0xff] }
  0x44   :  { %6556 = vmatmul.mubr.msk.f32.gmra.mxu1 %vm194_vm1, %v172_v62  ;;  %v109_v48 = vld [vmem:[%s11351_s0 + $0x230] sm:$0xff]  ;;  %v110_v49 = vld [vmem:[%s11351_s0 + $0x238] sm:$0xff]  ;;  %v111_v50 = vld [vmem:[%s11351_s0 + $0x240] sm:$0xff] }
  0x45   :  { %6558 = vmatprep.mubr.msk.f32.mxu1 %vm194_vm1, %v173_v63  ;;  %v112_v51 = vld [vmem:[%s11351_s0 + $0x248] sm:$0xff]  ;;  %v113_v52 = vld [vmem:[%s11351_s0 + $0x250] sm:$0xff]  ;;  %v114_v53 = vld [vmem:[%s11351_s0 + $0x258] sm:$0xff] }
  0x46   :  { %6403 = vmatmul.mubr.msk.f32.gmra.mxu0 %vm194_vm1, %v70_v0  ;;  %v115_v54 = vld [vmem:[%s11351_s0 + $0x260] sm:$0xff]  ;;  %v116_v55 = vld [vmem:[%s11351_s0 + $0x268] sm:$0xff]  ;;  %v117_v56 = vld [vmem:[%s11351_s0 + $0x270] sm:$0xff] }
  0x47   :  { %6405 = vmatprep.mubr.msk.f32.mxu0 %vm194_vm1, %v71_v1  ;;  %v118_v57 = vld [vmem:[%s11351_s0 + $0x278] sm:$0xff]  ;;  %v119_v58 = vld [vmem:[%s11351_s0 + $0x280] sm:$0xff]  ;;  %v120_v59 = vld [vmem:[%s11351_s0 + $0x288] sm:$0xff] }
  0x48   :  { %6559 = vmatmul.mubr.msk.f32.gmra.mxu1 %vm194_vm1, %v174_v2  ;;  %v121_v60 = vld [vmem:[%s11351_s0 + $0x290] sm:$0xff]  ;;  %v122_v61 = vld [vmem:[%s11351_s0 + $0x298] sm:$0xff]  ;;  %v123_v62 = vld [vmem:[%s11351_s0 + $0x2a0] sm:$0xff] }
  0x49   :  { %6561 = vmatprep.mubr.msk.f32.mxu1 %vm194_vm1, %v175_v3  ;;  %v124_v63 = vld [vmem:[%s11351_s0 + $0x2a8] sm:$0xff]  ;;  %v125_v0 = vld [vmem:[%s11351_s0 + $0x2b0] sm:$0xff]  ;;  %v126_v1 = vld [vmem:[%s11351_s0 + $0x2b8] sm:$0xff] }
  0x4a   :  { %6406 = vmatmul.mubr.msk.f32.gmra.mxu0 %vm194_vm1, %v72_v4  ;;  %v127_v2 = vld [vmem:[%s11351_s0 + $0x2c0] sm:$0xff]  ;;  %v128_v3 = vld [vmem:[%s11351_s0 + $0x2c8] sm:$0xff]  ;;  %v129_v4 = vld [vmem:[%s11351_s0 + $0x2d0] sm:$0xff] }
  0x4b   :  { %6408 = vmatprep.mubr.msk.f32.mxu0 %vm194_vm1, %v73_v5  ;;  %v130_v5 = vld [vmem:[%s11351_s0 + $0x2d8] sm:$0xff]  ;;  %vm7847_vm8 = vmor %vm627_vm0, %vm2181_vm2  ;;  %vm4089_vm0 = vcmask 1045504   ;;  %vm11473_vm2 = vcmask 392528  }
  0x4c   :  { %6562 = vmatmul.mubr.msk.f32.gmra.mxu1 %vm194_vm1, %v176_v6  ;;  %v131_v6 = vld [vmem:[%s11351_s0 + $0x2e0] sm:$0xff]  ;;  %vm7865_vm9 = vmor %vm1789_vm3, %vm1790_vm4  ;;  %vm2750_vm3 = vcmask 441728   ;;  %vm2817_vm4 = vcmask 490928  }
  0x4d   :  { %6564 = vmatprep.mubr.msk.f32.mxu1 %vm194_vm1, %v177_v7  ;;  %v132_v7 = vld [vmem:[%s11351_s0 + $0x2e8] sm:$0xff]  ;;  %vm7915_vm10 = vmor %vm1985_vm5, %vm1986_vm6  ;;  %vm11504_vm5 = vcmask 540128   ;;  %vm2965_vm6 = vcmask 589328  }
  0x4e   :  { %6409 = vmatmul.mubr.msk.f32.gmra.mxu0 %vm194_vm1, %v74_v8  ;;  %v133_v8 = vld [vmem:[%s11351_s0 + $0x2f0] sm:$0xff] }
  0x4f   :  { %6411 = vmatprep.mubr.msk.f32.mxu0 %vm194_vm1, %v75_v9  ;;  %v134_v9 = vld [vmem:[%s11351_s0 + $0x2f8] sm:$0xff] }
  0x50   :  { %6565 = vmatmul.mubr.msk.f32.gmra.mxu1 %vm194_vm1, %v178_v10  ;;  %v135_v10 = vld [vmem:[%s11351_s0 + $0x300] sm:$0xff] }
  0x51   :  { %6567 = vmatprep.mubr.msk.f32.mxu1 %vm194_vm1, %v179_v11  ;;  %v136_v11 = vld [vmem:[%s11351_s0 + $0x308] sm:$0xff] }
  0x52   :  { %6412 = vmatmul.mubr.msk.f32.gmra.mxu0 %vm194_vm1, %v76_v12  ;;  %v137_v12 = vld [vmem:[%s11351_s0 + $0x310] sm:$0xff] }
  0x53   :  { %6414 = vmatprep.mubr.msk.f32.mxu0 %vm194_vm1, %v77_v13 }
  0x54   :  { %6568 = vmatmul.mubr.msk.f32.gmra.mxu1 %vm194_vm1, %v180_v14  ;;  %v138_v14 = vld [vmem:[%s11351_s0 + $0x318] sm:$0xff] }
  0x55   :  { %6570 = vmatprep.mubr.msk.f32.mxu1 %vm194_vm1, %v181_v15 }
  0x56   :  { %6415 = vmatmul.mubr.msk.f32.gmra.mxu0 %vm194_vm1, %v78_v16  ;;  %v139_v16 = vld [vmem:[%s11351_s0 + $0x320] sm:$0xff] }
  0x57   :  { %6417 = vmatprep.mubr.msk.f32.mxu0 %vm194_vm1, %v79_v17 }
  0x58   :  { %6571 = vmatmul.mubr.msk.f32.gmra.mxu1 %vm194_vm1, %v182_v18  ;;  %v140_v18 = vld [vmem:[%s11351_s0 + $0x328] sm:$0xff] }
  0x5a   :  { %6418 = vmatmul.mubr.msk.f32.gmra.mxu0 %vm194_vm1, %v80_v19 }
  0x5b   :  { %6420 = vmatprep.mubr.msk.f32.mxu0 %vm194_vm1, %v81_v20  ;;  %v141_v20 = vld [vmem:[%s11351_s0 + $0x330] sm:$0xff] }
  0x5e   :  { %6421 = vmatmul.mubr.msk.f32.gmra.mxu0 %vm194_vm1, %v82_v21 }
  0x5f   :  { %6423 = vmatprep.mubr.msk.f32.mxu0 %vm194_vm1, %v83_v22 }
  0x62   :  { %6424 = vmatmul.mubr.msk.f32.gmra.mxu0 %vm194_vm1, %v84_v23 }
  0x63   :  { %6426 = vmatprep.mubr.msk.f32.mxu0 %vm194_vm1, %v85_v24  ;;  %v142_v24 = vld [vmem:[%s11351_s0 + $0x338] sm:$0xff] }
  0x66   :  { %6427 = vmatmul.mubr.msk.f32.gmra.mxu0 %vm194_vm1, %v86_v25 }
  0x67   :  { %6429 = vmatprep.mubr.msk.f32.mxu0 %vm194_vm1, %v87_v26  ;;  %v143_v26 = vld [vmem:[%s11351_s0 + $0x340] sm:$0xff] }
  0x6a   :  { %6430 = vmatmul.mubr.msk.f32.gmra.mxu0 %vm194_vm1, %v88_v27 }
  0x6b   :  { %6432 = vmatprep.mubr.msk.f32.mxu0 %vm194_vm1, %v89_v28 }
  0x6e   :  { %6433 = vmatmul.mubr.msk.f32.gmra.mxu0 %vm194_vm1, %v90_v29 }
  0x6f   :  { %6435 = vmatprep.mubr.msk.f32.mxu0 %vm194_vm1, %v91_v30  ;;  %v144_v30 = vld [vmem:[%s11351_s0 + $0x348] sm:$0xff]  ;;  %s6725_s0 = smov 16  }
  0x72   :  { %6436 = vmatmul.mubr.msk.f32.gmra.mxu0 %vm194_vm1, %v92_v31 }
  0x73   :  { %6438 = vmatprep.mubr.msk.f32.mxu0 %vm194_vm1, %v93_v32 }
  0x76   :  { %6439 = vmatmul.mubr.msk.f32.gmra.mxu0 %vm194_vm1, %v94_v33 }
  0x77   :  { %6441 = vmatprep.mubr.msk.f32.mxu0 %vm194_vm1, %v95_v34 }
  0x7a   :  { %6442 = vmatmul.mubr.msk.f32.gmra.mxu0 %vm194_vm1, %v96_v35 }
  0x7b   :  { %6444 = vmatprep.mubr.msk.f32.mxu0 %vm194_vm1, %v97_v36 }
  0x7e   :  { %6445 = vmatmul.mubr.msk.f32.gmra.mxu0 %vm194_vm1, %v98_v37 }
  0x7f   :  { %6447 = vmatprep.mubr.msk.f32.mxu0 %vm194_vm1, %v99_v38 }
  0x82   :  { %6448 = vmatmul.mubr.msk.f32.gmra.mxu0 %vm194_vm1, %v100_v39 }
  0x83   :  { %6450 = vmatprep.mubr.msk.f32.mxu0 %vm194_vm1, %v101_v40 }
  0x86   :  { %6451 = vmatmul.mubr.msk.f32.gmra.mxu0 %vm194_vm1, %v102_v41 }
  0x87   :  { %6453 = vmatprep.mubr.msk.f32.mxu0 %vm194_vm1, %v103_v42 }
  0x8a   :  { %6454 = vmatmul.mubr.msk.f32.gmra.mxu0 %vm194_vm1, %v104_v43 }
  0x8b   :  { %6456 = vmatprep.mubr.msk.f32.mxu0 %vm194_vm1, %v105_v44 }
  0x8e   :  { %6457 = vmatmul.mubr.msk.f32.gmra.mxu0 %vm194_vm1, %v106_v45 }
  0x8f   :  { %6459 = vmatprep.mubr.msk.f32.mxu0 %vm194_vm1, %v107_v46 }
  0x92   :  { %6460 = vmatmul.mubr.msk.f32.gmra.mxu0 %vm194_vm1, %v108_v47 }
  0x93   :  { %6462 = vmatprep.mubr.msk.f32.mxu0 %vm194_vm1, %v109_v48 }
  0x96   :  { %6463 = vmatmul.mubr.msk.f32.gmra.mxu0 %vm194_vm1, %v110_v49 }
  0x97   :  { %6465 = vmatprep.mubr.msk.f32.mxu0 %vm194_vm1, %v111_v50 }
  0x9a   :  { %6466 = vmatmul.mubr.msk.f32.gmra.mxu0 %vm194_vm1, %v112_v51 }
  0x9b   :  { %6468 = vmatprep.mubr.msk.f32.mxu0 %vm194_vm1, %v113_v52 }
  0x9e   :  { %6469 = vmatmul.mubr.msk.f32.gmra.mxu0 %vm194_vm1, %v114_v53 }
  0x9f   :  { %6471 = vmatprep.mubr.msk.f32.mxu0 %vm194_vm1, %v115_v54 }
  0xa2   :  { %6472 = vmatmul.mubr.msk.f32.gmra.mxu0 %vm194_vm1, %v116_v55 }
  0xa3   :  { %6474 = vmatprep.mubr.msk.f32.mxu0 %vm194_vm1, %v117_v56 }
  0xa6   :  { %6475 = vmatmul.mubr.msk.f32.gmra.mxu0 %vm194_vm1, %v118_v57 }
  0xa7   :  { %6477 = vmatprep.mubr.msk.f32.mxu0 %vm194_vm1, %v119_v58 }
  0xaa   :  { %6478 = vmatmul.mubr.msk.f32.gmra.mxu0 %vm194_vm1, %v120_v59 }
  0xab   :  { %6480 = vmatprep.mubr.msk.f32.mxu0 %vm194_vm1, %v121_v60 }
  0xae   :  { %6481 = vmatmul.mubr.msk.f32.gmra.mxu0 %vm194_vm1, %v122_v61 }
  0xaf   :  { %6483 = vmatprep.mubr.msk.f32.mxu0 %vm194_vm1, %v123_v62 }
  0xb2   :  { %6484 = vmatmul.mubr.msk.f32.gmra.mxu0 %vm194_vm1, %v124_v63 }
  0xb3   :  { %6486 = vmatprep.mubr.msk.f32.mxu0 %vm194_vm1, %v125_v0 }
  0xb6   :  { %6487 = vmatmul.mubr.msk.f32.gmra.mxu0 %vm194_vm1, %v126_v1 }
  0xb7   :  { %6489 = vmatprep.mubr.msk.f32.mxu0 %vm194_vm1, %v127_v2 }
  0xba   :  { %6490 = vmatmul.mubr.msk.f32.gmra.mxu0 %vm194_vm1, %v128_v3 }
  0xbb   :  { %6492 = vmatprep.mubr.msk.f32.mxu0 %vm194_vm1, %v129_v4 }
  0xbe   :  { %6493 = vmatmul.mubr.msk.f32.gmra.mxu0 %vm194_vm1, %v130_v5 }
  0xbf   :  { %6495 = vmatprep.mubr.msk.f32.mxu0 %vm194_vm1, %v131_v6 }
  0xc2   :  { %6496 = vmatmul.mubr.msk.f32.gmra.mxu0 %vm194_vm1, %v132_v7 }
  0xc3   :  { %6498 = vmatprep.mubr.msk.f32.mxu0 %vm194_vm1, %v133_v8 }
  0xc6   :  { %6499 = vmatmul.mubr.msk.f32.gmra.mxu0 %vm194_vm1, %v134_v9 }
  0xc7   :  { %6501 = vmatprep.mubr.msk.f32.mxu0 %vm194_vm1, %v135_v10 }
  0xca   :  { %v7360_v13 = vpop.f32.mrf.mxu0  ;;  %6502 = vmatmul.mubr.msk.f32.gmra.mxu0 %vm194_vm1, %v136_v11 }
  0xcb   :  { %6504 = vmatprep.mubr.msk.f32.mxu0 %vm194_vm1, %v137_v12 }
  0xcc   :  { %v7367_v15 = vpop.f32.mrf.mxu0  ;;  %v7384_v21 = vpop.f32.mrf.mxu1 }
  0xce   :  { %v7372_v17 = vpop.f32.mrf.mxu0  ;;  %6505 = vmatmul.mubr.msk.f32.gmra.mxu0 %vm194_vm1, %v138_v14  ;;  %v7389_v23 = vpop.f32.mrf.mxu1 }
  0xcf   :  { %6507 = vmatprep.mubr.msk.f32.mxu0 %vm194_vm1, %v139_v16 }
  0xd0   :  { %v7379_v19 = vpop.f32.mrf.mxu0  ;;  %v7400_v27 = vpop.f32.mrf.mxu1 }
  0xd2   :  { %v7386_v22 = vpop.f32.mrf.mxu0  ;;  %6508 = vmatmul.mubr.msk.f32.gmra.mxu0 %vm194_vm1, %v140_v18  ;;  %v7405_v29 = vpop.f32.mrf.mxu1 }
  0xd3   :  { %6510 = vmatprep.mubr.msk.f32.mxu0 %vm194_vm1, %v141_v20 }
  0xd4   :  { %v7395_v25 = vpop.f32.mrf.mxu0  ;;  %v7413_v32 = vpop.f32.mrf.mxu1 }
  0xd6   :  { %v7402_v28 = vpop.f32.mrf.mxu0  ;;  %6511 = vmatmul.mubr.msk.f32.gmra.mxu0 %vm194_vm1, %v142_v24  ;;  %v7418_v34 = vpop.f32.mrf.mxu1 }
  0xd7   :  { %6513 = vmatprep.mubr.msk.f32.mxu0 %vm194_vm1, %v143_v26 }
  0xd8   :  { %v7411_v31 = vpop.f32.mrf.mxu0  ;;  %v7422_v36 = vpop.f32.mrf.mxu1 }
  0xda   :  { %v7415_v33 = vpop.f32.mrf.mxu0  ;;  %6514 = vmatmul.mubr.msk.f32.gmra.mxu0 %vm194_vm1, %v144_v30  ;;  %v7426_v38 = vpop.f32.mrf.mxu1  ;;  %vm11483_vm1 = vcmask 343328  }
  0xdc   :  { %v7420_v35 = vpop.f32.mrf.mxu0  ;;  %v7430_v40 = vpop.f32.mrf.mxu1 }
  0xde   :  { %v7424_v37 = vpop.f32.mrf.mxu0  ;;  %v7434_v42 = vpop.f32.mrf.mxu1 }
  0xe0   :  { %v7428_v39 = vpop.f32.mrf.mxu0  ;;  %v7438_v44 = vpop.f32.mrf.mxu1 }
  0xe2   :  { %v7432_v41 = vpop.f32.mrf.mxu0  ;;  %v7442_v46 = vpop.f32.mrf.mxu1 }
  0xe3   :  { %11508 = vst [vmem:[#allocation7_spill] sm:$0xff] %v7442_v46 }
  0xe4   :  { %v7436_v43 = vpop.f32.mrf.mxu0  ;;  %v7446_v48 = vpop.f32.mrf.mxu1 }
  0xe5   :  { %11509 = vst [vmem:[#allocation8_spill] sm:$0xff] %v7446_v48 }
  0xe6   :  { %v7440_v45 = vpop.f32.mrf.mxu0  ;;  %v7450_v50 = vpop.f32.mrf.mxu1 }
  0xe7   :  { %11510 = vst [vmem:[#allocation9_spill] sm:$0xff] %v7450_v50 }
  0xe8   :  { %v7444_v47 = vpop.f32.mrf.mxu0 }
  0xea   :  { %v7448_v49 = vpop.f32.mrf.mxu0 }
  0xec   :  { %v7452_v51 = vpop.f32.mrf.mxu0  ;;  %v7454_v52 = vpop.f32.mrf.mxu1 }
  0xed   :  { %11511 = vst [vmem:[#allocation10_spill] sm:$0xff] %v7454_v52 }
  0xee   :  { %v7456_v53 = vpop.f32.mrf.mxu0  ;;  %v7458_v54 = vpop.f32.mrf.mxu1 }
  0xef   :  { %11512 = vst [vmem:[#allocation11_spill] sm:$0xff] %v7458_v54 }
  0xf0   :  { %v7460_v55 = vpop.f32.mrf.mxu0  ;;  %v7462_v56 = vpop.f32.mrf.mxu1 }
  0xf1   :  { %11513 = vst [vmem:[#allocation12_spill] sm:$0xff] %v7462_v56 }
  0xf2   :  { %v7464_v57 = vpop.f32.mrf.mxu0  ;;  %v7466_v58 = vpop.f32.mrf.mxu1 }
  0xf3   :  { %11514 = vst [vmem:[#allocation13_spill] sm:$0xff] %v7466_v58 }
  0xf4   :  { %v7468_v59 = vpop.f32.mrf.mxu0  ;;  %v7470_v60 = vpop.f32.mrf.mxu1 }
  0xf5   :  { %11515 = vst [vmem:[#allocation14_spill] sm:$0xff] %v7470_v60 }
  0xf6   :  { %v7472_v61 = vpop.f32.mrf.mxu0  ;;  %v7474_v62 = vpop.f32.mrf.mxu1 }
  0xf7   :  { %11516 = vst [vmem:[#allocation15_spill] sm:$0xff] %v7474_v62 }
  0xf8   :  { %v7476_v63 = vpop.f32.mrf.mxu0  ;;  %v7478_v0 = vpop.f32.mrf.mxu1 }
  0xf9   :  { %11517 = vst [vmem:[#allocation16_spill] sm:$0xff] %v7478_v0 }
  0xfa   :  { %v7480_v1 = vpop.f32.mrf.mxu0  ;;  %v7482_v2 = vpop.f32.mrf.mxu1 }
  0xfb   :  { %11518 = vst [vmem:[#allocation17_spill] sm:$0xff] %v7482_v2 }
  0xfc   :  { %v7484_v3 = vpop.f32.mrf.mxu0  ;;  %v7486_v4 = vpop.f32.mrf.mxu1 }
  0xfd   :  { %11519 = vst [vmem:[#allocation18_spill] sm:$0xff] %v7486_v4 }
  0xfe   :  { %v7488_v5 = vpop.f32.mrf.mxu0  ;;  %v7490_v6 = vpop.f32.mrf.mxu1 }
  0xff   :  { %11520 = vst [vmem:[#allocation19_spill] sm:$0xff] %v7490_v6 }
 0x100   :  { %v7492_v7 = vpop.f32.mrf.mxu0  ;;  %v7494_v8 = vpop.f32.mrf.mxu1 }
 0x101   :  { %11521 = vst [vmem:[#allocation20_spill] sm:$0xff] %v7494_v8 }
 0x102   :  { %v7496_v9 = vpop.f32.mrf.mxu0  ;;  %v7498_v10 = vpop.f32.mrf.mxu1 }
 0x103   :  { %11522 = vst [vmem:[#allocation21_spill] sm:$0xff] %v7498_v10 }
 0x104   :  { %v7500_v11 = vpop.f32.mrf.mxu0  ;;  %v7502_v12 = vpop.f32.mrf.mxu1 }
 0x105   :  { %11523 = vst [vmem:[#allocation22_spill] sm:$0xff] %v7502_v12  ;;  %v7523_v12 = vld [vmem:[%s11353_s2] ss:$0 sm:$0xff] }
 0x106   :  { %v7504_v14 = vpop.f32.mrf.mxu0  ;;  %v7506_v16 = vpop.f32.mrf.mxu1  ;;  %v713_v62 = vadd.f32 %v7372_v17, %v7523_v12 }
 0x107   :  { %11524 = vst [vmem:[#allocation23_spill] sm:$0xff] %v7506_v16 }
 0x108   :  { %v7508_v18 = vpop.f32.mrf.mxu0  ;;  %v7510_v20 = vpop.f32.mrf.mxu1 }
 0x109   :  { %11525 = vst [vmem:[#allocation24_spill] sm:$0xff] %v7510_v20 }
 0x10a   :  { %v7512_v24 = vpop.f32.mrf.mxu0  ;;  %v7514_v26 = vpop.f32.mrf.mxu1 }
 0x10b   :  { %11526 = vst [vmem:[#allocation25_spill] sm:$0xff] %v7514_v26  ;;  %v703_v26 = vadd.f32 %v7360_v13, %v7523_v12 }
 0x10c   :  { %v7516_v30 = vpop.f32.mrf.mxu0  ;;  %v7518_v8 = vpop.f32.mrf.mxu1 }
 0x10d   :  { %11527 = vst [vmem:[#allocation26_spill] sm:$0xff] %v7518_v8  ;;  %v698_v8 = vadd.f32 %v7523_v12, %v7367_v15 }
 0x10e   :  { %v7525_v10 = vpop.f32.mrf.mxu0  ;;  %v7527_v16 = vpop.f32.mrf.mxu1 }
 0x10f   :  { %11528 = vst [vmem:[#allocation27_spill] sm:$0xff] %v7527_v16  ;;  %v1233_v16 = vadd.f32 %v7384_v21, %v7523_v12  ;;  %v1419_v21 = vmax.f32 %v713_v62, 0.0 }
 0x110   :  { %v7529_v6 = vpop.f32.mrf.mxu0  ;;  %v7531_v20 = vpop.f32.mrf.mxu1 }
 0x111   :  { %11529 = vst [vmem:[#allocation28_spill] sm:$0xff] %v7531_v20  ;;  %v1417_v20 = vmax.f32 %v703_v26, 0.0  ;;  %v1523_v26 = vmax.f32 %v1233_v16, 0.0 }
 0x112   :  { %v6413_v4 = vpop.f32.mrf.mxu0  ;;  %v7535_v2 = vpop.f32.mrf.mxu1 }
 0x113   :  { %11530 = vst [vmem:[#allocation29_spill] sm:$0xff] %v7535_v2  ;;  %v883_v0 = vadd.f32 %v6413_v4, %v7523_v12  ;;  %v708_v2 = vadd.f32 %v7523_v12, %v7379_v19  ;;  %v1416_v4 = vmax.f32 %v698_v8, 0.0 }
 0x114   :  { %v877_v60 = vpop.f32.mrf.mxu0  ;;  %v7544_v58 = vpop.f32.mrf.mxu1 }
 0x115   :  { %11531 = vst [vmem:[#allocation30_spill] sm:$0xff] %v7544_v58  ;;  %v1453_v56 = vmax.f32 %v883_v0, 0.0  ;;  %v878_v13 = vadd.f32 %v7523_v12, %v877_v60  ;;  %v723_v58 = vadd.f32 %v7386_v22, %v7523_v12  ;;  %v1418_v8 = vmax.f32 %v708_v2, 0.0 }
 0x116   :  { %v6416_v54 = vpop.f32.mrf.mxu0  ;;  %v7549_v15 = vpop.f32.mrf.mxu1 }
 0x117   :  { %11532 = vst [vmem:[#allocation31_spill] sm:$0xff] %v7549_v15  ;;  %v7551_v52 = vmax.f32 %v1417_v20, %v1453_v56  ;;  %v1452_v17 = vmax.f32 %v878_v13, 0.0  ;;  %v893_v50 = vadd.f32 %v6416_v54, %v7523_v12  ;;  %v718_v56 = vadd.f32 %v7523_v12, %v7395_v25 }
 0x118   :  { %v887_v0 = vpop.f32.mrf.mxu0  ;;  %v6572_v48 = vpop.f32.mrf.mxu1  ;;  %v1421_v13 = vmax.f32 %v723_v58, 0.0 }
 0x119   :  { %v7556_v60 = vmax.f32 %v1416_v4, %v1452_v17  ;;  %v1455_v46 = vmax.f32 %v893_v50, 0.0  ;;  %v888_v19 = vadd.f32 %v7523_v12, %v887_v0  ;;  %v1413_v15 = vadd.f32 %v6572_v48, %v7523_v12 }
 0x11a   :  { %v6419_v20 = vpop.f32.mrf.mxu0  ;;  %v733_v4 = vadd.f32 %v7402_v28, %v7523_v12  ;;  %v1420_v25 = vmax.f32 %v718_v56, 0.0  ;;  %v743_v28 = vadd.f32 %v7415_v33, %v7523_v12  ;;  %v738_v56 = vadd.f32 %v7523_v12, %v7420_v35 }
 0x11b   :  { %11533 = vst [vmem:[#allocation32_spill] sm:$0xff] %v7556_v60  ;;  %v7562_v54 = vmax.f32 %v1419_v21, %v1455_v46  ;;  %v1454_v62 = vmax.f32 %v888_v19, 0.0  ;;  %v903_v22 = vadd.f32 %v6419_v20, %v7523_v12  ;;  %v1559_v16 = vmax.f32 %v1413_v15, 0.0 }
 0x11c   :  { %v897_v50 = vpop.f32.mrf.mxu0  ;;  %v728_v46 = vadd.f32 %v7523_v12, %v7411_v31  ;;  %v753_v33 = vadd.f32 %v7424_v37, %v7523_v12  ;;  %v748_v35 = vadd.f32 %v7523_v12, %v7428_v39 }
 0x11d   :  { %v7567_v17 = vmax.f32 %v1418_v8, %v1454_v62  ;;  %v1457_v0 = vmax.f32 %v903_v22, 0.0  ;;  %v898_v48 = vadd.f32 %v7523_v12, %v897_v50  ;;  %v7570_v2 = vmax.f32 %v1523_v26, %v1559_v16 }
 0x11e   :  { %v6422_v60 = vpop.f32.mrf.mxu0  ;;  %v1423_v8 = vmax.f32 %v733_v4, 0.0  ;;  %v1422_v31 = vmax.f32 %v728_v46, 0.0  ;;  %v1425_v50 = vmax.f32 %v743_v28, 0.0  ;;  %v763_v28 = vadd.f32 %v7432_v41, %v7523_v12 }
 0x11f   :  { %v7574_v21 = vmax.f32 %v1421_v13, %v1457_v0  ;;  %v1456_v15 = vmax.f32 %v898_v48, 0.0  ;;  %v913_v58 = vadd.f32 %v6422_v60, %v7523_v12  ;;  %v1427_v37 = vmax.f32 %v753_v33, 0.0 }
 0x120   :  { %v907_v19 = vpop.f32.mrf.mxu0  ;;  %v1426_v39 = vmax.f32 %v748_v35, 0.0  ;;  %v773_v41 = vadd.f32 %v7440_v45, %v7523_v12 }
 0x121   :  { %v7579_v20 = vmax.f32 %v1420_v25, %v1456_v15  ;;  %v1459_v62 = vmax.f32 %v913_v58, 0.0  ;;  %v908_v26 = vadd.f32 %v7523_v12, %v907_v19  ;;  %v1424_v15 = vmax.f32 %v738_v56, 0.0 }
 0x122   :  { %v6425_v22 = vpop.f32.mrf.mxu0  ;;  %v758_v56 = vadd.f32 %v7523_v12, %v7436_v43  ;;  %v768_v43 = vadd.f32 %v7523_v12, %v7444_v47  ;;  %v1431_v45 = vmax.f32 %v773_v41, 0.0 }
 0x123   :  { %v7584_v16 = vmax.f32 %v1423_v8, %v1459_v62  ;;  %v1458_v13 = vmax.f32 %v908_v26, 0.0  ;;  %v923_v60 = vadd.f32 %v6425_v22, %v7523_v12 }
 0x124   :  { %v917_v0 = vpop.f32.mrf.mxu0  ;;  %v1430_v47 = vmax.f32 %v768_v43, 0.0 }
 0x125   :  { %v7589_v4 = vmax.f32 %v1422_v31, %v1458_v13  ;;  %v1461_v48 = vmax.f32 %v923_v60, 0.0  ;;  %v918_v25 = vadd.f32 %v7523_v12, %v917_v0 }
 0x126   :  { %v6428_v58 = vpop.f32.mrf.mxu0 }
 0x127   :  { %v7594_v46 = vmax.f32 %v1425_v50, %v1461_v48  ;;  %v1460_v19 = vmax.f32 %v918_v25, 0.0  ;;  %v933_v8 = vadd.f32 %v6428_v58, %v7523_v12  ;;  %v1429_v48 = vmax.f32 %v763_v28, 0.0 }
 0x128   :  { %v927_v62 = vpop.f32.mrf.mxu0  ;;  %v783_v28 = vadd.f32 %v7448_v49, %v7523_v12  ;;  %v793_v49 = vadd.f32 %v7456_v53, %v7523_v12 }
 0x129   :  { %v7599_v26 = vmax.f32 %v1424_v15, %v1460_v19  ;;  %v1463_v22 = vmax.f32 %v933_v8, 0.0  ;;  %v928_v31 = vadd.f32 %v7523_v12, %v927_v62  ;;  %v1428_v19 = vmax.f32 %v758_v56, 0.0 }
 0x12a   :  { %v6431_v13 = vpop.f32.mrf.mxu0  ;;  %v778_v56 = vadd.f32 %v7523_v12, %v7452_v51  ;;  %v788_v51 = vadd.f32 %v7523_v12, %v7460_v55  ;;  %v1435_v53 = vmax.f32 %v793_v49, 0.0 }
 0x12b   :  { %v7604_v60 = vmax.f32 %v1427_v37, %v1463_v22  ;;  %v1462_v50 = vmax.f32 %v928_v31, 0.0  ;;  %v943_v0 = vadd.f32 %v6431_v13, %v7523_v12 }
 0x12c   :  { %v937_v25 = vpop.f32.mrf.mxu0  ;;  %v1434_v55 = vmax.f32 %v788_v51, 0.0 }
 0x12d   :  { %11534 = vst [vmem:[#allocation33_spill] sm:$0xff] %v7604_v60  ;;  %v7609_v33 = vmax.f32 %v1426_v39, %v1462_v50  ;;  %v1465_v15 = vmax.f32 %v943_v0, 0.0  ;;  %v938_v58 = vadd.f32 %v7523_v12, %v937_v25 }
 0x12e   :  { %v6434_v8 = vpop.f32.mrf.mxu0 }
 0x12f   :  { %11535 = vst [vmem:[#allocation34_spill] sm:$0xff] %v7609_v33  ;;  %v7614_v35 = vmax.f32 %v1429_v48, %v1465_v15  ;;  %v1464_v62 = vmax.f32 %v938_v58, 0.0  ;;  %v953_v37 = vadd.f32 %v6434_v8, %v7523_v12  ;;  %v1433_v15 = vmax.f32 %v783_v28, 0.0 }
 0x130   :  { %v947_v22 = vpop.f32.mrf.mxu0  ;;  %v803_v28 = vadd.f32 %v7464_v57, %v7523_v12  ;;  %v813_v57 = vadd.f32 %v7472_v61, %v7523_v12 }
 0x131   :  { %v7619_v31 = vmax.f32 %v1428_v19, %v1464_v62  ;;  %v1467_v13 = vmax.f32 %v953_v37, 0.0  ;;  %v948_v39 = vadd.f32 %v7523_v12, %v947_v22  ;;  %v1432_v62 = vmax.f32 %v778_v56, 0.0 }
 0x132   :  { %v6437_v50 = vpop.f32.mrf.mxu0  ;;  %v798_v56 = vadd.f32 %v7523_v12, %v7468_v59  ;;  %v808_v59 = vadd.f32 %v7523_v12, %v7476_v63  ;;  %v1439_v61 = vmax.f32 %v813_v57, 0.0 }
 0x133   :  { %v7624_v0 = vmax.f32 %v1431_v45, %v1467_v13  ;;  %v1466_v48 = vmax.f32 %v948_v39, 0.0  ;;  %v963_v25 = vadd.f32 %v6437_v50, %v7523_v12 }
 0x134   :  { %v957_v58 = vpop.f32.mrf.mxu0  ;;  %v1438_v63 = vmax.f32 %v808_v59, 0.0 }
 0x135   :  { %v7629_v41 = vmax.f32 %v1430_v47, %v1466_v48  ;;  %v1469_v19 = vmax.f32 %v963_v25, 0.0  ;;  %v958_v8 = vadd.f32 %v7523_v12, %v957_v58 }
 0x136   :  { %v6440_v37 = vpop.f32.mrf.mxu0 }
 0x137   :  { %v7634_v43 = vmax.f32 %v1433_v15, %v1469_v19  ;;  %v1468_v22 = vmax.f32 %v958_v8, 0.0  ;;  %v973_v45 = vadd.f32 %v6440_v37, %v7523_v12  ;;  %v1437_v19 = vmax.f32 %v803_v28, 0.0 }
 0x138   :  { %v967_v13 = vpop.f32.mrf.mxu0  ;;  %v823_v28 = vadd.f32 %v7480_v1, %v7523_v12  ;;  %v833_v1 = vadd.f32 %v7488_v5, %v7523_v12 }
 0x139   :  { %v7639_v39 = vmax.f32 %v1432_v62, %v1468_v22  ;;  %v1471_v50 = vmax.f32 %v973_v45, 0.0  ;;  %v968_v47 = vadd.f32 %v7523_v12, %v967_v13  ;;  %v1436_v22 = vmax.f32 %v798_v56, 0.0 }
 0x13a   :  { %v6443_v48 = vpop.f32.mrf.mxu0  ;;  %v818_v56 = vadd.f32 %v7523_v12, %v7484_v3  ;;  %v828_v3 = vadd.f32 %v7523_v12, %v7492_v7  ;;  %v1443_v5 = vmax.f32 %v833_v1, 0.0 }
 0x13b   :  { %v7644_v25 = vmax.f32 %v1435_v53, %v1471_v50  ;;  %v1470_v15 = vmax.f32 %v968_v47, 0.0  ;;  %v983_v58 = vadd.f32 %v6443_v48, %v7523_v12 }
 0x13c   :  { %v977_v8 = vpop.f32.mrf.mxu0  ;;  %v1442_v7 = vmax.f32 %v828_v3, 0.0 }
 0x13d   :  { %11536 = vst [vmem:[#allocation35_spill] sm:$0xff] %v7644_v25  ;;  %v7649_v49 = vmax.f32 %v1434_v55, %v1470_v15  ;;  %v1473_v62 = vmax.f32 %v983_v58, 0.0  ;;  %v978_v37 = vadd.f32 %v7523_v12, %v977_v8 }
 0x13e   :  { %v6446_v45 = vpop.f32.mrf.mxu0 }
 0x13f   :  { %11537 = vst [vmem:[#allocation36_spill] sm:$0xff] %v7649_v49  ;;  %v7654_v51 = vmax.f32 %v1437_v19, %v1473_v62  ;;  %v1472_v13 = vmax.f32 %v978_v37, 0.0  ;;  %v993_v53 = vadd.f32 %v6446_v45, %v7523_v12  ;;  %v1441_v62 = vmax.f32 %v823_v28, 0.0 }
 0x140   :  { %v987_v50 = vpop.f32.mrf.mxu0  ;;  %v843_v28 = vadd.f32 %v7496_v9, %v7523_v12  ;;  %v853_v9 = vadd.f32 %v7504_v14, %v7523_v12 }
 0x141   :  { %11538 = vst [vmem:[#allocation37_spill] sm:$0xff] %v7654_v51  ;;  %v7659_v47 = vmax.f32 %v1436_v22, %v1472_v13  ;;  %v1475_v48 = vmax.f32 %v993_v53, 0.0  ;;  %v988_v55 = vadd.f32 %v7523_v12, %v987_v50  ;;  %v1440_v13 = vmax.f32 %v818_v56, 0.0  ;;  %v11569_v51 = vld [vmem:[#allocation16_spill] sm:$0xff] }
 0x142   :  { %v6449_v15 = vpop.f32.mrf.mxu0  ;;  %v838_v56 = vadd.f32 %v7523_v12, %v7500_v11  ;;  %v848_v11 = vadd.f32 %v7523_v12, %v7508_v18  ;;  %v1447_v14 = vmax.f32 %v853_v9, 0.0 }
 0x143   :  { %11539 = vst [vmem:[#allocation38_spill] sm:$0xff] %v7659_v47  ;;  %v7664_v58 = vmax.f32 %v1439_v61, %v1475_v48  ;;  %v1474_v19 = vmax.f32 %v988_v55, 0.0  ;;  %v1003_v8 = vadd.f32 %v6449_v15, %v7523_v12 }
 0x144   :  { %v997_v37 = vpop.f32.mrf.mxu0 }
 0x145   :  { %11540 = vst [vmem:[#allocation39_spill] sm:$0xff] %v7664_v58  ;;  %v7669_v57 = vmax.f32 %v1438_v63, %v1474_v19  ;;  %v1477_v22 = vmax.f32 %v1003_v8, 0.0  ;;  %v998_v45 = vadd.f32 %v7523_v12, %v997_v37 }
 0x146   :  { %v6452_v53 = vpop.f32.mrf.mxu0 }
 0x147   :  { %11541 = vst [vmem:[#allocation40_spill] sm:$0xff] %v7669_v57  ;;  %v7674_v59 = vmax.f32 %v1441_v62, %v1477_v22  ;;  %v1476_v50 = vmax.f32 %v998_v45, 0.0  ;;  %v1013_v61 = vadd.f32 %v6452_v53, %v7523_v12  ;;  %v1445_v22 = vmax.f32 %v843_v28, 0.0 }
 0x148   :  { %v1007_v48 = vpop.f32.mrf.mxu0  ;;  %v863_v28 = vadd.f32 %v7512_v24, %v7523_v12  ;;  %v1228_v24 = vadd.f32 %v7523_v12, %v7389_v23 }
 0x149   :  { %11542 = vst [vmem:[#allocation41_spill] sm:$0xff] %v7674_v59  ;;  %v7679_v55 = vmax.f32 %v1440_v13, %v1476_v50  ;;  %v1479_v15 = vmax.f32 %v1013_v61, 0.0  ;;  %v1008_v63 = vadd.f32 %v7523_v12, %v1007_v48  ;;  %v1444_v50 = vmax.f32 %v838_v56, 0.0  ;;  %v1407_v56 = vpop.f32.mrf.mxu1 }
 0x14a   :  { %v6455_v19 = vpop.f32.mrf.mxu0 }
 0x14b   :  { %11543 = vst [vmem:[#allocation42_spill] sm:$0xff] %v7679_v55  ;;  %v7684_v8 = vmax.f32 %v1443_v5, %v1479_v15  ;;  %v1478_v62 = vmax.f32 %v1008_v63, 0.0  ;;  %v1023_v37 = vadd.f32 %v6455_v19, %v7523_v12 }
 0x14c   :  { %v1017_v45 = vpop.f32.mrf.mxu0 }
 0x14d   :  { %11544 = vst [vmem:[#allocation43_spill] sm:$0xff] %v7684_v8  ;;  %v7689_v1 = vmax.f32 %v1442_v7, %v1478_v62  ;;  %v1481_v13 = vmax.f32 %v1023_v37, 0.0  ;;  %v1018_v53 = vadd.f32 %v7523_v12, %v1017_v45  ;;  %v858_v62 = vadd.f32 %v7523_v12, %v7516_v30 }
 0x14e   :  { %v6458_v61 = vpop.f32.mrf.mxu0  ;;  %v1446_v37 = vmax.f32 %v848_v11, 0.0 }
 0x14f   :  { %11545 = vst [vmem:[#allocation44_spill] sm:$0xff] %v7689_v1  ;;  %v7694_v3 = vmax.f32 %v1445_v22, %v1481_v13  ;;  %v1480_v48 = vmax.f32 %v1018_v53, 0.0  ;;  %v1033_v5 = vadd.f32 %v6458_v61, %v7523_v12  ;;  %v1449_v53 = vmax.f32 %v863_v28, 0.0 }
 0x150   :  { %v1027_v15 = vpop.f32.mrf.mxu0  ;;  %v873_v61 = vadd.f32 %v7525_v10, %v7523_v12  ;;  %v868_v28 = vadd.f32 %v7523_v12, %v7529_v6  ;;  %v1253_v6 = vadd.f32 %v7413_v32, %v7523_v12 }
 0x151   :  { %11546 = vst [vmem:[#allocation45_spill] sm:$0xff] %v7694_v3  ;;  %v7699_v63 = vmax.f32 %v1444_v50, %v1480_v48  ;;  %v1483_v19 = vmax.f32 %v1033_v5, 0.0  ;;  %v1028_v7 = vadd.f32 %v7523_v12, %v1027_v15  ;;  %v1408_v50 = vadd.f32 %v7523_v12, %v1407_v56 }
 0x152   :  { %v6461_v18 = vpop.f32.mrf.mxu0  ;;  %v1448_v5 = vmax.f32 %v858_v62, 0.0  ;;  %v1243_v15 = vadd.f32 %v7400_v27, %v7523_v12  ;;  %v1522_v56 = vmax.f32 %v1228_v24, 0.0  ;;  %v1238_v27 = vadd.f32 %v7523_v12, %v7405_v29 }
 0x153   :  { %11547 = vst [vmem:[#allocation46_spill] sm:$0xff] %v7699_v63  ;;  %v7704_v22 = vmax.f32 %v1447_v14, %v1483_v19  ;;  %v1482_v45 = vmax.f32 %v1028_v7, 0.0  ;;  %v1043_v13 = vadd.f32 %v6461_v18, %v7523_v12  ;;  %v1558_v10 = vmax.f32 %v1408_v50, 0.0 }
 0x154   :  { %v1037_v9 = vpop.f32.mrf.mxu0  ;;  %v1248_v50 = vadd.f32 %v7523_v12, %v7418_v34 }
 0x155   :  { %11548 = vst [vmem:[#allocation47_spill] sm:$0xff] %v7704_v22  ;;  %v7712_v48 = vmax.f32 %v1446_v37, %v1482_v45  ;;  %v1485_v30 = vmax.f32 %v1043_v13, 0.0  ;;  %v1038_v11 = vadd.f32 %v7523_v12, %v1037_v9  ;;  %v1451_v37 = vmax.f32 %v873_v61, 0.0 }
 0x156   :  { %v6464_v14 = vpop.f32.mrf.mxu0  ;;  %v1525_v9 = vmax.f32 %v1243_v15, 0.0  ;;  %v7734_v61 = vadd.f32 %v7422_v36, %v7523_v12 }
 0x157   :  { %11549 = vst [vmem:[#allocation48_spill] sm:$0xff] %v7712_v48  ;;  %v7719_v23 = vmax.f32 %v1449_v53, %v1485_v30  ;;  %v1484_v19 = vmax.f32 %v1038_v11, 0.0  ;;  %v1053_v7 = vadd.f32 %v6464_v14, %v7523_v12  ;;  %v1450_v30 = vmax.f32 %v868_v28, 0.0 }
 0x158   :  { %v1047_v18 = vpop.f32.mrf.mxu0  ;;  %v11571_v33 = vmax.f32 %v7734_v61, 0.0 }
 0x159   :  { %11550 = vst [vmem:[#allocation49_spill] sm:$0xff] %v7719_v23  ;;  %v7722_v45 = vmax.f32 %v1448_v5, %v1484_v19  ;;  %v1487_v13 = vmax.f32 %v1053_v7, 0.0  ;;  %v1048_v62 = vadd.f32 %v7523_v12, %v1047_v18  ;;  %v1630_v5 = vmax.f32 %v1522_v56, %v1558_v10  ;;  %v11570_v23 = vld [vmem:[#allocation17_spill] sm:$0xff] }
 0x15a   :  { %v6467_v53 = vpop.f32.mrf.mxu0  ;;  %v1524_v7 = vmax.f32 %v1238_v27, 0.0  ;;  %v1527_v18 = vmax.f32 %v1253_v6, 0.0  ;;  %v1526_v10 = vmax.f32 %v1248_v50, 0.0  ;;  %v7756_v6 = vadd.f32 %v7438_v44, %v7523_v12 }
 0x15b   :  { %11551 = vst [vmem:[#allocation50_spill] sm:$0xff] %v7722_v45  ;;  %v1595_v11 = vmax.f32 %v1451_v37, %v1487_v13  ;;  %v1486_v14 = vmax.f32 %v1048_v62, 0.0  ;;  %v1063_v24 = vadd.f32 %v6467_v53, %v7523_v12  ;;  %v1258_v37 = vadd.f32 %v7523_v12, %v7426_v38 }
 0x15c   :  { %v1057_v15 = vpop.f32.mrf.mxu0  ;;  %v7751_v53 = vadd.f32 %v7523_v12, %v7434_v42  ;;  %v7885_v45 = vadd.f32 %v11569_v51, %v7523_v12  ;;  %v7889_v48 = vadd.f32 %v7523_v12, %v11570_v23 }
 0x15d   :  { %v7737_v29 = vmax.f32 %v1595_v11, %v7570_v2  ;;  %v1594_v19 = vmax.f32 %v1450_v30, %v1486_v14  ;;  %v1489_v32 = vmax.f32 %v1063_v24, 0.0  ;;  %v1058_v28 = vadd.f32 %v7523_v12, %v1057_v15  ;;  %v11554_v14 = vld [vmem:[#allocation7_spill] sm:$0xff] }
 0x15e   :  { %v6470_v13 = vpop.f32.mrf.mxu0  ;;  %v7747_v2 = vadd.f32 %v7430_v40, %v7523_v12  ;;  %v1528_v11 = vmax.f32 %v1258_v37, 0.0  ;;  %v7760_v24 = vadd.f32 %v7523_v12, %v11554_v14  ;;  %v11555_v40 = vld [vmem:[#allocation8_spill] sm:$0xff] }
 0x15f   :  { %11552 = vst [vmem:[#allocation51_spill] sm:$0xff] %v7737_v29  ;;  %v7742_v34 = vmax.f32 %v1594_v19, %v1630_v5  ;;  %v1597_v62 = vmax.f32 %v1489_v32, %v1525_v9  ;;  %v1488_v36 = vmax.f32 %v1058_v28, 0.0  ;;  %v1073_v56 = vadd.f32 %v6470_v13, %v7523_v12  ;;  %v11556_v19 = vld [vmem:[#allocation32_spill] sm:$0xff] }
 0x160   :  { %v1067_v27 = vpop.f32.mrf.mxu0  ;;  %v7764_v50 = vadd.f32 %v11555_v40, %v7523_v12 }
 0x161   :  { %11553 = vst [vmem:[#allocation52_spill] sm:$0xff] %v7742_v34  ;;  %v1596_v9 = vmax.f32 %v1488_v36, %v1524_v7  ;;  %v1491_v30 = vmax.f32 %v1073_v56, 0.0  ;;  %v1068_v42 = vadd.f32 %v7523_v12, %v1067_v27  ;;  %v7768_v15 = vmax.f32 %v7551_v52, %v1597_v62  ;;  %v11561_v36 = vld [vmem:[#allocation12_spill] sm:$0xff]  ;;  %v11562_v7 = vld [vmem:[#allocation13_spill] sm:$0xff] }
 0x162   :  { %v6473_v5 = vpop.f32.mrf.mxu0  ;;  %v7825_v38 = vadd.f32 %v7523_v12, %v11562_v7 }
 0x163   :  { %v7771_v44 = vmax.f32 %v11556_v19, %v1596_v9  ;;  %v1599_v32 = vmax.f32 %v1491_v30, %v1527_v18  ;;  %v1490_v37 = vmax.f32 %v1068_v42, 0.0  ;;  %v11558_v9 = vld [vmem:[#allocation9_spill] sm:$0xff]  ;;  %v1797_v7 = vrot.slane %v7768_v15, 5 }
 0x164   :  { %v1077_v13 = vpop.f32.mrf.mxu0  ;;  %v7788_v30 = vadd.f32 %v7523_v12, %v11558_v9  ;;  %v2188_v1 = vrot.slane %v7768_v15, 7 }
 0x165   :  { %v7777_v56 = vmax.f32 %v7562_v54, %v1599_v32  ;;  %v1078_v52 = vadd.f32 %v7523_v12, %v1077_v13  ;;  %v7782_v62 = vcombine.high %v7771_v44, %v7771_v44  ;;  %v1598_v14 = vmax.f32 %v1490_v37, %v1526_v10  ;;  %v11559_v54 = vld [vmem:[#allocation10_spill] sm:$0xff] }
 0x166   :  { %v7790_v40 = vpop.f32.mrf.mxu0  ;;  %v7794_v42 = vadd.f32 %v11559_v54, %v7523_v12  ;;  %v7800_v13 = vcombine.high %v7768_v15, %v7768_v15  ;;  %v11560_v54 = vld [vmem:[#allocation11_spill] sm:$0xff]  ;;  %v6072_v58 = vrot.slane %v7771_v44, 9  ;;  %v6104_v47 = vrot.slane %v7771_v44, 11 }
 0x167   :  { %11557 = vst [vmem:[#allocation7_spill] sm:$0xff] %v7782_v62  ;;  %v1492_v19 = vmax.f32 %v1078_v52, 0.0  ;;  %v2376_v32 = vcombine.low %v7782_v62, %v7768_v15  ;;  %v7803_v27 = vmax.f32 %v7567_v17, %v1598_v14  ;;  %v7809_v10 = vcombine.high %v7777_v56, %v7777_v56 }
 0x168   :  { %v7805_v9 = vpop.f32.mrf.mxu0  ;;  %v1794_v37 = vrot.slane %v7782_v62, 5  ;;  %v2185_v52 = vrot.slane %v7782_v62, 7  ;;  %v7815_v18 = vadd.f32 %v7523_v12, %v11560_v54  ;;  %v7819_v17 = vadd.f32 %v11561_v36, %v7523_v12 }
 0x169   :  { %v1083_v14 = vadd.f32 %v6473_v5, %v7523_v12  ;;  %v1600_v28 = vmax.f32 %v1492_v19, %v1528_v11  ;;  %2392 = vrot.lane.b32.xlu1 %v2376_v32, %s11478_s14  ;;  %v7831_v54 = vcombine.high %v7803_v27, %v7803_v27  ;;  %v1741_v36 = vcombine.low %v7800_v13, %v7803_v27  ;;  %v11563_v11 = vld [vmem:[#allocation14_spill] sm:$0xff] }
 0x16a   :  { %v7827_v29 = vpop.f32.mrf.mxu0  ;;  %v1742_v5 = vcombine.low %v7777_v56, %v7809_v10  ;;  %v7839_v19 = vadd.f32 %v11563_v11, %v7523_v12  ;;  %v1796_v8 = vrot.slane %v1794_v37, 4  ;;  %v2187_v11 = vrot.slane %v2185_v52, 4 }
 0x16b   :  { %v7842_v32 = vmax.f32 %v7579_v20, %v1600_v28  ;;  %v2377_v63 = vcombine.low %v7803_v27, %v7831_v54  ;;  %1774 = vst.msk [vmem:[#allocation2 + $0x10] sm:$0xff] %vm1772_vm7, %v1741_v36  ;;  %v11566_v20 = vld [vmem:[#allocation15_spill] sm:$0xff]  ;;  %v1493_v59 = vmax.f32 %v1083_v14, 0.0  ;;  %v1536_v51 = vmax.f32 %v7815_v18, 0.0 }
 0x16c   :  { %v7851_v3 = vpop.f32.mrf.mxu0  ;;  %1775 = vst.msk [vmem:[#allocation2 + $0x20] sm:$0xff] %vm1772_vm7, %v1742_v5  ;;  %v7860_v28 = vadd.f32 %v7523_v12, %v11566_v20  ;;  %v1798_v14 = vsel %vm7865_vm9, %v1796_v8, %v1797_v7  ;;  %v1990_v20 = vrot.slane %v7782_v62, 6  ;;  %v1795_v8 = vsel %vm7865_vm9, %v6072_v58, %v1794_v37 }
 0x16d   :  { %2459 = vrot.lane.b32.xlu1 %v1741_v36, %s11426_s15  ;;  %2394 = vrot.lane.b32.xlu0 %v2377_v63, %s11478_s14  ;;  %v2189_v36 = vsel %vm7847_vm8, %v2187_v11, %v2188_v1  ;;  %v7881_v25 = vcombine.low %v7809_v10, %v7842_v32  ;;  %v2186_v1 = vsel %vm7847_vm8, %v6104_v47, %v2185_v52  ;;  %v1537_v11 = vmax.f32 %v7794_v42, 0.0 }
 0x16e   :  { %v7872_v55 = vpop.f32.mrf.mxu0  ;;  %v1904_v62 = vcombine.low %v1795_v8, %v1798_v14  ;;  %v2295_v22 = vcombine.low %v2186_v1, %v2189_v36  ;;  %v1539_v60 = vmax.f32 %v7819_v17, 0.0  ;;  %v1601_v58 = vmax.f32 %v1493_v59, %v11571_v33  ;;  %v11574_v17 = vld [vmem:[#allocation18_spill] sm:$0xff] }
 0x16f   :  { %v6088_v37 = vrot.slane %v7771_v44, 10  ;;  %v1992_v52 = vrot.slane %v1990_v20, 4  ;;  %v1993_v18 = vrot.slane %v7768_v15, 6  ;;  %v6073_v8 = vrot.slane %v7800_v13, 9 }
 0x170   :  { %v7897_v49 = vpop.f32.mrf.mxu0  ;;  %v1801_v1 = vrot.slane %v7803_v27, 5  ;;  %v7926_v14 = vmax.f32 %v7574_v21, %v1601_v58  ;;  %v1804_v58 = vrot.slane %v7831_v54, 5  ;;  %v1997_v47 = vrot.slane %v7803_v27, 6 }
 0x171   :  { %2461 = vrot.lane.b32.xlu1 %v1742_v5, %s11426_s15  ;;  %2769 = vrot.lane.b32.xlu0 %v2377_v63, %s11499_s16  ;;  %v1991_v36 = vsel %vm7915_vm10, %v6088_v37, %v1990_v20  ;;  %v1994_v15 = vsel %vm7915_vm10, %v1992_v52, %v1993_v18  ;;  %v7932_v20 = vadd.f32 %v11574_v17, %v7523_v12  ;;  %v11575_v18 = vld [vmem:[#allocation19_spill] sm:$0xff] }
 0x172   :  { %v6485_v42 = vpop.f32.mrf.mxu0  ;;  %v2100_v7 = vcombine.low %v1991_v36, %v1994_v15  ;;  %v1802_v52 = vsel %vm7865_vm9, %v6073_v8, %v1801_v1  ;;  %v1803_v21 = vrot.slane %v1801_v1, 4  ;;  %v2000_v8 = vrot.slane %v7831_v54, 6 }
 0x173   :  { %v1123_v33 = vadd.f32 %v6485_v42, %v7523_v12 }
 0x174   :  { %v1117_v63 = vpop.f32.mrf.mxu0  ;;  %v1805_v15 = vsel %vm7865_vm9, %v1803_v21, %v1804_v58 }
 0x175   :  { %v1501_v42 = vmax.f32 %v1123_v33, 0.0  ;;  %v1118_v61 = vadd.f32 %v7523_v12, %v1117_v63  ;;  %2836 = vrot.lane.b32.xlu1 %v1742_v5, %s11424_s17  ;;  %1920 = vrot.lane.b32.xlu0 %v1904_v62, %s6711_s18  ;;  %v7940_v33 = vadd.f32 %v7523_v12, %v11575_v18  ;;  %v6089_v62 = vrot.slane %v7800_v13, 10 }
 0x176   :  { %v6488_v37 = vpop.f32.mrf.mxu0 }
 0x177   :  { %v1609_v5 = vmax.f32 %v1501_v42, %v1537_v11  ;;  %v1500_v63 = vmax.f32 %v1118_v61, 0.0  ;;  %v1133_v36 = vadd.f32 %v6488_v37, %v7523_v12  ;;  %v7954_v11 = vcombine.high %v7926_v14, %v7926_v14 }
 0x178   :  { %v1127_v17 = vpop.f32.mrf.mxu0  ;;  %v7958_v37 = vcombine.low %v1802_v52, %v1805_v15  ;;  %v2192_v52 = vrot.slane %v7803_v27, 7  ;;  %v1103_v15 = vadd.f32 %v7827_v29, %v7523_v12 }
 0x179   :  { %v7949_v1 = vmax.f32 %v7614_v35, %v1609_v5  ;;  %v1608_v23 = vmax.f32 %v1500_v63, %v1536_v51  ;;  %v1503_v18 = vmax.f32 %v1133_v36, 0.0  ;;  %2311 = vrot.lane.b32.xlu1 %v2295_v22, %s6712_s19  ;;  %v1128_v61 = vadd.f32 %v7523_v12, %v1127_v17  ;;  %2116 = vrot.lane.b32.xlu0 %v2100_v7, %s6713_s20 }
 0x17a   :  { %v6491_v42 = vpop.f32.mrf.mxu0  ;;  %v1998_v35 = vsel %vm7915_vm10, %v6089_v62, %v1997_v47  ;;  %v1999_v51 = vrot.slane %v1997_v47, 4  ;;  %v6105_v5 = vrot.slane %v7800_v13, 11  ;;  %v2195_v17 = vrot.slane %v7831_v54, 7 }
 0x17b   :  { %11576 = vst [vmem:[#allocation8_spill] sm:$0xff] %v7949_v1  ;;  %v7963_v21 = vmax.f32 %v7619_v31, %v1608_v23  ;;  %v1611_v22 = vmax.f32 %v1503_v18, %v1539_v60  ;;  %v1143_v58 = vadd.f32 %v6491_v42, %v7523_v12  ;;  %v1502_v63 = vmax.f32 %v1128_v61, 0.0  ;;  %v11579_v18 = vld [vmem:[#allocation20_spill] sm:$0xff] }
 0x17c   :  { %v1137_v36 = vpop.f32.mrf.mxu0  ;;  %v2001_v7 = vsel %vm7915_vm10, %v1999_v51, %v2000_v8  ;;  %v11578_v13 = vmax.f32 %v7825_v38, 0.0  ;;  %v2194_v62 = vrot.slane %v2192_v52, 4  ;;  %v7991_v61 = vadd.f32 %v11579_v18, %v7523_v12  ;;  %v11588_v18 = vld [vmem:[#allocation24_spill] sm:$0xff] }
 0x17d   :  { %11577 = vst [vmem:[#allocation32_spill] sm:$0xff] %v7963_v21  ;;  %v7973_v47 = vmax.f32 %v7624_v0, %v1611_v22  ;;  %v1505_v31 = vmax.f32 %v1143_v58, 0.0  ;;  %v1138_v60 = vadd.f32 %v7523_v12, %v1137_v36  ;;  %2396 = vrot.lane.b32.xlu1 %v7881_v25, %s11478_s14  ;;  %2771 = vrot.lane.b32.xlu0 %v7881_v25, %s11499_s16  ;;  %v11580_v38 = vmax.f32 %v7839_v19, 0.0  ;;  %v11582_v36 = vld [vmem:[#allocation21_spill] sm:$0xff] }
 0x17e   :  { %v1610_v23 = vmax.f32 %v1502_v63, %v11578_v13  ;;  %v7982_v27 = vpop.f32.mrf.mxu0  ;;  %v7984_v54 = vcombine.low %v1998_v35, %v2001_v7  ;;  %v2193_v0 = vsel %vm7847_vm8, %v6105_v5, %v2192_v52  ;;  %v2379_v35 = vcombine.low %v7926_v14, %v7954_v11 }
 0x17f   :  { %v1613_v42 = vmax.f32 %v1505_v31, %v11580_v38  ;;  %v1504_v51 = vmax.f32 %v1138_v60, 0.0  ;;  %v2196_v5 = vsel %vm7847_vm8, %v2194_v62, %v2195_v17  ;;  %v8006_v63 = vcombine.high %v7842_v32, %v7842_v32  ;;  %v11587_v62 = vld [vmem:[#allocation23_spill] sm:$0xff] }
 0x180   :  { %v7996_v22 = vmax.f32 %v7629_v41, %v1610_v23  ;;  %v7998_v58 = vpop.f32.mrf.mxu0  ;;  %v8010_v19 = vadd.f32 %v7523_v12, %v11582_v36  ;;  %v1088_v41 = vadd.f32 %v7523_v12, %v7805_v9  ;;  %v11585_v52 = vmax.f32 %v7860_v28, 0.0  ;;  %v11586_v28 = vld [vmem:[#allocation22_spill] sm:$0xff] }
 0x181   :  { %v8015_v7 = vmax.f32 %v7634_v43, %v1613_v42  ;;  %3146 = vrot.lane.b32.xlu1 %v7881_v25, %s6714_s21  ;;  %2398 = vrot.lane.b32.xlu0 %v2379_v35, %s11478_s14  ;;  %v8024_v60 = vcombine.low %v2193_v0, %v2196_v5  ;;  %v8028_v13 = vcombine.low %v8006_v63, %v7926_v14  ;;  %v2004_v43 = vrot.slane %v7809_v10, 6  ;;  %v11591_v42 = vld [vmem:[#allocation25_spill] sm:$0xff] }
 0x182   :  { %11581 = vst [vmem:[#allocation9_spill] sm:$0xff] %v7996_v22  ;;  %11583 = vst [vmem:[#allocation10_spill] sm:$0xff] %v8010_v19  ;;  %v1612_v31 = vmax.f32 %v1504_v51, %v11585_v52  ;;  %v8022_v17 = vpop.f32.mrf.mxu0  ;;  %v2007_v9 = vrot.slane %v7842_v32, 6  ;;  %v8034_v23 = vadd.f32 %v11586_v28, %v7523_v12  ;;  %v8038_v25 = vadd.f32 %v7523_v12, %v11587_v62 }
 0x183   :  { %11584 = vst [vmem:[#allocation11_spill] sm:$0xff] %v8015_v7  ;;  %v8042_v0 = vadd.f32 %v11588_v18, %v7523_v12  ;;  %v8049_v51 = vadd.f32 %v7523_v12, %v11591_v42  ;;  %v6090_v36 = vrot.slane %v7777_v56, 10  ;;  %v2006_v52 = vrot.slane %v2004_v43, 4  ;;  %1776 = vst.msk [vmem:[#allocation2 + $0x30] sm:$0xff] %vm1772_vm7, %v8028_v13  ;;  %v11593_v42 = vld [vmem:[#allocation28_spill] sm:$0xff] }
 0x184   :  { %v8045_v38 = vmax.f32 %v7639_v39, %v1612_v31  ;;  %v8051_v5 = vpop.f32.mrf.mxu0  ;;  %v1808_v28 = vrot.slane %v7809_v10, 5  ;;  %v1093_v39 = vadd.f32 %v7790_v40, %v7523_v12  ;;  %v1494_v31 = vmax.f32 %v1088_v41, 0.0 }
 0x185   :  { %11589 = vst [vmem:[#allocation12_spill] sm:$0xff] %v8042_v0  ;;  %11592 = vst [vmem:[#allocation14_spill] sm:$0xff] %v8049_v51  ;;  %3148 = vrot.lane.b32.xlu1 %v2379_v35, %s6714_s21  ;;  %v8064_v8 = vadd.f32 %v11593_v42, %v7523_v12  ;;  %2773 = vrot.lane.b32.xlu0 %v2379_v35, %s11499_s16  ;;  %v2005_v18 = vsel %vm7915_vm10, %v6090_v36, %v2004_v43  ;;  %v1811_v19 = vrot.slane %v7842_v32, 5 }
 0x186   :  { %11590 = vst [vmem:[#allocation13_spill] sm:$0xff] %v8045_v38  ;;  %v8069_v7 = vpop.f32.mrf.mxu0  ;;  %v2008_v40 = vsel %vm7915_vm10, %v2006_v52, %v2007_v9  ;;  %v1810_v1 = vrot.slane %v1808_v28, 4  ;;  %v2199_v43 = vrot.slane %v7809_v10, 7  ;;  %v1495_v36 = vmax.f32 %v1093_v39, 0.0  ;;  %v11597_v39 = vld [vmem:[#allocation29_spill] sm:$0xff] }
 0x187   :  { %v8078_v38 = vcombine.low %v2005_v18, %v2008_v40  ;;  %v11594_v9 = vmax.f32 %v7751_v53, 0.0  ;;  %v1098_v41 = vadd.f32 %v7523_v12, %v7851_v3  ;;  %v6074_v18 = vrot.slane %v7777_v56, 9  ;;  %v11595_v40 = vld [vmem:[#allocation27_spill] sm:$0xff] }
 0x188   :  { %v8081_v22 = vpop.f32.mrf.mxu0  ;;  %v8094_v42 = vadd.f32 %v7523_v12, %v11595_v40  ;;  %v1497_v10 = vmax.f32 %v1103_v15, 0.0  ;;  %v1812_v3 = vsel %vm7865_vm9, %v1810_v1, %v1811_v19  ;;  %v1108_v40 = vadd.f32 %v7523_v12, %v7897_v49 }
 0x189   :  { %v1602_v52 = vmax.f32 %v1494_v31, %v11594_v9  ;;  %2540 = vrot.lane.b32.xlu1 %v7958_v37, %s11497_s22  ;;  %3523 = vrot.lane.b32.xlu0 %v2379_v35, %s11491_s23  ;;  %v8104_v31 = vadd.f32 %v7523_v12, %v11597_v39  ;;  %v11598_v9 = vld [vmem:[#allocation30_spill] sm:$0xff]  ;;  %v1809_v15 = vsel %vm7865_vm9, %v6074_v18, %v1808_v28  ;;  %v2202_v1 = vrot.slane %v7842_v32, 7 }
 0x18a   :  { %11596 = vst [vmem:[#allocation15_spill] sm:$0xff] %v8094_v42  ;;  %v8098_v53 = vpop.f32.mrf.mxu0  ;;  %v8108_v62 = vadd.f32 %v11598_v9, %v7523_v12  ;;  %v8116_v29 = vcombine.low %v1809_v15, %v1812_v3  ;;  %v2201_v42 = vrot.slane %v2199_v43, 4  ;;  %v6075_v19 = vrot.slane %v8006_v63, 9 }
 0x18b   :  { %v11599_v39 = vmax.f32 %v7747_v2, 0.0  ;;  %v8123_v9 = vmax.f32 %v7589_v4, %v1602_v52  ;;  %v1496_v51 = vmax.f32 %v1098_v41, 0.0  ;;  %v6106_v49 = vrot.slane %v7777_v56, 11 }
 0x18c   :  { %v8114_v35 = vpop.f32.mrf.mxu0  ;;  %v11600_v28 = vmax.f32 %v7756_v6, 0.0  ;;  %v2203_v2 = vsel %vm7847_vm8, %v2201_v42, %v2202_v1  ;;  %v1815_v4 = vrot.slane %v7926_v14, 5  ;;  %v6091_v41 = vrot.slane %v8006_v63, 10 }
 0x18d   :  { %v1603_v0 = vmax.f32 %v1495_v36, %v11599_v39  ;;  %2621 = vrot.lane.b32.xlu1 %v7984_v54, %s6717_s24  ;;  %1922 = vrot.lane.b32.xlu0 %v7958_v37, %s6711_s18  ;;  %v1113_v36 = vadd.f32 %v7872_v55, %v7523_v12  ;;  %v1498_v52 = vmax.f32 %v1108_v40, 0.0  ;;  %v2200_v6 = vsel %vm7847_vm8, %v6106_v49, %v2199_v43  ;;  %v11602_v49 = vld [vmem:[#allocation31_spill] sm:$0xff] }
 0x18e   :  { %v1605_v18 = vmax.f32 %v1497_v10, %v11600_v28  ;;  %v8132_v32 = vpop.f32.mrf.mxu0  ;;  %v1818_v56 = vrot.slane %v7954_v11, 5  ;;  %v8145_v37 = vcombine.low %v2200_v6, %v2203_v2  ;;  %v1816_v42 = vsel %vm7865_vm9, %v6075_v19, %v1815_v4  ;;  %v8162_v19 = vld [vmem:[%s11353_s2] ss:$0 sm:$0xff]  ;;  %s11421_s2 = smov 90  }
 0x18f   :  { %v1817_v3 = vrot.slane %v1815_v4, 4  ;;  %v2011_v15 = vrot.slane %v7926_v14, 6  ;;  %v1554_v1 = vmax.f32 %v8104_v31, 0.0  ;;  %v1557_v12 = vmax.f32 %v8108_v62, 0.0 }
 0x190   :  { %v8143_v10 = vpop.f32.mrf.mxu0  ;;  %v8153_v55 = vmax.f32 %v7584_v16, %v1603_v0  ;;  %v11601_v43 = vmax.f32 %v7760_v24, 0.0  ;;  %v1148_v39 = vadd.f32 %v8162_v19, %v7998_v58  ;;  %v8175_v28 = vadd.f32 %v8162_v19, %v11602_v49 }
 0x191   :  { %2702 = vrot.lane.b32.xlu1 %v8024_v60, %s6718_s25  ;;  %2118 = vrot.lane.b32.xlu0 %v7984_v54, %s6713_s20  ;;  %v2012_v24 = vsel %vm7915_vm10, %v6091_v41, %v2011_v15  ;;  %v2013_v0 = vrot.slane %v2011_v15, 4  ;;  %v8178_v2 = vmax.f32 %v7594_v46, %v1605_v18  ;;  %v1499_v4 = vmax.f32 %v1113_v36, 0.0 }
 0x192   :  { %v1604_v40 = vmax.f32 %v1496_v51, %v11601_v43  ;;  %v8168_v16 = vpop.f32.mrf.mxu0  ;;  %v2014_v51 = vrot.slane %v7954_v11, 6  ;;  %v1819_v58 = vsel %vm7865_vm9, %v1817_v3, %v1818_v56  ;;  %v8184_v54 = vcombine.high %v8123_v9, %v8123_v9 }
 0x193   :  { %v11603_v41 = vmax.f32 %v7788_v30, 0.0  ;;  %v8190_v43 = vcombine.low %v1816_v42, %v1819_v58  ;;  %v6107_v49 = vrot.slane %v8006_v63, 11  ;;  %v8195_v46 = vcombine.high %v8153_v55, %v8153_v55 }
 0x194   :  { %v8188_v15 = vpop.f32.mrf.mxu0  ;;  %v8198_v18 = vmax.f32 %v7599_v26, %v1604_v40  ;;  %v1153_v36 = vadd.f32 %v8162_v19, %v7982_v27  ;;  %v2015_v30 = vsel %vm7915_vm10, %v2013_v0, %v2014_v51  ;;  %v1163_v63 = vadd.f32 %v8162_v19, %v8022_v17  ;;  %v11605_v17 = vld [vmem:[#allocation34_spill] sm:$0xff] }
 0x195   :  { %v1606_v6 = vmax.f32 %v1498_v52, %v11603_v41  ;;  %2463 = vrot.lane.b32.xlu1 %v8028_v13, %s11426_s15  ;;  %v1506_v52 = vmax.f32 %v1148_v39, 0.0  ;;  %2313 = vrot.lane.b32.xlu0 %v8024_v60, %s6712_s19  ;;  %v8210_v42 = vcombine.low %v2012_v24, %v2015_v30  ;;  %v2206_v26 = vrot.slane %v7926_v14, 7 }
 0x196   :  { %v6512_v56 = vpop.f32.mrf.mxu0  ;;  %v8215_v27 = vcombine.high %v8178_v2, %v8178_v2  ;;  %v11604_v3 = vmax.f32 %v7764_v50, 0.0  ;;  %v2209_v0 = vrot.slane %v7954_v11, 7  ;;  %v8228_v14 = vcombine.low %v8123_v9, %v8184_v54 }
 0x197   :  { %v1213_v39 = vadd.f32 %v8162_v19, %v6512_v56  ;;  %v8222_v51 = vmax.f32 %v11605_v17, %v1606_v6  ;;  %v2207_v24 = vsel %vm7847_vm8, %v6107_v49, %v2206_v26  ;;  %v2208_v58 = vrot.slane %v2206_v26, 4 }
 0x198   :  { %v1607_v40 = vmax.f32 %v1499_v4, %v11604_v3  ;;  %v1207_v60 = vpop.f32.mrf.mxu0  ;;  %v1556_v41 = vmax.f32 %v8175_v28, 0.0  ;;  %v1507_v50 = vmax.f32 %v1153_v36, 0.0  ;;  %v11606_v11 = vmax.f32 %v7889_v48, 0.0  ;;  %1777 = vst.msk [vmem:[#allocation2 + $0x40] sm:$0xff] %vm1772_vm7, %v8228_v14  ;;  %v11608_v3 = vld [vmem:[#allocation33_spill] sm:$0xff] }
 0x199   :  { %v1519_v4 = vmax.f32 %v1213_v39, 0.0  ;;  %v1208_v30 = vadd.f32 %v8162_v19, %v1207_v60  ;;  %3213 = vrot.lane.b32.xlu1 %v8028_v13, %s11421_s2  ;;  %v1509_v56 = vmax.f32 %v1163_v63, 0.0  ;;  %2838 = vrot.lane.b32.xlu0 %v8028_v13, %s11424_s17  ;;  %v8240_v26 = vcombine.low %v8184_v54, %v8153_v55 }
 0x19a   :  { %v1614_v6 = vmax.f32 %v1506_v52, %v11606_v11  ;;  %v6515_v49 = vpop.f32.mrf.mxu0  ;;  %v8244_v28 = vcombine.low %v8195_v46, %v8198_v18  ;;  %v11607_v36 = vmax.f32 %v8064_v8, 0.0  ;;  %v2210_v13 = vsel %vm7847_vm8, %v2208_v58, %v2209_v0 }
 0x19b   :  { %v1518_v52 = vmax.f32 %v1208_v30, 0.0  ;;  %v1223_v63 = vadd.f32 %v8162_v19, %v6515_v49  ;;  %v8254_v39 = vmax.f32 %v11608_v3, %v1607_v40  ;;  %v8258_v17 = vcombine.high %v8222_v51, %v8222_v51  ;;  %v11609_v40 = vld [vmem:[#allocation47_spill] sm:$0xff]  ;;  %v11615_v3 = vld [vmem:[#allocation48_spill] sm:$0xff] }
 0x19c   :  { %v1627_v48 = vmax.f32 %v1519_v4, %v11607_v36  ;;  %v1217_v60 = vpop.f32.mrf.mxu0  ;;  %v8260_v11 = vcombine.low %v2207_v24, %v2210_v13  ;;  %v8264_v8 = vcombine.low %v8178_v2, %v8215_v27  ;;  %1778 = vst.msk [vmem:[#allocation2 + $0x50] sm:$0xff] %vm1772_vm7, %v8244_v28  ;;  %v8270_v0 = vadd.f32 %v8162_v19, %v8051_v5 }
 0x19d   :  { %v1626_v4 = vmax.f32 %v1518_v52, %v1554_v1  ;;  %v1521_v30 = vmax.f32 %v1223_v63, 0.0  ;;  %2120 = vrot.lane.b32.xlu1 %v8078_v38, %s6713_s20  ;;  %v8281_v24 = vcombine.high %v7963_v21, %v7963_v21  ;;  %v11611_v49 = vmax.f32 %v7885_v45, 0.0  ;;  %1924 = vrot.lane.b32.xlu0 %v8116_v29, %s6711_s18  ;;  %v11613_v1 = vld [vmem:[#allocation36_spill] sm:$0xff] }
 0x19e   :  { %v8273_v58 = vmax.f32 %v11609_v40, %v1627_v48  ;;  %v1218_v5 = vadd.f32 %v8162_v19, %v1217_v60  ;;  %v11612_v48 = vld [vmem:[#allocation7_spill] sm:$0xff]  ;;  %1779 = vst.msk [vmem:[#allocation2 + $0x60] sm:$0xff] %vm1772_vm7, %v8264_v8  ;;  %v8293_v52 = vmax.f32 %v11613_v1, %v1614_v6  ;;  %v11614_v63 = vmax.f32 %v7932_v20, 0.0 }
 0x19f   :  { %11610 = vst [vmem:[#allocation16_spill] sm:$0xff] %v8281_v24  ;;  %v1615_v36 = vmax.f32 %v1507_v50, %v11611_v49  ;;  %v1740_v31 = vcombine.low %v7771_v44, %v11612_v48  ;;  %v8298_v45 = vmax.f32 %v11615_v3, %v1626_v4  ;;  %v1629_v50 = vmax.f32 %v1521_v30, %v1557_v12 }
 0x1a0   :  { %v1617_v13 = vmax.f32 %v1509_v56, %v11614_v63  ;;  %v8304_v60 = vadd.f32 %v8162_v19, %v8069_v7  ;;  %v1520_v44 = vmax.f32 %v1218_v5, 0.0  ;;  %v6076_v40 = vrot.slane %v8123_v9, 9  ;;  %v11617_v56 = vld [vmem:[#allocation49_spill] sm:$0xff] }
 0x1a1   :  { %11616 = vst [vmem:[#allocation17_spill] sm:$0xff] %v8298_v45  ;;  %1773 = vst.msk [vmem:[#allocation2] sm:$0xff] %vm1772_vm7, %v1740_v31  ;;  %v1822_v6 = vrot.slane %v8184_v54, 5  ;;  %v1508_v20 = vmax.f32 %v8270_v0, 0.0  ;;  %v8311_v49 = vmax.f32 %v11617_v56, %v1629_v50  ;;  %2623 = vrot.lane.b32.xlu1 %v8078_v38, %s6717_s24  ;;  %v1825_v62 = vrot.slane %v8153_v55, 5  ;;  %2542 = vrot.lane.b32.xlu0 %v8116_v29, %s11497_s22  ;;  %v11621_v56 = vld [vmem:[#allocation37_spill] sm:$0xff] }
 0x1a2   :  { %v6092_v7 = vrot.slane %v8123_v9, 10  ;;  %v1628_v12 = vmax.f32 %v1520_v44, %v1556_v41  ;;  %v2018_v0 = vrot.slane %v8184_v54, 6  ;;  %v8324_v5 = vcombine.high %v8198_v18, %v8198_v18  ;;  %v11619_v41 = vld [vmem:[#allocation50_spill] sm:$0xff] }
 0x1a3   :  { %11618 = vst [vmem:[#allocation18_spill] sm:$0xff] %v8311_v49  ;;  %v1823_v4 = vsel %vm7865_vm9, %v6076_v40, %v1822_v6  ;;  %v1824_v30 = vrot.slane %v1822_v6, 4  ;;  %v2021_v48 = vrot.slane %v8153_v55, 6  ;;  %v6108_v31 = vrot.slane %v8123_v9, 11 }
 0x1a4   :  { %v2213_v1 = vrot.slane %v8184_v54, 7  ;;  %v8330_v63 = vmax.f32 %v11619_v41, %v1628_v12  ;;  %v2019_v50 = vsel %vm7915_vm10, %v6092_v7, %v2018_v0  ;;  %v2020_v44 = vrot.slane %v2018_v0, 4 }
 0x1a5   :  { %v1826_v3 = vsel %vm7865_vm9, %v1824_v30, %v1825_v62  ;;  %2998 = vrot.lane.b32.xlu1 %v8078_v38, %s11505_s28  ;;  %v2216_v6 = vrot.slane %v8153_v55, 7  ;;  %v8344_v12 = vmax.f32 %v11621_v56, %v1617_v13  ;;  %v8348_v62 = vadd.f32 %v8162_v19, %v8081_v22  ;;  %2315 = vrot.lane.b32.xlu0 %v8145_v37, %s6712_s19  ;;  %v11622_v55 = vld [vmem:[#allocation35_spill] sm:$0xff] }
 0x1a6   :  { %11620 = vst [vmem:[#allocation19_spill] sm:$0xff] %v8330_v63  ;;  %v8338_v40 = vcombine.low %v1823_v4, %v1826_v3  ;;  %v2214_v9 = vsel %vm7847_vm8, %v6108_v31, %v2213_v1  ;;  %v2215_v54 = vrot.slane %v2213_v1, 4  ;;  %v1178_v7 = vadd.f32 %v8162_v19, %v8114_v35 }
 0x1a7   :  { %v2022_v38 = vsel %vm7915_vm10, %v2020_v44, %v2021_v48  ;;  %v8358_v4 = vcombine.high %v7973_v47, %v7973_v47  ;;  %v8361_v13 = vmax.f32 %v11622_v55, %v1615_v36  ;;  %v8369_v35 = vcombine.high %v8293_v52, %v8293_v52 }
 0x1a8   :  { %v8363_v30 = vcombine.low %v2019_v50, %v2022_v38  ;;  %v2217_v22 = vsel %vm7847_vm8, %v2215_v54, %v2216_v6  ;;  %v8376_v48 = vcombine.low %v8215_v27, %v8222_v51  ;;  %v8380_v36 = vadd.f32 %v8162_v19, %v8098_v53 }
 0x1a9   :  { %v8372_v31 = vcombine.low %v2214_v9, %v2217_v22  ;;  %3079 = vrot.lane.b32.xlu1 %v8145_v37, %s11502_s29  ;;  %v6077_v1 = vrot.slane %v8195_v46, 9  ;;  %v1829_v41 = vrot.slane %v8198_v18, 5  ;;  %v1832_v3 = vrot.slane %v8324_v5, 5  ;;  %2917 = vrot.lane.b32.xlu0 %v8116_v29, %s6722_s30 }
 0x1aa   :  { %11623 = vst [vmem:[#allocation20_spill] sm:$0xff] %v8376_v48  ;;  %v8389_v50 = vcombine.high %v8344_v12, %v8344_v12  ;;  %v11624_v44 = vmax.f32 %v7940_v33, 0.0  ;;  %v1512_v54 = vmax.f32 %v1178_v7, 0.0  ;;  %v6093_v38 = vrot.slane %v8195_v46, 10 }
 0x1ab   :  { %v1830_v6 = vsel %vm7865_vm9, %v6077_v1, %v1829_v41  ;;  %v1831_v56 = vrot.slane %v1829_v41, 4  ;;  %v2025_v55 = vrot.slane %v8198_v18, 6  ;;  %v2028_v22 = vrot.slane %v8324_v5, 6 }
 0x1ac   :  { %v8393_v9 = vmax.f32 %v1508_v20, %v11624_v44  ;;  %v6109_v33 = vrot.slane %v8195_v46, 11  ;;  %v2220_v20 = vrot.slane %v8198_v18, 7  ;;  %v2223_v7 = vrot.slane %v8324_v5, 7 }
 0x1ad   :  { %2544 = vrot.lane.b32.xlu1 %v8190_v43, %s11497_s22  ;;  %v1833_v29 = vsel %vm7865_vm9, %v1831_v56, %v1832_v3  ;;  %v2026_v1 = vsel %vm7915_vm10, %v6093_v38, %v2025_v55  ;;  %v2027_v41 = vrot.slane %v2025_v55, 4  ;;  %v11625_v53 = vmax.f32 %v8038_v25, 0.0  ;;  %2704 = vrot.lane.b32.xlu0 %v8145_v37, %s6718_s25 }
 0x1ae   :  { %v8417_v46 = vcombine.low %v1830_v6, %v1833_v29  ;;  %v2221_v44 = vsel %vm7847_vm8, %v6109_v33, %v2220_v20  ;;  %v2222_v48 = vrot.slane %v2220_v20, 4  ;;  %v8423_v63 = vcombine.high %v8254_v39, %v8254_v39 }
 0x1af   :  { %v1620_v0 = vmax.f32 %v1512_v54, %v11625_v53  ;;  %v2029_v3 = vsel %vm7915_vm10, %v2027_v41, %v2028_v22  ;;  %v8429_v25 = vcombine.low %v8258_v17, %v8254_v39  ;;  %v6078_v53 = vrot.slane %v8178_v2, 9 }
 0x1b0   :  { %v8432_v37 = vcombine.low %v2026_v1, %v2029_v3  ;;  %v2224_v54 = vsel %vm7847_vm8, %v2222_v48, %v2223_v7  ;;  %v1836_v6 = vrot.slane %v8215_v27, 5  ;;  %v1839_v56 = vrot.slane %v8222_v51, 5 }
 0x1b1   :  { %11626 = vst [vmem:[#allocation21_spill] sm:$0xff] %v8429_v25  ;;  %2625 = vrot.lane.b32.xlu1 %v8210_v42, %s6717_s24  ;;  %v8440_v38 = vcombine.low %v2221_v44, %v2224_v54  ;;  %1780 = vst.msk [vmem:[#allocation2 + $0x70] sm:$0xff] %vm1772_vm7, %v8429_v25  ;;  %v6094_v55 = vrot.slane %v8178_v2, 10  ;;  %v2032_v22 = vrot.slane %v8215_v27, 6  ;;  %v2035_v33 = vrot.slane %v8222_v51, 6  ;;  %1926 = vrot.lane.b32.xlu0 %v8190_v43, %s6711_s18 }
 0x1b2   :  { %v1837_v48 = vsel %vm7865_vm9, %v6078_v53, %v1836_v6  ;;  %v1838_v20 = vrot.slane %v1836_v6, 4  ;;  %v6110_v7 = vrot.slane %v8178_v2, 11  ;;  %v2227_v44 = vrot.slane %v8215_v27, 7 }
 0x1b3   :  { %v2033_v29 = vsel %vm7915_vm10, %v6094_v55, %v2032_v22  ;;  %v2034_v1 = vrot.slane %v2032_v22, 4  ;;  %v2230_v41 = vrot.slane %v8222_v51, 7  ;;  %v6079_v3 = vrot.slane %v8258_v17, 9 }
 0x1b4   :  { %v1840_v54 = vsel %vm7865_vm9, %v1838_v20, %v1839_v56  ;;  %v2228_v25 = vsel %vm7847_vm8, %v6110_v7, %v2227_v44  ;;  %v2229_v53 = vrot.slane %v2227_v44, 4  ;;  %v1843_v6 = vrot.slane %v8254_v39, 5 }
 0x1b5   :  { %2706 = vrot.lane.b32.xlu1 %v8260_v11, %s6718_s25  ;;  %v8464_v2 = vcombine.low %v1837_v48, %v1840_v54  ;;  %v2036_v27 = vsel %vm7915_vm10, %v2034_v1, %v2035_v33  ;;  %v1846_v51 = vrot.slane %v8423_v63, 5  ;;  %v6095_v55 = vrot.slane %v8258_v17, 10  ;;  %2122 = vrot.lane.b32.xlu0 %v8210_v42, %s6713_s20 }
 0x1b6   :  { %v8472_v56 = vcombine.low %v2033_v29, %v2036_v27  ;;  %v2231_v22 = vsel %vm7847_vm8, %v2229_v53, %v2230_v41  ;;  %v1844_v20 = vsel %vm7865_vm9, %v6079_v3, %v1843_v6  ;;  %v1845_v48 = vrot.slane %v1843_v6, 4  ;;  %v11630_v53 = vld [vmem:[#allocation10_spill] sm:$0xff] }
 0x1b7   :  { %v8478_v7 = vcombine.low %v2228_v25, %v2231_v22  ;;  %v2039_v33 = vrot.slane %v8254_v39, 6  ;;  %v2042_v44 = vrot.slane %v8423_v63, 6  ;;  %v6111_v1 = vrot.slane %v8258_v17, 11 }
 0x1b8   :  { %v11628_v54 = vmax.f32 %v7991_v61, 0.0  ;;  %v11629_v29 = vmax.f32 %v8304_v60, 0.0  ;;  %v1847_v41 = vsel %vm7865_vm9, %v1845_v48, %v1846_v51  ;;  %v2234_v3 = vrot.slane %v8254_v39, 7 }
 0x1b9   :  { %11627 = vst [vmem:[#allocation22_spill] sm:$0xff] %v8478_v7  ;;  %v2237_v25 = vrot.slane %v8423_v63, 7  ;;  %v11631_v6 = vmax.f32 %v11630_v53, 0.0  ;;  %v11632_v22 = vmax.f32 %v8348_v62, 0.0  ;;  %3294 = vrot.lane.b32.xlu1 %v8190_v43, %s6723_s1  ;;  %v8501_v61 = vcombine.low %v1844_v20, %v1847_v41  ;;  %2317 = vrot.lane.b32.xlu0 %v8260_v11, %s6712_s19  ;;  %v11634_v62 = vld [vmem:[#allocation8_spill] sm:$0xff] }
 0x1ba   :  { %v8487_v27 = vmax.f32 %v11629_v29, %v11628_v54  ;;  %v2040_v17 = vsel %vm7915_vm10, %v6095_v55, %v2039_v33  ;;  %v2041_v60 = vrot.slane %v2039_v33, 4  ;;  %v2235_v51 = vsel %vm7847_vm8, %v6111_v1, %v2234_v3  ;;  %v11638_v33 = vld [vmem:[#allocation42_spill] sm:$0xff] }
 0x1bb   :  { %v8497_v7 = vmax.f32 %v11632_v22, %v11631_v6  ;;  %11633 = vst [vmem:[#allocation23_spill] sm:$0xff] %v8501_v61  ;;  %v2236_v48 = vrot.slane %v2234_v3, 4  ;;  %v8511_v54 = vcombine.low %v8281_v24, %v11634_v62  ;;  %v1717_v29 = vcombine.high %v11634_v62, %v11634_v62 }
 0x1bc   :  { %v11636_v20 = vmax.f32 %v8034_v23, 0.0  ;;  %v11637_v41 = vmax.f32 %v8380_v36, 0.0  ;;  %v8522_v53 = vmax.f32 %v11638_v33, %v1620_v0  ;;  %v8526_v1 = vadd.f32 %v8162_v19, %v8143_v10  ;;  %v11641_v23 = vld [vmem:[#allocation9_spill] sm:$0xff] }
 0x1bd   :  { %11635 = vst [vmem:[#allocation24_spill] sm:$0xff] %v8511_v54  ;;  %v2043_v3 = vsel %vm7915_vm10, %v2041_v60, %v2042_v44  ;;  %v2238_v22 = vsel %vm7847_vm8, %v2236_v48, %v2237_v25  ;;  %v8535_v54 = vcombine.low %v1717_v29, %v11641_v23  ;;  %v8539_v36 = vcombine.high %v11641_v23, %v11641_v23 }
 0x1be   :  { %v8519_v55 = vmax.f32 %v11637_v41, %v11636_v20  ;;  %11639 = vst [vmem:[#allocation25_spill] sm:$0xff] %v8522_v53  ;;  %v8530_v6 = vcombine.low %v2040_v17, %v2043_v3  ;;  %3081 = vrot.lane.b32.xlu1 %v8260_v11, %s11502_s29  ;;  %v8543_v10 = vcombine.low %v2235_v51, %v2238_v22  ;;  %v6120_v0 = vrot.slane %v7963_v21, 9 }
 0x1bf   :  { %11642 = vst [vmem:[#allocation27_spill] sm:$0xff] %v8535_v54  ;;  %v2526_v44 = vrot.slane %v8281_v24, 5  ;;  %v2529_v17 = vrot.slane %v11634_v62, 5  ;;  %2919 = vrot.lane.b32.xlu0 %v8190_v43, %s6722_s30  ;;  %v6122_v25 = vrot.slane %v7963_v21, 10  ;;  %v2607_v60 = vrot.slane %v8281_v24, 6 }
 0x1c0   :  { %11640 = vst [vmem:[#allocation28_spill] sm:$0xff] %v8530_v6  ;;  %11643 = vst [vmem:[#allocation29_spill] sm:$0xff] %v8543_v10  ;;  %v2610_v48 = vrot.slane %v11634_v62, 6  ;;  %v6124_v20 = vrot.slane %v7963_v21, 11  ;;  %v2688_v33 = vrot.slane %v8281_v24, 7  ;;  %v2691_v3 = vrot.slane %v11634_v62, 7 }
 0x1c1   :  { %v2527_v51 = vsel %vm7865_vm9, %v6120_v0, %v2526_v44  ;;  %v2528_v41 = vrot.slane %v2526_v44, 4  ;;  %v2608_v22 = vsel %vm7915_vm10, %v6122_v25, %v2607_v60  ;;  %v2609_v43 = vrot.slane %v2607_v60, 4 }
 0x1c2   :  { %v6126_v54 = vrot.slane %v1717_v29, 9  ;;  %v2903_v10 = vrot.slane %v11641_v23, 5  ;;  %2465 = vrot.lane.b32.xlu1 %v8228_v14, %s11426_s15  ;;  %v2689_v0 = vsel %vm7847_vm8, %v6124_v20, %v2688_v33  ;;  %v2690_v44 = vrot.slane %v2688_v33, 4 }
 0x1c3   :  { %v2530_v21 = vsel %vm7865_vm9, %v2528_v41, %v2529_v17  ;;  %v2906_v24 = vrot.slane %v8539_v36, 5  ;;  %3000 = vrot.lane.b32.xlu0 %v8210_v42, %s11505_s28  ;;  %v2611_v25 = vsel %vm7915_vm10, %v2609_v43, %v2610_v48  ;;  %v6128_v20 = vrot.slane %v1717_v29, 10 }
 0x1c4   :  { %v8570_v62 = vcombine.low %v2527_v51, %v2530_v21  ;;  %v2904_v60 = vsel %vm7865_vm9, %v6126_v54, %v2903_v10  ;;  %v2905_v6 = vrot.slane %v2903_v10, 4  ;;  %v8576_v61 = vcombine.low %v2608_v22, %v2611_v25  ;;  %v11650_v25 = vld [vmem:[#allocation38_spill] sm:$0xff] }
 0x1c5   :  { %v2692_v17 = vsel %vm7847_vm8, %v2690_v44, %v2691_v3  ;;  %v2984_v41 = vrot.slane %v11641_v23, 6  ;;  %v2987_v51 = vrot.slane %v8539_v36, 6  ;;  %v6130_v48 = vrot.slane %v1717_v29, 11 }
 0x1c6   :  { %11644 = vst [vmem:[#allocation30_spill] sm:$0xff] %v8576_v61  ;;  %v8581_v33 = vcombine.low %v2689_v0, %v2692_v17  ;;  %v2907_v21 = vsel %vm7865_vm9, %v2905_v6, %v2906_v24  ;;  %3215 = vrot.lane.b32.xlu1 %v8228_v14, %s11421_s2  ;;  %v3065_v22 = vrot.slane %v11641_v23, 7  ;;  %v1514_v43 = vmax.f32 %v8526_v1, 0.0  ;;  %v11648_v0 = vld [vmem:[#allocation13_spill] sm:$0xff]  ;;  %v11652_v17 = vld [vmem:[#allocation39_spill] sm:$0xff] }
 0x1c7   :  { %v8588_v54 = vcombine.low %v2904_v60, %v2907_v21  ;;  %v2985_v10 = vsel %vm7915_vm10, %v6128_v20, %v2984_v41  ;;  %v2986_v3 = vrot.slane %v2984_v41, 4  ;;  %3375 = vrot.lane.b32.xlu0 %v8210_v42, %s11495_s12  ;;  %v3068_v24 = vrot.slane %v8539_v36, 7  ;;  %v11654_v41 = vld [vmem:[#allocation40_spill] sm:$0xff] }
 0x1c8   :  { %11645 = vst [vmem:[#allocation31_spill] sm:$0xff] %v8581_v33  ;;  %v8601_v6 = vcombine.low %v8344_v12, %v8389_v50  ;;  %v8605_v44 = vcombine.high %v11648_v0, %v11648_v0  ;;  %v8609_v1 = vmax.f32 %v11650_v25, %v8393_v9  ;;  %v3066_v60 = vsel %vm7847_vm8, %v6130_v48, %v3065_v22  ;;  %v11656_v9 = vld [vmem:[#allocation41_spill] sm:$0xff] }
 0x1c9   :  { %11646 = vst [vmem:[#allocation34_spill] sm:$0xff] %v8588_v54  ;;  %v2988_v42 = vsel %vm7915_vm10, %v2986_v3, %v2987_v51  ;;  %v8617_v20 = vmax.f32 %v11652_v17, %v8487_v27  ;;  %v8621_v21 = vmax.f32 %v11654_v41, %v8497_v7  ;;  %v3067_v54 = vrot.slane %v3065_v22, 4 }
 0x1ca   :  { %11647 = vst [vmem:[#allocation33_spill] sm:$0xff] %v8601_v6  ;;  %11649 = vst [vmem:[#allocation47_spill] sm:$0xff] %v8605_v44  ;;  %v8623_v29 = vcombine.low %v2985_v10, %v2988_v42  ;;  %v8629_v51 = vmax.f32 %v11656_v9, %v8519_v55  ;;  %v8633_v48 = vcombine.high %v8522_v53, %v8522_v53  ;;  %3917 = vrot.lane.b32.xlu1 %v8240_v26, %s6725_s0  ;;  %v11659_v10 = vld [vmem:[#allocation14_spill] sm:$0xff] }
 0x1cb   :  { %11651 = vst [vmem:[#allocation7_spill] sm:$0xff] %v8609_v1  ;;  %11653 = vst [vmem:[#allocation36_spill] sm:$0xff] %v8617_v20  ;;  %v8637_v27 = vadd.f32 %v8162_v19, %v8132_v32  ;;  %v3361_v7 = vrot.slane %v8358_v4, 6  ;;  %v11660_v3 = vmax.f32 %v11659_v10, 0.0  ;;  %3456 = vrot.lane.b32.xlu0 %v8260_v11, %s11398_s13  ;;  %v3069_v55 = vsel %vm7847_vm8, %v3067_v54, %v3068_v24  ;;  %s11719_s13 = smov 108  }
 0x1cc   :  { %11655 = vst [vmem:[#allocation48_spill] sm:$0xff] %v8623_v29  ;;  %1783 = vst.msk [vmem:[#allocation2 + $0xa0] sm:$0xff] %vm1772_vm7, %v8601_v6  ;;  %v3364_v32 = vrot.slane %v11648_v0, 6  ;;  %v1850_v25 = vrot.slane %v8369_v35, 5  ;;  %v8654_v42 = vadd.f32 %v8162_v19, %v8188_v15  ;;  %v8656_v17 = vcombine.low %v3066_v60, %v3069_v55 }
 0x1cd   :  { %11657 = vst [vmem:[#allocation49_spill] sm:$0xff] %v8629_v51  ;;  %11658 = vst [vmem:[#allocation50_spill] sm:$0xff] %v8633_v48  ;;  %v8644_v22 = vmax.f32 %v1514_v43, %v11660_v3  ;;  %v8660_v43 = vcombine.high %v8609_v1, %v8609_v1  ;;  %v6134_v41 = vrot.slane %v7973_v47, 10  ;;  %v3363_v11 = vrot.slane %v3361_v7, 4 }
 0x1ce   :  { %11661 = vst [vmem:[#allocation37_spill] sm:$0xff] %v8656_v17  ;;  %v6080_v9 = vrot.slane %v8293_v52, 9  ;;  %v1852_v54 = vrot.slane %v1850_v25, 4  ;;  %v1853_v24 = vrot.slane %v8361_v13, 5  ;;  %3150 = vrot.lane.b32.xlu1 %v8240_v26, %s6714_s21  ;;  %v6136_v60 = vrot.slane %v7973_v47, 11 }
 0x1cf   :  { %11662 = vst [vmem:[#allocation35_spill] sm:$0xff] %v8660_v43  ;;  %v3362_v15 = vsel %vm7915_vm10, %v6134_v41, %v3361_v7  ;;  %v3442_v10 = vrot.slane %v8358_v4, 7  ;;  %v3445_v3 = vrot.slane %v11648_v0, 7  ;;  %2840 = vrot.lane.b32.xlu0 %v8228_v14, %s11424_s17  ;;  %v3365_v55 = vsel %vm7915_vm10, %v3363_v11, %v3364_v32  ;;  %v4029_v32 = vld [vmem:[%s11354_s3 + $0x78] sm:$0xff] }
 0x1d0   :  { %v8678_v6 = vsel %vm7865_vm9, %v6080_v9, %v1850_v25  ;;  %v8682_v17 = vsel %vm7865_vm9, %v1852_v54, %v1853_v24  ;;  %v6096_v7 = vrot.slane %v8293_v52, 10  ;;  %v8685_v41 = vcombine.low %v3362_v15, %v3365_v55  ;;  %v4028_v55 = vld [vmem:[%s11354_s3 + $0x70] sm:$0xff] }
 0x1d1   :  { %11663 = vst [vmem:[#allocation10_spill] sm:$0xff] %v8678_v6  ;;  %11664 = vst [vmem:[#allocation8_spill] sm:$0xff] %v8682_v17  ;;  %v3443_v33 = vsel %vm7847_vm8, %v6136_v60, %v3442_v10  ;;  %v3444_v61 = vrot.slane %v3442_v10, 4  ;;  %v2046_v25 = vrot.slane %v8369_v35, 6  ;;  %v2049_v11 = vrot.slane %v8361_v13, 6 }
 0x1d2   :  { %11665 = vst [vmem:[#allocation42_spill] sm:$0xff] %v8685_v41  ;;  %v1723_v9 = vcombine.high %v8361_v13, %v8361_v13  ;;  %2467 = vrot.lane.b32.xlu1 %v8244_v28, %s11426_s15  ;;  %v11392_v54 = vmov 0.0   ;;  %v6112_v15 = vrot.slane %v8293_v52, 11  ;;  %v2241_v60 = vrot.slane %v8369_v35, 7 }
 0x1d3   :  { %4093 = vmatprep.subr.mxu1 %v11392_v54  ;;  %v3446_v24 = vsel %vm7847_vm8, %v3444_v61, %v3445_v3  ;;  %v2244_v10 = vrot.slane %v8361_v13, 7  ;;  %2400 = vrot.lane.b32.xlu0 %v8240_v26, %s11478_s14  ;;  %v8715_v54 = vsel %vm7915_vm10, %v6096_v7, %v2046_v25  ;;  %v2048_v61 = vrot.slane %v2046_v25, 4  ;;  %v4027_v7 = vld [vmem:[%s11354_s3 + $0x68] sm:$0xff] }
 0x1d4   :  { %4094 = vmatpush1.msra.mxu1 %v4029_v32  ;;  %v8711_v29 = vcombine.low %v3443_v33, %v3446_v24  ;;  %11667 = vst [vmem:[#allocation38_spill] sm:$0xff] %v8715_v54  ;;  %v8718_v3 = vcombine.low %v1723_v9, %v8609_v1  ;;  %v11669_v17 = vmov 0.0   ;;  %v8723_v6 = vsel %vm7847_vm8, %v6112_v15, %v2241_v60 }
 0x1d5   :  { %4095 = vmatprep.subr.mxu1 %v11669_v17  ;;  %11670 = vst [vmem:[#allocation40_spill] sm:$0xff] %v8723_v6  ;;  %v2243_v32 = vrot.slane %v2241_v60, 4  ;;  %v8727_v41 = vcombine.low %v8389_v50, %v8621_v21  ;;  %v6081_v33 = vrot.slane %v1723_v9, 9  ;;  %v8734_v25 = vsel %vm7915_vm10, %v2048_v61, %v2049_v11 }
 0x1d6   :  { %11666 = vst [vmem:[#allocation9_spill] sm:$0xff] %v8711_v29  ;;  %11668 = vst [vmem:[#allocation39_spill] sm:$0xff] %v8718_v3  ;;  %4096 = vmatpush1.msra.mxu1 %v4028_v55  ;;  %v1857_v24 = vrot.slane %v8609_v1, 5  ;;  %v1860_v15 = vrot.slane %v8660_v43, 5  ;;  %v6097_v60 = vrot.slane %v1723_v9, 10  ;;  %3217 = vrot.lane.b32.xlu1 %v8244_v28, %s11421_s2  ;;  %v2053_v61 = vrot.slane %v8609_v1, 6 }
 0x1d7   :  { %11671 = vst [vmem:[#allocation41_spill] sm:$0xff] %v8727_v41  ;;  %11672 = vst [vmem:[#allocation14_spill] sm:$0xff] %v8734_v25  ;;  %4097 = vmatprep.subr.mxu1 %v11669_v17  ;;  %v8747_v11 = vsel %vm7847_vm8, %v2243_v32, %v2244_v10  ;;  %v2056_v41 = vrot.slane %v8660_v43, 6  ;;  %3590 = vrot.lane.b32.xlu0 %v8228_v14, %s11428_s26  ;;  %v6113_v25 = vrot.slane %v1723_v9, 11  ;;  %v2248_v14 = vrot.slane %v8609_v1, 7  ;;  %v4025_v55 = vld [vmem:[%s11354_s3 + $0x58] sm:$0xff] }
 0x1d8   :  { %1782 = vst.msk [vmem:[#allocation2 + $0x90] sm:$0xff] %vm1772_vm7, %v8718_v3  ;;  %11673 = vst [vmem:[#allocation53_spill] sm:$0xff] %v8747_v11  ;;  %4098 = vmatpush1.msra.mxu1 %v4027_v7  ;;  %v4026_v3 = vld [vmem:[%s11354_s3 + $0x60] sm:$0xff]  ;;  %v1858_v10 = vsel %vm7865_vm9, %v6081_v33, %v1857_v24  ;;  %v1859_v32 = vrot.slane %v1857_v24, 4  ;;  %v2054_v54 = vsel %vm7915_vm10, %v6097_v60, %v2053_v61  ;;  %v2055_v29 = vrot.slane %v2053_v61, 4 }
 0x1d9   :  { %4099 = vmatprep.subr.mxu1 %v11669_v17  ;;  %v2251_v7 = vrot.slane %v8660_v43, 7  ;;  %v6082_v9 = vrot.slane %v8344_v12, 9  ;;  %v1864_v24 = vrot.slane %v8389_v50, 5  ;;  %v1867_v11 = vrot.slane %v8621_v21, 5 }
 0x1da   :  { %4100 = vmatpush1.msra.mxu1 %v4026_v3  ;;  %v1861_v33 = vsel %vm7865_vm9, %v1859_v32, %v1860_v15  ;;  %2469 = vrot.lane.b32.xlu1 %v8264_v8, %s11426_s15  ;;  %v2057_v3 = vsel %vm7915_vm10, %v2055_v29, %v2056_v41  ;;  %v2249_v61 = vsel %vm7847_vm8, %v6113_v25, %v2248_v14  ;;  %v2250_v15 = vrot.slane %v2248_v14, 4  ;;  %s6730_s15 = smov 4  }
 0x1db   :  { %4101 = vmatprep.subr.mxu1 %v11669_v17  ;;  %v8776_v60 = vcombine.low %v1858_v10, %v1861_v33  ;;  %2775 = vrot.lane.b32.xlu0 %v8240_v26, %s11499_s16  ;;  %v8787_v6 = vcombine.low %v8198_v18, %v8324_v5  ;;  %v4024_v10 = vld [vmem:[%s11354_s3 + $0x50] sm:$0xff]  ;;  %v8792_v33 = vcombine.low %v2054_v54, %v2057_v3  ;;  %v8796_v41 = vpop.permute.xlu1 %2392  ;;  %v1866_v14 = vrot.slane %v1864_v24, 4  ;;  %v4023_v54 = vld [vmem:[%s11354_s3 + $0x48] sm:$0xff] }
 0x1dc   :  { %4102 = vmatpush1.msra.mxu1 %v4025_v55  ;;  %v1865_v29 = vsel %vm7865_vm9, %v6082_v9, %v1864_v24  ;;  %v2252_v25 = vsel %vm7847_vm8, %v2250_v15, %v2251_v7  ;;  %v6098_v18 = vrot.slane %v8344_v12, 10  ;;  %v2060_v5 = vrot.slane %v8389_v50, 6 }
 0x1dd   :  { %11674 = vst [vmem:[#allocation54_spill] sm:$0xff] %v8776_v60  ;;  %11675 = vst [vmem:[#allocation55_spill] sm:$0xff] %v8792_v33  ;;  %4103 = vmatprep.subr.mxu1 %v11669_v17  ;;  %v8806_v55 = vcombine.low %v2249_v61, %v2252_v25  ;;  %v2063_v9 = vrot.slane %v8621_v21, 6  ;;  %v6114_v3 = vrot.slane %v8344_v12, 11  ;;  %v2255_v32 = vrot.slane %v8389_v50, 7  ;;  %v4022_v12 = vld [vmem:[%s11354_s3 + $0x40] sm:$0xff] }
 0x1de   :  { %4104 = vmatpush1.msra.mxu1 %v4024_v10  ;;  %3219 = vrot.lane.b32.xlu1 %v8264_v8, %s11421_s2  ;;  %v1868_v7 = vsel %vm7865_vm9, %v1866_v14, %v1867_v11  ;;  %v2061_v24 = vsel %vm7915_vm10, %v6098_v18, %v2060_v5  ;;  %v2062_v15 = vrot.slane %v2060_v5, 4  ;;  %v2258_v61 = vrot.slane %v8621_v21, 7  ;;  %v4019_v60 = vld [vmem:[%s11354_s3 + $0x28] sm:$0xff]  ;;  %s6729_s2 = smov 126  }
 0x1df   :  { %11676 = vst [vmem:[#allocation56_spill] sm:$0xff] %v8806_v55  ;;  %4105 = vmatprep.subr.mxu1 %v11669_v17  ;;  %3525 = vrot.lane.b32.xlu0 %v8240_v26, %s11491_s23  ;;  %v8824_v50 = vcombine.low %v1865_v29, %v1868_v7  ;;  %v2256_v10 = vsel %vm7847_vm8, %v6114_v3, %v2255_v32  ;;  %v2257_v11 = vrot.slane %v2255_v32, 4  ;;  %v8832_v14 = vpop.permute.xlu1 %2459  ;;  %v1871_v32 = vrot.slane %v8617_v20, 5  ;;  %v8844_v5 = vpop.permute.xlu0 %2394  ;;  %v11680_v7 = vld [vmem:[#allocation11_spill] sm:$0xff] }
 0x1e0   :  { %4106 = vmatpush1.msra.mxu1 %v4023_v54  ;;  %v8830_v25 = vcombine.low %v8358_v4, %v11648_v0  ;;  %v2064_v26 = vsel %vm7915_vm10, %v2062_v15, %v2063_v9  ;;  %v1726_v18 = vcombine.high %v8621_v21, %v8621_v21  ;;  %v8841_v29 = vcombine.high %v8617_v20, %v8617_v20  ;;  %v4021_v54 = vld [vmem:[%s11354_s3 + $0x38] sm:$0xff] }
 0x1e1   :  { %11677 = vst [vmem:[#allocation57_spill] sm:$0xff] %v8824_v50  ;;  %4107 = vmatprep.subr.mxu1 %v11669_v17  ;;  %v8849_v3 = vcombine.low %v2061_v24, %v2064_v26  ;;  %v2259_v9 = vsel %vm7847_vm8, %v2257_v11, %v2258_v61  ;;  %v8855_v21 = vcombine.high %v11680_v7, %v11680_v7  ;;  %v6138_v15 = vrot.slane %v8605_v44, 9  ;;  %v4020_v61 = vld [vmem:[%s11354_s3 + $0x30] sm:$0xff] }
 0x1e2   :  { %11678 = vst [vmem:[#allocation58_spill] sm:$0xff] %v8830_v25  ;;  %4108 = vmatpush1.msra.mxu1 %v4022_v12  ;;  %3919 = vrot.lane.b32.xlu1 %v8787_v6, %s6725_s0  ;;  %v8861_v12 = vcombine.low %v2256_v10, %v2259_v9  ;;  %v8864_v25 = vcombine.low %v1726_v18, %v8617_v20  ;;  %v6083_v24 = vrot.slane %v1726_v18, 9  ;;  %v1873_v26 = vrot.slane %v1871_v32, 4 }
 0x1e3   :  { %11679 = vst [vmem:[#allocation59_spill] sm:$0xff] %v8849_v3  ;;  %11681 = vst [vmem:[#allocation60_spill] sm:$0xff] %v8855_v21  ;;  %4109 = vmatprep.subr.mxu1 %v11669_v17  ;;  %2842 = vrot.lane.b32.xlu0 %v8244_v28, %s11424_s17  ;;  %v1874_v11 = vrot.slane %v8841_v29, 5  ;;  %v3657_v3 = vrot.slane %v11680_v7, 5  ;;  %v3660_v10 = vrot.slane %v8855_v21, 5  ;;  %v8874_v9 = vpop.permute.xlu1 %2461  ;;  %v2067_v50 = vrot.slane %v8617_v20, 6  ;;  %v8883_v33 = vpop.permute.xlu0 %2769 }
 0x1e4   :  { %11682 = vst [vmem:[#allocation61_spill] sm:$0xff] %v8861_v12  ;;  %11683 = vst [vmem:[#allocation62_spill] sm:$0xff] %v8864_v25  ;;  %4110 = vmatpush1.msra.mxu1 %v4021_v54  ;;  %v1872_v54 = vsel %vm7865_vm9, %v6083_v24, %v1871_v32  ;;  %v6099_v12 = vrot.slane %v1726_v18, 10  ;;  %v2070_v55 = vrot.slane %v8841_v29, 6  ;;  %v6140_v24 = vrot.slane %v8605_v44, 10 }
 0x1e5   :  { %4111 = vmatprep.subr.mxu1 %v11669_v17  ;;  %1784 = vst.msk [vmem:[#allocation2 + $0xb0] sm:$0xff] %vm1772_vm7, %v8864_v25  ;;  %v1875_v1 = vsel %vm7865_vm9, %v1873_v26, %v1874_v11  ;;  %v8892_v25 = vsel %vm7865_vm9, %v6138_v15, %v3657_v3  ;;  %v3659_v32 = vrot.slane %v3657_v3, 4  ;;  %v2069_v0 = vrot.slane %v2067_v50, 4  ;;  %v4018_v3 = vld [vmem:[%s11354_s3 + $0x20] sm:$0xff] }
 0x1e6   :  { %4112 = vmatpush1.msra.mxu1 %v4020_v61  ;;  %3152 = vrot.lane.b32.xlu1 %v8787_v6, %s6714_s21  ;;  %v8898_v61 = vcombine.low %v1872_v54, %v1875_v1  ;;  %v2068_v43 = vsel %vm7915_vm10, %v6099_v12, %v2067_v50  ;;  %v3755_v26 = vrot.slane %v11680_v7, 6  ;;  %v3758_v1 = vrot.slane %v8855_v21, 6 }
 0x1e7   :  { %4113 = vmatprep.subr.mxu1 %v11669_v17  ;;  %3592 = vrot.lane.b32.xlu0 %v8244_v28, %s11428_s26  ;;  %v8910_v15 = vsel %vm7865_vm9, %v3659_v32, %v3660_v10  ;;  %v6115_v11 = vrot.slane %v1726_v18, 11  ;;  %v2262_v12 = vrot.slane %v8617_v20, 7  ;;  %v8914_v50 = vpop.permute.xlu1 %2836  ;;  %v1921_v32 = vpop.permute.xlu0 %1920  ;;  %v4017_v18 = vld [vmem:[%s11354_s3 + $0x18] sm:$0xff] }
 0x1e8   :  { %11684 = vst [vmem:[#allocation63_spill] sm:$0xff] %v8898_v61  ;;  %4114 = vmatpush1.msra.mxu1 %v4019_v60  ;;  %11685 = vst [vmem:[#allocation64_spill] sm:$0xff] %v8910_v15  ;;  %v2071_v60 = vsel %vm7915_vm10, %v2069_v0, %v2070_v55  ;;  %v8923_v54 = vsel %vm7915_vm10, %v6140_v24, %v3755_v26  ;;  %v3757_v10 = vrot.slane %v3755_v26, 4  ;;  %v2265_v15 = vrot.slane %v8841_v29, 7  ;;  %v11686_v26 = vld [vmem:[#allocation12_spill] sm:$0xff] }
 0x1e9   :  { %4115 = vmatprep.subr.mxu1 %v11669_v17  ;;  %v8928_v20 = vcombine.low %v2068_v43, %v2071_v60  ;;  %v2263_v61 = vsel %vm7847_vm8, %v6115_v11, %v2262_v12  ;;  %v2264_v28 = vrot.slane %v2262_v12, 4  ;;  %1969 = vst.msk [vmem:[#allocation2] sm:$0xff] %vm11474_vm11, %v1921_v32  ;;  %v6142_v43 = vrot.slane %v8605_v44, 11 }
 0x1ea   :  { %4116 = vmatpush1.msra.mxu1 %v4018_v3  ;;  %3671 = vrot.lane.b32.xlu1 %v8338_v40, %s6729_s2  ;;  %v8939_v0 = vsel %vm7915_vm10, %v3757_v10, %v3758_v1  ;;  %v3836_v55 = vrot.slane %v11680_v7, 7  ;;  %v3839_v24 = vrot.slane %v8855_v21, 7  ;;  %v11687_v3 = vmax.f32 %v11686_v26, 0.0  ;;  %v4016_v1 = vld [vmem:[%s11354_s3 + $0x10] sm:$0xff]  ;;  %v11710_v7 = vld [vmem:[#allocation19_spill] sm:$0xff] }
 0x1eb   :  { %4117 = vmatprep.subr.mxu1 %v11669_v17  ;;  %v11688_v11 = vmax.f32 %v8637_v27, 0.0  ;;  %2844 = vrot.lane.b32.xlu0 %v8264_v8, %s11424_s17  ;;  %v2266_v10 = vsel %vm7847_vm8, %v2264_v28, %v2265_v15  ;;  %v2312_v32 = vpop.permute.xlu1 %2311  ;;  %v2117_v21 = vpop.permute.xlu0 %2116  ;;  %v8967_v60 = vcombine.low %v8522_v53, %v8633_v48  ;;  %v6125_v53 = vrot.slane %v8298_v45, 11  ;;  %s11725_s17 = smov 60  }
 0x1ec   :  { %4118 = vmatpush1.msra.mxu1 %v4017_v18  ;;  %v8958_v27 = vcombine.low %v2263_v61, %v2266_v10  ;;  %v8962_v26 = vsel %vm7847_vm8, %v6142_v43, %v3836_v55  ;;  %v3838_v18 = vrot.slane %v3836_v55, 4  ;;  %v11691_v61 = vld [vmem:[#allocation44_spill] sm:$0xff]  ;;  %v1516_v43 = vmax.f32 %v8654_v42, 0.0  ;;  %2165 = vst.msk [vmem:[#allocation2] sm:$0xff] %vm11488_vm12, %v2117_v21 }
 0x1ed   :  { %v1623_v12 = vmax.f32 %v11688_v11, %v11687_v3  ;;  %4119 = vmatprep.subr.mxu1 %v11669_v17  ;;  %v11689_v3 = vld [vmem:[#allocation15_spill] sm:$0xff]  ;;  %11690 = vst [vmem:[#allocation12_spill] sm:$0xff] %v8967_v60  ;;  %v8973_v28 = vmax.f32 %v11691_v61, %v8644_v22  ;;  %2360 = vst.msk [vmem:[#allocation2] sm:$0xff] %vm11475_vm13, %v2312_v32  ;;  %v1748_v21 = vcombine.low %v8293_v52, %v8369_v35 }
 0x1ee   :  { %v1552_v11 = vmax.f32 %v11689_v3, 0.0  ;;  %4120 = vmatpush1.msra.mxu1 %v4016_v1  ;;  %2546 = vrot.lane.b32.xlu1 %v8338_v40, %s11497_s22  ;;  %v4015_v55 = vld [vmem:[%s11354_s3 + $0x8] sm:$0xff]  ;;  %v8985_v1 = vsel %vm7847_vm8, %v3838_v18, %v3839_v24  ;;  %v4014_v22 = vld [vmem:[%s11354_s3] sm:$0xff]  ;;  %1785 = vst.msk [vmem:[#allocation2 + $0xc0] sm:$0xff] %vm1772_vm7, %v8967_v60  ;;  %v1203_v3 = vadd.f32 %v8162_v19, %v8168_v16  ;;  %v4032_v16 = vld [vmem:[%s11354_s3 + $0x90] sm:$0x3f] }
 0x1ef   :  { %11692 = vst [vmem:[#allocation15_spill] sm:$0xff] %v8973_v28  ;;  %4121 = vmatprep.subr.mxu1 %v11669_v17  ;;  %3594 = vrot.lane.b32.xlu0 %v8264_v8, %s11428_s26  ;;  %v11693_v24 = vld [vmem:[#allocation26_spill] sm:$0xff]  ;;  %v9003_v8 = vcombine.high %v8629_v51, %v8629_v51  ;;  %v11695_v32 = vld [vmem:[#allocation43_spill] sm:$0xff]  ;;  %v9010_v61 = vpop.permute.xlu1 %2396  ;;  %2441 = vst.msk [vmem:[#allocation2] sm:$0xff] %vm11471_vm14, %v8796_v41  ;;  %v9015_v52 = vpop.permute.xlu0 %2771  ;;  %v9151_v48 = vcombine.high %v11710_v7, %v11710_v7  ;;  %s11724_s26 = smov 90  }
 0x1f0   :  { %4122 = vmatpush1.msra.mxu1 %v4015_v55  ;;  %v1383_v10 = vadd.f32 %v8162_v19, %v11693_v24  ;;  %v9006_v18 = vmax.f32 %v11695_v32, %v1623_v12  ;;  %2508 = vst.msk [vmem:[#allocation2] sm:$0xff] %vm11472_vm15, %v8832_v14  ;;  %v1624_v12 = vmax.f32 %v1516_v43, %v1552_v11  ;;  %v4031_v41 = vld [vmem:[%s11354_s3 + $0x88] sm:$0xff]  ;;  %v1517_v43 = vmax.f32 %v1203_v3, 0.0 }
 0x1f1   :  { %11694 = vst [vmem:[#allocation44_spill] sm:$0xff] %v9003_v8  ;;  %4123 = vmatprep.subr.mxu1 %v11669_v17  ;;  %1781 = vst.msk [vmem:[#allocation2 + $0x80] sm:$0xff] %vm1772_vm7, %v1748_v21  ;;  %v9025_v19 = vcombine.low %v9003_v8, %v8973_v28  ;;  %v11699_v21 = vld [vmem:[#allocation46_spill] sm:$0xff] }
 0x1f2   :  { %11696 = vst [vmem:[#allocation26_spill] sm:$0xff] %v9006_v18  ;;  %4124 = vmatpush1.msra.mxu1 %v4014_v22  ;;  %3769 = vrot.lane.b32.xlu1 %v8363_v30, %s6730_s15  ;;  %v1553_v14 = vmax.f32 %v1383_v10, 0.0  ;;  %v9037_v11 = vcombine.high %v9006_v18, %v9006_v18  ;;  %v9047_v24 = vmax.f32 %v11699_v21, %v1624_v12  ;;  %v4030_v10 = vld [vmem:[%s11354_s3 + $0x80] sm:$0xff]  ;;  %s11493_s3 = smov 10  }
 0x1f3   :  { %4151 = vmatprep.subr.mxu1 %v11669_v17  ;;  %11697 = vst [vmem:[#allocation43_spill] sm:$0xff] %v9025_v19  ;;  %2402 = vrot.lane.b32.xlu0 %v8787_v6, %s11478_s14  ;;  %v9039_v55 = vpop.permute.xlu1 %3146  ;;  %1786 = vst.msk [vmem:[#allocation2 + $0xd0] sm:$0xff] %vm1772_vm7, %v9025_v19  ;;  %v9043_v22 = vpop.permute.xlu0 %2398 }
 0x1f4   :  { %11698 = vst [vmem:[#allocation65_spill] sm:$0xff] %v9037_v11  ;;  %6145 = vmatpush2.msk.msra.mxu1 %vm4089_vm0, %v4032_v16  ;;  %11700 = vst [vmem:[#allocation46_spill] sm:$0xff] %v9047_v24  ;;  %v1625_v32 = vmax.f32 %v1517_v43, %v1553_v14  ;;  %v9061_v12 = vcombine.low %v9006_v18, %v9037_v11  ;;  %v11703_v14 = vld [vmem:[#allocation45_spill] sm:$0xff]  ;;  %v9119_v11 = vcombine.high %v8311_v49, %v8311_v49  ;;  %vm11476_vm0 = vcmask 687728  }
 0x1f5   :  { %4153 = vmatprep.subr.mxu1 %v11669_v17 }
 0x1f6   :  { %2627 = vrot.lane.b32.xlu1 %v8363_v30, %s6717_s24  ;;  %4154 = vmatpush2.msra.mxu1 %v4031_v41  ;;  %11701 = vst [vmem:[#allocation66_spill] sm:$0xff] %v9061_v12  ;;  %v9068_v41 = vcombine.high %v9047_v24, %v9047_v24  ;;  %1787 = vst.msk [vmem:[#allocation2 + $0xe0] sm:$0xff] %vm1772_vm7, %v9061_v12  ;;  %v9077_v43 = vmax.f32 %v11703_v14, %v1625_v32 }
 0x1f7   :  { %2777 = vrot.lane.b32.xlu0 %v8787_v6, %s11499_s16  ;;  %4155 = vmatprep.subr.mxu1 %v11669_v17  ;;  %v9057_v3 = vpop.permute.xlu1 %3148  ;;  %v9063_v16 = vpop.permute.xlu0 %2773  ;;  %v9094_v32 = vcombine.high %v8298_v45, %v8298_v45  ;;  %v1735_v24 = vcombine.high %v8273_v58, %v8273_v58 }
 0x1f8   :  { %4156 = vmatpush2.msra.mxu1 %v4030_v10  ;;  %11702 = vst [vmem:[#allocation67_spill] sm:$0xff] %v9068_v41  ;;  %11704 = vst [vmem:[#allocation45_spill] sm:$0xff] %v9077_v43  ;;  %v9086_v15 = vcombine.low %v9068_v41, %v9077_v43  ;;  %v6121_v41 = vrot.slane %v8298_v45, 9 }
 0x1f9   :  { %5652 = vmatprep.subr.mxu1 %v11669_v17  ;;  %v2533_v43 = vrot.slane %v9094_v32, 5  ;;  %v2614_v18 = vrot.slane %v9094_v32, 6  ;;  %v2695_v60 = vrot.slane %v9094_v32, 7 }
 0x1fa   :  { %3850 = vrot.lane.b32.xlu1 %v8372_v31, %s11493_s3  ;;  %11705 = vst [vmem:[#allocation68_spill] sm:$0xff] %v9086_v15  ;;  %1788 = vst.msk [vmem:[#allocation2 + $0xf0] sm:$0xff] %vm1772_vm7, %v9086_v15  ;;  %v11707_v15 = vld [vmem:[#allocation51_spill] sm:$0xff]  ;;  %vm3046_vm7 = vcmask 638528  }
 0x1fb   :  { %3527 = vrot.lane.b32.xlu0 %v8787_v6, %s11491_s23  ;;  %v2541_v21 = vpop.permute.xlu1 %2540  ;;  %v9080_v10 = vpop.permute.xlu0 %3523  ;;  %v2534_v12 = vsel %vm7865_vm9, %v6121_v41, %v2533_v43  ;;  %v2535_v8 = vrot.slane %v2533_v43, 4  ;;  %v2616_v44 = vrot.slane %v2614_v18, 4  ;;  %v2698_v41 = vrot.slane %v8273_v58, 7 }
 0x1fc   :  { %2589 = vst.msk [vmem:[#allocation2] sm:$0xff] %vm11483_vm1, %v2541_v21  ;;  %v11706_v21 = vld [vmem:[#allocation52_spill] sm:$0xff]  ;;  %v9147_v43 = vcombine.low %v9094_v32, %v8273_v58 }
 0x1fd   :  { %v9104_v42 = vcombine.high %v11706_v21, %v11706_v21  ;;  %11708 = vst [vmem:[#allocation52_spill] sm:$0xff] %v9119_v11 }
 0x1fe   :  { %2708 = vrot.lane.b32.xlu1 %v8372_v31, %s6718_s25  ;;  %11709 = vst [vmem:[#allocation51_spill] sm:$0xff] %v9147_v43  ;;  %v2910_v43 = vrot.slane %v11710_v7, 5 }
 0x1ff   :  { %1928 = vrot.lane.b32.xlu0 %v8338_v40, %s6711_s18  ;;  %v2622_v6 = vpop.permute.xlu1 %2621  ;;  %v1923_v14 = vpop.permute.xlu0 %1922 }
 0x200   :  { %2670 = vst.msk [vmem:[#allocation2] sm:$0xff] %vm11473_vm2, %v2622_v6  ;;  %v9108_v6 = vcombine.high %v11707_v15, %v11707_v15 }
 0x201   :  { %1970 = vst.msk [vmem:[#allocation2 + $0x10] sm:$0xff] %vm11474_vm11, %v1923_v14 }
 0x202   :  { %3296 = vrot.lane.b32.xlu1 %v8338_v40, %s6723_s1 }
 0x203   :  { %2124 = vrot.lane.b32.xlu0 %v8363_v30, %s6713_s20  ;;  %v2703_v17 = vpop.permute.xlu1 %2702  ;;  %v2119_v14 = vpop.permute.xlu0 %2118 }
 0x204   :  { %2751 = vst.msk [vmem:[#allocation2] sm:$0xff] %vm2750_vm3, %v2703_v17  ;;  %v6123_v17 = vrot.slane %v8298_v45, 10  ;;  %v2697_v45 = vrot.slane %v2695_v60, 4 }
 0x205   :  { %2818 = vst.msk [vmem:[#allocation2] sm:$0xff] %vm2817_vm4, %v8883_v33  ;;  %v2536_v33 = vrot.slane %v8273_v58, 5 }
 0x206   :  { %2166 = vst.msk [vmem:[#allocation2 + $0x10] sm:$0xff] %vm11488_vm12, %v2119_v14  ;;  %3083 = vrot.lane.b32.xlu1 %v8372_v31, %s11502_s29  ;;  %v2617_v14 = vrot.slane %v8273_v58, 6  ;;  %v2615_v28 = vsel %vm7915_vm10, %v6123_v17, %v2614_v18  ;;  %v11711_v18 = vld [vmem:[#allocation20_spill] sm:$0xff] }
 0x207   :  { %2319 = vrot.lane.b32.xlu0 %v8372_v31, %s6712_s19  ;;  %2885 = vst.msk [vmem:[#allocation2] sm:$0xff] %vm11504_vm5, %v8914_v50  ;;  %v9136_v19 = vpop.permute.xlu1 %2463  ;;  %v2314_v51 = vpop.permute.xlu0 %2313  ;;  %v2537_v50 = vsel %vm7865_vm9, %v2535_v8, %v2536_v33  ;;  %v2696_v33 = vsel %vm7847_vm8, %v6125_v53, %v2695_v60  ;;  %v2699_v53 = vsel %vm7847_vm8, %v2697_v45, %v2698_v41  ;;  %v6129_v60 = vrot.slane %v1735_v24, 10 }
 0x208   :  { %2361 = vst.msk [vmem:[#allocation2 + $0x10] sm:$0xff] %vm11475_vm13, %v2314_v51  ;;  %v9156_v17 = vcombine.low %v2534_v12, %v2537_v50  ;;  %v2618_v8 = vsel %vm7915_vm10, %v2616_v44, %v2617_v14  ;;  %v6127_v51 = vrot.slane %v1735_v24, 9  ;;  %v2913_v12 = vrot.slane %v9151_v48, 5 }
 0x209   :  { %2442 = vst.msk [vmem:[#allocation2 + $0x10] sm:$0xff] %vm11471_vm14, %v8844_v5  ;;  %v9166_v58 = vcombine.low %v2615_v28, %v2618_v8  ;;  %v2991_v5 = vrot.slane %v11710_v7, 6  ;;  %v9180_v14 = vcombine.low %v2696_v33, %v2699_v53  ;;  %v2912_v8 = vrot.slane %v2910_v43, 4 }
 0x20a   :  { %3921 = vrot.lane.b32.xlu1 %v11711_v18, %s6725_s0  ;;  %11712 = vst [vmem:[#allocation20_spill] sm:$0xff] %v9156_v17  ;;  %2509 = vst.msk [vmem:[#allocation2 + $0x10] sm:$0xff] %vm11472_vm15, %v8874_v9  ;;  %v2911_v50 = vsel %vm7865_vm9, %v6127_v51, %v2910_v43  ;;  %v9185_v9 = vcombine.low %v1735_v24, %v11710_v7  ;;  %v3072_v17 = vrot.slane %v11710_v7, 7  ;;  %v3075_v51 = vrot.slane %v9151_v48, 7 }
 0x20b   :  { %2921 = vrot.lane.b32.xlu0 %v8338_v40, %s6722_s30  ;;  %11713 = vst [vmem:[#allocation69_spill] sm:$0xff] %v9166_v58  ;;  %v9172_v44 = vpop.permute.xlu1 %3213  ;;  %v2994_v40 = vrot.slane %v9151_v48, 6  ;;  %v9178_v28 = vpop.permute.xlu0 %2838  ;;  %11714 = vst [vmem:[#allocation70_spill] sm:$0xff] %v9180_v14  ;;  %v2992_v45 = vsel %vm7915_vm10, %v6129_v60, %v2991_v5  ;;  %v2993_v41 = vrot.slane %v2991_v5, 4  ;;  %v6131_v58 = vrot.slane %v1735_v24, 11 }
 0x20c   :  { %11715 = vst [vmem:[#allocation71_spill] sm:$0xff] %v9185_v9  ;;  %v9196_v33 = vcombine.low %v8254_v39, %v8423_v63  ;;  %v2914_v43 = vsel %vm7865_vm9, %v2912_v8, %v2913_v12  ;;  %v6135_v53 = vrot.slane %v8311_v49, 10  ;;  %v3074_v7 = vrot.slane %v3072_v17, 4 }
 0x20d   :  { %v9202_v60 = vcombine.low %v2911_v50, %v2914_v43  ;;  %v2995_v24 = vsel %vm7915_vm10, %v2993_v41, %v2994_v40  ;;  %v3073_v5 = vsel %vm7847_vm8, %v6131_v58, %v3072_v17  ;;  %v3368_v63 = vrot.slane %v9119_v11, 6 }
 0x20e   :  { %3154 = vrot.lane.b32.xlu1 %v11711_v18, %s6714_s21  ;;  %v9208_v39 = vcombine.low %v2992_v45, %v2995_v24  ;;  %v6133_v12 = vrot.slane %v8311_v49, 9  ;;  %v3287_v8 = vrot.slane %v9119_v11, 5  ;;  %v3076_v40 = vsel %vm7847_vm8, %v3074_v7, %v3075_v51 }
 0x20f   :  { %3002 = vrot.lane.b32.xlu0 %v8363_v30, %s11505_s28  ;;  %v2121_v9 = vpop.permute.xlu1 %2120  ;;  %v1925_v14 = vpop.permute.xlu0 %1924  ;;  %v9220_v17 = vcombine.low %v9119_v11, %v11706_v21  ;;  %v6137_v58 = vrot.slane %v8311_v49, 11  ;;  %v3452_v50 = vrot.slane %v11706_v21, 7  ;;  %v3369_v45 = vsel %vm7915_vm10, %v6135_v53, %v3368_v63 }
 0x210   :  { %1971 = vst.msk [vmem:[#allocation2 + $0x20] sm:$0xff] %vm11474_vm11, %v1925_v14  ;;  %v9227_v14 = vcombine.low %v3073_v5, %v3076_v40  ;;  %v3370_v41 = vrot.slane %v3368_v63, 4  ;;  %v3288_v7 = vsel %vm7865_vm9, %v6133_v12, %v3287_v8  ;;  %v3289_v51 = vrot.slane %v3287_v8, 4 }
 0x211   :  { %11716 = vst [vmem:[#allocation72_spill] sm:$0xff] %v9220_v17  ;;  %2167 = vst.msk [vmem:[#allocation2 + $0x20] sm:$0xff] %vm11488_vm12, %v2121_v9  ;;  %v3449_v24 = vrot.slane %v9119_v11, 7  ;;  %v6139_v17 = vrot.slane %v9104_v42, 9  ;;  %v3664_v9 = vrot.slane %v11707_v15, 5  ;;  %v3667_v53 = vrot.slane %v9108_v6, 5 }
 0x212   :  { %3923 = vrot.lane.b32.xlu1 %v9196_v33, %s6725_s0  ;;  %v6141_v63 = vrot.slane %v9104_v42, 10  ;;  %v3762_v12 = vrot.slane %v11707_v15, 6  ;;  %v11718_v40 = vrot.slane %v11706_v21, 5 }
 0x213   :  { %3377 = vrot.lane.b32.xlu0 %v8363_v30, %s11495_s12  ;;  %v2624_v43 = vpop.permute.xlu1 %2623  ;;  %v2543_v49 = vpop.permute.xlu0 %2542  ;;  %v11717_v30 = vrot.slane %v11706_v21, 6 }
 0x214   :  { %2590 = vst.msk [vmem:[#allocation2 + $0x10] sm:$0xff] %vm11483_vm1, %v2543_v49  ;;  %v3291_v11 = vsel %vm7865_vm9, %v3289_v51, %v11718_v40  ;;  %v9265_v21 = vsel %vm7915_vm10, %v6141_v63, %v3762_v12  ;;  %v3846_v63 = vrot.slane %v9108_v6, 7 }
 0x215   :  { %v3372_v5 = vsel %vm7915_vm10, %v3370_v41, %v11717_v30  ;;  %v3450_v41 = vsel %vm7847_vm8, %v6137_v58, %v3449_v24  ;;  %v3451_v30 = vrot.slane %v3449_v24, 4  ;;  %2671 = vst.msk [vmem:[#allocation2 + $0x10] sm:$0xff] %vm11473_vm2, %v2624_v43  ;;  %v9257_v49 = vcombine.low %v3288_v7, %v3291_v11 }
 0x216   :  { %3156 = vrot.lane.b32.xlu1 %v9196_v33, %s6714_s21  ;;  %v9246_v8 = vcombine.low %v3369_v45, %v3372_v5  ;;  %v9261_v45 = vsel %vm7865_vm9, %v6139_v17, %v3664_v9  ;;  %v3666_v5 = vrot.slane %v3664_v9, 4  ;;  %v3764_v24 = vrot.slane %v3762_v12, 4 }
 0x217   :  { %3458 = vrot.lane.b32.xlu0 %v8372_v31, %s11719_s13  ;;  %v2999_v51 = vpop.permute.xlu1 %2998  ;;  %v3453_v58 = vsel %vm7847_vm8, %v3451_v30, %v3452_v50  ;;  %v3765_v43 = vrot.slane %v9108_v6, 6  ;;  %v6143_v31 = vrot.slane %v9104_v42, 11  ;;  %v2316_v11 = vpop.permute.xlu0 %2315  ;;  %v3843_v9 = vrot.slane %v11707_v15, 7 }
 0x218   :  { %v9271_v7 = vcombine.low %v3450_v41, %v3453_v58  ;;  %v9275_v17 = vsel %vm7865_vm9, %v3666_v5, %v3667_v53  ;;  %2362 = vst.msk [vmem:[#allocation2 + $0x20] sm:$0xff] %vm11475_vm13, %v2316_v11 }
 0x219   :  { %v9286_v12 = vsel %vm7915_vm10, %v3764_v24, %v3765_v43  ;;  %2443 = vst.msk [vmem:[#allocation2 + $0x20] sm:$0xff] %vm11471_vm14, %v9010_v61  ;;  %v9298_v41 = vsel %vm7847_vm8, %v6143_v31, %v3843_v9  ;;  %v3845_v30 = vrot.slane %v3843_v9, 4  ;;  %vm11490_vm14 = vcmask 736928  }
 0x21a   :  { %3673 = vrot.lane.b32.xlu1 %v8417_v46, %s6729_s2  ;;  %2510 = vst.msk [vmem:[#allocation2 + $0x20] sm:$0xff] %vm11472_vm15, %v9136_v19  ;;  %vm11489_vm15 = vcmask 786128  }
 0x21b   :  { %2404 = vrot.lane.b32.xlu0 %v11711_v18, %s11478_s14  ;;  %v3080_v5 = vpop.permute.xlu1 %3079  ;;  %v2918_v58 = vpop.permute.xlu0 %2917  ;;  %v9304_v61 = vsel %vm7847_vm8, %v3845_v30, %v3846_v63  ;;  %v11723_v63 = vld [vmem:[#allocation21_spill] sm:$0xff] }
 0x21c   :  { %2966 = vst.msk [vmem:[#allocation2] sm:$0xff] %vm2965_vm6, %v2918_v58 }
 0x21d   :  { %3047 = vst.msk [vmem:[#allocation2] sm:$0xff] %vm3046_vm7, %v2999_v51 }
 0x21e   :  { %2548 = vrot.lane.b32.xlu1 %v8417_v46, %s11497_s22  ;;  %3128 = vst.msk [vmem:[#allocation2] sm:$0xff] %vm11476_vm0, %v3080_v5 }
 0x21f   :  { %2779 = vrot.lane.b32.xlu0 %v11711_v18, %s11499_s16  ;;  %v2545_v19 = vpop.permute.xlu1 %2544  ;;  %v2705_v43 = vpop.permute.xlu0 %2704  ;;  %3195 = vst.msk [vmem:[#allocation2] sm:$0xff] %vm11490_vm14, %v9039_v55 }
 0x220   :  { %2591 = vst.msk [vmem:[#allocation2 + $0x20] sm:$0xff] %vm11483_vm1, %v2545_v19 }
 0x221   :  { %2752 = vst.msk [vmem:[#allocation2 + $0x10] sm:$0xff] %vm2750_vm3, %v2705_v43 }
 0x222   :  { %3771 = vrot.lane.b32.xlu1 %v8432_v37, %s6730_s15  ;;  %3262 = vst.msk [vmem:[#allocation2] sm:$0xff] %vm11489_vm15, %v9172_v44 }
 0x223   :  { %2819 = vst.msk [vmem:[#allocation2 + $0x10] sm:$0xff] %vm2817_vm4, %v9015_v52  ;;  %3529 = vrot.lane.b32.xlu0 %v11711_v18, %s11491_s23  ;;  %v2626_v51 = vpop.permute.xlu1 %2625  ;;  %v1927_v55 = vpop.permute.xlu0 %1926 }
 0x224   :  { %2886 = vst.msk [vmem:[#allocation2 + $0x10] sm:$0xff] %vm11504_vm5, %v9178_v28 }
 0x225   :  { %2672 = vst.msk [vmem:[#allocation2 + $0x20] sm:$0xff] %vm11473_vm2, %v2626_v51  ;;  %vm11487_vm2 = vcmask 835328  }
 0x226   :  { %1972 = vst.msk [vmem:[#allocation2 + $0x30] sm:$0xff] %vm11474_vm11, %v1927_v55  ;;  %2629 = vrot.lane.b32.xlu1 %v8432_v37, %s6717_s24  ;;  %vm11720_vm11 = vcmask 244928  }
 0x227   :  { %2406 = vrot.lane.b32.xlu0 %v9196_v33, %s11478_s14  ;;  %v2707_v44 = vpop.permute.xlu1 %2706  ;;  %v2123_v52 = vpop.permute.xlu0 %2122  ;;  %s11727_s14 = smov 120  }
 0x228   :  { %2753 = vst.msk [vmem:[#allocation2 + $0x20] sm:$0xff] %vm2750_vm3, %v2707_v44 }
 0x229   :  { %2820 = vst.msk [vmem:[#allocation2 + $0x20] sm:$0xff] %vm2817_vm4, %v9063_v16 }
 0x22a   :  { %2168 = vst.msk [vmem:[#allocation2 + $0x30] sm:$0xff] %vm11488_vm12, %v2123_v52  ;;  %3852 = vrot.lane.b32.xlu1 %v8440_v38, %s11493_s3  ;;  %v11726_v52 = vld [vmem:[#allocation22_spill] sm:$0xff] }
 0x22b   :  { %2781 = vrot.lane.b32.xlu0 %v9196_v33, %s11499_s16  ;;  %v3295_v18 = vpop.permute.xlu1 %3294  ;;  %v2318_v28 = vpop.permute.xlu0 %2317 }
 0x22c   :  { %3343 = vst.msk [vmem:[#allocation2] sm:$0xff] %vm11487_vm2, %v3295_v18 }
 0x22d   :  { %2363 = vst.msk [vmem:[#allocation2 + $0x30] sm:$0xff] %vm11475_vm13, %v2318_v28  ;;  %vm11721_vm13 = vcmask 294128  }
 0x22e   :  { %2710 = vrot.lane.b32.xlu1 %v8440_v38, %s6718_s25  ;;  %2444 = vst.msk [vmem:[#allocation2 + $0x30] sm:$0xff] %vm11720_vm11, %v9043_v22  ;;  %vm11482_vm11 = vcmask 884528  }
 0x22f   :  { %3531 = vrot.lane.b32.xlu0 %v9196_v33, %s11491_s23 }
 0x230   :  { %v3082_v16 = vpop.permute.xlu1 %3081 }
 0x231   :  { %v2920_v31 = vpop.permute.xlu0 %2919 }
 0x232   :  { %2967 = vst.msk [vmem:[#allocation2 + $0x10] sm:$0xff] %vm2965_vm6, %v2920_v31  ;;  %3298 = vrot.lane.b32.xlu1 %v8417_v46, %s6723_s1 }
 0x233   :  { %1930 = vrot.lane.b32.xlu0 %v8417_v46, %s6711_s18 }
 0x234   :  { %v2466_v11 = vpop.permute.xlu1 %2465 }
 0x235   :  { %2511 = vst.msk [vmem:[#allocation2 + $0x30] sm:$0xff] %vm11721_vm13, %v2466_v11  ;;  %v3001_v9 = vpop.permute.xlu0 %3000  ;;  %vm11481_vm13 = vcmask 933728  }
 0x236   :  { %3048 = vst.msk [vmem:[#allocation2 + $0x10] sm:$0xff] %vm3046_vm7, %v3001_v9  ;;  %3085 = vrot.lane.b32.xlu1 %v8440_v38, %s11502_s29 }
 0x237   :  { %3129 = vst.msk [vmem:[#allocation2 + $0x10] sm:$0xff] %vm11476_vm0, %v3082_v16  ;;  %2126 = vrot.lane.b32.xlu0 %v8432_v37, %s6713_s20  ;;  %vm11477_vm0 = vcmask 982928  }
 0x238   :  { %3196 = vst.msk [vmem:[#allocation2 + $0x10] sm:$0xff] %vm11490_vm14, %v9057_v3  ;;  %v3216_v22 = vpop.permute.xlu1 %3215 }
 0x239   :  { %3263 = vst.msk [vmem:[#allocation2 + $0x10] sm:$0xff] %vm11489_vm15, %v3216_v22  ;;  %v3376_v33 = vpop.permute.xlu0 %3375 }
 0x23a   :  { %3424 = vst.msk [vmem:[#allocation2] sm:$0xff] %vm11482_vm11, %v3376_v33  ;;  %2471 = vrot.lane.b32.xlu1 %v11723_v63, %s11722_s27  ;;  %v11728_v33 = vld [vmem:[#allocation23_spill] sm:$0xff]  ;;  %vm11485_vm11 = vcmask 80928  }
 0x23b   :  { %2321 = vrot.lane.b32.xlu0 %v8440_v38, %s6712_s19 }
 0x23c   :  { %v9371_v30 = vpop.permute.xlu1 %3917 }
 0x23d   :  { %v3457_v5 = vpop.permute.xlu0 %3456 }
 0x23e   :  { %3505 = vst.msk [vmem:[#allocation2] sm:$0xff] %vm11481_vm13, %v3457_v5  ;;  %3221 = vrot.lane.b32.xlu1 %v11723_v63, %s11724_s26  ;;  %vm11484_vm13 = vcmask 31744  }
 0x23f   :  { %2923 = vrot.lane.b32.xlu0 %v8417_v46, %s6722_s30  ;;  %3572 = vst.msk [vmem:[#allocation2] sm:$0xff] %vm11477_vm0, %v9080_v10  ;;  %vm11480_vm0 = vcmask 1032128  }
 0x240   :  { %v9380_v3 = vpop.permute.xlu1 %3150 }
 0x241   :  { %v2841_v58 = vpop.permute.xlu0 %2840 }
 0x242   :  { %2887 = vst.msk [vmem:[#allocation2 + $0x20] sm:$0xff] %vm11504_vm5, %v2841_v58  ;;  %3675 = vrot.lane.b32.xlu1 %v8464_v2, %s6729_s2 }
 0x243   :  { %3004 = vrot.lane.b32.xlu0 %v8432_v37, %s11505_s28 }
 0x244   :  { %v9387_v19 = vpop.permute.xlu1 %2467 }
 0x245   :  { %v9389_v43 = vpop.permute.xlu0 %2400 }
 0x246   :  { %2550 = vrot.lane.b32.xlu1 %v8464_v2, %s11497_s22 }
 0x247   :  { %3379 = vrot.lane.b32.xlu0 %v8432_v37, %s11495_s12 }
 0x248   :  { %v9395_v46 = vpop.permute.xlu1 %3217 }
 0x249   :  { %v3591_v10 = vpop.permute.xlu0 %3590 }
 0x24a   :  { %3639 = vst.msk [vmem:[#allocation2] sm:$0xff] %vm11480_vm0, %v3591_v10  ;;  %3773 = vrot.lane.b32.xlu1 %v8472_v56, %s6730_s15  ;;  %vm3719_vm0 = vcmask 1048560  }
 0x24b   :  { %3460 = vrot.lane.b32.xlu0 %v8440_v38, %s11719_s13 }
 0x24c   :  { %v9402_v51 = vpop.permute.xlu1 %2469 }
 0x24d   :  { %v2776_v55 = vpop.permute.xlu0 %2775 }
 0x24e   :  { %2631 = vrot.lane.b32.xlu1 %v8472_v56, %s6717_s24 }
 0x24f   :  { %2846 = vrot.lane.b32.xlu0 %v11723_v63, %s11725_s17 }
 0x250   :  { %v9408_v37 = vpop.permute.xlu1 %3219 }
 0x251   :  { %v9410_v44 = vpop.permute.xlu0 %3525 }
 0x252   :  { %3854 = vrot.lane.b32.xlu1 %v11726_v52, %s11493_s3 }
 0x253   :  { %3596 = vrot.lane.b32.xlu0 %v11723_v63, %s11727_s14 }
 0x254   :  { %v9416_v38 = vpop.permute.xlu1 %3919 }
 0x255   :  { %v2843_v18 = vpop.permute.xlu0 %2842 }
 0x256   :  { %2712 = vrot.lane.b32.xlu1 %v11726_v52, %s6718_s25 }
 0x257   :  { %1932 = vrot.lane.b32.xlu0 %v8464_v2, %s6711_s18 }
 0x258   :  { %v9422_v28 = vpop.permute.xlu1 %3152 }
 0x259   :  { %v9424_v16 = vpop.permute.xlu0 %3592 }
 0x25a   :  { %3300 = vrot.lane.b32.xlu1 %v8464_v2, %s6723_s1 }
 0x25b   :  { %2128 = vrot.lane.b32.xlu0 %v8472_v56, %s6713_s20 }
 0x25c   :  { %v3672_v31 = vpop.permute.xlu1 %3671 }
 0x25d   :  { %3720 = vst.msk [vmem:[#allocation2] sm:$0xff] %vm3719_vm0, %v3672_v31  ;;  %v9432_v11 = vpop.permute.xlu0 %2844 }
 0x25e   :  { %3722 = vst.msk [vmem:[#allocation2 + $0x8] sm:$0xff] %vm11484_vm13, %v3672_v31  ;;  %3087 = vrot.lane.b32.xlu1 %v11726_v52, %s11502_s29  ;;  %v11730_v31 = vld [vmem:[#allocation28_spill] sm:$0xff]  ;;  %vm3898_vm13 = vcmask 130128  }
 0x25f   :  { %2323 = vrot.lane.b32.xlu0 %v11726_v52, %s6712_s19 }
 0x260   :  { %v2547_v9 = vpop.permute.xlu1 %2546 }
 0x261   :  { %2592 = vst.msk [vmem:[#allocation2 + $0x30] sm:$0xff] %vm11483_vm1, %v2547_v9  ;;  %v9439_v22 = vpop.permute.xlu0 %3594  ;;  %vm11729_vm1 = vcmask 392528  }
 0x262   :  { %3677 = vrot.lane.b32.xlu1 %v11728_v33, %s6729_s2 }
 0x263   :  { %2925 = vrot.lane.b32.xlu0 %v8464_v2, %s6722_s30 }
 0x264   :  { %v3770_v63 = vpop.permute.xlu1 %3769 }
 0x265   :  { %3818 = vst.msk [vmem:[#allocation2 + $0x8] sm:$0xff] %vm11485_vm11, %v3770_v63  ;;  %v9446_v5 = vpop.permute.xlu0 %2402  ;;  %vm11486_vm11 = vcmask 179328  }
 0x266   :  { %2552 = vrot.lane.b32.xlu1 %v11728_v33, %s11497_s22 }
 0x267   :  { %3006 = vrot.lane.b32.xlu0 %v8472_v56, %s11505_s28 }
 0x268   :  { %v2628_v58 = vpop.permute.xlu1 %2627 }
 0x269   :  { %2673 = vst.msk [vmem:[#allocation2 + $0x30] sm:$0xff] %vm11729_vm1, %v2628_v58  ;;  %v9453_v10 = vpop.permute.xlu0 %2777  ;;  %vm11731_vm1 = vcmask 97328  }
 0x26a   :  { %3775 = vrot.lane.b32.xlu1 %v11730_v31, %s6730_s15 }
 0x26b   :  { %3381 = vrot.lane.b32.xlu0 %v8472_v56, %s11495_s12  ;;  %v11732_v56 = vld [vmem:[#allocation29_spill] sm:$0xff] }
 0x26c   :  { %v3851_v2 = vpop.permute.xlu1 %3850 }
 0x26d   :  { %3899 = vst.msk [vmem:[#allocation2 + $0x8] sm:$0xff] %vm3898_vm13, %v3851_v2  ;;  %v9460_v9 = vpop.permute.xlu0 %3527 }
 0x26e   :  { %3966 = vst.msk [vmem:[#allocation2 + $0x8] sm:$0xff] %vm11486_vm11, %v9371_v30  ;;  %2633 = vrot.lane.b32.xlu1 %v11730_v31, %s6717_s24  ;;  %vm4040_vm11 = vcmask 179200  }
 0x26f   :  { %3462 = vrot.lane.b32.xlu0 %v11726_v52, %s11719_s13 }
 0x270   :  { %v2709_v63 = vpop.permute.xlu1 %2708 }
 0x271   :  { %2754 = vst.msk [vmem:[#allocation2 + $0x30] sm:$0xff] %vm2750_vm3, %v2709_v63  ;;  %v1929_v58 = vpop.permute.xlu0 %1928 }
 0x272   :  { %2821 = vst.msk [vmem:[#allocation2 + $0x30] sm:$0xff] %vm2817_vm4, %v2776_v55  ;;  %3856 = vrot.lane.b32.xlu1 %v11732_v56, %s11493_s3  ;;  %v3982_v55 = vld [vmem:[#allocation2] sm:$0xff] }
 0x273   :  { %1973 = vst.msk [vmem:[#allocation2 + $0x40] sm:$0xff] %vm11731_vm1, %v1929_v58  ;;  %1934 = vrot.lane.b32.xlu0 %v11728_v33, %s6711_s18  ;;  %vm11733_vm1 = vcmask 195728  }
 0x274   :  { %2888 = vst.msk [vmem:[#allocation2 + $0x30] sm:$0xff] %vm11504_vm5, %v2843_v18  ;;  %v3297_v30 = vpop.permute.xlu1 %3296 }
 0x275   :  { %3344 = vst.msk [vmem:[#allocation2 + $0x10] sm:$0xff] %vm11487_vm2, %v3297_v30  ;;  %v2125_v52 = vpop.permute.xlu0 %2124  ;;  %v3983_v2 = vld [vmem:[#allocation2 + $0x8] sm:$0xff]  ;;  %vm11734_vm2 = vcmask 244928  }
 0x276   :  { %2169 = vst.msk [vmem:[#allocation2 + $0x40] sm:$0xff] %vm11488_vm12, %v2125_v52  ;;  %2714 = vrot.lane.b32.xlu1 %v11732_v56, %s6718_s25  ;;  %6146 = vmatprep.mubr.msk.f32.mxu1 %vm4040_vm11, %v3983_v2  ;;  %vm11735_vm12 = vcmask 294128   ;;  %v11737_v2 = vld [vmem:[#allocation32_spill] sm:$0xff] }
 0x277   :  { %2130 = vrot.lane.b32.xlu0 %v11730_v31, %s6713_s20  ;;  %4158 = vmatmul.mubr.f32.vlgmr.msra.gmra.mxu1 %v3982_v55 }
 0x278   :  { %v3084_v18 = vpop.permute.xlu1 %3083 }
 0x279   :  { %v2320_v63 = vpop.permute.xlu0 %2319 }
 0x27a   :  { %2364 = vst.msk [vmem:[#allocation2 + $0x40] sm:$0xff] %vm11733_vm1, %v2320_v63  ;;  %3302 = vrot.lane.b32.xlu1 %v11728_v33, %s6723_s1  ;;  %vm11740_vm1 = vcmask 933728  }
 0x27b   :  { %2445 = vst.msk [vmem:[#allocation2 + $0x40] sm:$0xff] %vm11734_vm2, %v9389_v43  ;;  %2325 = vrot.lane.b32.xlu0 %v11732_v56, %s6712_s19  ;;  %v11736_v43 = vld [vmem:[#allocation16_spill] sm:$0xff]  ;;  %vm11739_vm2 = vcmask 884528  }
 0x27c   :  { %2512 = vst.msk [vmem:[#allocation2 + $0x40] sm:$0xff] %vm11735_vm12, %v9387_v19  ;;  %v9492_v58 = vpop.permute.xlu1 %3921  ;;  %v2457_v55 = vcombine.low %v11737_v2, %v11736_v43  ;;  %vm11738_vm12 = vcmask 687728   ;;  %v9544_v2 = vcombine.low %v7973_v47, %v8358_v4 }
 0x27d   :  { %v2922_v30 = vpop.permute.xlu0 %2921 }
 0x27e   :  { %2968 = vst.msk [vmem:[#allocation2 + $0x20] sm:$0xff] %vm2965_vm6, %v2922_v30  ;;  %3089 = vrot.lane.b32.xlu1 %v11732_v56, %s11502_s29 }
 0x27f   :  { %2927 = vrot.lane.b32.xlu0 %v11728_v33, %s6722_s30 }
 0x280   :  { %v9499_v52 = vpop.permute.xlu1 %3154 }
 0x281   :  { %v3003_v63 = vpop.permute.xlu0 %3002 }
 0x282   :  { %3049 = vst.msk [vmem:[#allocation2 + $0x20] sm:$0xff] %vm3046_vm7, %v3003_v63  ;;  %2473 = vrot.lane.b32.xlu1 %v2457_v55, %s11722_s27 }
 0x283   :  { %3130 = vst.msk [vmem:[#allocation2 + $0x20] sm:$0xff] %vm11738_vm12, %v3084_v18  ;;  %3008 = vrot.lane.b32.xlu0 %v11730_v31, %s11505_s28  ;;  %vm11742_vm12 = vcmask 982928  }
 0x284   :  { %3197 = vst.msk [vmem:[#allocation2 + $0x20] sm:$0xff] %vm11490_vm14, %v9380_v3  ;;  %v9510_v19 = vpop.permute.xlu1 %3923  ;;  %v11741_v3 = vld [vmem:[#allocation24_spill] sm:$0xff] }
 0x285   :  { %3264 = vst.msk [vmem:[#allocation2 + $0x20] sm:$0xff] %vm11489_vm15, %v9395_v46  ;;  %v3378_v33 = vpop.permute.xlu0 %3377  ;;  %vm11744_vm15 = vcmask 31744  }
 0x286   :  { %3425 = vst.msk [vmem:[#allocation2 + $0x10] sm:$0xff] %vm11739_vm2, %v3378_v33  ;;  %3223 = vrot.lane.b32.xlu1 %v2457_v55, %s11724_s26  ;;  %vm11743_vm2 = vcmask 1032128  }
 0x287   :  { %3383 = vrot.lane.b32.xlu0 %v11730_v31, %s11495_s12 }
 0x288   :  { %v9518_v18 = vpop.permute.xlu1 %3156 }
 0x289   :  { %v3459_v30 = vpop.permute.xlu0 %3458 }
 0x28a   :  { %3506 = vst.msk [vmem:[#allocation2 + $0x10] sm:$0xff] %vm11740_vm1, %v3459_v30  ;;  %3925 = vrot.lane.b32.xlu1 %v11741_v3, %s6725_s0  ;;  %vm11745_vm1 = vcmask 343328   ;;  %v3144_v30 = vcombine.low %v11641_v23, %v8539_v36 }
 0x28b   :  { %3573 = vst.msk [vmem:[#allocation2 + $0x10] sm:$0xff] %vm11742_vm12, %v9410_v44  ;;  %3464 = vrot.lane.b32.xlu0 %v11732_v56, %s11719_s13  ;;  %v11746_v56 = vld [vmem:[#allocation27_spill] sm:$0xff]  ;;  %vm11748_vm12 = vcmask 392528  }
 0x28c   :  { %3640 = vst.msk [vmem:[#allocation2 + $0x10] sm:$0xff] %vm11743_vm2, %v9424_v16  ;;  %v3674_v46 = vpop.permute.xlu1 %3673  ;;  %vm11749_vm2 = vcmask 179328  }
 0x28d   :  { %3723 = vst.msk [vmem:[#allocation2 + $0x10] sm:$0xff] %vm3719_vm0, %v3674_v46  ;;  %v9531_v31 = vpop.permute.xlu0 %2404 }
 0x28e   :  { %3724 = vst.msk [vmem:[#allocation2 + $0x18] sm:$0xff] %vm11744_vm15, %v3674_v46  ;;  %3158 = vrot.lane.b32.xlu1 %v11741_v3, %s6714_s21  ;;  %vm11747_vm15 = vcmask 80928  }
 0x28f   :  { %2848 = vrot.lane.b32.xlu0 %v2457_v55, %s11725_s17 }
 0x290   :  { %v2549_v43 = vpop.permute.xlu1 %2548 }
 0x291   :  { %2593 = vst.msk [vmem:[#allocation2 + $0x40] sm:$0xff] %vm11745_vm1, %v2549_v43  ;;  %v9537_v44 = vpop.permute.xlu0 %2779  ;;  %vm11750_vm1 = vcmask 835328  }
 0x292   :  { %3225 = vrot.lane.b32.xlu1 %v11746_v56, %s11724_s26 }
 0x293   :  { %3598 = vrot.lane.b32.xlu0 %v2457_v55, %s11727_s14 }
 0x294   :  { %v3772_v16 = vpop.permute.xlu1 %3771 }
 0x295   :  { %3819 = vst.msk [vmem:[#allocation2 + $0x18] sm:$0xff] %vm11747_vm15, %v3772_v16  ;;  %v9547_v63 = vpop.permute.xlu0 %3529  ;;  %vm11751_vm15 = vcmask 97328  }
 0x296   :  { %3227 = vrot.lane.b32.xlu1 %v9544_v2, %s11724_s26 }
 0x297   :  { %2783 = vrot.lane.b32.xlu0 %v11741_v3, %s11499_s16 }
 0x298   :  { %v2630_v33 = vpop.permute.xlu1 %2629 }
 0x299   :  { %2674 = vst.msk [vmem:[#allocation2 + $0x40] sm:$0xff] %vm11748_vm12, %v2630_v33  ;;  %v9556_v55 = vpop.permute.xlu0 %2406  ;;  %vm11752_vm12 = vcmask 146528  }
 0x29a   :  { %3927 = vrot.lane.b32.xlu1 %v3144_v30, %s6725_s0 }
 0x29b   :  { %3533 = vrot.lane.b32.xlu0 %v11741_v3, %s11491_s23 }
 0x29c   :  { %v3853_v46 = vpop.permute.xlu1 %3852 }
 0x29d   :  { %3900 = vst.msk [vmem:[#allocation2 + $0x18] sm:$0xff] %vm3898_vm13, %v3853_v46  ;;  %v9562_v43 = vpop.permute.xlu0 %2781 }
 0x29e   :  { %3967 = vst.msk [vmem:[#allocation2 + $0x18] sm:$0xff] %vm11749_vm2, %v9416_v38  ;;  %3160 = vrot.lane.b32.xlu1 %v3144_v30, %s6714_s21  ;;  %vm11754_vm2 = vcmask 195728  }
 0x29f   :  { %2850 = vrot.lane.b32.xlu0 %v11746_v56, %s11725_s17 }
 0x2a0   :  { %v2711_v23 = vpop.permute.xlu1 %2710 }
 0x2a1   :  { %2755 = vst.msk [vmem:[#allocation2 + $0x40] sm:$0xff] %vm2750_vm3, %v2711_v23  ;;  %v9570_v36 = vpop.permute.xlu0 %3531 }
 0x2a2   :  { %2822 = vst.msk [vmem:[#allocation2 + $0x40] sm:$0xff] %vm2817_vm4, %v9453_v10  ;;  %3679 = vrot.lane.b32.xlu1 %v8570_v62, %s6729_s2  ;;  %v3984_v10 = vld [vmem:[#allocation2 + $0x10] sm:$0xff] }
 0x2a3   :  { %2889 = vst.msk [vmem:[#allocation2 + $0x40] sm:$0xff] %vm11504_vm5, %v9432_v11  ;;  %3600 = vrot.lane.b32.xlu0 %v11746_v56, %s11727_s14  ;;  %v11753_v56 = vld [vmem:[#allocation30_spill] sm:$0xff] }
 0x2a4   :  { %v3299_v38 = vpop.permute.xlu1 %3298 }
 0x2a5   :  { %3345 = vst.msk [vmem:[#allocation2 + $0x20] sm:$0xff] %vm11750_vm1, %v3299_v38  ;;  %v1931_v3 = vpop.permute.xlu0 %1930  ;;  %v3985_v16 = vld [vmem:[#allocation2 + $0x18] sm:$0xff]  ;;  %vm11755_vm1 = vcmask 244928  }
 0x2a6   :  { %1974 = vst.msk [vmem:[#allocation2 + $0x50] sm:$0xff] %vm11751_vm15, %v1931_v3  ;;  %2554 = vrot.lane.b32.xlu1 %v8570_v62, %s11497_s22  ;;  %6147 = vmatprep.mubr.msk.f32.mxu1 %vm4040_vm11, %v3985_v16  ;;  %vm11756_vm15 = vcmask 294128   ;;  %v11757_v3 = vld [vmem:[#allocation31_spill] sm:$0xff] }
 0x2a7   :  { %3535 = vrot.lane.b32.xlu0 %v3144_v30, %s11491_s23  ;;  %4163 = vmatmul.mubr.f32.gmra.mxu1 %v3984_v10  ;;  %s11773_s23 = smov 24  }
 0x2a8   :  { %v3086_v11 = vpop.permute.xlu1 %3085 }
 0x2a9   :  { %v2127_v33 = vpop.permute.xlu0 %2126 }
 0x2aa   :  { %2170 = vst.msk [vmem:[#allocation2 + $0x50] sm:$0xff] %vm11752_vm12, %v2127_v33  ;;  %3777 = vrot.lane.b32.xlu1 %v11753_v56, %s6730_s15  ;;  %vm11758_vm12 = vcmask 31744  }
 0x2ab   :  { %2929 = vrot.lane.b32.xlu0 %v8570_v62, %s6722_s30 }
 0x2ac   :  { %v9591_v46 = vpop.permute.xlu1 %2471 }
 0x2ad   :  { %v2322_v23 = vpop.permute.xlu0 %2321 }
 0x2ae   :  { %2365 = vst.msk [vmem:[#allocation2 + $0x50] sm:$0xff] %vm11754_vm2, %v2322_v23  ;;  %2635 = vrot.lane.b32.xlu1 %v11753_v56, %s6717_s24  ;;  %vm11759_vm2 = vcmask 687728  }
 0x2af   :  { %2446 = vst.msk [vmem:[#allocation2 + $0x50] sm:$0xff] %vm11755_vm1, %v9446_v5  ;;  %3010 = vrot.lane.b32.xlu0 %v11753_v56, %s11505_s28  ;;  %vm11760_vm1 = vcmask 786128  }
 0x2b0   :  { %2513 = vst.msk [vmem:[#allocation2 + $0x50] sm:$0xff] %vm11756_vm15, %v9402_v51  ;;  %v9602_v30 = vpop.permute.xlu1 %3221  ;;  %vm11761_vm15 = vcmask 343328  }
 0x2b1   :  { %v2924_v38 = vpop.permute.xlu0 %2923 }
 0x2b2   :  { %2969 = vst.msk [vmem:[#allocation2 + $0x30] sm:$0xff] %vm2965_vm6, %v2924_v38  ;;  %3858 = vrot.lane.b32.xlu1 %v11757_v3, %s11493_s3 }
 0x2b3   :  { %3385 = vrot.lane.b32.xlu0 %v11753_v56, %s11495_s12 }
 0x2b4   :  { %v3676_v16 = vpop.permute.xlu1 %3675 }
 0x2b5   :  { %3726 = vst.msk [vmem:[#allocation2 + $0x28] sm:$0xff] %vm11758_vm12, %v3676_v16  ;;  %v3005_v5 = vpop.permute.xlu0 %3004  ;;  %vm11762_vm12 = vcmask 884528  }
 0x2b6   :  { %3050 = vst.msk [vmem:[#allocation2 + $0x30] sm:$0xff] %vm3046_vm7, %v3005_v5  ;;  %2716 = vrot.lane.b32.xlu1 %v11757_v3, %s6718_s25 }
 0x2b7   :  { %3131 = vst.msk [vmem:[#allocation2 + $0x30] sm:$0xff] %vm11759_vm2, %v3086_v11  ;;  %3466 = vrot.lane.b32.xlu0 %v11757_v3, %s11719_s13  ;;  %v11763_v11 = vld [vmem:[#allocation34_spill] sm:$0xff]  ;;  %vm11764_vm2 = vcmask 80928  }
 0x2b8   :  { %3198 = vst.msk [vmem:[#allocation2 + $0x30] sm:$0xff] %vm11490_vm14, %v9422_v28  ;;  %v2551_v51 = vpop.permute.xlu1 %2550  ;;  %vm11765_vm14 = vcmask 933728  }
 0x2b9   :  { %3265 = vst.msk [vmem:[#allocation2 + $0x30] sm:$0xff] %vm11760_vm1, %v9408_v37  ;;  %v3380_v10 = vpop.permute.xlu0 %3379  ;;  %vm11766_vm1 = vcmask 982928   ;;  %v11767_v37 = vld [vmem:[#allocation48_spill] sm:$0xff] }
 0x2ba   :  { %2594 = vst.msk [vmem:[#allocation2 + $0x50] sm:$0xff] %vm11761_vm15, %v2551_v51  ;;  %3304 = vrot.lane.b32.xlu1 %v8570_v62, %s6723_s1  ;;  %vm11768_vm15 = vcmask 1032128  }
 0x2bb   :  { %3426 = vst.msk [vmem:[#allocation2 + $0x20] sm:$0xff] %vm11762_vm12, %v3380_v10  ;;  %2931 = vrot.lane.b32.xlu0 %v11763_v11, %s6722_s30  ;;  %vm11769_vm12 = vcmask 392528  }
 0x2bc   :  { %v3774_v33 = vpop.permute.xlu1 %3773 }
 0x2bd   :  { %3820 = vst.msk [vmem:[#allocation2 + $0x28] sm:$0xff] %vm11764_vm2, %v3774_v33  ;;  %v3461_v56 = vpop.permute.xlu0 %3460  ;;  %vm11772_vm2 = vcmask 97328  }
 0x2be   :  { %3507 = vst.msk [vmem:[#allocation2 + $0x20] sm:$0xff] %vm11765_vm14, %v3461_v56  ;;  %3091 = vrot.lane.b32.xlu1 %v11757_v3, %s11502_s29  ;;  %vm11770_vm14 = vcmask 179328  }
 0x2bf   :  { %3574 = vst.msk [vmem:[#allocation2 + $0x20] sm:$0xff] %vm11766_vm1, %v9460_v9  ;;  %3012 = vrot.lane.b32.xlu0 %v11767_v37, %s11505_s28  ;;  %vm11775_vm1 = vcmask 835328  }
 0x2c0   :  { %3641 = vst.msk [vmem:[#allocation2 + $0x20] sm:$0xff] %vm11768_vm15, %v9439_v22  ;;  %v2632_v62 = vpop.permute.xlu1 %2631  ;;  %v11771_v22 = vld [vmem:[#allocation37_spill] sm:$0xff]  ;;  %vm11777_vm15 = vcmask 146528  }
 0x2c1   :  { %3725 = vst.msk [vmem:[#allocation2 + $0x20] sm:$0xff] %vm3719_vm0, %v3676_v16  ;;  %v2847_v28 = vpop.permute.xlu0 %2846  ;;  %v3280_v16 = vrot.slane %v8358_v4, 5 }
 0x2c2   :  { %2675 = vst.msk [vmem:[#allocation2 + $0x50] sm:$0xff] %vm11769_vm12, %v2632_v62  ;;  %3681 = vrot.lane.b32.xlu1 %v11763_v11, %s6729_s2  ;;  %v11779_v62 = vld [vmem:[#allocation35_spill] sm:$0xff]  ;;  %vm11781_vm12 = vcmask 195728  }
 0x2c3   :  { %3387 = vrot.lane.b32.xlu0 %v11767_v37, %s11495_s12  ;;  %v3282_v4 = vrot.slane %v3280_v16, 4 }
 0x2c4   :  { %v3855_v23 = vpop.permute.xlu1 %3854 }
 0x2c5   :  { %3901 = vst.msk [vmem:[#allocation2 + $0x28] sm:$0xff] %vm3898_vm13, %v3855_v23  ;;  %v9643_v9 = vpop.permute.xlu0 %3596 }
 0x2c6   :  { %3968 = vst.msk [vmem:[#allocation2 + $0x28] sm:$0xff] %vm11770_vm14, %v9492_v58  ;;  %3779 = vrot.lane.b32.xlu1 %v11767_v37, %s6730_s15  ;;  %v11774_v58 = vcombine.low %v8369_v35, %v8361_v13  ;;  %v11778_v13 = vld [vmem:[#allocation33_spill] sm:$0xff]  ;;  %vm11782_vm14 = vcmask 244928  }
 0x2c7   :  { %3468 = vrot.lane.b32.xlu0 %v11771_v22, %s11719_s13 }
 0x2c8   :  { %v2713_v38 = vpop.permute.xlu1 %2712  ;;  %v3986_v56 = vld [vmem:[#allocation2 + $0x20] sm:$0xff] }
 0x2c9   :  { %2756 = vst.msk [vmem:[#allocation2 + $0x50] sm:$0xff] %vm2750_vm3, %v2713_v38  ;;  %v1933_v3 = vpop.permute.xlu0 %1932  ;;  %v6132_v38 = vrot.slane %v7973_v47, 9 }
 0x2ca   :  { %2823 = vst.msk [vmem:[#allocation2 + $0x50] sm:$0xff] %vm2817_vm4, %v9537_v44  ;;  %3860 = vrot.lane.b32.xlu1 %v11771_v22, %s11493_s3  ;;  %v11776_v44 = vld [vmem:[#allocation13_spill] sm:$0xff] }
 0x2cb   :  { %1975 = vst.msk [vmem:[#allocation2 + $0x60] sm:$0xff] %vm11772_vm2, %v1933_v3  ;;  %2408 = vrot.lane.b32.xlu0 %v11774_v58, %s11773_s23  ;;  %v3283_v33 = vrot.slane %v11776_v44, 5  ;;  %vm11783_vm2 = vcmask 294128  }
 0x2cc   :  { %2890 = vst.msk [vmem:[#allocation2 + $0x50] sm:$0xff] %vm11504_vm5, %v2847_v28  ;;  %v3301_v5 = vpop.permute.xlu1 %3300  ;;  %v11780_v28 = vld [vmem:[#allocation7_spill] sm:$0xff] }
 0x2cd   :  { %3346 = vst.msk [vmem:[#allocation2 + $0x30] sm:$0xff] %vm11775_vm1, %v3301_v5  ;;  %v2129_v51 = vpop.permute.xlu0 %2128  ;;  %v3987_v10 = vld [vmem:[#allocation2 + $0x28] sm:$0xff]  ;;  %v2385_v23 = vcombine.low %v11780_v28, %v11779_v62  ;;  %v3284_v3 = vsel %vm7865_vm9, %v3282_v4, %v3283_v33  ;;  %vm11784_vm1 = vcmask 31744   ;;  %v11796_v4 = vld [vmem:[#allocation38_spill] sm:$0xff] }
 0x2ce   :  { %2171 = vst.msk [vmem:[#allocation2 + $0x60] sm:$0xff] %vm11777_vm15, %v2129_v51  ;;  %3306 = vrot.lane.b32.xlu1 %v11763_v11, %s6723_s1  ;;  %6148 = vmatprep.mubr.msk.f32.mxu1 %vm4040_vm11, %v3987_v10  ;;  %v3281_v11 = vsel %vm7865_vm9, %v6132_v38, %v3280_v16  ;;  %vm11785_vm15 = vcmask 343328   ;;  %v11788_v16 = vld [vmem:[#allocation10_spill] sm:$0xff]  ;;  %v11789_v51 = vld [vmem:[#allocation8_spill] sm:$0xff] }
 0x2cf   :  { %2852 = vrot.lane.b32.xlu0 %v11778_v13, %s11725_s17  ;;  %4168 = vmatmul.mubr.f32.gmra.mxu1 %v3986_v56  ;;  %v9686_v58 = vcombine.low %v3281_v11, %v3284_v3  ;;  %v11790_v10 = vcombine.low %v11788_v16, %v11789_v51  ;;  %v11795_v56 = vld [vmem:[#allocation9_spill] sm:$0xff]  ;;  %v11803_v28 = vld [vmem:[#allocation40_spill] sm:$0xff] }
 0x2d0   :  { %v3088_v35 = vpop.permute.xlu1 %3087 }
 0x2d1   :  { %v2324_v37 = vpop.permute.xlu0 %2323 }
 0x2d2   :  { %2366 = vst.msk [vmem:[#allocation2 + $0x60] sm:$0xff] %vm11781_vm12, %v2324_v37  ;;  %3093 = vrot.lane.b32.xlu1 %v11771_v22, %s11502_s29  ;;  %vm11787_vm12 = vcmask 687728  }
 0x2d3   :  { %2447 = vst.msk [vmem:[#allocation2 + $0x60] sm:$0xff] %vm11782_vm14, %v9531_v31  ;;  %2410 = vrot.lane.b32.xlu0 %v2385_v23, %s11773_s23  ;;  %vm11791_vm14 = vcmask 736928  }
 0x2d4   :  { %2514 = vst.msk [vmem:[#allocation2 + $0x60] sm:$0xff] %vm11783_vm2, %v9591_v46  ;;  %v3678_v47 = vpop.permute.xlu1 %3677  ;;  %v11786_v46 = vld [vmem:[#allocation42_spill] sm:$0xff]  ;;  %vm11792_vm2 = vcmask 786128  }
 0x2d5   :  { %3728 = vst.msk [vmem:[#allocation2 + $0x38] sm:$0xff] %vm11784_vm1, %v3678_v47  ;;  %v2926_v5 = vpop.permute.xlu0 %2925  ;;  %vm11793_vm1 = vcmask 80928  }
 0x2d6   :  { %2970 = vst.msk [vmem:[#allocation2 + $0x40] sm:$0xff] %vm2965_vm6, %v2926_v5  ;;  %3683 = vrot.lane.b32.xlu1 %v9686_v58, %s6729_s2 }
 0x2d7   :  { %2785 = vrot.lane.b32.xlu0 %v2385_v23, %s11499_s16  ;;  %v11804_v23 = vld [vmem:[#allocation53_spill] sm:$0xff] }
 0x2d8   :  { %v2553_v31 = vpop.permute.xlu1 %2552  ;;  %v11805_v38 = vcombine.low %v11803_v28, %v11804_v23 }
 0x2d9   :  { %2595 = vst.msk [vmem:[#allocation2 + $0x60] sm:$0xff] %vm11785_vm15, %v2553_v31  ;;  %v3007_v22 = vpop.permute.xlu0 %3006  ;;  %vm11794_vm15 = vcmask 884528  }
 0x2da   :  { %3051 = vst.msk [vmem:[#allocation2 + $0x40] sm:$0xff] %vm3046_vm7, %v3007_v22  ;;  %3781 = vrot.lane.b32.xlu1 %v11786_v46, %s6730_s15  ;;  %v11814_v22 = vld [vmem:[#allocation55_spill] sm:$0xff] }
 0x2db   :  { %3132 = vst.msk [vmem:[#allocation2 + $0x40] sm:$0xff] %vm11787_vm12, %v3088_v35  ;;  %1936 = vrot.lane.b32.xlu0 %v11790_v10, %s6711_s18  ;;  %v11797_v35 = vld [vmem:[#allocation14_spill] sm:$0xff]  ;;  %vm11799_vm12 = vcmask 392528   ;;  %v11816_v10 = vld [vmem:[#allocation56_spill] sm:$0xff] }
 0x2dc   :  { %3199 = vst.msk [vmem:[#allocation2 + $0x40] sm:$0xff] %vm11791_vm14, %v9499_v52  ;;  %v3776_v44 = vpop.permute.xlu1 %3775  ;;  %v11798_v37 = vcombine.low %v11796_v4, %v11797_v35  ;;  %vm11800_vm14 = vcmask 933728  }
 0x2dd   :  { %3266 = vst.msk [vmem:[#allocation2 + $0x40] sm:$0xff] %vm11792_vm2, %v9602_v30  ;;  %v3382_v33 = vpop.permute.xlu0 %3381  ;;  %v11801_v30 = vld [vmem:[#allocation39_spill] sm:$0xff]  ;;  %vm11802_vm2 = vcmask 982928  }
 0x2de   :  { %3821 = vst.msk [vmem:[#allocation2 + $0x38] sm:$0xff] %vm11793_vm1, %v3776_v44  ;;  %3862 = vrot.lane.b32.xlu1 %v11795_v56, %s11493_s3  ;;  %vm11806_vm1 = vcmask 1032128  }
 0x2df   :  { %3427 = vst.msk [vmem:[#allocation2 + $0x30] sm:$0xff] %vm11794_vm15, %v3382_v33  ;;  %2132 = vrot.lane.b32.xlu0 %v11798_v37, %s6713_s20  ;;  %vm11807_vm15 = vcmask 179328   ;;  %v11823_v37 = vld [vmem:[#allocation59_spill] sm:$0xff] }
 0x2e0   :  { %v2634_v62 = vpop.permute.xlu1 %2633 }
 0x2e1   :  { %2676 = vst.msk [vmem:[#allocation2 + $0x60] sm:$0xff] %vm11799_vm12, %v2634_v62  ;;  %v3463_v52 = vpop.permute.xlu0 %3462  ;;  %vm11808_vm12 = vcmask 97328  }
 0x2e2   :  { %3508 = vst.msk [vmem:[#allocation2 + $0x30] sm:$0xff] %vm11800_vm14, %v3463_v52  ;;  %2475 = vrot.lane.b32.xlu1 %v11801_v30, %s11722_s27  ;;  %vm11810_vm14 = vcmask 146528   ;;  %v11825_v30 = vld [vmem:[#allocation61_spill] sm:$0xff] }
 0x2e3   :  { %3575 = vst.msk [vmem:[#allocation2 + $0x30] sm:$0xff] %vm11802_vm2, %v9547_v63  ;;  %2327 = vrot.lane.b32.xlu0 %v11805_v38, %s6712_s19  ;;  %v11809_v63 = vld [vmem:[#allocation41_spill] sm:$0xff]  ;;  %vm11812_vm2 = vcmask 835328  }
 0x2e4   :  { %3642 = vst.msk [vmem:[#allocation2 + $0x30] sm:$0xff] %vm11806_vm1, %v9643_v9  ;;  %v3857_v3 = vpop.permute.xlu1 %3856  ;;  %vm11813_vm1 = vcmask 195728  }
 0x2e5   :  { %3727 = vst.msk [vmem:[#allocation2 + $0x30] sm:$0xff] %vm3719_vm0, %v3678_v47  ;;  %v1935_v11 = vpop.permute.xlu0 %1934  ;;  %v11811_v47 = vld [vmem:[#allocation54_spill] sm:$0xff] }
 0x2e6   :  { %3902 = vst.msk [vmem:[#allocation2 + $0x38] sm:$0xff] %vm3898_vm13, %v3857_v3  ;;  %2477 = vrot.lane.b32.xlu1 %v11778_v13, %s11722_s27 }
 0x2e7   :  { %3969 = vst.msk [vmem:[#allocation2 + $0x38] sm:$0xff] %vm11807_vm15, %v9510_v19  ;;  %2412 = vrot.lane.b32.xlu0 %v11809_v63, %s11773_s23  ;;  %vm11815_vm15 = vcmask 244928  }
 0x2e8   :  { %1976 = vst.msk [vmem:[#allocation2 + $0x70] sm:$0xff] %vm11808_vm12, %v1935_v11  ;;  %v2715_v5 = vpop.permute.xlu1 %2714  ;;  %vm11817_vm12 = vcmask 294128  }
 0x2e9   :  { %2757 = vst.msk [vmem:[#allocation2 + $0x60] sm:$0xff] %vm2750_vm3, %v2715_v5  ;;  %v2131_v9 = vpop.permute.xlu0 %2130  ;;  %v11829_v5 = vld [vmem:[#allocation62_spill] sm:$0xff] }
 0x2ea   :  { %2824 = vst.msk [vmem:[#allocation2 + $0x60] sm:$0xff] %vm2817_vm4, %v9562_v43  ;;  %2556 = vrot.lane.b32.xlu1 %v11811_v47, %s11497_s22 }
 0x2eb   :  { %2172 = vst.msk [vmem:[#allocation2 + $0x70] sm:$0xff] %vm11810_vm14, %v2131_v9  ;;  %1938 = vrot.lane.b32.xlu0 %v11811_v47, %s6711_s18  ;;  %vm11819_vm14 = vcmask 687728   ;;  %v11830_v47 = vld [vmem:[#allocation63_spill] sm:$0xff] }
 0x2ec   :  { %v3303_v19 = vpop.permute.xlu1 %3302  ;;  %v3988_v43 = vld [vmem:[#allocation2 + $0x30] sm:$0xff] }
 0x2ed   :  { %3347 = vst.msk [vmem:[#allocation2 + $0x40] sm:$0xff] %vm11812_vm2, %v3303_v19  ;;  %v2326_v13 = vpop.permute.xlu0 %2325  ;;  %vm11820_vm2 = vcmask 736928  }
 0x2ee   :  { %v3989_v31 = vld [vmem:[#allocation2 + $0x38] sm:$0xff]  ;;  %2367 = vst.msk [vmem:[#allocation2 + $0x70] sm:$0xff] %vm11813_vm1, %v2326_v13  ;;  %2637 = vrot.lane.b32.xlu1 %v11814_v22, %s6717_s24  ;;  %vm11821_vm1 = vcmask 786128  }
 0x2ef   :  { %6149 = vmatprep.mubr.msk.f32.mxu1 %vm4040_vm11, %v3989_v31  ;;  %2448 = vst.msk [vmem:[#allocation2 + $0x70] sm:$0xff] %vm11815_vm15, %v9556_v55  ;;  %2134 = vrot.lane.b32.xlu0 %v11814_v22, %s6713_s20  ;;  %v11818_v55 = vld [vmem:[#allocation57_spill] sm:$0xff]  ;;  %vm11822_vm15 = vcmask 884528   ;;  %v11831_v31 = vld [vmem:[#allocation64_spill] sm:$0xff] }
 0x2f0   :  { %4173 = vmatmul.mubr.f32.gmra.mxu1 %v3988_v43  ;;  %v3090_v16 = vpop.permute.xlu1 %3089  ;;  %v11832_v22 = vcombine.low %v8892_v25, %v11831_v31 }
 0x2f1   :  { %v2928_v51 = vpop.permute.xlu0 %2927 }
 0x2f2   :  { %2971 = vst.msk [vmem:[#allocation2 + $0x50] sm:$0xff] %vm2965_vm6, %v2928_v51  ;;  %2718 = vrot.lane.b32.xlu1 %v11816_v10, %s6718_s25 }
 0x2f3   :  { %2329 = vrot.lane.b32.xlu0 %v11816_v10, %s6712_s19 }
 0x2f4   :  { %v2474_v44 = vpop.permute.xlu1 %2473 }
 0x2f5   :  { %2515 = vst.msk [vmem:[#allocation2 + $0x70] sm:$0xff] %vm11817_vm12, %v2474_v44  ;;  %v3009_v33 = vpop.permute.xlu0 %3008  ;;  %vm11824_vm12 = vcmask 933728  }
 0x2f6   :  { %3052 = vst.msk [vmem:[#allocation2 + $0x50] sm:$0xff] %vm3046_vm7, %v3009_v33  ;;  %2558 = vrot.lane.b32.xlu1 %v11818_v55, %s11497_s22 }
 0x2f7   :  { %3133 = vst.msk [vmem:[#allocation2 + $0x50] sm:$0xff] %vm11819_vm14, %v3090_v16  ;;  %1940 = vrot.lane.b32.xlu0 %v11818_v55, %s6711_s18  ;;  %vm11826_vm14 = vcmask 982928  }
 0x2f8   :  { %3200 = vst.msk [vmem:[#allocation2 + $0x50] sm:$0xff] %vm11820_vm2, %v9518_v18  ;;  %v3224_v4 = vpop.permute.xlu1 %3223  ;;  %vm11827_vm2 = vcmask 1032128  }
 0x2f9   :  { %3267 = vst.msk [vmem:[#allocation2 + $0x50] sm:$0xff] %vm11821_vm1, %v3224_v4  ;;  %v3384_v35 = vpop.permute.xlu0 %3383  ;;  %vm11833_vm1 = vcmask 31744  }
 0x2fa   :  { %3428 = vst.msk [vmem:[#allocation2 + $0x40] sm:$0xff] %vm11822_vm15, %v3384_v35  ;;  %2639 = vrot.lane.b32.xlu1 %v11823_v37, %s6717_s24  ;;  %vm11834_vm15 = vcmask 343328  }
 0x2fb   :  { %2136 = vrot.lane.b32.xlu0 %v11823_v37, %s6713_s20 }
 0x2fc   :  { %v3926_v62 = vpop.permute.xlu1 %3925 }
 0x2fd   :  { %v3465_v52 = vpop.permute.xlu0 %3464 }
 0x2fe   :  { %3509 = vst.msk [vmem:[#allocation2 + $0x40] sm:$0xff] %vm11824_vm12, %v3465_v52  ;;  %2720 = vrot.lane.b32.xlu1 %v11825_v30, %s6718_s25  ;;  %vm11835_vm12 = vcmask 80928   ;;  %v11847_v52 = vld [vmem:[#allocation36_spill] sm:$0xff] }
 0x2ff   :  { %3576 = vst.msk [vmem:[#allocation2 + $0x40] sm:$0xff] %vm11826_vm14, %v9570_v36  ;;  %2331 = vrot.lane.b32.xlu0 %v11825_v30, %s6712_s19  ;;  %v11828_v36 = vld [vmem:[#allocation58_spill] sm:$0xff]  ;;  %vm11837_vm14 = vcmask 392528  }
 0x300   :  { %v9779_v18 = vpop.permute.xlu1 %3158 }
 0x301   :  { %v2849_v28 = vpop.permute.xlu0 %2848 }
 0x302   :  { %2891 = vst.msk [vmem:[#allocation2 + $0x60] sm:$0xff] %vm11504_vm5, %v2849_v28  ;;  %3308 = vrot.lane.b32.xlu1 %v9686_v58, %s6723_s1  ;;  %v11849_v28 = vld [vmem:[#allocation50_spill] sm:$0xff] }
 0x303   :  { %2933 = vrot.lane.b32.xlu0 %v11818_v55, %s6722_s30 }
 0x304   :  { %v9786_v23 = vpop.permute.xlu1 %3225 }
 0x305   :  { %v3599_v38 = vpop.permute.xlu0 %3598 }
 0x306   :  { %3643 = vst.msk [vmem:[#allocation2 + $0x40] sm:$0xff] %vm11827_vm2, %v3599_v38  ;;  %3929 = vrot.lane.b32.xlu1 %v11828_v36, %s6725_s0  ;;  %vm11838_vm2 = vcmask 179328   ;;  %v1878_v38 = vrot.slane %v11849_v28, 5 }
 0x307   :  { %3014 = vrot.lane.b32.xlu0 %v11823_v37, %s11505_s28 }
 0x308   :  { %v9793_v3 = vpop.permute.xlu1 %3227 }
 0x309   :  { %v2784_v11 = vpop.permute.xlu0 %2783 }
 0x30a   :  { %2479 = vrot.lane.b32.xlu1 %v11829_v5, %s11722_s27 }
 0x30b   :  { %3602 = vrot.lane.b32.xlu0 %v9544_v2, %s11727_s14 }
 0x30c   :  { %v9799_v58 = vpop.permute.xlu1 %3927 }
 0x30d   :  { %v3534_v9 = vpop.permute.xlu0 %3533 }
 0x30e   :  { %3095 = vrot.lane.b32.xlu1 %v11825_v30, %s11502_s29  ;;  %v9869_v30 = vcombine.low %v11847_v52, %v8841_v29  ;;  %v11852_v29 = vld [vmem:[#allocation11_spill] sm:$0xff] }
 0x30f   :  { %1942 = vrot.lane.b32.xlu0 %v11830_v47, %s6711_s18 }
 0x310   :  { %v9805_v19 = vpop.permute.xlu1 %3160 }
 0x311   :  { %v2851_v13 = vpop.permute.xlu0 %2850 }
 0x312   :  { %3685 = vrot.lane.b32.xlu1 %v11832_v22, %s6729_s2 }
 0x313   :  { %2787 = vrot.lane.b32.xlu0 %v11809_v63, %s11499_s16 }
 0x314   :  { %v3680_v2 = vpop.permute.xlu1 %3679 }
 0x315   :  { %3729 = vst.msk [vmem:[#allocation2 + $0x40] sm:$0xff] %vm3719_vm0, %v3680_v2  ;;  %v3601_v43 = vpop.permute.xlu0 %3600 }
 0x316   :  { %3730 = vst.msk [vmem:[#allocation2 + $0x48] sm:$0xff] %vm11833_vm1, %v3680_v2  ;;  %2560 = vrot.lane.b32.xlu1 %v11830_v47, %s11497_s22  ;;  %vm11840_vm1 = vcmask 835328  }
 0x317   :  { %3389 = vrot.lane.b32.xlu0 %v11786_v46, %s11495_s12  ;;  %v11836_v46 = vcombine.low %v8923_v54, %v8939_v0 }
 0x318   :  { %v2555_v16 = vpop.permute.xlu1 %2554 }
 0x319   :  { %2596 = vst.msk [vmem:[#allocation2 + $0x70] sm:$0xff] %vm11834_vm15, %v2555_v16  ;;  %v9820_v25 = vpop.permute.xlu0 %3535  ;;  %vm11841_vm15 = vcmask 884528   ;;  %v11857_v16 = vld [vmem:[#allocation25_spill] sm:$0xff] }
 0x31a   :  { %3162 = vrot.lane.b32.xlu1 %v11809_v63, %s6714_s21  ;;  %v6100_v52 = vrot.slane %v11857_v16, 10 }
 0x31b   :  { %2138 = vrot.lane.b32.xlu0 %v8928_v20, %s6713_s20 }
 0x31c   :  { %v3778_v51 = vpop.permute.xlu1 %3777 }
 0x31d   :  { %3822 = vst.msk [vmem:[#allocation2 + $0x48] sm:$0xff] %vm11835_vm12, %v3778_v51  ;;  %v2930_v10 = vpop.permute.xlu0 %2929  ;;  %vm11842_vm12 = vcmask 933728   ;;  %v6084_v51 = vrot.slane %v11857_v16, 9 }
 0x31e   :  { %2972 = vst.msk [vmem:[#allocation2 + $0x60] sm:$0xff] %vm2965_vm6, %v2930_v10  ;;  %3783 = vrot.lane.b32.xlu1 %v11836_v46, %s6730_s15  ;;  %v11858_v46 = vld [vmem:[#allocation47_spill] sm:$0xff] }
 0x31f   :  { %2854 = vrot.lane.b32.xlu0 %v11829_v5, %s11725_s17 }
 0x320   :  { %v2636_v44 = vpop.permute.xlu1 %2635 }
 0x321   :  { %2677 = vst.msk [vmem:[#allocation2 + $0x70] sm:$0xff] %vm11837_vm14, %v2636_v44  ;;  %v3011_v63 = vpop.permute.xlu0 %3010  ;;  %vm11844_vm14 = vcmask 982928   ;;  %v11859_v44 = vcombine.low %v11858_v46, %v11852_v29 }
 0x322   :  { %3053 = vst.msk [vmem:[#allocation2 + $0x60] sm:$0xff] %vm3046_vm7, %v3011_v63  ;;  %2641 = vrot.lane.b32.xlu1 %v8928_v20, %s6717_s24 }
 0x323   :  { %3470 = vrot.lane.b32.xlu0 %v11795_v56, %s11719_s13  ;;  %v11839_v56 = vcombine.low %v8962_v26, %v8985_v1  ;;  %v3990_v26 = vld [vmem:[#allocation2 + $0x40] sm:$0xff] }
 0x324   :  { %v3859_v33 = vpop.permute.xlu1 %3858 }
 0x325   :  { %3903 = vst.msk [vmem:[#allocation2 + $0x48] sm:$0xff] %vm3898_vm13, %v3859_v33  ;;  %v3386_v54 = vpop.permute.xlu0 %3385  ;;  %v1879_v33 = vsel %vm7865_vm9, %v6084_v51, %v1878_v38 }
 0x326   :  { %3970 = vst.msk [vmem:[#allocation2 + $0x48] sm:$0xff] %vm11838_vm2, %v3926_v62  ;;  %3229 = vrot.lane.b32.xlu1 %v11829_v5, %s11724_s26  ;;  %vm11845_vm2 = vcmask 1032128  }
 0x327   :  { %2333 = vrot.lane.b32.xlu0 %v8958_v27, %s6712_s19 }
 0x328   :  { %v2717_v0 = vpop.permute.xlu1 %2716 }
 0x329   :  { %2758 = vst.msk [vmem:[#allocation2 + $0x70] sm:$0xff] %vm2750_vm3, %v2717_v0  ;;  %v3467_v55 = vpop.permute.xlu0 %3466 }
 0x32a   :  { %2825 = vst.msk [vmem:[#allocation2 + $0x70] sm:$0xff] %vm2817_vm4, %v2784_v11  ;;  %3864 = vrot.lane.b32.xlu1 %v11839_v56, %s11493_s3  ;;  %s11843_s3 = smov 114   ;;  %v11851_v11 = vld [vmem:[#allocation60_spill] sm:$0xff] }
 0x32b   :  { %2892 = vst.msk [vmem:[#allocation2 + $0x70] sm:$0xff] %vm11504_vm5, %v2851_v13  ;;  %2935 = vrot.lane.b32.xlu0 %v11830_v47, %s6722_s30  ;;  %v3915_v5 = vcombine.low %v11852_v29, %v11851_v11  ;;  %v11854_v13 = vld [vmem:[#allocation49_spill] sm:$0xff]  ;;  %v6732_v29 = vmov 1983009808  }
 0x32c   :  { %v3305_v4 = vpop.permute.xlu1 %3304  ;;  %v1881_v31 = vrot.slane %v11854_v13, 5 }
 0x32d   :  { %3348 = vst.msk [vmem:[#allocation2 + $0x50] sm:$0xff] %vm11840_vm1, %v3305_v4  ;;  %v2932_v35 = vpop.permute.xlu0 %2931  ;;  %v3991_v37 = vld [vmem:[#allocation2 + $0x48] sm:$0xff]  ;;  %vm11846_vm1 = vcmask 687728  }
 0x32e   :  { %3429 = vst.msk [vmem:[#allocation2 + $0x50] sm:$0xff] %vm11841_vm15, %v3386_v54  ;;  %2722 = vrot.lane.b32.xlu1 %v8958_v27, %s6718_s25  ;;  %6150 = vmatprep.mubr.msk.f32.mxu1 %vm4040_vm11, %v3991_v37  ;;  %vm11848_vm15 = vcmask 736928   ;;  %v2077_v37 = vrot.slane %v11854_v13, 6 }
 0x32f   :  { %2973 = vst.msk [vmem:[#allocation2 + $0x70] sm:$0xff] %vm2965_vm6, %v2932_v35  ;;  %3537 = vrot.lane.b32.xlu0 %v11828_v36, %s11843_s3  ;;  %4178 = vmatmul.mubr.f32.gmra.mxu1 %v3990_v26 }
 0x330   :  { %3510 = vst.msk [vmem:[#allocation2 + $0x50] sm:$0xff] %vm11842_vm12, %v3467_v55  ;;  %v3092_v1 = vpop.permute.xlu1 %3091  ;;  %vm11850_vm12 = vcmask 786128   ;;  %v2074_v55 = vrot.slane %v11849_v28, 6 }
 0x331   :  { %3577 = vst.msk [vmem:[#allocation2 + $0x50] sm:$0xff] %vm11844_vm14, %v3534_v9  ;;  %v3013_v62 = vpop.permute.xlu0 %3012  ;;  %vm11853_vm14 = vcmask 31744   ;;  %v1880_v9 = vrot.slane %v1878_v38, 4 }
 0x332   :  { %3644 = vst.msk [vmem:[#allocation2 + $0x50] sm:$0xff] %vm11845_vm2, %v3601_v43  ;;  %3310 = vrot.lane.b32.xlu1 %v11830_v47, %s6723_s1  ;;  %vm11855_vm2 = vcmask 80928   ;;  %v11856_v43 = vld [vmem:[#allocation12_spill] sm:$0xff]  ;;  %v2076_v35 = vrot.slane %v2074_v55, 4 }
 0x333   :  { %3134 = vst.msk [vmem:[#allocation2 + $0x60] sm:$0xff] %vm11846_vm1, %v3092_v1  ;;  %2414 = vrot.lane.b32.xlu0 %v9869_v30, %s11773_s23  ;;  %v1882_v10 = vsel %vm7865_vm9, %v1880_v9, %v1881_v31  ;;  %vm11860_vm1 = vcmask 179328  }
 0x334   :  { %3201 = vst.msk [vmem:[#allocation2 + $0x60] sm:$0xff] %vm11848_vm15, %v9779_v18  ;;  %v3682_v36 = vpop.permute.xlu1 %3681  ;;  %v9906_v0 = vcombine.low %v1879_v33, %v1882_v10  ;;  %vm11861_vm15 = vcmask 835328  }
 0x335   :  { %3054 = vst.msk [vmem:[#allocation2 + $0x70] sm:$0xff] %vm3046_vm7, %v3013_v62  ;;  %v3388_v18 = vpop.permute.xlu0 %3387 }
 0x336   :  { %3268 = vst.msk [vmem:[#allocation2 + $0x60] sm:$0xff] %vm11850_vm12, %v9786_v23  ;;  %3931 = vrot.lane.b32.xlu1 %v3915_v5, %s6725_s0  ;;  %vm11862_vm12 = vcmask 884528   ;;  %v4272_v5 = vunpack.c.l.s4 %v6732_v29 }
 0x337   :  { %3731 = vst.msk [vmem:[#allocation2 + $0x50] sm:$0xff] %vm3719_vm0, %v3682_v36  ;;  %3016 = vrot.lane.b32.xlu0 %v8928_v20, %s11505_s28  ;;  %v9888_v47 = vpop.f32.mrf.mxu1 }
 0x338   :  { %3732 = vst.msk [vmem:[#allocation2 + $0x58] sm:$0xff] %vm11853_vm14, %v3682_v36  ;;  %v3780_v23 = vpop.permute.xlu1 %3779  ;;  %vm11863_vm14 = vcmask 933728   ;;  %v4273_v10 = vunpack.c.0.s8 %v4272_v5 }
 0x339   :  { %3823 = vst.msk [vmem:[#allocation2 + $0x58] sm:$0xff] %vm11855_vm2, %v3780_v23  ;;  %v3469_v22 = vpop.permute.xlu0 %3468  ;;  %v4161_v2 = vpop.f32.mrf.mxu1  ;;  %vm11864_vm2 = vcmask 982928   ;;  %v9961_v23 = vld [vmem:[%s11355_s4] ss:$0 sm:$0xff] }
 0x33a   :  { %2481 = vrot.lane.b32.xlu1 %v11856_v43, %s11722_s27  ;;  %v2272_v2 = vrot.slane %v11854_v13, 7  ;;  %v4160_v51 = vadd.f32 %v9961_v23, %v9888_v47 }
 0x33b   :  { %3604 = vrot.lane.b32.xlu0 %v11859_v44, %s11727_s14 }
 0x33c   :  { %v3861_v63 = vpop.permute.xlu1 %3860 }
 0x33d   :  { %3904 = vst.msk [vmem:[#allocation2 + $0x58] sm:$0xff] %vm3898_vm13, %v3861_v63  ;;  %v9904_v54 = vpop.permute.xlu0 %2408  ;;  %v6116_v63 = vrot.slane %v11857_v16, 11 }
 0x33e   :  { %3971 = vst.msk [vmem:[#allocation2 + $0x58] sm:$0xff] %vm11860_vm1, %v9799_v58  ;;  %3097 = vrot.lane.b32.xlu1 %v8958_v27, %s11502_s29  ;;  %vm11865_vm1 = vcmask 687728   ;;  %v3992_v62 = vld [vmem:[#allocation2 + $0x50] sm:$0xff] }
 0x33f   :  { %1944 = vrot.lane.b32.xlu0 %v9906_v0, %s6711_s18 }
 0x340   :  { %v3307_v56 = vpop.permute.xlu1 %3306 }
 0x341   :  { %3349 = vst.msk [vmem:[#allocation2 + $0x60] sm:$0xff] %vm11861_vm15, %v3307_v56  ;;  %v9916_v4 = vpop.permute.xlu0 %2852  ;;  %vm11866_vm15 = vcmask 736928   ;;  %v4238_v56 = vmax.f32 %v4160_v51, 0.0 }
 0x342   :  { %3430 = vst.msk [vmem:[#allocation2 + $0x60] sm:$0xff] %vm11862_vm12, %v3388_v18  ;;  %3687 = vrot.lane.b32.xlu1 %v9906_v0, %s6729_s2  ;;  %vm11867_vm12 = vcmask 786128   ;;  %v4274_v18 = vlaneseq }
 0x343   :  { %3511 = vst.msk [vmem:[#allocation2 + $0x60] sm:$0xff] %vm11863_vm14, %v3469_v22  ;;  %2789 = vrot.lane.b32.xlu0 %v9869_v30, %s11499_s16  ;;  %vm11868_vm14 = vcmask 31744  }
 0x344   :  { %3578 = vst.msk [vmem:[#allocation2 + $0x60] sm:$0xff] %vm11864_vm2, %v9820_v25  ;;  %v3094_v58 = vpop.permute.xlu1 %3093  ;;  %v2078_v25 = vsel %vm7915_vm10, %v2076_v35, %v2077_v37  ;;  %vm11869_vm2 = vcmask 80928   ;;  %v4275_v46 = vshrl.u32 %v4274_v18, 7  ;;  %v10015_v18 = vcombine.low %v11849_v28, %v11854_v13 }
 0x345   :  { %3135 = vst.msk [vmem:[#allocation2 + $0x70] sm:$0xff] %vm11865_vm1, %v3094_v58  ;;  %v9928_v26 = vpop.permute.xlu0 %2410  ;;  %v3993_v1 = vld [vmem:[#allocation2 + $0x58] sm:$0xff]  ;;  %vm11870_vm1 = vcmask 97328  }
 0x346   :  { %3202 = vst.msk [vmem:[#allocation2 + $0x70] sm:$0xff] %vm11866_vm15, %v9805_v19  ;;  %2562 = vrot.lane.b32.xlu1 %v9906_v0, %s11497_s22  ;;  %6151 = vmatprep.mubr.msk.f32.mxu1 %vm4040_vm11, %v3993_v1  ;;  %v2075_v19 = vsel %vm7915_vm10, %v6100_v52, %v2074_v55  ;;  %vm11871_vm15 = vcmask 146528   ;;  %v9982_v35 = vsub.s32 %v4273_v10, %v4275_v46  ;;  %s11875_s22 = smov 10  }
 0x347   :  { %3269 = vst.msk [vmem:[#allocation2 + $0x70] sm:$0xff] %vm11867_vm12, %v9793_v3  ;;  %3391 = vrot.lane.b32.xlu0 %v8928_v20, %s11495_s12  ;;  %4183 = vmatmul.mubr.f32.gmra.mxu1 %v3992_v62  ;;  %v9950_v11 = vcombine.low %v2075_v19, %v2078_v25  ;;  %v2269_v3 = vrot.slane %v11849_v28, 7  ;;  %vm11872_vm12 = vcmask 195728   ;;  %v4270_v62 = vcombine.high %v4238_v56, %v4238_v56  ;;  %s11893_s12 = smov 36  }
 0x348   :  { %v9942_v38 = vpop.permute.xlu1 %3683  ;;  %v4277_v16 = vrot.slane %v4238_v56, %v9982_v35 }
 0x349   :  { %3734 = vst.msk [vmem:[#allocation2 + $0x68] sm:$0xff] %vm11868_vm14, %v9942_v38  ;;  %v9948_v36 = vpop.permute.xlu0 %2785  ;;  %v2271_v31 = vrot.slane %v2269_v3, 4  ;;  %v2270_v47 = vsel %vm7847_vm8, %v6116_v63, %v2269_v3  ;;  %vm11873_vm14 = vcmask 244928   ;;  %v10003_v19 = vrot.slane %v4270_v62, %v9982_v35 }
 0x34a   :  { %3164 = vrot.lane.b32.xlu1 %v9869_v30, %s6714_s21  ;;  %v4285_v25 = vcombine.high %v4277_v16, %v4277_v16 }
 0x34b   :  { %2140 = vrot.lane.b32.xlu0 %v9950_v11, %s6713_s20  ;;  %v2273_v33 = vsel %vm7847_vm8, %v2271_v31, %v2272_v2 }
 0x34c   :  { %v3782_v20 = vpop.permute.xlu1 %3781  ;;  %v9984_v37 = vcombine.low %v2270_v47, %v2273_v33 }
 0x34d   :  { %3824 = vst.msk [vmem:[#allocation2 + $0x68] sm:$0xff] %vm11869_vm2, %v3782_v20  ;;  %v1937_v9 = vpop.permute.xlu0 %1936  ;;  %vm11874_vm2 = vcmask 294128  }
 0x34e   :  { %1977 = vst.msk [vmem:[#allocation2 + $0x80] sm:$0xff] %vm11870_vm1, %v1937_v9  ;;  %3785 = vrot.lane.b32.xlu1 %v9950_v11, %s6730_s15  ;;  %vm4606_vm1 = vcmask 91136   ;;  %v11879_v9 = vld [vmem:[#allocation15_spill] sm:$0xff] }
 0x34f   :  { %2856 = vrot.lane.b32.xlu0 %v11856_v43, %s11725_s17  ;;  %v4607_v3 = vsel %vm4606_vm1, %v4277_v16, -inf  ;;  %v4614_v29 = vsel %vm4606_vm1, %v4285_v25, -inf  ;;  %v10019_v31 = vcombine.high %v11879_v9, %v11879_v9  ;;  %v2081_v25 = vrot.slane %v11879_v9, 6 }
 0x350   :  { %v3863_v22 = vpop.permute.xlu1 %3862  ;;  %v4608_v2 = vrot.slane %v4607_v3, 4  ;;  %v4615_v28 = vrot.slane %v4614_v29, 4 }
 0x351   :  { %3905 = vst.msk [vmem:[#allocation2 + $0x68] sm:$0xff] %vm3898_vm13, %v3863_v22  ;;  %v2133_v44 = vpop.permute.xlu0 %2132  ;;  %v4621_v22 = vsel %vm4606_vm1, %v10003_v19, -inf  ;;  %v1888_v46 = vrot.slane %v10019_v31, 5 }
 0x352   :  { %2173 = vst.msk [vmem:[#allocation2 + $0x80] sm:$0xff] %vm11871_vm15, %v2133_v44  ;;  %2643 = vrot.lane.b32.xlu1 %v9950_v11, %s6717_s24  ;;  %vm11876_vm15 = vcmask 343328   ;;  %v4622_v51 = vrot.slane %v4621_v22, 4  ;;  %v4609_v44 = vmax.f32 %v4607_v3, %v4608_v2 }
 0x353   :  { %3472 = vrot.lane.b32.xlu0 %v8958_v27, %s11719_s13 }
 0x354   :  { %v2476_v55 = vpop.permute.xlu1 %2475  ;;  %v4623_v47 = vmax.f32 %v4621_v22, %v4622_v51 }
 0x355   :  { %v2328_v58 = vpop.permute.xlu0 %2327 }
 0x356   :  { %2368 = vst.msk [vmem:[#allocation2 + $0x80] sm:$0xff] %vm11872_vm12, %v2328_v58  ;;  %3231 = vrot.lane.b32.xlu1 %v11856_v43, %s11724_s26  ;;  %vm11877_vm12 = vcmask 97328   ;;  %v4624_v22 = vrot.slane %v4623_v47, 2 }
 0x357   :  { %2449 = vst.msk [vmem:[#allocation2 + $0x80] sm:$0xff] %vm11873_vm14, %v9904_v54  ;;  %2335 = vrot.lane.b32.xlu0 %v9984_v37, %s6712_s19  ;;  %vm11878_vm14 = vcmask 392528  }
 0x358   :  { %2516 = vst.msk [vmem:[#allocation2 + $0x80] sm:$0xff] %vm11874_vm2, %v2476_v55  ;;  %v2478_v27 = vpop.permute.xlu1 %2477  ;;  %vm11880_vm2 = vcmask 146528  }
 0x359   :  { %v9995_v1 = vpop.permute.xlu0 %2412 }
 0x35a   :  { %3866 = vrot.lane.b32.xlu1 %v9984_v37, %s11875_s22 }
 0x35b   :  { %2937 = vrot.lane.b32.xlu0 %v9906_v0, %s6722_s30 }
 0x35c   :  { %v2557_v52 = vpop.permute.xlu1 %2556 }
 0x35d   :  { %2597 = vst.msk [vmem:[#allocation2 + $0x80] sm:$0xff] %vm11876_vm15, %v2557_v52  ;;  %v1939_v54 = vpop.permute.xlu0 %1938  ;;  %vm11881_vm15 = vcmask 195728  }
 0x35e   :  { %1978 = vst.msk [vmem:[#allocation2 + $0x90] sm:$0xff] %vm11877_vm12, %v1939_v54  ;;  %2724 = vrot.lane.b32.xlu1 %v9984_v37, %s6718_s25  ;;  %vm11882_vm12 = vcmask 244928  }
 0x35f   :  { %3539 = vrot.lane.b32.xlu0 %v9869_v30, %s11843_s3  ;;  %v1885_v30 = vrot.slane %v11879_v9, 5 }
 0x360   :  { %v2638_v20 = vpop.permute.xlu1 %2637 }
 0x361   :  { %2678 = vst.msk [vmem:[#allocation2 + $0x80] sm:$0xff] %vm11878_vm14, %v2638_v20  ;;  %v2135_v5 = vpop.permute.xlu0 %2134  ;;  %vm11883_vm14 = vcmask 294128  }
 0x362   :  { %2174 = vst.msk [vmem:[#allocation2 + $0x90] sm:$0xff] %vm11880_vm2, %v2135_v5  ;;  %3312 = vrot.lane.b32.xlu1 %v9906_v0, %s6723_s1  ;;  %v1887_v0 = vrot.slane %v1885_v30, 4  ;;  %vm11884_vm2 = vcmask 343328  }
 0x363   :  { %2416 = vrot.lane.b32.xlu0 %v10015_v18, %s11773_s23 }
 0x364   :  { %v2719_v13 = vpop.permute.xlu1 %2718  ;;  %v1889_v52 = vsel %vm7865_vm9, %v1887_v0, %v1888_v46 }
 0x365   :  { %2759 = vst.msk [vmem:[#allocation2 + $0x80] sm:$0xff] %vm2750_vm3, %v2719_v13  ;;  %v2330_v10 = vpop.permute.xlu0 %2329 }
 0x366   :  { %2826 = vst.msk [vmem:[#allocation2 + $0x80] sm:$0xff] %vm2817_vm4, %v9948_v36  ;;  %3933 = vrot.lane.b32.xlu1 %v10015_v18, %s6725_s0  ;;  %v4616_v36 = vmax.f32 %v4614_v29, %v4615_v28 }
 0x367   :  { %2369 = vst.msk [vmem:[#allocation2 + $0x90] sm:$0xff] %vm11881_vm15, %v2330_v10  ;;  %3018 = vrot.lane.b32.xlu0 %v9950_v11, %s11505_s28  ;;  %v4164_v63 = vpop.f32.mrf.mxu1  ;;  %vm11885_vm15 = vcmask 97328  }
 0x368   :  { %2893 = vst.msk [vmem:[#allocation2 + $0x80] sm:$0xff] %vm11504_vm5, %v9916_v4  ;;  %v4165_v33 = vadd.f32 %v9961_v23, %v4164_v63  ;;  %v2559_v55 = vpop.permute.xlu1 %2558  ;;  %v11886_v4 = vld [vmem:[#allocation43_spill] sm:$0xff]  ;;  %v4617_v54 = vrot.slane %v4616_v36, 2 }
 0x369   :  { %2450 = vst.msk [vmem:[#allocation2 + $0x90] sm:$0xff] %vm11882_vm12, %v9928_v26  ;;  %v1941_v56 = vpop.permute.xlu0 %1940  ;;  %v4166_v58 = vpop.f32.mrf.mxu1  ;;  %v11887_v26 = vld [vmem:[#allocation44_spill] sm:$0xff]  ;;  %vm11888_vm12 = vcmask 392528  }
 0x36a   :  { %2517 = vst.msk [vmem:[#allocation2 + $0x90] sm:$0xff] %vm11883_vm14, %v2478_v27  ;;  %v4239_v16 = vmax.f32 %v4165_v33, 0.0  ;;  %2483 = vrot.lane.b32.xlu1 %v11886_v4, %s11722_s27  ;;  %v6085_v62 = vrot.slane %v11887_v26, 9  ;;  %v4610_v27 = vrot.slane %v4609_v44, 2  ;;  %vm11889_vm14 = vcmask 146528  }
 0x36b   :  { %2598 = vst.msk [vmem:[#allocation2 + $0x90] sm:$0xff] %vm11884_vm2, %v2559_v55  ;;  %3606 = vrot.lane.b32.xlu0 %v11856_v43, %s11727_s14  ;;  %v4618_v46 = vmax.f32 %v4616_v36, %v4617_v54  ;;  %v4625_v58 = vmax.f32 %v4623_v47, %v4624_v22  ;;  %vm11890_vm2 = vcmask 195728  }
 0x36c   :  { %1979 = vst.msk [vmem:[#allocation2 + $0xa0] sm:$0xff] %vm11885_vm15, %v1941_v56  ;;  %v4287_v3 = vcombine.high %v4239_v16, %v4239_v16  ;;  %v4294_v20 = vrot.slane %v4239_v16, %v9982_v35  ;;  %v2640_v29 = vpop.permute.xlu1 %2639  ;;  %v1886_v5 = vsel %vm7865_vm9, %v6085_v62, %v1885_v30  ;;  %v4611_v10 = vmax.f32 %v4609_v44, %v4610_v27 }
 0x36d   :  { %2679 = vst.msk [vmem:[#allocation2 + $0x90] sm:$0xff] %vm11888_vm12, %v2640_v29  ;;  %v2137_v2 = vpop.permute.xlu0 %2136  ;;  %v10058_v28 = vcombine.low %v1886_v5, %v1889_v52  ;;  %v2084_v30 = vrot.slane %v10019_v31, 6  ;;  %v2083_v56 = vrot.slane %v2081_v25, 4  ;;  %vm11891_vm15 = vcmask 244928  }
 0x36e   :  { %v10061_v13 = vrot.slane %v4287_v3, %v9982_v35  ;;  %v4302_v43 = vcombine.high %v4294_v20, %v4294_v20  ;;  %v4635_v51 = vsel %vm4606_vm1, %v4294_v20, -inf  ;;  %2175 = vst.msk [vmem:[#allocation2 + $0xa0] sm:$0xff] %vm11889_vm14, %v2137_v2  ;;  %3099 = vrot.lane.b32.xlu1 %v9984_v37, %s11502_s29  ;;  %v4612_v36 = vrot.slane %v4611_v10, 1 }
 0x36f   :  { %v4636_v0 = vrot.slane %v4635_v51, 4  ;;  %1946 = vrot.lane.b32.xlu0 %v10058_v28, %s6711_s18  ;;  %v4619_v47 = vrot.slane %v4618_v46, 1  ;;  %v6101_v29 = vrot.slane %v11887_v26, 10  ;;  %v2085_v5 = vsel %vm7915_vm10, %v2083_v56, %v2084_v30 }
 0x370   :  { %v4642_v63 = vsel %vm4606_vm1, %v4302_v43, -inf  ;;  %v4649_v33 = vsel %vm4606_vm1, %v10061_v13, -inf  ;;  %v2721_v55 = vpop.permute.xlu1 %2720  ;;  %v4626_v22 = vrot.slane %v4625_v58, 1  ;;  %vm11892_vm12 = vcmask 835328  }
 0x371   :  { %v4637_v16 = vmax.f32 %v4635_v51, %v4636_v0  ;;  %v4643_v62 = vrot.slane %v4642_v63, 4  ;;  %v4650_v52 = vrot.slane %v4649_v33, 4  ;;  %2760 = vst.msk [vmem:[#allocation2 + $0x90] sm:$0xff] %vm2750_vm3, %v2721_v55  ;;  %v2332_v44 = vpop.permute.xlu0 %2331  ;;  %v4620_v30 = vmax.f32 %v4618_v46, %v4619_v47 }
 0x372   :  { %2370 = vst.msk [vmem:[#allocation2 + $0xa0] sm:$0xff] %vm11890_vm2, %v2332_v44  ;;  %3689 = vrot.lane.b32.xlu1 %v10058_v28, %s6729_s2  ;;  %vm11501_vm14 = vcmask 97280   ;;  %vm11895_vm2 = vcmask 179328  }
 0x373   :  { %v4638_v27 = vrot.slane %v4637_v16, 2  ;;  %v4644_v54 = vmax.f32 %v4642_v63, %v4643_v62  ;;  %v4651_v3 = vmax.f32 %v4649_v33, %v4650_v52  ;;  %2451 = vst.msk [vmem:[#allocation2 + $0xa0] sm:$0xff] %vm11891_vm15, %v9995_v1  ;;  %2791 = vrot.lane.b32.xlu0 %v10015_v18, %s11499_s16  ;;  %v2082_v1 = vsel %vm7915_vm10, %v6101_v29, %v2081_v25  ;;  %s11894_s16 = smov 102  }
 0x374   :  { %v3309_v20 = vpop.permute.xlu1 %3308  ;;  %v4613_v63 = vmax.f32 %v4611_v10, %v4612_v36  ;;  %v4627_v52 = vmax.f32 %v4625_v58, %v4626_v22  ;;  %v2276_v25 = vrot.slane %v11879_v9, 7  ;;  %vm11896_vm15 = vcmask 294128  }
 0x375   :  { %v4639_v2 = vmax.f32 %v4637_v16, %v4638_v27  ;;  %v4645_v43 = vrot.slane %v4644_v54, 2  ;;  %v4652_v51 = vrot.slane %v4651_v3, 2  ;;  %3350 = vst.msk [vmem:[#allocation2 + $0x70] sm:$0xff] %vm11892_vm12, %v3309_v20  ;;  %v2934_v0 = vpop.permute.xlu0 %2933  ;;  %v10092_v16 = vcombine.low %v2082_v1, %v2085_v5 }
 0x376   :  { %2974 = vst.msk [vmem:[#allocation2 + $0x80] sm:$0xff] %vm2965_vm6, %v2934_v0  ;;  %2564 = vrot.lane.b32.xlu1 %v10058_v28, %s11893_s12  ;;  %v10113_v47 = vsel %vm11501_vm14, %v4627_v52, -inf  ;;  %vm11897_vm12 = vcmask 1032128   ;;  %v2279_v1 = vrot.slane %v10019_v31, 7 }
 0x377   :  { %v4640_v33 = vrot.slane %v4639_v2, 1  ;;  %v4646_v55 = vmax.f32 %v4644_v54, %v4645_v43  ;;  %v4653_v62 = vmax.f32 %v4651_v3, %v4652_v51  ;;  %3393 = vrot.lane.b32.xlu0 %v9950_v11, %s11894_s16  ;;  %v10100_v11 = vsel %vm11501_vm14, %v4613_v63, -inf }
 0x378   :  { %v3930_v56 = vpop.permute.xlu1 %3929  ;;  %v10110_v3 = vsel %vm11501_vm14, %v4620_v30, -inf  ;;  %v2278_v51 = vrot.slane %v2276_v25, 4 }
 0x379   :  { %v4641_v44 = vmax.f32 %v4639_v2, %v4640_v33  ;;  %v4647_v27 = vrot.slane %v4646_v55, 1  ;;  %v4654_v20 = vrot.slane %v4653_v62, 1  ;;  %3972 = vst.msk [vmem:[#allocation2 + $0x68] sm:$0xff] %vm11895_vm2, %v3930_v56  ;;  %v3015_v0 = vpop.permute.xlu0 %3014  ;;  %vm11898_vm2 = vcmask 687728  }
 0x37a   :  { %3055 = vst.msk [vmem:[#allocation2 + $0x80] sm:$0xff] %vm3046_vm7, %v3015_v0  ;;  %3166 = vrot.lane.b32.xlu1 %v10015_v18, %s6714_s21 }
 0x37b   :  { %v4648_v10 = vmax.f32 %v4646_v55, %v4647_v27  ;;  %v4655_v46 = vmax.f32 %v4653_v62, %v4654_v20  ;;  %v10103_v58 = vsel %vm11501_vm14, %v4641_v44, -inf  ;;  %2142 = vrot.lane.b32.xlu0 %v10092_v16, %s6713_s20  ;;  %v6117_v62 = vrot.slane %v11887_v26, 11 }
 0x37c   :  { %v2480_v54 = vpop.permute.xlu1 %2479 }
 0x37d   :  { %v10116_v29 = vsel %vm11501_vm14, %v4648_v10, -inf  ;;  %v10119_v5 = vsel %vm11501_vm14, %v4655_v46, -inf  ;;  %2518 = vst.msk [vmem:[#allocation2 + $0xa0] sm:$0xff] %vm11896_vm15, %v2480_v54  ;;  %v3603_v22 = vpop.permute.xlu0 %3602  ;;  %vm11899_vm15 = vcmask 97328   ;;  %v2277_v56 = vsel %vm7847_vm8, %v6117_v62, %v2276_v25 }
 0x37e   :  { %3645 = vst.msk [vmem:[#allocation2 + $0x60] sm:$0xff] %vm11897_vm12, %v3603_v22  ;;  %3787 = vrot.lane.b32.xlu1 %v10092_v16, %s6730_s15  ;;  %vm11900_vm12 = vcmask 31744   ;;  %vm11904_vm14 = vcmask 146528   ;;  %v10172_v22 = vcombine.low %v11879_v9, %v10019_v31  ;;  %v11909_v9 = vld [vmem:[#allocation46_spill] sm:$0xff]  ;;  %v4286_v62 = vcombine.high %v10003_v19, %v10003_v19 }
 0x37f   :  { %3733 = vst.msk [vmem:[#allocation2 + $0x60] sm:$0xff] %vm3719_vm0, %v9942_v38  ;;  %2858 = vrot.lane.b32.xlu0 %v11886_v4, %s11725_s17  ;;  %v2280_v38 = vsel %vm7847_vm8, %v2278_v51, %v2279_v1  ;;  %v1895_v31 = vrot.slane %v11909_v9, 5 }
 0x380   :  { %v3096_v63 = vpop.permute.xlu1 %3095  ;;  %v3995_v33 = vld [vmem:[#allocation2 + $0x68] sm:$0xff]  ;;  %v10150_v44 = vcombine.low %v2277_v56, %v2280_v38 }
 0x381   :  { %3136 = vst.msk [vmem:[#allocation2 + $0x80] sm:$0xff] %vm11898_vm2, %v3096_v63  ;;  %v1943_v55 = vpop.permute.xlu0 %1942  ;;  %6152 = vmatprep.mubr.msk.f32.mxu1 %vm4040_vm11, %v3995_v33  ;;  %vm11901_vm2 = vcmask 343328  }
 0x382   :  { %1980 = vst.msk [vmem:[#allocation2 + $0xb0] sm:$0xff] %vm11899_vm15, %v1943_v55  ;;  %2645 = vrot.lane.b32.xlu1 %v10092_v16, %s6717_s24  ;;  %vm11902_vm15 = vcmask 884528  }
 0x383   :  { %3474 = vrot.lane.b32.xlu0 %v9984_v37, %s11719_s13 }
 0x384   :  { %v10144_v30 = vpop.permute.xlu1 %3685 }
 0x385   :  { %3736 = vst.msk [vmem:[#allocation2 + $0x78] sm:$0xff] %vm11900_vm12, %v10144_v30  ;;  %v2788_v52 = vpop.permute.xlu0 %2787  ;;  %vm11903_vm12 = vcmask 736928  }
 0x386   :  { %2827 = vst.msk [vmem:[#allocation2 + $0x90] sm:$0xff] %vm2817_vm4, %v2788_v52  ;;  %3233 = vrot.lane.b32.xlu1 %v11886_v4, %s11724_s26  ;;  %v3994_v26 = vld [vmem:[#allocation2 + $0x60] sm:$0xff] }
 0x387   :  { %2337 = vrot.lane.b32.xlu0 %v10150_v44, %s6712_s19  ;;  %4188 = vmatmul.mubr.f32.gmra.mxu1 %v3994_v26  ;;  %v11912_v52 = vld [vmem:[#allocation66_spill] sm:$0xff] }
 0x388   :  { %v2561_v37 = vpop.permute.xlu1 %2560  ;;  %v11913_v26 = vld [vmem:[#allocation26_spill] sm:$0xff] }
 0x389   :  { %2599 = vst.msk [vmem:[#allocation2 + $0xa0] sm:$0xff] %vm11901_vm2, %v2561_v37  ;;  %v3390_v27 = vpop.permute.xlu0 %3389  ;;  %vm11905_vm2 = vcmask 80928   ;;  %v6086_v37 = vrot.slane %v11913_v26, 9 }
 0x38a   :  { %3431 = vst.msk [vmem:[#allocation2 + $0x70] sm:$0xff] %vm11902_vm15, %v3390_v27  ;;  %3868 = vrot.lane.b32.xlu1 %v10150_v44, %s11875_s22  ;;  %vm11908_vm15 = vcmask 933728  }
 0x38b   :  { %2939 = vrot.lane.b32.xlu0 %v10058_v28, %s6722_s30 }
 0x38c   :  { %v3163_v20 = vpop.permute.xlu1 %3162 }
 0x38d   :  { %3203 = vst.msk [vmem:[#allocation2 + $0x80] sm:$0xff] %vm11903_vm12, %v3163_v20  ;;  %v2139_v0 = vpop.permute.xlu0 %2138  ;;  %vm11910_vm12 = vcmask 786128  }
 0x38e   :  { %2176 = vst.msk [vmem:[#allocation2 + $0xb0] sm:$0xff] %vm11904_vm14, %v2139_v0  ;;  %2726 = vrot.lane.b32.xlu1 %v10150_v44, %s6718_s25  ;;  %vm11907_vm14 = vcmask 392528   ;;  %v4628_v0 = vsel %vm4606_vm1, %v4286_v62, -inf }
 0x38f   :  { %3541 = vrot.lane.b32.xlu0 %v10015_v18, %s11843_s3  ;;  %v4169_v25 = vpop.f32.mrf.mxu1  ;;  %v11906_v18 = vld [vmem:[#allocation65_spill] sm:$0xff] }
 0x390   :  { %v3784_v10 = vpop.permute.xlu1 %3783  ;;  %v1892_v1 = vrot.slane %v11906_v18, 5  ;;  %v4170_v38 = vadd.f32 %v9961_v23, %v4169_v25 }
 0x391   :  { %3825 = vst.msk [vmem:[#allocation2 + $0x78] sm:$0xff] %vm11905_vm2, %v3784_v10  ;;  %v2855_v46 = vpop.permute.xlu0 %2854  ;;  %v4171_v54 = vpop.f32.mrf.mxu1  ;;  %vm11911_vm2 = vcmask 195728  }
 0x392   :  { %2894 = vst.msk [vmem:[#allocation2 + $0x90] sm:$0xff] %vm11504_vm5, %v2855_v46  ;;  %3314 = vrot.lane.b32.xlu1 %v10058_v28, %s6723_s1  ;;  %v4303_v28 = vcombine.high %v10061_v13, %v10061_v13  ;;  %v1894_v55 = vrot.slane %v1892_v1, 4  ;;  %v1893_v20 = vsel %vm7865_vm9, %v6086_v37, %v1892_v1  ;;  %v4240_v25 = vmax.f32 %v4170_v38, 0.0 }
 0x393   :  { %2418 = vrot.lane.b32.xlu0 %v10172_v22, %s11773_s23  ;;  %v4629_v54 = vrot.slane %v4628_v0, 4  ;;  %v2088_v1 = vrot.slane %v11906_v18, 6 }
 0x394   :  { %v2642_v51 = vpop.permute.xlu1 %2641  ;;  %v1896_v13 = vsel %vm7865_vm9, %v1894_v55, %v1895_v31  ;;  %v4656_v19 = vsel %vm4606_vm1, %v4303_v28, -inf  ;;  %v4304_v28 = vcombine.high %v4240_v25, %v4240_v25 }
 0x395   :  { %2680 = vst.msk [vmem:[#allocation2 + $0xa0] sm:$0xff] %vm11907_vm14, %v2642_v51  ;;  %v3471_v63 = vpop.permute.xlu0 %3470  ;;  %v10206_v46 = vcombine.low %v1893_v20, %v1896_v13  ;;  %vm11914_vm14 = vcmask 982928   ;;  %v4630_v62 = vmax.f32 %v4628_v0, %v4629_v54 }
 0x396   :  { %3512 = vst.msk [vmem:[#allocation2 + $0x70] sm:$0xff] %vm11908_vm15, %v3471_v63  ;;  %3935 = vrot.lane.b32.xlu1 %v10172_v22, %s6725_s0  ;;  %v4311_v63 = vrot.slane %v4240_v25, %v9982_v35  ;;  %vm11916_vm15 = vcmask 835328  }
 0x397   :  { %3020 = vrot.lane.b32.xlu0 %v10092_v16, %s11505_s28  ;;  %v4631_v25 = vrot.slane %v4630_v62, 2 }
 0x398   :  { %v3230_v33 = vpop.permute.xlu1 %3229  ;;  %v4319_v37 = vcombine.high %v4311_v63, %v4311_v63 }
 0x399   :  { %3270 = vst.msk [vmem:[#allocation2 + $0x80] sm:$0xff] %vm11910_vm12, %v3230_v33  ;;  %v2334_v56 = vpop.permute.xlu0 %2333  ;;  %v2091_v33 = vrot.slane %v11909_v9, 6  ;;  %vm11917_vm12 = vcmask 244928  }
 0x39a   :  { %2371 = vst.msk [vmem:[#allocation2 + $0xb0] sm:$0xff] %vm11911_vm2, %v2334_v56  ;;  %2485 = vrot.lane.b32.xlu1 %v11912_v52, %s11722_s27  ;;  %v2090_v56 = vrot.slane %v2088_v1, 4  ;;  %vm11918_vm2 = vcmask 179328  }
 0x39b   :  { %3608 = vrot.lane.b32.xlu0 %v11886_v4, %s11727_s14  ;;  %v4657_v4 = vrot.slane %v4656_v19, 4 }
 0x39c   :  { %v3865_v27 = vpop.permute.xlu1 %3864  ;;  %v2092_v20 = vsel %vm7915_vm10, %v2090_v56, %v2091_v33 }
 0x39d   :  { %3906 = vst.msk [vmem:[#allocation2 + $0x78] sm:$0xff] %vm3898_vm13, %v3865_v27  ;;  %v2936_v10 = vpop.permute.xlu0 %2935  ;;  %v4658_v55 = vmax.f32 %v4656_v19, %v4657_v4  ;;  %v10224_v27 = vrot.slane %v4304_v28, %v9982_v35  ;;  %v6102_v19 = vrot.slane %v11913_v26, 10 }
 0x39e   :  { %2975 = vst.msk [vmem:[#allocation2 + $0x90] sm:$0xff] %vm2965_vm6, %v2936_v10  ;;  %3101 = vrot.lane.b32.xlu1 %v10150_v44, %s11502_s29  ;;  %s11915_s29 = smov 54   ;;  %v4663_v10 = vsel %vm4606_vm1, %v4311_v63, -inf }
 0x39f   :  { %1948 = vrot.lane.b32.xlu0 %v10206_v46, %s6711_s18  ;;  %v4659_v0 = vrot.slane %v4658_v55, 2  ;;  %v2089_v54 = vsel %vm7915_vm10, %v6102_v19, %v2088_v1  ;;  %v4677_v33 = vsel %vm4606_vm1, %v10224_v27, -inf  ;;  %v4664_v63 = vrot.slane %v4663_v10, 4 }
 0x3a0   :  { %v2723_v51 = vpop.permute.xlu1 %2722  ;;  %v10239_v28 = vcombine.low %v2089_v54, %v2092_v20  ;;  %v4632_v1 = vmax.f32 %v4630_v62, %v4631_v25 }
 0x3a1   :  { %2761 = vst.msk [vmem:[#allocation2 + $0xa0] sm:$0xff] %vm2750_vm3, %v2723_v51  ;;  %v3538_v31 = vpop.permute.xlu0 %3537  ;;  %v4670_v51 = vsel %vm4606_vm1, %v4319_v37, -inf  ;;  %v2283_v37 = vrot.slane %v11906_v18, 7 }
 0x3a2   :  { %3579 = vst.msk [vmem:[#allocation2 + $0x70] sm:$0xff] %vm11914_vm14, %v3538_v31  ;;  %3691 = vrot.lane.b32.xlu1 %v10206_v46, %s6729_s2  ;;  %vm11919_vm14 = vcmask 294128   ;;  %v4633_v25 = vrot.slane %v4632_v1, 1 }
 0x3a3   :  { %2793 = vrot.lane.b32.xlu0 %v10172_v22, %s11915_s29 }
 0x3a4   :  { %v3311_v38 = vpop.permute.xlu1 %3310 }
 0x3a5   :  { %3351 = vst.msk [vmem:[#allocation2 + $0x80] sm:$0xff] %vm11916_vm15, %v3311_v38  ;;  %v2415_v13 = vpop.permute.xlu0 %2414  ;;  %v4671_v38 = vrot.slane %v4670_v51, 4  ;;  %vm11920_vm15 = vcmask 1032128  }
 0x3a6   :  { %2452 = vst.msk [vmem:[#allocation2 + $0xb0] sm:$0xff] %vm11917_vm12, %v2415_v13  ;;  %2566 = vrot.lane.b32.xlu1 %v10206_v46, %s11893_s12  ;;  %v4678_v13 = vrot.slane %v4677_v33, 4  ;;  %vm11921_vm12 = vcmask 687728  }
 0x3a7   :  { %3395 = vrot.lane.b32.xlu0 %v10092_v16, %s11894_s16  ;;  %v4660_v16 = vmax.f32 %v4658_v55, %v4659_v0  ;;  %v2286_v55 = vrot.slane %v11909_v9, 7  ;;  %v4665_v0 = vmax.f32 %v4663_v10, %v4664_v63 }
 0x3a8   :  { %v3932_v4 = vpop.permute.xlu1 %3931  ;;  %v4679_v36 = vmax.f32 %v4677_v33, %v4678_v13  ;;  %v4634_v33 = vmax.f32 %v4632_v1, %v4633_v25 }
 0x3a9   :  { %3973 = vst.msk [vmem:[#allocation2 + $0x78] sm:$0xff] %vm11918_vm2, %v3932_v4  ;;  %v3017_v31 = vpop.permute.xlu0 %3016  ;;  %v4661_v20 = vrot.slane %v4660_v16, 1  ;;  %v4672_v4 = vmax.f32 %v4670_v51, %v4671_v38  ;;  %vm11922_vm2 = vcmask 97328   ;;  %v4666_v38 = vrot.slane %v4665_v0, 2 }
 0x3aa   :  { %3056 = vst.msk [vmem:[#allocation2 + $0x90] sm:$0xff] %vm3046_vm7, %v3017_v31  ;;  %3168 = vrot.lane.b32.xlu1 %v10172_v22, %s6714_s21 }
 0x3ab   :  { %2144 = vrot.lane.b32.xlu0 %v10239_v28, %s6713_s20  ;;  %v4662_v63 = vmax.f32 %v4660_v16, %v4661_v20  ;;  %v4673_v13 = vrot.slane %v4672_v4, 2 }
 0x3ac   :  { %v2482_v56 = vpop.permute.xlu1 %2481 }
 0x3ad   :  { %2519 = vst.msk [vmem:[#allocation2 + $0xb0] sm:$0xff] %vm11919_vm14, %v2482_v56  ;;  %v3605_v19 = vpop.permute.xlu0 %3604  ;;  %vm11923_vm14 = vcmask 31744  }
 0x3ae   :  { %3646 = vst.msk [vmem:[#allocation2 + $0x70] sm:$0xff] %vm11920_vm15, %v3605_v19  ;;  %3789 = vrot.lane.b32.xlu1 %v10239_v28, %s6730_s15  ;;  %v2285_v19 = vrot.slane %v2283_v37, 4  ;;  %vm11924_vm15 = vcmask 97280  }
 0x3af   :  { %3735 = vst.msk [vmem:[#allocation2 + $0x70] sm:$0xff] %vm3719_vm0, %v10144_v30  ;;  %2860 = vrot.lane.b32.xlu0 %v11912_v52, %s11725_s17  ;;  %v6118_v30 = vrot.slane %v11913_v26, 11  ;;  %v10286_v25 = vsel %vm11924_vm15, %v4662_v63, -inf }
 0x3b0   :  { %v4174_v62 = vpop.f32.mrf.mxu1  ;;  %v3098_v31 = vpop.permute.xlu1 %3097  ;;  %v3997_v56 = vld [vmem:[#allocation2 + $0x78] sm:$0xff]  ;;  %v2287_v51 = vsel %vm7847_vm8, %v2285_v19, %v2286_v55 }
 0x3b1   :  { %v4175_v54 = vadd.f32 %v9961_v23, %v4174_v62  ;;  %3137 = vst.msk [vmem:[#allocation2 + $0x90] sm:$0xff] %vm11921_vm12, %v3098_v31  ;;  %v1945_v43 = vpop.permute.xlu0 %1944  ;;  %6153 = vmatprep.mubr.msk.f32.mxu1 %vm4040_vm11, %v3997_v56  ;;  %v4667_v31 = vmax.f32 %v4665_v0, %v4666_v38  ;;  %vm11925_vm12 = vmmov %vm11924_vm15  ;;  %vm11928_vm15 = vcmask 736928  }
 0x3b2   :  { %v4176_v2 = vpop.f32.mrf.mxu1  ;;  %1981 = vst.msk [vmem:[#allocation2 + $0xc0] sm:$0xff] %vm11922_vm2, %v1945_v43  ;;  %2647 = vrot.lane.b32.xlu1 %v10239_v28, %s6717_s24  ;;  %v10291_v19 = vsel %vm11925_vm12, %v4634_v33, -inf  ;;  %vm11926_vm2 = vcmask 343328   ;;  %vm11929_vm12 = vcmask 146528  }
 0x3b3   :  { %v4241_v10 = vmax.f32 %v4175_v54, 0.0  ;;  %3476 = vrot.lane.b32.xlu0 %v10150_v44, %s11719_s13  ;;  %v2284_v2 = vsel %vm7847_vm8, %v6118_v30, %v2283_v37  ;;  %v4680_v54 = vrot.slane %v4679_v36, 2  ;;  %v4674_v30 = vmax.f32 %v4672_v4, %v4673_v13 }
 0x3b4   :  { %v10272_v43 = vpop.permute.xlu1 %3687  ;;  %v10276_v16 = vcombine.low %v2284_v2, %v2287_v51  ;;  %v4668_v38 = vrot.slane %v4667_v31, 1 }
 0x3b5   :  { %v4321_v26 = vcombine.high %v4241_v10, %v4241_v10  ;;  %v4328_v62 = vrot.slane %v4241_v10, %v9982_v35  ;;  %3738 = vst.msk [vmem:[#allocation2 + $0x88] sm:$0xff] %vm11923_vm14, %v10272_v43  ;;  %v2790_v55 = vpop.permute.xlu0 %2789  ;;  %vm11927_vm14 = vcmask 884528  }
 0x3b6   :  { %2828 = vst.msk [vmem:[#allocation2 + $0xa0] sm:$0xff] %vm2817_vm4, %v2790_v55  ;;  %3235 = vrot.lane.b32.xlu1 %v11912_v52, %s11724_s26  ;;  %v3996_v1 = vld [vmem:[#allocation2 + $0x70] sm:$0xff]  ;;  %v4669_v4 = vmax.f32 %v4667_v31, %v4668_v38 }
 0x3b7   :  { %v10279_v20 = vrot.slane %v4321_v26, %v9982_v35  ;;  %v4336_v44 = vcombine.high %v4328_v62, %v4328_v62  ;;  %v4691_v37 = vsel %vm4606_vm1, %v4328_v62, -inf  ;;  %2339 = vrot.lane.b32.xlu0 %v10276_v16, %s6712_s19  ;;  %4193 = vmatmul.mubr.f32.gmra.mxu1 %v3996_v1  ;;  %v4681_v26 = vmax.f32 %v4679_v36, %v4680_v54 }
 0x3b8   :  { %v4692_v56 = vrot.slane %v4691_v37, 4  ;;  %v2563_v2 = vpop.permute.xlu1 %2562  ;;  %v4675_v36 = vrot.slane %v4674_v30, 1 }
 0x3b9   :  { %v4698_v10 = vsel %vm4606_vm1, %v4336_v44, -inf  ;;  %v4705_v51 = vsel %vm4606_vm1, %v10279_v20, -inf  ;;  %2600 = vst.msk [vmem:[#allocation2 + $0xb0] sm:$0xff] %vm11926_vm2, %v2563_v2  ;;  %v3392_v0 = vpop.permute.xlu0 %3391  ;;  %vm11930_vm2 = vcmask 80928  }
 0x3ba   :  { %v4693_v62 = vmax.f32 %v4691_v37, %v4692_v56  ;;  %v4699_v63 = vrot.slane %v4698_v10, 4  ;;  %v4706_v55 = vrot.slane %v4705_v51, 4  ;;  %3432 = vst.msk [vmem:[#allocation2 + $0x80] sm:$0xff] %vm11927_vm14, %v3392_v0  ;;  %3870 = vrot.lane.b32.xlu1 %v10276_v16, %s11875_s22  ;;  %v4682_v37 = vrot.slane %v4681_v26, 1 }
 0x3bb   :  { %2941 = vrot.lane.b32.xlu0 %v10206_v46, %s6722_s30  ;;  %vm11931_vm14 = vcmask 97280  }
 0x3bc   :  { %v4694_v33 = vrot.slane %v4693_v62, 2  ;;  %v4700_v13 = vmax.f32 %v4698_v10, %v4699_v63  ;;  %v4707_v44 = vmax.f32 %v4705_v51, %v4706_v55  ;;  %v3165_v54 = vpop.permute.xlu1 %3164  ;;  %v4676_v55 = vmax.f32 %v4674_v30, %v4675_v36 }
 0x3bd   :  { %3204 = vst.msk [vmem:[#allocation2 + $0x90] sm:$0xff] %vm11928_vm15, %v3165_v54  ;;  %v2141_v0 = vpop.permute.xlu0 %2140  ;;  %vm11932_vm15 = vmmov %vm11931_vm14 }
 0x3be   :  { %v4695_v1 = vmax.f32 %v4693_v62, %v4694_v33  ;;  %v4701_v56 = vrot.slane %v4700_v13, 2  ;;  %v4708_v2 = vrot.slane %v4707_v44, 2  ;;  %2177 = vst.msk [vmem:[#allocation2 + $0xc0] sm:$0xff] %vm11929_vm12, %v2141_v0  ;;  %2728 = vrot.lane.b32.xlu1 %v10276_v16, %s6718_s25  ;;  %v10312_v62 = vcombine.low %v11906_v18, %v11909_v9  ;;  %v11933_v9 = vld [vmem:[#allocation45_spill] sm:$0xff]  ;;  %vm11934_vm12 = vmmov %vm11931_vm14 }
 0x3bf   :  { %3543 = vrot.lane.b32.xlu0 %v10172_v22, %s11843_s3  ;;  %v4683_v33 = vmax.f32 %v4681_v26, %v4682_v37  ;;  %v10319_v22 = vsel %vm11931_vm14, %v4669_v4, -inf  ;;  %v10334_v4 = vsel %vm11934_vm12, %v4676_v55, -inf  ;;  %v11943_v55 = vld [vmem:[#allocation68_spill] sm:$0xff] }
 0x3c0   :  { %v4696_v10 = vrot.slane %v4695_v1, 1  ;;  %v4702_v51 = vmax.f32 %v4700_v13, %v4701_v56  ;;  %v4709_v63 = vmax.f32 %v4707_v44, %v4708_v2  ;;  %v3786_v53 = vpop.permute.xlu1 %3785 }
 0x3c1   :  { %3826 = vst.msk [vmem:[#allocation2 + $0x88] sm:$0xff] %vm11930_vm2, %v3786_v53  ;;  %v2857_v40 = vpop.permute.xlu0 %2856  ;;  %v10328_v53 = vcombine.high %v11933_v9, %v11933_v9  ;;  %vm11935_vm2 = vmmov %vm11934_vm12  ;;  %vm11939_vm12 = vcmask 933728  }
 0x3c2   :  { %v4697_v54 = vmax.f32 %v4695_v1, %v4696_v10  ;;  %v4703_v24 = vrot.slane %v4702_v51, 1  ;;  %v4710_v0 = vrot.slane %v4709_v63, 1  ;;  %2895 = vst.msk [vmem:[#allocation2 + $0xa0] sm:$0xff] %vm11504_vm5, %v2857_v40  ;;  %3316 = vrot.lane.b32.xlu1 %v10206_v46, %s6723_s1  ;;  %v1899_v46 = vrot.slane %v11933_v9, 5  ;;  %vm11936_vm14 = vmmov %vm11935_vm2  ;;  %v11940_v1 = vld [vmem:[#allocation67_spill] sm:$0xff] }
 0x3c3   :  { %2420 = vrot.lane.b32.xlu0 %v10312_v62, %s11773_s23  ;;  %vm11938_vm5 = vcmask 392528   ;;  %v6087_v56 = vrot.slane %v11940_v1, 9 }
 0x3c4   :  { %v4704_v31 = vmax.f32 %v4702_v51, %v4703_v24  ;;  %v4711_v30 = vmax.f32 %v4709_v63, %v4710_v0  ;;  %v10322_v18 = vsel %vm11932_vm15, %v4697_v54, -inf  ;;  %v2644_v26 = vpop.permute.xlu1 %2643  ;;  %v10337_v24 = vsel %vm11935_vm2, %v4683_v33, -inf  ;;  %vm11937_vm15 = vmmov %vm11935_vm2 }
 0x3c5   :  { %2681 = vst.msk [vmem:[#allocation2 + $0xb0] sm:$0xff] %vm11938_vm5, %v2644_v26  ;;  %v3473_v44 = vpop.permute.xlu0 %3472  ;;  %v1901_v10 = vrot.slane %v1899_v46, 4  ;;  %v1902_v51 = vrot.slane %v10328_v53, 5  ;;  %vm11941_vm5 = vcmask 786128   ;;  %vm11942_vm2 = vcmask 195728  }
 0x3c6   :  { %v10340_v38 = vsel %vm11936_vm14, %v4704_v31, -inf  ;;  %v10343_v13 = vsel %vm11937_vm15, %v4711_v30, -inf  ;;  %3513 = vst.msk [vmem:[#allocation2 + $0x80] sm:$0xff] %vm11939_vm12, %v3473_v44  ;;  %3937 = vrot.lane.b32.xlu1 %v10312_v62, %s6725_s0  ;;  %v1900_v33 = vsel %vm7865_vm9, %v6087_v56, %v1899_v46  ;;  %v6103_v46 = vrot.slane %v11940_v1, 10 }
 0x3c7   :  { %3022 = vrot.lane.b32.xlu0 %v10239_v28, %s11505_s28  ;;  %v1903_v0 = vsel %vm7865_vm9, %v1901_v10, %v1902_v51  ;;  %s11944_s28 = smov 78   ;;  %vm11945_vm9 = vcmask 982928   ;;  %vm11946_vm14 = vcmask 835328   ;;  %vm11947_vm15 = vcmask 244928  }
 0x3c8   :  { %v3232_v2 = vpop.permute.xlu1 %3231  ;;  %v10368_v30 = vcombine.low %v1900_v33, %v1903_v0  ;;  %vm11948_vm12 = vcmask 179328  }
 0x3c9   :  { %3271 = vst.msk [vmem:[#allocation2 + $0x90] sm:$0xff] %vm11941_vm5, %v3232_v2  ;;  %v2336_v63 = vpop.permute.xlu0 %2335  ;;  %v2098_v2 = vrot.slane %v10328_v53, 6  ;;  %vm11949_vm5 = vcmask 294128  }
 0x3ca   :  { %2372 = vst.msk [vmem:[#allocation2 + $0xc0] sm:$0xff] %vm11942_vm2, %v2336_v63  ;;  %2487 = vrot.lane.b32.xlu1 %v11943_v55, %s11722_s27  ;;  %vm11951_vm2 = vcmask 687728  }
 0x3cb   :  { %3610 = vrot.lane.b32.xlu0 %v11912_v52, %s11727_s14  ;;  %v2095_v52 = vrot.slane %v11933_v9, 6 }
 0x3cc   :  { %v3867_v54 = vpop.permute.xlu1 %3866 }
 0x3cd   :  { %3907 = vst.msk [vmem:[#allocation2 + $0x88] sm:$0xff] %vm3898_vm13, %v3867_v54  ;;  %v2938_v31 = vpop.permute.xlu0 %2937  ;;  %v2097_v56 = vrot.slane %v2095_v52, 4  ;;  %v2096_v51 = vsel %vm7915_vm10, %v6103_v46, %v2095_v52  ;;  %v4337_v52 = vcombine.high %v10279_v20, %v10279_v20 }
 0x3ce   :  { %2976 = vst.msk [vmem:[#allocation2 + $0xa0] sm:$0xff] %vm2965_vm6, %v2938_v31  ;;  %3103 = vrot.lane.b32.xlu1 %v10276_v16, %s11944_s28 }
 0x3cf   :  { %1950 = vrot.lane.b32.xlu0 %v10368_v30, %s6711_s18  ;;  %v2099_v33 = vsel %vm7915_vm10, %v2097_v56, %v2098_v2  ;;  %vm11950_vm10 = vcmask 1032128   ;;  %v2293_v56 = vrot.slane %v10328_v53, 7  ;;  %v4712_v20 = vsel %vm4606_vm1, %v4337_v52, -inf  ;;  %s11962_s18 = smov 72  }
 0x3d0   :  { %v2725_v26 = vpop.permute.xlu1 %2724  ;;  %v10395_v0 = vcombine.low %v2096_v51, %v2099_v33 }
 0x3d1   :  { %2762 = vst.msk [vmem:[#allocation2 + $0xb0] sm:$0xff] %vm2750_vm3, %v2725_v26  ;;  %v3540_v57 = vpop.permute.xlu0 %3539  ;;  %v6119_v26 = vrot.slane %v11940_v1, 11  ;;  %v4320_v1 = vcombine.high %v10224_v27, %v10224_v27 }
 0x3d2   :  { %3580 = vst.msk [vmem:[#allocation2 + $0x80] sm:$0xff] %vm11945_vm9, %v3540_v57  ;;  %3693 = vrot.lane.b32.xlu1 %v10368_v30, %s6729_s2  ;;  %vm11952_vm9 = vcmask 97328  }
 0x3d3   :  { %2795 = vrot.lane.b32.xlu0 %v10312_v62, %s11915_s29  ;;  %v4684_v33 = vsel %vm4606_vm1, %v4320_v1, -inf }
 0x3d4   :  { %v3313_v44 = vpop.permute.xlu1 %3312 }
 0x3d5   :  { %3352 = vst.msk [vmem:[#allocation2 + $0x90] sm:$0xff] %vm11946_vm14, %v3313_v44  ;;  %v2417_v10 = vpop.permute.xlu0 %2416  ;;  %vm11953_vm14 = vcmask 31744  }
 0x3d6   :  { %2453 = vst.msk [vmem:[#allocation2 + $0xc0] sm:$0xff] %vm11947_vm15, %v2417_v10  ;;  %2568 = vrot.lane.b32.xlu1 %v10368_v30, %s11893_s12  ;;  %vm11955_vm15 = vcmask 884528  }
 0x3d7   :  { %3397 = vrot.lane.b32.xlu0 %v10239_v28, %s11894_s16  ;;  %v2290_v28 = vrot.slane %v11933_v9, 7 }
 0x3d8   :  { %v3934_v63 = vpop.permute.xlu1 %3933 }
 0x3d9   :  { %3974 = vst.msk [vmem:[#allocation2 + $0x88] sm:$0xff] %vm11948_vm12, %v3934_v63  ;;  %v3019_v54 = vpop.permute.xlu0 %3018  ;;  %v2292_v44 = vrot.slane %v2290_v28, 4  ;;  %vm11956_vm12 = vcmask 736928  }
 0x3da   :  { %3057 = vst.msk [vmem:[#allocation2 + $0xa0] sm:$0xff] %vm3046_vm7, %v3019_v54  ;;  %3170 = vrot.lane.b32.xlu1 %v10312_v62, %s6714_s21  ;;  %v4713_v54 = vrot.slane %v4712_v20, 4 }
 0x3db   :  { %2146 = vrot.lane.b32.xlu0 %v10395_v0, %s6713_s20  ;;  %v2294_v51 = vsel %vm7847_vm8, %v2292_v44, %v2293_v56 }
 0x3dc   :  { %v2484_v31 = vpop.permute.xlu1 %2483 }
 0x3dd   :  { %2520 = vst.msk [vmem:[#allocation2 + $0xc0] sm:$0xff] %vm11949_vm5, %v2484_v31  ;;  %v3607_v59 = vpop.permute.xlu0 %3606  ;;  %v4685_v31 = vrot.slane %v4684_v33, 4  ;;  %vm11957_vm5 = vcmask 146528  }
 0x3de   :  { %3647 = vst.msk [vmem:[#allocation2 + $0x80] sm:$0xff] %vm11950_vm10, %v3607_v59  ;;  %3791 = vrot.lane.b32.xlu1 %v10395_v0, %s6730_s15  ;;  %v4714_v59 = vmax.f32 %v4712_v20, %v4713_v54  ;;  %vm11958_vm10 = vcmask 80928  }
 0x3df   :  { %3737 = vst.msk [vmem:[#allocation2 + $0x80] sm:$0xff] %vm3719_vm0, %v10272_v43  ;;  %2862 = vrot.lane.b32.xlu0 %v11943_v55, %s11725_s17  ;;  %v2291_v43 = vsel %vm7847_vm8, %v6119_v26, %v2290_v28  ;;  %vm11954_vm8 = vcmask 343328   ;;  %v4686_v52 = vmax.f32 %v4684_v33, %v4685_v31 }
 0x3e0   :  { %v3100_v57 = vpop.permute.xlu1 %3099  ;;  %v3999_v46 = vld [vmem:[#allocation2 + $0x88] sm:$0xff]  ;;  %v10433_v63 = vcombine.low %v2291_v43, %v2294_v51  ;;  %v10457_v51 = vcombine.low %v11933_v9, %v10328_v53 }
 0x3e1   :  { %3138 = vst.msk [vmem:[#allocation2 + $0xa0] sm:$0xff] %vm11951_vm2, %v3100_v57  ;;  %v1947_v2 = vpop.permute.xlu0 %1946  ;;  %6154 = vmatprep.mubr.msk.f32.mxu1 %vm4040_vm11, %v3999_v46  ;;  %v4715_v46 = vrot.slane %v4714_v59, 2  ;;  %vm11959_vm2 = vcmask 540128  }
 0x3e2   :  { %1982 = vst.msk [vmem:[#allocation2 + $0xd0] sm:$0xff] %vm11952_vm9, %v1947_v2  ;;  %2649 = vrot.lane.b32.xlu1 %v10395_v0, %s6717_s24  ;;  %v4687_v2 = vrot.slane %v4686_v52, 2  ;;  %vm11960_vm9 = vcmask 392528  }
 0x3e3   :  { %3478 = vrot.lane.b32.xlu0 %v10276_v16, %s11719_s13 }
 0x3e4   :  { %v10427_v10 = vpop.permute.xlu1 %3689  ;;  %v4688_v33 = vmax.f32 %v4686_v52, %v4687_v2 }
 0x3e5   :  { %3740 = vst.msk [vmem:[#allocation2 + $0x98] sm:$0xff] %vm11953_vm14, %v10427_v10  ;;  %v2792_v27 = vpop.permute.xlu0 %2791  ;;  %vm11961_vm14 = vcmask 933728  }
 0x3e6   :  { %2829 = vst.msk [vmem:[#allocation2 + $0xb0] sm:$0xff] %vm2817_vm4, %v2792_v27  ;;  %3237 = vrot.lane.b32.xlu1 %v11943_v55, %s11724_s26  ;;  %v3998_v16 = vld [vmem:[#allocation2 + $0x80] sm:$0xff]  ;;  %v4716_v27 = vmax.f32 %v4714_v59, %v4715_v46  ;;  %v11965_v46 = vld [vmem:[#allocation17_spill] sm:$0xff] }
 0x3e7   :  { %2341 = vrot.lane.b32.xlu0 %v10433_v63, %s6712_s19  ;;  %4198 = vmatmul.mubr.f32.gmra.mxu1 %v3998_v16 }
 0x3e8   :  { %v2565_v34 = vpop.permute.xlu1 %2564  ;;  %v4717_v9 = vrot.slane %v4716_v27, 1 }
 0x3e9   :  { %2601 = vst.msk [vmem:[#allocation2 + $0xc0] sm:$0xff] %vm11954_vm8, %v2565_v34  ;;  %v3394_v28 = vpop.permute.xlu0 %3393  ;;  %vm11963_vm8 = vcmask 786128  }
 0x3ea   :  { %3433 = vst.msk [vmem:[#allocation2 + $0x90] sm:$0xff] %vm11955_vm15, %v3394_v28  ;;  %3872 = vrot.lane.b32.xlu1 %v10433_v63, %s11875_s22  ;;  %vm11964_vm15 = vcmask 195728   ;;  %v4718_v28 = vmax.f32 %v4716_v27, %v4717_v9  ;;  %v11969_v27 = vld [vmem:[#allocation20_spill] sm:$0xff] }
 0x3eb   :  { %2943 = vrot.lane.b32.xlu0 %v10368_v30, %s6722_s30 }
 0x3ec   :  { %v3167_v26 = vpop.permute.xlu1 %3166 }
 0x3ed   :  { %3205 = vst.msk [vmem:[#allocation2 + $0xa0] sm:$0xff] %vm11956_vm12, %v3167_v26  ;;  %v2143_v57 = vpop.permute.xlu0 %2142  ;;  %vm11966_vm12 = vcmask 97280  }
 0x3ee   :  { %2178 = vst.msk [vmem:[#allocation2 + $0xd0] sm:$0xff] %vm11957_vm5, %v2143_v57  ;;  %2730 = vrot.lane.b32.xlu1 %v10433_v63, %s6718_s25  ;;  %vm11967_vm5 = vmmov %vm11966_vm12 }
 0x3ef   :  { %3545 = vrot.lane.b32.xlu0 %v10312_v62, %s11843_s3  ;;  %v4179_v44 = vpop.f32.mrf.mxu1 }
 0x3f0   :  { %v3788_v56 = vpop.permute.xlu1 %3787  ;;  %v4180_v1 = vadd.f32 %v9961_v23, %v4179_v44  ;;  %v10480_v44 = vcombine.low %v11965_v46, %v9094_v32 }
 0x3f1   :  { %3827 = vst.msk [vmem:[#allocation2 + $0x98] sm:$0xff] %vm11958_vm10, %v3788_v56  ;;  %v2859_v43 = vpop.permute.xlu0 %2858  ;;  %v4181_v20 = vpop.f32.mrf.mxu1  ;;  %vm11968_vm10 = vcmask 982928  }
 0x3f2   :  { %2896 = vst.msk [vmem:[#allocation2 + $0xb0] sm:$0xff] %vm11959_vm2, %v2859_v43  ;;  %3318 = vrot.lane.b32.xlu1 %v10368_v30, %s6723_s1  ;;  %v4242_v23 = vmax.f32 %v4180_v1, 0.0  ;;  %v4689_v30 = vrot.slane %v4688_v33, 1  ;;  %vm11970_vm2 = vcmask 835328  }
 0x3f3   :  { %2422 = vrot.lane.b32.xlu0 %v10457_v51, %s11773_s23 }
 0x3f4   :  { %v2646_v62 = vpop.permute.xlu1 %2645  ;;  %v4345_v54 = vrot.slane %v4242_v23, %v9982_v35  ;;  %v4338_v31 = vcombine.high %v4242_v23, %v4242_v23  ;;  %v4690_v26 = vmax.f32 %v4688_v33, %v4689_v30 }
 0x3f5   :  { %2682 = vst.msk [vmem:[#allocation2 + $0xc0] sm:$0xff] %vm11960_vm9, %v2646_v62  ;;  %v3475_v16 = vpop.permute.xlu0 %3474  ;;  %vm11971_vm9 = vcmask 244928  }
 0x3f6   :  { %3514 = vst.msk [vmem:[#allocation2 + $0x90] sm:$0xff] %vm11961_vm14, %v3475_v16  ;;  %3939 = vrot.lane.b32.xlu1 %v10457_v51, %s6725_s0  ;;  %v4353_v52 = vcombine.high %v4345_v54, %v4345_v54  ;;  %v10483_v56 = vrot.slane %v4338_v31, %v9982_v35  ;;  %v4719_v2 = vsel %vm4606_vm1, %v4345_v54, -inf  ;;  %v10495_v32 = vsel %vm11967_vm5, %v4690_v26, -inf  ;;  %v10517_v31 = vld [vmem:[%s11355_s4] ss:$0 sm:$0xff] }
 0x3f7   :  { %3024 = vrot.lane.b32.xlu0 %v10395_v0, %s11962_s18  ;;  %v4720_v33 = vrot.slane %v4719_v2, 4  ;;  %vm11972_vm14 = vcmask 179328   ;;  %vm11977_vm5 = vcmask 97328  }
 0x3f8   :  { %v3234_v53 = vpop.permute.xlu1 %3233  ;;  %v4726_v43 = vsel %vm4606_vm1, %v4353_v52, -inf }
 0x3f9   :  { %3272 = vst.msk [vmem:[#allocation2 + $0xa0] sm:$0xff] %vm11963_vm8, %v3234_v53  ;;  %v2338_v34 = vpop.permute.xlu0 %2337  ;;  %v4727_v23 = vrot.slane %v4726_v43, 4  ;;  %v4721_v30 = vmax.f32 %v4719_v2, %v4720_v33  ;;  %v11973_v2 = vld [vmem:[#allocation69_spill] sm:$0xff]  ;;  %vm11974_vm8 = vcmask 294128  }
 0x3fa   :  { %2373 = vst.msk [vmem:[#allocation2 + $0xd0] sm:$0xff] %vm11964_vm15, %v2338_v34  ;;  %2797 = vrot.lane.b32.xlu1 %v10457_v51, %s11915_s29  ;;  %vm11975_vm15 = vcmask 1032128  }
 0x3fb   :  { %3612 = vrot.lane.b32.xlu0 %v11943_v55, %s11727_s14  ;;  %v10489_v55 = vsel %vm11966_vm12, %v4718_v28, -inf  ;;  %v4728_v34 = vmax.f32 %v4726_v43, %v4727_v23  ;;  %vm11976_vm12 = vcmask 687728  }
 0x3fc   :  { %v3869_v59 = vpop.permute.xlu1 %3868 }
 0x3fd   :  { %3908 = vst.msk [vmem:[#allocation2 + $0x98] sm:$0xff] %vm3898_vm13, %v3869_v59  ;;  %v2940_v57 = vpop.permute.xlu0 %2939  ;;  %v4729_v43 = vrot.slane %v4728_v34, 2 }
 0x3fe   :  { %2977 = vst.msk [vmem:[#allocation2 + $0xb0] sm:$0xff] %vm2965_vm6, %v2940_v57  ;;  %3399 = vrot.lane.b32.xlu1 %v10395_v0, %s11894_s16  ;;  %v4733_v0 = vsel %vm4606_vm1, %v10483_v56, -inf }
 0x3ff   :  { %2489 = vrot.lane.b32.xlu0 %v10480_v44, %s11722_s27  ;;  %v4734_v9 = vrot.slane %v4733_v0, 4 }
 0x400   :  { %v2727_v1 = vpop.permute.xlu1 %2726 }
 0x401   :  { %2763 = vst.msk [vmem:[#allocation2 + $0xc0] sm:$0xff] %vm2750_vm3, %v2727_v1  ;;  %v3542_v20 = vpop.permute.xlu0 %3541  ;;  %v4735_v26 = vmax.f32 %v4733_v0, %v4734_v9  ;;  %v4722_v1 = vrot.slane %v4721_v30, 2 }
 0x402   :  { %3581 = vst.msk [vmem:[#allocation2 + $0x90] sm:$0xff] %vm11968_vm10, %v3542_v20  ;;  %2570 = vrot.lane.b32.xlu1 %v11969_v27, %s11893_s12  ;;  %vm11978_vm10 = vcmask 31744  }
 0x403   :  { %3105 = vrot.lane.b32.xlu0 %v10433_v63, %s11944_s28  ;;  %v4736_v0 = vrot.slane %v4735_v26, 2 }
 0x404   :  { %v3315_v16 = vpop.permute.xlu1 %3314 }
 0x405   :  { %3353 = vst.msk [vmem:[#allocation2 + $0xa0] sm:$0xff] %vm11970_vm2, %v3315_v16  ;;  %v2419_v53 = vpop.permute.xlu0 %2418  ;;  %vm11980_vm2 = vcmask 343328  }
 0x406   :  { %2454 = vst.msk [vmem:[#allocation2 + $0xd0] sm:$0xff] %vm11971_vm9, %v2419_v53  ;;  %3172 = vrot.lane.b32.xlu1 %v10457_v51, %s6714_s21  ;;  %vm11981_vm9 = vcmask 884528  }
 0x407   :  { %3695 = vrot.lane.b32.xlu0 %v11969_v27, %s6729_s2  ;;  %v4184_v54 = vpop.f32.mrf.mxu1 }
 0x408   :  { %v4185_v28 = vadd.f32 %v10517_v31, %v4184_v54  ;;  %v3936_v59 = vpop.permute.xlu1 %3935 }
 0x409   :  { %3975 = vst.msk [vmem:[#allocation2 + $0x98] sm:$0xff] %vm11972_vm14, %v3936_v59  ;;  %v3021_v52 = vpop.permute.xlu0 %3020  ;;  %v4186_v57 = vpop.f32.mrf.mxu1  ;;  %vm11982_vm14 = vcmask 97280  }
 0x40a   :  { %v4243_v46 = vmax.f32 %v4185_v28, 0.0  ;;  %3058 = vst.msk [vmem:[#allocation2 + $0xb0] sm:$0xff] %vm3046_vm7, %v3021_v52  ;;  %3793 = vrot.lane.b32.xlu1 %v11973_v2, %s6730_s15  ;;  %v4723_v28 = vmax.f32 %v4721_v30, %v4722_v1  ;;  %v4730_v52 = vmax.f32 %v4728_v34, %v4729_v43 }
 0x40b   :  { %2864 = vrot.lane.b32.xlu0 %v10480_v44, %s11725_s17 }
 0x40c   :  { %v4355_v20 = vcombine.high %v4243_v46, %v4243_v46  ;;  %v4362_v33 = vrot.slane %v4243_v46, %v9982_v35  ;;  %v2486_v23 = vpop.permute.xlu1 %2485 }
 0x40d   :  { %2521 = vst.msk [vmem:[#allocation2 + $0xd0] sm:$0xff] %vm11974_vm8, %v2486_v23  ;;  %v3609_v16 = vpop.permute.xlu0 %3608  ;;  %v4737_v23 = vmax.f32 %v4735_v26, %v4736_v0  ;;  %v4731_v26 = vrot.slane %v4730_v52, 1  ;;  %vm11983_vm8 = vmmov %vm11982_vm14 }
 0x40e   :  { %v10529_v9 = vrot.slane %v4355_v20, %v9982_v35  ;;  %v4370_v53 = vcombine.high %v4362_v33, %v4362_v33  ;;  %v4747_v54 = vsel %vm4606_vm1, %v4362_v33, -inf  ;;  %3648 = vst.msk [vmem:[#allocation2 + $0x90] sm:$0xff] %vm11975_vm15, %v3609_v16  ;;  %2945 = vrot.lane.b32.xlu1 %v11969_v27, %s6722_s30  ;;  %vm11984_vm15 = vmmov %vm11983_vm8 }
 0x40f   :  { %v4748_v59 = vrot.slane %v4747_v54, 4  ;;  %3739 = vst.msk [vmem:[#allocation2 + $0x90] sm:$0xff] %vm3719_vm0, %v10427_v10  ;;  %3480 = vrot.lane.b32.xlu0 %v10433_v63, %s11719_s13  ;;  %v4724_v10 = vrot.slane %v4723_v28, 1  ;;  %v4738_v0 = vrot.slane %v4737_v23, 1 }
 0x410   :  { %v4754_v57 = vsel %vm4606_vm1, %v4370_v53, -inf  ;;  %v4761_v46 = vsel %vm4606_vm1, %v10529_v9, -inf  ;;  %v3102_v20 = vpop.permute.xlu1 %3101  ;;  %v4001_v33 = vld [vmem:[#allocation2 + $0x98] sm:$0xff] }
 0x411   :  { %v4749_v16 = vmax.f32 %v4747_v54, %v4748_v59  ;;  %v4755_v62 = vrot.slane %v4754_v57, 4  ;;  %v4762_v37 = vrot.slane %v4761_v46, 4  ;;  %3139 = vst.msk [vmem:[#allocation2 + $0xb0] sm:$0xff] %vm11976_vm12, %v3102_v20  ;;  %v1949_v30 = vpop.permute.xlu0 %1948  ;;  %6155 = vmatprep.mubr.msk.f32.mxu1 %vm4040_vm11, %v4001_v33  ;;  %vm11985_vm12 = vmmov %vm11983_vm8 }
 0x412   :  { %1983 = vst.msk [vmem:[#allocation2 + $0xe0] sm:$0xff] %vm11977_vm5, %v1949_v30  ;;  %3547 = vrot.lane.b32.xlu1 %v10457_v51, %s11843_s3  ;;  %v11979_v51 = vld [vmem:[#allocation70_spill] sm:$0xff]  ;;  %vm11986_vm5 = vmmov %vm11983_vm8 }
 0x413   :  { %v4750_v63 = vrot.slane %v4749_v16, 2  ;;  %v4756_v34 = vmax.f32 %v4754_v57, %v4755_v62  ;;  %v4763_v1 = vmax.f32 %v4761_v46, %v4762_v37  ;;  %2651 = vrot.lane.b32.xlu0 %v11973_v2, %s6717_s24  ;;  %v4725_v62 = vmax.f32 %v4723_v28, %v4724_v10 }
 0x414   :  { %v10549_v43 = vpop.permute.xlu1 %3691 }
 0x415   :  { %v4751_v53 = vmax.f32 %v4749_v16, %v4750_v63  ;;  %v4757_v54 = vrot.slane %v4756_v34, 2  ;;  %v4764_v59 = vrot.slane %v4763_v1, 2  ;;  %3742 = vst.msk [vmem:[#allocation2 + $0xa8] sm:$0xff] %vm11978_vm10, %v10549_v43  ;;  %v2794_v20 = vpop.permute.xlu0 %2793  ;;  %v4732_v16 = vmax.f32 %v4730_v52, %v4731_v26  ;;  %vm11987_vm10 = vmmov %vm11986_vm5 }
 0x416   :  { %2830 = vst.msk [vmem:[#allocation2 + $0xc0] sm:$0xff] %vm2817_vm4, %v2794_v20  ;;  %2732 = vrot.lane.b32.xlu1 %v11979_v51, %s6718_s25  ;;  %v4000_v37 = vld [vmem:[#allocation2 + $0x90] sm:$0xff]  ;;  %v4739_v63 = vmax.f32 %v4737_v23, %v4738_v0  ;;  %v10563_v28 = vsel %vm11982_vm14, %v4725_v62, -inf  ;;  %vm11991_vm14 = vcmask 80928  }
 0x417   :  { %v4752_v57 = vrot.slane %v4751_v53, 1  ;;  %v4758_v46 = vmax.f32 %v4756_v34, %v4757_v54  ;;  %v4765_v33 = vmax.f32 %v4763_v1, %v4764_v59  ;;  %3239 = vrot.lane.b32.xlu0 %v10480_v44, %s11724_s26  ;;  %4203 = vmatmul.mubr.f32.gmra.mxu1 %v4000_v37  ;;  %v10573_v26 = vsel %vm11984_vm15, %v4732_v16, -inf  ;;  %v11990_v54 = vld [vmem:[#allocation51_spill] sm:$0xff] }
 0x418   :  { %v2567_v30 = vpop.permute.xlu1 %2566  ;;  %vm11993_vm15 = vcmask 392528  }
 0x419   :  { %v4753_v36 = vmax.f32 %v4751_v53, %v4752_v57  ;;  %v4759_v40 = vrot.slane %v4758_v46, 1  ;;  %v4766_v50 = vrot.slane %v4765_v33, 1  ;;  %2602 = vst.msk [vmem:[#allocation2 + $0xd0] sm:$0xff] %vm11980_vm2, %v2567_v30  ;;  %v3396_v20 = vpop.permute.xlu0 %3395  ;;  %vm11988_vm2 = vcmask 736928   ;;  %v11997_v30 = vld [vmem:[#allocation71_spill] sm:$0xff] }
 0x41a   :  { %3434 = vst.msk [vmem:[#allocation2 + $0xa0] sm:$0xff] %vm11981_vm9, %v3396_v20  ;;  %3320 = vrot.lane.b32.xlu1 %v11969_v27, %s6723_s1  ;;  %v10576_v27 = vsel %vm11985_vm12, %v4739_v63, -inf  ;;  %vm11989_vm9 = vcmask 146528   ;;  %vm11994_vm12 = vcmask 933728  }
 0x41b   :  { %v4760_v10 = vmax.f32 %v4758_v46, %v4759_v40  ;;  %v4767_v34 = vmax.f32 %v4765_v33, %v4766_v50  ;;  %v10566_v52 = vsel %vm11983_vm8, %v4753_v36, -inf  ;;  %3874 = vrot.lane.b32.xlu0 %v11979_v51, %s11875_s22  ;;  %vm11992_vm8 = vcmask 540128  }
 0x41c   :  { %v3169_v1 = vpop.permute.xlu1 %3168 }
 0x41d   :  { %v10579_v0 = vsel %vm11986_vm5, %v4760_v10, -inf  ;;  %v10582_v50 = vsel %vm11987_vm10, %v4767_v34, -inf  ;;  %3206 = vst.msk [vmem:[#allocation2 + $0xb0] sm:$0xff] %vm11988_vm2, %v3169_v1  ;;  %v2145_v40 = vpop.permute.xlu0 %2144  ;;  %vm11995_vm5 = vcmask 786128   ;;  %vm11996_vm10 = vcmask 195728  }
 0x41e   :  { %2179 = vst.msk [vmem:[#allocation2 + $0xe0] sm:$0xff] %vm11989_vm9, %v2145_v40  ;;  %3941 = vrot.lane.b32.xlu1 %v11990_v54, %s6725_s0  ;;  %vm11998_vm2 = vcmask 982928   ;;  %vm11999_vm9 = vcmask 835328   ;;  %v4371_v34 = vcombine.high %v10529_v9, %v10529_v9  ;;  %v12002_v9 = vld [vmem:[#allocation19_spill] sm:$0xff] }
 0x41f   :  { %3026 = vrot.lane.b32.xlu0 %v11973_v2, %s11962_s18 }
 0x420   :  { %v3790_v59 = vpop.permute.xlu1 %3789 }
 0x421   :  { %3828 = vst.msk [vmem:[#allocation2 + $0xa8] sm:$0xff] %vm11991_vm14, %v3790_v59  ;;  %v2861_v37 = vpop.permute.xlu0 %2860  ;;  %vm12000_vm14 = vcmask 244928   ;;  %v4768_v59 = vsel %vm4606_vm1, %v4371_v34, -inf }
 0x422   :  { %2897 = vst.msk [vmem:[#allocation2 + $0xc0] sm:$0xff] %vm11992_vm8, %v2861_v37  ;;  %3107 = vrot.lane.b32.xlu1 %v11979_v51, %s11944_s28  ;;  %vm12001_vm8 = vcmask 179328  }
 0x423   :  { %3614 = vrot.lane.b32.xlu0 %v10480_v44, %s11727_s14 }
 0x424   :  { %v2648_v62 = vpop.permute.xlu1 %2647 }
 0x425   :  { %2683 = vst.msk [vmem:[#allocation2 + $0xd0] sm:$0xff] %vm11993_vm15, %v2648_v62  ;;  %v3477_v57 = vpop.permute.xlu0 %3476  ;;  %v3145_v62 = vcombine.low %v12002_v9, %v9151_v48  ;;  %vm12003_vm15 = vcmask 294128  }
 0x426   :  { %3515 = vst.msk [vmem:[#allocation2 + $0xa0] sm:$0xff] %vm11994_vm12, %v3477_v57  ;;  %3697 = vrot.lane.b32.xlu1 %v9202_v60, %s6729_s2  ;;  %vm12004_vm12 = vcmask 1032128  }
 0x427   :  { %2799 = vrot.lane.b32.xlu0 %v11990_v54, %s11915_s29 }
 0x428   :  { %v3236_v46 = vpop.permute.xlu1 %3235 }
 0x429   :  { %3273 = vst.msk [vmem:[#allocation2 + $0xb0] sm:$0xff] %vm11995_vm5, %v3236_v46  ;;  %v2340_v33 = vpop.permute.xlu0 %2339  ;;  %vm12005_vm5 = vcmask 687728  }
 0x42a   :  { %2374 = vst.msk [vmem:[#allocation2 + $0xe0] sm:$0xff] %vm11996_vm10, %v2340_v33  ;;  %3174 = vrot.lane.b32.xlu1 %v11990_v54, %s6714_s21  ;;  %vm12006_vm10 = vcmask 97328  }
 0x42b   :  { %3401 = vrot.lane.b32.xlu0 %v11973_v2, %s11894_s16 }
 0x42c   :  { %v3871_v44 = vpop.permute.xlu1 %3870 }
 0x42d   :  { %3909 = vst.msk [vmem:[#allocation2 + $0xa8] sm:$0xff] %vm3898_vm13, %v3871_v44  ;;  %v2942_v16 = vpop.permute.xlu0 %2941 }
 0x42e   :  { %2978 = vst.msk [vmem:[#allocation2 + $0xc0] sm:$0xff] %vm2965_vm6, %v2942_v16  ;;  %3795 = vrot.lane.b32.xlu1 %v9208_v39, %s6730_s15 }
 0x42f   :  { %2866 = vrot.lane.b32.xlu0 %v11997_v30, %s11725_s17 }
 0x430   :  { %v2729_v63 = vpop.permute.xlu1 %2728 }
 0x431   :  { %2764 = vst.msk [vmem:[#allocation2 + $0xd0] sm:$0xff] %vm2750_vm3, %v2729_v63  ;;  %v3544_v20 = vpop.permute.xlu0 %3543 }
 0x432   :  { %3582 = vst.msk [vmem:[#allocation2 + $0xa0] sm:$0xff] %vm11998_vm2, %v3544_v20  ;;  %3241 = vrot.lane.b32.xlu1 %v11997_v30, %s11724_s26  ;;  %vm12007_vm2 = vcmask 31744  }
 0x433   :  { %3482 = vrot.lane.b32.xlu0 %v11979_v51, %s11719_s13  ;;  %v4354_v51 = vcombine.high %v10483_v56, %v10483_v56  ;;  %v4769_v56 = vrot.slane %v4768_v59, 4 }
 0x434   :  { %v3317_v2 = vpop.permute.xlu1 %3316 }
 0x435   :  { %3354 = vst.msk [vmem:[#allocation2 + $0xb0] sm:$0xff] %vm11999_vm9, %v3317_v2  ;;  %v2421_v10 = vpop.permute.xlu0 %2420  ;;  %v4740_v46 = vsel %vm4606_vm1, %v4354_v51, -inf  ;;  %v4770_v44 = vmax.f32 %v4768_v59, %v4769_v56  ;;  %vm12008_vm9 = vcmask 343328  }
 0x436   :  { %2455 = vst.msk [vmem:[#allocation2 + $0xe0] sm:$0xff] %vm12000_vm14, %v2421_v10  ;;  %3876 = vrot.lane.b32.xlu1 %v9227_v14, %s11875_s22  ;;  %v4741_v33 = vrot.slane %v4740_v46, 4  ;;  %vm12009_vm14 = vcmask 884528  }
 0x437   :  { %2947 = vrot.lane.b32.xlu0 %v9202_v60, %s6722_s30  ;;  %v4771_v2 = vrot.slane %v4770_v44, 2 }
 0x438   :  { %v3938_v1 = vpop.permute.xlu1 %3937  ;;  %v4742_v16 = vmax.f32 %v4740_v46, %v4741_v33 }
 0x439   :  { %3976 = vst.msk [vmem:[#allocation2 + $0xa8] sm:$0xff] %vm12001_vm8, %v3938_v1  ;;  %v3023_v40 = vpop.permute.xlu0 %3022  ;;  %vm12010_vm8 = vcmask 736928  }
 0x43a   :  { %3059 = vst.msk [vmem:[#allocation2 + $0xc0] sm:$0xff] %vm3046_vm7, %v3023_v40  ;;  %3322 = vrot.lane.b32.xlu1 %v9202_v60, %s6723_s1  ;;  %v4772_v40 = vmax.f32 %v4770_v44, %v4771_v2 }
 0x43b   :  { %3549 = vrot.lane.b32.xlu0 %v11990_v54, %s11843_s3 }
 0x43c   :  { %v2488_v37 = vpop.permute.xlu1 %2487  ;;  %v4773_v9 = vrot.slane %v4772_v40, 1 }
 0x43d   :  { %2522 = vst.msk [vmem:[#allocation2 + $0xe0] sm:$0xff] %vm12003_vm15, %v2488_v37  ;;  %v3611_v57 = vpop.permute.xlu0 %3610  ;;  %vm12011_vm15 = vcmask 146528  }
 0x43e   :  { %3649 = vst.msk [vmem:[#allocation2 + $0xa0] sm:$0xff] %vm12004_vm12, %v3611_v57  ;;  %3943 = vrot.lane.b32.xlu1 %v3145_v62, %s6725_s0  ;;  %vm12012_vm12 = vcmask 80928  }
 0x43f   :  { %3741 = vst.msk [vmem:[#allocation2 + $0xa0] sm:$0xff] %vm3719_vm0, %v10549_v43  ;;  %3028 = vrot.lane.b32.xlu0 %v9208_v39, %s11962_s18 }
 0x440   :  { %v3104_v60 = vpop.permute.xlu1 %3103  ;;  %v4003_v54 = vld [vmem:[#allocation2 + $0xa8] sm:$0xff] }
 0x441   :  { %3140 = vst.msk [vmem:[#allocation2 + $0xc0] sm:$0xff] %vm12005_vm5, %v3104_v60  ;;  %v1951_v48 = vpop.permute.xlu0 %1950  ;;  %6156 = vmatprep.mubr.msk.f32.mxu1 %vm4040_vm11, %v4003_v54  ;;  %v12013_v60 = vld [vmem:[#allocation52_spill] sm:$0xff]  ;;  %v12014_v54 = vld [vmem:[#allocation18_spill] sm:$0xff]  ;;  %vm12015_vm5 = vcmask 540128  }
 0x442   :  { %1984 = vst.msk [vmem:[#allocation2 + $0xf0] sm:$0xff] %vm12006_vm10, %v1951_v48  ;;  %3403 = vrot.lane.b32.xlu1 %v9208_v39, %s11894_s16  ;;  %v3212_v33 = vcombine.low %v12014_v54, %v12013_v60  ;;  %v4774_v48 = vmax.f32 %v4772_v40, %v4773_v9  ;;  %vm12016_vm10 = vcmask 392528   ;;  %v12024_v40 = vcombine.low %v9265_v21, %v9286_v12 }
 0x443   :  { %3616 = vrot.lane.b32.xlu0 %v11997_v30, %s11727_s14  ;;  %v4743_v30 = vrot.slane %v4742_v16, 2 }
 0x444   :  { %v10658_v43 = vpop.permute.xlu1 %3693 }
 0x445   :  { %3744 = vst.msk [vmem:[#allocation2 + $0xb8] sm:$0xff] %vm12007_vm2, %v10658_v43  ;;  %v2796_v63 = vpop.permute.xlu0 %2795  ;;  %v4744_v59 = vmax.f32 %v4742_v16, %v4743_v30  ;;  %vm12017_vm2 = vcmask 933728   ;;  %v12018_v16 = vld [vmem:[#allocation72_spill] sm:$0xff] }
 0x446   :  { %2831 = vst.msk [vmem:[#allocation2 + $0xd0] sm:$0xff] %vm2817_vm4, %v2796_v63  ;;  %3176 = vrot.lane.b32.xlu1 %v3145_v62, %s6714_s21  ;;  %v4002_v20 = vld [vmem:[#allocation2 + $0xa0] sm:$0xff] }
 0x447   :  { %3109 = vrot.lane.b32.xlu0 %v9227_v14, %s11944_s28  ;;  %v4189_v39 = vpop.f32.mrf.mxu1  ;;  %4208 = vmatmul.mubr.f32.gmra.mxu1 %v4002_v20  ;;  %v4745_v46 = vrot.slane %v4744_v59, 1  ;;  %s6735_s28 = smov 52  }
 0x448   :  { %v2569_v10 = vpop.permute.xlu1 %2568 }
 0x449   :  { %2603 = vst.msk [vmem:[#allocation2 + $0xe0] sm:$0xff] %vm12008_vm9, %v2569_v10  ;;  %v3398_v34 = vpop.permute.xlu0 %3397  ;;  %v4191_v1 = vpop.f32.mrf.mxu1  ;;  %v4746_v44 = vmax.f32 %v4744_v59, %v4745_v46  ;;  %vm12019_vm9 = vcmask 97280   ;;  %v12023_v10 = vcombine.low %v9261_v45, %v9275_v17  ;;  %v4190_v17 = vadd.f32 %v10517_v31, %v4189_v39 }
 0x44a   :  { %3435 = vst.msk [vmem:[#allocation2 + $0xb0] sm:$0xff] %vm12009_vm14, %v3398_v34  ;;  %3797 = vrot.lane.b32.xlu1 %v9246_v8, %s6730_s15  ;;  %v10689_v63 = vsel %vm12019_vm9, %v4774_v48, -inf  ;;  %vm12020_vm14 = vmmov %vm12019_vm9  ;;  %v12026_v59 = vcombine.low %v9298_v41, %v9304_v61  ;;  %vm12031_vm9 = vcmask 1032128  }
 0x44b   :  { %3699 = vrot.lane.b32.xlu0 %v9257_v49, %s6729_s2  ;;  %v10694_v20 = vsel %vm12020_vm14, %v4746_v44, -inf  ;;  %v4244_v12 = vmax.f32 %v4190_v17, 0.0  ;;  %vm12032_vm14 = vcmask 884528  }
 0x44c   :  { %v3171_v51 = vpop.permute.xlu1 %3170 }
 0x44d   :  { %3207 = vst.msk [vmem:[#allocation2 + $0xc0] sm:$0xff] %vm12010_vm8, %v3171_v51  ;;  %v2147_v37 = vpop.permute.xlu0 %2146  ;;  %vm12021_vm8 = vcmask 786128   ;;  %v4379_v61 = vrot.slane %v4244_v12, %v9982_v35 }
 0x44e   :  { %2180 = vst.msk [vmem:[#allocation2 + $0xf0] sm:$0xff] %vm12011_vm15, %v2147_v37  ;;  %3551 = vrot.lane.b32.xlu1 %v3145_v62, %s11843_s3  ;;  %vm12022_vm15 = vcmask 195728   ;;  %v4372_v37 = vcombine.high %v4244_v12, %v4244_v12 }
 0x44f   :  { %3484 = vrot.lane.b32.xlu0 %v9227_v14, %s11719_s13  ;;  %v4775_v60 = vsel %vm4606_vm1, %v4379_v61, -inf }
 0x450   :  { %v3792_v57 = vpop.permute.xlu1 %3791 }
 0x451   :  { %3829 = vst.msk [vmem:[#allocation2 + $0xb8] sm:$0xff] %vm12012_vm12, %v3792_v57  ;;  %v2863_v56 = vpop.permute.xlu0 %2862  ;;  %vm12025_vm12 = vcmask 982928   ;;  %v4387_v57 = vcombine.high %v4379_v61, %v4379_v61 }
 0x452   :  { %2898 = vst.msk [vmem:[#allocation2 + $0xd0] sm:$0xff] %vm12015_vm5, %v2863_v56  ;;  %3324 = vrot.lane.b32.xlu1 %v9257_v49, %s6723_s1  ;;  %vm12027_vm5 = vcmask 835328   ;;  %v10738_v56 = vrot.slane %v4372_v37, %v9982_v35 }
 0x453   :  { %3243 = vrot.lane.b32.xlu0 %v3212_v33, %s11724_s26 }
 0x454   :  { %v2650_v62 = vpop.permute.xlu1 %2649  ;;  %v4789_v48 = vsel %vm4606_vm1, %v10738_v56, -inf }
 0x455   :  { %2684 = vst.msk [vmem:[#allocation2 + $0xe0] sm:$0xff] %vm12016_vm10, %v2650_v62  ;;  %v3479_v14 = vpop.permute.xlu0 %3478  ;;  %vm12028_vm10 = vcmask 244928   ;;  %v4776_v62 = vrot.slane %v4775_v60, 4 }
 0x456   :  { %3516 = vst.msk [vmem:[#allocation2 + $0xb0] sm:$0xff] %vm12017_vm2, %v3479_v14  ;;  %3945 = vrot.lane.b32.xlu1 %v12018_v16, %s6725_s0  ;;  %vm12029_vm2 = vcmask 179328  }
 0x457   :  { %3878 = vrot.lane.b32.xlu0 %v9271_v7, %s11875_s22 }
 0x458   :  { %v3238_v49 = vpop.permute.xlu1 %3237 }
 0x459   :  { %3274 = vst.msk [vmem:[#allocation2 + $0xc0] sm:$0xff] %vm12021_vm8, %v3238_v49  ;;  %v2342_v2 = vpop.permute.xlu0 %2341  ;;  %vm12033_vm8 = vcmask 294128  }
 0x45a   :  { %2375 = vst.msk [vmem:[#allocation2 + $0xf0] sm:$0xff] %vm12022_vm15, %v2342_v2  ;;  %3701 = vrot.lane.b32.xlu1 %v12023_v10, %s6729_s2  ;;  %vm12034_vm15 = vcmask 343328   ;;  %v4777_v2 = vmax.f32 %v4775_v60, %v4776_v62 }
 0x45b   :  { %3618 = vrot.lane.b32.xlu0 %v3212_v33, %s11727_s14 }
 0x45c   :  { %v3873_v34 = vpop.permute.xlu1 %3872 }
 0x45d   :  { %3910 = vst.msk [vmem:[#allocation2 + $0xb8] sm:$0xff] %vm3898_vm13, %v3873_v34  ;;  %v2944_v1 = vpop.permute.xlu0 %2943 }
 0x45e   :  { %2979 = vst.msk [vmem:[#allocation2 + $0xd0] sm:$0xff] %vm2965_vm6, %v2944_v1  ;;  %3799 = vrot.lane.b32.xlu1 %v12024_v40, %s6730_s15 }
 0x45f   :  { %3405 = vrot.lane.b32.xlu0 %v9246_v8, %s11894_s16  ;;  %v3916_v8 = vcombine.low %v11707_v15, %v9108_v6  ;;  %v12030_v6 = vcombine.low %v9104_v42, %v11707_v15  ;;  %v4782_v15 = vsel %vm4606_vm1, %v4387_v57, -inf }
 0x460   :  { %v2731_v45 = vpop.permute.xlu1 %2730  ;;  %v4783_v44 = vrot.slane %v4782_v15, 4 }
 0x461   :  { %2765 = vst.msk [vmem:[#allocation2 + $0xe0] sm:$0xff] %vm2750_vm3, %v2731_v45  ;;  %v3546_v51 = vpop.permute.xlu0 %3545 }
 0x462   :  { %3583 = vst.msk [vmem:[#allocation2 + $0xb0] sm:$0xff] %vm12025_vm12, %v3546_v51  ;;  %3880 = vrot.lane.b32.xlu1 %v12026_v59, %s11875_s22  ;;  %vm12035_vm12 = vcmask 687728   ;;  %v4784_v34 = vmax.f32 %v4782_v15, %v4783_v44 }
 0x463   :  { %3486 = vrot.lane.b32.xlu0 %v9271_v7, %s11719_s13 }
 0x464   :  { %v3319_v21 = vpop.permute.xlu1 %3318 }
 0x465   :  { %3355 = vst.msk [vmem:[#allocation2 + $0xc0] sm:$0xff] %vm12027_vm5, %v3319_v21  ;;  %v2423_v39 = vpop.permute.xlu0 %2422  ;;  %vm12036_vm5 = vcmask 736928   ;;  %v4778_v21 = vrot.slane %v4777_v2, 2 }
 0x466   :  { %2456 = vst.msk [vmem:[#allocation2 + $0xf0] sm:$0xff] %vm12028_vm10, %v2423_v39  ;;  %3947 = vrot.lane.b32.xlu1 %v3916_v8, %s6725_s0  ;;  %vm12037_vm10 = vcmask 31744   ;;  %v4785_v8 = vrot.slane %v4784_v34, 2 }
 0x467   :  { %3553 = vrot.lane.b32.xlu0 %v12018_v16, %s11843_s3  ;;  %v4779_v57 = vmax.f32 %v4777_v2, %v4778_v21 }
 0x468   :  { %v3940_v41 = vpop.permute.xlu1 %3939  ;;  %v4786_v60 = vmax.f32 %v4784_v34, %v4785_v8 }
 0x469   :  { %3977 = vst.msk [vmem:[#allocation2 + $0xb8] sm:$0xff] %vm12029_vm2, %v3940_v41  ;;  %v3025_v7 = vpop.permute.xlu0 %3024  ;;  %vm12038_vm2 = vcmask 80928  }
 0x46a   :  { %3060 = vst.msk [vmem:[#allocation2 + $0xd0] sm:$0xff] %vm3046_vm7, %v3025_v7 }
 0x46b   :  { %3620 = vrot.lane.b32.xlu0 %v12030_v6, %s11727_s14 }
 0x46c   :  { %v2798_v9 = vpop.permute.xlu1 %2797 }
 0x46d   :  { %2832 = vst.msk [vmem:[#allocation2 + $0xe0] sm:$0xff] %vm2817_vm4, %v2798_v9  ;;  %v3613_v46 = vpop.permute.xlu0 %3612 }
 0x46e   :  { %3650 = vst.msk [vmem:[#allocation2 + $0xb0] sm:$0xff] %vm12031_vm9, %v3613_v46  ;;  %vm12039_vm9 = vcmask 540128  }
 0x46f   :  { %3743 = vst.msk [vmem:[#allocation2 + $0xb0] sm:$0xff] %vm3719_vm0, %v10658_v43  ;;  %v4790_v43 = vrot.slane %v4789_v48, 4 }
 0x470   :  { %v3400_v54 = vpop.permute.xlu1 %3399  ;;  %v4005_v33 = vld [vmem:[#allocation2 + $0xb8] sm:$0xff] }
 0x471   :  { %3436 = vst.msk [vmem:[#allocation2 + $0xc0] sm:$0xff] %vm12032_vm14, %v3400_v54  ;;  %v2490_v42 = vpop.permute.xlu0 %2489  ;;  %6157 = vmatprep.mubr.msk.f32.mxu1 %vm4040_vm11, %v4005_v33  ;;  %v4791_v45 = vmax.f32 %v4789_v48, %v4790_v43  ;;  %vm12040_vm14 = vcmask 933728   ;;  %v4780_v43 = vrot.slane %v4779_v57, 1 }
 0x472   :  { %2523 = vst.msk [vmem:[#allocation2 + $0xf0] sm:$0xff] %vm12033_vm8, %v2490_v42  ;;  %vm12041_vm8 = vcmask 982928  }
 0x473   :  { %v4792_v61 = vrot.slane %v4791_v45, 2  ;;  %v4781_v21 = vmax.f32 %v4779_v57, %v4780_v43 }
 0x474   :  { %v2571_v14 = vpop.permute.xlu1 %2570 }
 0x475   :  { %2604 = vst.msk [vmem:[#allocation2 + $0xf0] sm:$0xff] %vm12034_vm15, %v2571_v14  ;;  %v3106_v16 = vpop.permute.xlu0 %3105  ;;  %v4793_v42 = vmax.f32 %v4791_v45, %v4792_v61  ;;  %vm12042_vm15 = vcmask 392528  }
 0x476   :  { %3141 = vst.msk [vmem:[#allocation2 + $0xd0] sm:$0xff] %vm12035_vm12, %v3106_v16  ;;  %v4004_v49 = vld [vmem:[#allocation2 + $0xb0] sm:$0xff]  ;;  %vm12043_vm12 = vcmask 786128  }
 0x477   :  { %v4194_v10 = vpop.f32.mrf.mxu1  ;;  %4213 = vmatmul.mubr.f32.gmra.mxu1 %v4004_v49 }
 0x478   :  { %v4195_v1 = vadd.f32 %v10517_v31, %v4194_v10  ;;  %v3173_v40 = vpop.permute.xlu1 %3172  ;;  %v4787_v10 = vrot.slane %v4786_v60, 1 }
 0x479   :  { %3208 = vst.msk [vmem:[#allocation2 + $0xd0] sm:$0xff] %vm12036_vm5, %v3173_v40  ;;  %v10754_v17 = vpop.permute.xlu0 %3695  ;;  %v4196_v51 = vpop.f32.mrf.mxu1  ;;  %vm12044_vm5 = vcmask 97280  }
 0x47a   :  { %v4245_v59 = vmax.f32 %v4195_v1, 0.0  ;;  %3746 = vst.msk [vmem:[#allocation2 + $0xc8] sm:$0xff] %vm12037_vm10, %v10754_v17  ;;  %v4794_v1 = vrot.slane %v4793_v42, 1  ;;  %vm12045_vm10 = vmmov %vm12044_vm5 }
 0x47c   :  { %v4389_v12 = vcombine.high %v4245_v59, %v4245_v59  ;;  %v4396_v39 = vrot.slane %v4245_v59, %v9982_v35  ;;  %v3794_v41 = vpop.permute.xlu1 %3793 }
 0x47d   :  { %3830 = vst.msk [vmem:[#allocation2 + $0xc8] sm:$0xff] %vm12038_vm2, %v3794_v41  ;;  %v2865_v7 = vpop.permute.xlu0 %2864  ;;  %v4788_v41 = vmax.f32 %v4786_v60, %v4787_v10  ;;  %vm12046_vm2 = vmmov %vm12044_vm5 }
 0x47e   :  { %v10761_v37 = vrot.slane %v4389_v12, %v9982_v35  ;;  %v4404_v6 = vcombine.high %v4396_v39, %v4396_v39  ;;  %v4803_v9 = vsel %vm4606_vm1, %v4396_v39, -inf  ;;  %2899 = vst.msk [vmem:[#allocation2 + $0xe0] sm:$0xff] %vm12039_vm9, %v2865_v7  ;;  %v4795_v7 = vmax.f32 %v4793_v42, %v4794_v1  ;;  %vm12047_vm9 = vmmov %vm12046_vm2 }
 0x47f   :  { %v4804_v46 = vrot.slane %v4803_v9, 4 }
 0x480   :  { %v4810_v54 = vsel %vm4606_vm1, %v4404_v6, -inf  ;;  %v4817_v33 = vsel %vm4606_vm1, %v10761_v37, -inf  ;;  %v2946_v15 = vpop.permute.xlu1 %2945 }
 0x481   :  { %v4805_v48 = vmax.f32 %v4803_v9, %v4804_v46  ;;  %v4811_v62 = vrot.slane %v4810_v54, 4  ;;  %v4818_v44 = vrot.slane %v4817_v33, 4  ;;  %2980 = vst.msk [vmem:[#allocation2 + $0xe0] sm:$0xff] %vm2965_vm6, %v2946_v15  ;;  %v3481_v14 = vpop.permute.xlu0 %3480 }
 0x482   :  { %3517 = vst.msk [vmem:[#allocation2 + $0xc0] sm:$0xff] %vm12040_vm14, %v3481_v14  ;;  %vm12049_vm14 = vmmov %vm12046_vm2 }
 0x483   :  { %v4806_v16 = vrot.slane %v4805_v48, 2  ;;  %v4812_v49 = vmax.f32 %v4810_v54, %v4811_v62  ;;  %v4819_v2 = vmax.f32 %v4817_v33, %v4818_v44  ;;  %v10775_v33 = vsel %vm12044_vm5, %v4781_v21, -inf }
 0x484   :  { %v3548_v34 = vpop.permute.xlu1 %3547  ;;  %v10783_v62 = vsel %vm12046_vm2, %v4788_v41, -inf  ;;  %v10786_v44 = vsel %vm12047_vm9, %v4795_v7, -inf  ;;  %vm12053_vm5 = vcmask 1032128   ;;  %vm12056_vm9 = vcmask 884528  }
 0x485   :  { %v4807_v40 = vmax.f32 %v4805_v48, %v4806_v16  ;;  %v4813_v51 = vrot.slane %v4812_v49, 2  ;;  %v4820_v59 = vrot.slane %v4819_v2, 2  ;;  %3584 = vst.msk [vmem:[#allocation2 + $0xc0] sm:$0xff] %vm12041_vm8, %v3548_v34  ;;  %v2652_v45 = vpop.permute.xlu0 %2651  ;;  %vm12050_vm8 = vcmask 835328  }
 0x486   :  { %2685 = vst.msk [vmem:[#allocation2 + $0xf0] sm:$0xff] %vm12042_vm15, %v2652_v45  ;;  %vm12051_vm15 = vcmask 179328   ;;  %v4405_v7 = vcombine.high %v10761_v37, %v10761_v37 }
 0x487   :  { %v4808_v8 = vrot.slane %v4807_v40, 1  ;;  %v4814_v12 = vmax.f32 %v4812_v49, %v4813_v51  ;;  %v4821_v39 = vmax.f32 %v4819_v2, %v4820_v59 }
 0x488   :  { %v2733_v61 = vpop.permute.xlu1 %2732 }
 0x489   :  { %v4809_v6 = vmax.f32 %v4807_v40, %v4808_v8  ;;  %v4815_v9 = vrot.slane %v4814_v12, 1  ;;  %v4822_v46 = vrot.slane %v4821_v39, 1  ;;  %2766 = vst.msk [vmem:[#allocation2 + $0xf0] sm:$0xff] %vm2750_vm3, %v2733_v61  ;;  %v3240_v54 = vpop.permute.xlu0 %3239  ;;  %vm12048_vm3 = vmmov %vm12046_vm2  ;;  %vm12055_vm2 = vcmask 736928  }
 0x48a   :  { %3275 = vst.msk [vmem:[#allocation2 + $0xd0] sm:$0xff] %vm12043_vm12, %v3240_v54  ;;  %vm12052_vm12 = vcmask 687728  }
 0x48b   :  { %v4816_v15 = vmax.f32 %v4814_v12, %v4815_v9  ;;  %v4823_v48 = vmax.f32 %v4821_v39, %v4822_v46  ;;  %v10778_v57 = vsel %vm12045_vm10, %v4809_v6, -inf  ;;  %vm12054_vm10 = vcmask 31744  }
 0x48c   :  { %v3321_v42 = vpop.permute.xlu1 %3320  ;;  %v4388_v9 = vcombine.high %v10738_v56, %v10738_v56 }
 0x48d   :  { %v10789_v14 = vsel %vm12048_vm3, %v4816_v15, -inf  ;;  %v10792_v43 = vsel %vm12049_vm14, %v4823_v48, -inf  ;;  %3356 = vst.msk [vmem:[#allocation2 + $0xd0] sm:$0xff] %vm12050_vm8, %v3321_v42  ;;  %v3875_v16 = vpop.permute.xlu0 %3874  ;;  %vm12057_vm3 = vcmask 80928   ;;  %vm12058_vm14 = vcmask 540128  }
 0x48e   :  { %3911 = vst.msk [vmem:[#allocation2 + $0xc8] sm:$0xff] %vm3898_vm13, %v3875_v16  ;;  %vm12059_vm8 = vcmask 786128   ;;  %v4824_v48 = vsel %vm4606_vm1, %v4405_v7, -inf  ;;  %v4796_v42 = vsel %vm4606_vm1, %v4388_v9, -inf }
 0x490   :  { %v3942_v10 = vpop.permute.xlu1 %3941 }
 0x491   :  { %3978 = vst.msk [vmem:[#allocation2 + $0xc8] sm:$0xff] %vm12051_vm15, %v3942_v10  ;;  %v3027_v34 = vpop.permute.xlu0 %3026  ;;  %v4825_v10 = vrot.slane %v4824_v48, 4  ;;  %vm12061_vm15 = vcmask 835328  }
 0x492   :  { %3061 = vst.msk [vmem:[#allocation2 + $0xe0] sm:$0xff] %vm3046_vm7, %v3027_v34  ;;  %v4797_v34 = vrot.slane %v4796_v42, 4 }
 0x494   :  { %v3108_v1 = vpop.permute.xlu1 %3107 }
 0x495   :  { %3142 = vst.msk [vmem:[#allocation2 + $0xe0] sm:$0xff] %vm12052_vm12, %v3108_v1  ;;  %v3615_v40 = vpop.permute.xlu0 %3614  ;;  %vm12062_vm12 = vcmask 982928   ;;  %v4826_v1 = vmax.f32 %v4824_v48, %v4825_v10 }
 0x496   :  { %3651 = vst.msk [vmem:[#allocation2 + $0xc0] sm:$0xff] %vm12053_vm5, %v3615_v40  ;;  %vm12063_vm5 = vcmask 179328  }
 0x497   :  { %3745 = vst.msk [vmem:[#allocation2 + $0xc0] sm:$0xff] %vm3719_vm0, %v10754_v17 }
 0x498   :  { %v3698_v51 = vpop.permute.xlu1 %3697  ;;  %v4007_v59 = vld [vmem:[#allocation2 + $0xc8] sm:$0xff] }
 0x499   :  { %3748 = vst.msk [vmem:[#allocation2 + $0xd8] sm:$0xff] %vm12054_vm10, %v3698_v51  ;;  %v2800_v45 = vpop.permute.xlu0 %2799  ;;  %6158 = vmatprep.mubr.msk.f32.mxu1 %vm4040_vm11, %v4007_v59  ;;  %v4798_v59 = vmax.f32 %v4796_v42, %v4797_v34  ;;  %vm12065_vm10 = vcmask 1032128  }
 0x49a   :  { %2833 = vst.msk [vmem:[#allocation2 + $0xf0] sm:$0xff] %vm2817_vm4, %v2800_v45  ;;  %vm12060_vm4 = vcmask 933728  }
 0x49c   :  { %v3175_v21 = vpop.permute.xlu1 %3174 }
 0x49d   :  { %3209 = vst.msk [vmem:[#allocation2 + $0xe0] sm:$0xff] %vm12055_vm2, %v3175_v21  ;;  %v3402_v8 = vpop.permute.xlu0 %3401  ;;  %v4827_v21 = vrot.slane %v4826_v1, 2  ;;  %vm12066_vm2 = vcmask 687728  }
 0x49e   :  { %3437 = vst.msk [vmem:[#allocation2 + $0xd0] sm:$0xff] %vm12056_vm9, %v3402_v8  ;;  %v4006_v12 = vld [vmem:[#allocation2 + $0xc0] sm:$0xff] }
 0x49f   :  { %4218 = vmatmul.mubr.f32.gmra.mxu1 %v4006_v12  ;;  %v4799_v12 = vrot.slane %v4798_v59, 2 }
 0x4a0   :  { %v3796_v39 = vpop.permute.xlu1 %3795 }
 0x4a1   :  { %3831 = vst.msk [vmem:[#allocation2 + $0xd8] sm:$0xff] %vm12057_vm3, %v3796_v39  ;;  %v2867_v17 = vpop.permute.xlu0 %2866  ;;  %v4800_v7 = vmax.f32 %v4798_v59, %v4799_v12 }
 0x4a2   :  { %2900 = vst.msk [vmem:[#allocation2 + $0xf0] sm:$0xff] %vm12058_vm14, %v2867_v17  ;;  %vm12069_vm14 = vmmov %vm12060_vm4 }
 0x4a3   :  { %v4801_v48 = vrot.slane %v4800_v7, 1 }
 0x4a4   :  { %v3242_v41 = vpop.permute.xlu1 %3241 }
 0x4a5   :  { %3276 = vst.msk [vmem:[#allocation2 + $0xe0] sm:$0xff] %vm12059_vm8, %v3242_v41  ;;  %v3483_v61 = vpop.permute.xlu0 %3482  ;;  %v4828_v41 = vmax.f32 %v4826_v1, %v4827_v21  ;;  %vm12070_vm8 = vmmov %vm12062_vm12 }
 0x4a6   :  { %3518 = vst.msk [vmem:[#allocation2 + $0xd0] sm:$0xff] %vm12060_vm4, %v3483_v61  ;;  %vm12071_vm4 = vcmask 97280  }
 0x4a7   :  { %v4199_v6 = vpop.f32.mrf.mxu1 }
 0x4a8   :  { %v3877_v46 = vpop.permute.xlu1 %3876 }
 0x4a9   :  { %3912 = vst.msk [vmem:[#allocation2 + $0xd8] sm:$0xff] %vm3898_vm13, %v3877_v46  ;;  %v2948_v54 = vpop.permute.xlu0 %2947  ;;  %v4201_v15 = vpop.f32.mrf.mxu1  ;;  %v4829_v46 = vrot.slane %v4828_v41, 1 }
 0x4aa   :  { %2981 = vst.msk [vmem:[#allocation2 + $0xf0] sm:$0xff] %vm2965_vm6, %v2948_v54  ;;  %vm12064_vm6 = vmmov %vm12056_vm9  ;;  %vm12068_vm9 = vcmask 31744  }
 0x4ac   :  { %v3323_v16 = vpop.permute.xlu1 %3322 }
 0x4ad   :  { %3357 = vst.msk [vmem:[#allocation2 + $0xe0] sm:$0xff] %vm12061_vm15, %v3323_v16  ;;  %v3550_v37 = vpop.permute.xlu0 %3549  ;;  %v4830_v16 = vmax.f32 %v4828_v41, %v4829_v46  ;;  %vm12073_vm15 = vcmask 786128  }
 0x4ae   :  { %3585 = vst.msk [vmem:[#allocation2 + $0xd0] sm:$0xff] %vm12062_vm12, %v3550_v37  ;;  %v4802_v37 = vmax.f32 %v4800_v7, %v4801_v48  ;;  %vm12074_vm12 = vmmov %vm12071_vm4 }
 0x4af   :  { %v10839_v1 = vsel %vm12071_vm4, %v4830_v16, -inf }
 0x4b0   :  { %v3944_v56 = vpop.permute.xlu1 %3943  ;;  %12072 = vst [vmem:[#allocation21_spill] sm:$0xff] %v10839_v1 }
 0x4b1   :  { %3979 = vst.msk [vmem:[#allocation2 + $0xd8] sm:$0xff] %vm12063_vm5, %v3944_v56  ;;  %v3029_v40 = vpop.permute.xlu0 %3028  ;;  %vm12075_vm5 = vcmask 835328  }
 0x4b2   :  { %3062 = vst.msk [vmem:[#allocation2 + $0xf0] sm:$0xff] %vm3046_vm7, %v3029_v40  ;;  %vm12067_vm7 = vcmask 736928  }
 0x4b4   :  { %v3404_v45 = vpop.permute.xlu1 %3403 }
 0x4b5   :  { %3438 = vst.msk [vmem:[#allocation2 + $0xe0] sm:$0xff] %vm12064_vm6, %v3404_v45  ;;  %v3617_v8 = vpop.permute.xlu0 %3616  ;;  %vm12076_vm6 = vcmask 179328  }
 0x4b6   :  { %3652 = vst.msk [vmem:[#allocation2 + $0xd0] sm:$0xff] %vm12065_vm10, %v3617_v8  ;;  %vm12077_vm10 = vmmov %vm12068_vm9 }
 0x4b7   :  { %3747 = vst.msk [vmem:[#allocation2 + $0xd0] sm:$0xff] %vm3719_vm0, %v3698_v51  ;;  %v4200_v51 = vadd.f32 %v10517_v31, %v4199_v6  ;;  %v10843_v6 = vsel %vm12074_vm12, %v4802_v37, -inf }
 0x4b8   :  { %v3177_v39 = vpop.permute.xlu1 %3176  ;;  %v4009_v17 = vld [vmem:[#allocation2 + $0xd8] sm:$0xff] }
 0x4b9   :  { %v3110_v61 = vpop.permute.xlu0 %3109  ;;  %6159 = vmatprep.mubr.msk.f32.mxu1 %vm4040_vm11, %v4009_v17  ;;  %v4246_v34 = vmax.f32 %v4200_v51, 0.0 }
 0x4ba   :  { %3143 = vst.msk [vmem:[#allocation2 + $0xf0] sm:$0xff] %vm12066_vm2, %v3110_v61  ;;  %vm12078_vm2 = vcmask 1032128  }
 0x4bb   :  { %3210 = vst.msk [vmem:[#allocation2 + $0xf0] sm:$0xff] %vm12067_vm7, %v3177_v39  ;;  %v4406_v59 = vcombine.high %v4246_v34, %v4246_v34  ;;  %v4413_v45 = vrot.slane %v4246_v34, %v9982_v35  ;;  %vm12079_vm7 = vmmov %vm12057_vm3 }
 0x4bc   :  { %v3798_v9 = vpop.permute.xlu1 %3797 }
 0x4bd   :  { %v3700_v54 = vpop.permute.xlu0 %3699  ;;  %v4420_v39 = vrot.slane %v4406_v59, %v9982_v35  ;;  %v4421_v17 = vcombine.high %v4413_v45, %v4413_v45 }
 0x4be   :  { %3750 = vst.msk [vmem:[#allocation2 + $0xe8] sm:$0xff] %vm12068_vm9, %v3700_v54  ;;  %v4008_v15 = vld [vmem:[#allocation2 + $0xd0] sm:$0xff]  ;;  %vm12080_vm9 = vcmask 884528  }
 0x4bf   :  { %3832 = vst.msk [vmem:[#allocation2 + $0xe8] sm:$0xff] %vm12057_vm3, %v3798_v9  ;;  %4223 = vmatmul.mubr.f32.gmra.mxu1 %v4008_v15  ;;  %v4422_v7 = vcombine.high %v4420_v39, %v4420_v39  ;;  %v4831_v9 = vsel %vm4606_vm1, %v4413_v45, -inf  ;;  %v4838_v46 = vsel %vm4606_vm1, %v4421_v17, -inf  ;;  %v4845_v48 = vsel %vm4606_vm1, %v4420_v39, -inf  ;;  %vm12081_vm3 = vmmov %vm12069_vm14 }
 0x4c0   :  { %v3552_v42 = vpop.permute.xlu1 %3551  ;;  %v4832_v16 = vrot.slane %v4831_v9, 4 }
 0x4c1   :  { %v3485_v10 = vpop.permute.xlu0 %3484  ;;  %v4852_v37 = vsel %vm4606_vm1, %v4422_v7, -inf }
 0x4c2   :  { %3519 = vst.msk [vmem:[#allocation2 + $0xe0] sm:$0xff] %vm12069_vm14, %v3485_v10  ;;  %v4839_v10 = vrot.slane %v4838_v46, 4  ;;  %v4833_v45 = vmax.f32 %v4831_v9, %v4832_v16  ;;  %vm12082_vm14 = vmmov %vm12076_vm6 }
 0x4c3   :  { %3586 = vst.msk [vmem:[#allocation2 + $0xe0] sm:$0xff] %vm12070_vm8, %v3552_v42 }
 0x4c4   :  { %v3325_v56 = vpop.permute.xlu1 %3324 }
 0x4c5   :  { %v3244_v40 = vpop.permute.xlu0 %3243 }
 0x4c6   :  { %3277 = vst.msk [vmem:[#allocation2 + $0xf0] sm:$0xff] %vm12073_vm15, %v3244_v40  ;;  %v4853_v40 = vrot.slane %v4852_v37, 4 }
 0x4c7   :  { %3358 = vst.msk [vmem:[#allocation2 + $0xf0] sm:$0xff] %vm12075_vm5, %v3325_v56 }
 0x4c8   :  { %v3946_v21 = vpop.permute.xlu1 %3945 }
 0x4c9   :  { %v3879_v12 = vpop.permute.xlu0 %3878 }
 0x4ca   :  { %3913 = vst.msk [vmem:[#allocation2 + $0xe8] sm:$0xff] %vm3898_vm13, %v3879_v12 }
 0x4cb   :  { %3980 = vst.msk [vmem:[#allocation2 + $0xe8] sm:$0xff] %vm12076_vm6, %v3946_v21  ;;  %v4840_v21 = vmax.f32 %v4838_v46, %v4839_v10 }
 0x4cc   :  { %v3702_v41 = vpop.permute.xlu1 %3701 }
 0x4cd   :  { %3752 = vst.msk [vmem:[#allocation2 + $0xf8] sm:$0xff] %vm12077_vm10, %v3702_v41  ;;  %v3619_v61 = vpop.permute.xlu0 %3618  ;;  %v4841_v8 = vrot.slane %v4840_v21, 2 }
 0x4ce   :  { %3653 = vst.msk [vmem:[#allocation2 + $0xe0] sm:$0xff] %vm12078_vm2, %v3619_v61 }
 0x4cf   :  { %3749 = vst.msk [vmem:[#allocation2 + $0xe0] sm:$0xff] %vm3719_vm0, %v3700_v54  ;;  %v4846_v54 = vrot.slane %v4845_v48, 4 }
 0x4d0   :  { %v3800_v15 = vpop.permute.xlu1 %3799 }
 0x4d1   :  { %3833 = vst.msk [vmem:[#allocation2 + $0xf8] sm:$0xff] %vm12079_vm7, %v3800_v15  ;;  %v3406_v51 = vpop.permute.xlu0 %3405  ;;  %v4847_v39 = vmax.f32 %v4845_v48, %v4846_v54  ;;  %vm5174_vm7 = vcmask 1043459  }
 0x4d2   :  { %3439 = vst.msk [vmem:[#allocation2 + $0xf0] sm:$0xff] %vm12080_vm9, %v3406_v51  ;;  %v4011_v42 = vld [vmem:[#allocation2 + $0xe8] sm:$0xff]  ;;  %v4854_v51 = vmax.f32 %v4852_v37, %v4853_v40  ;;  %v4842_v37 = vmax.f32 %v4840_v21, %v4841_v8  ;;  %vm5176_vm9 = vcmask 1045509  }
 0x4d3   :  { %6160 = vmatprep.mubr.msk.f32.mxu1 %vm4040_vm11, %v4011_v42 }
 0x4d4   :  { %v3881_v34 = vpop.permute.xlu1 %3880  ;;  %v4855_v16 = vrot.slane %v4854_v51, 2 }
 0x4d5   :  { %3914 = vst.msk [vmem:[#allocation2 + $0xf8] sm:$0xff] %vm3898_vm13, %v3881_v34  ;;  %v3487_v56 = vpop.permute.xlu0 %3486  ;;  %vm12083_vm13 = vmmov %vm12070_vm8  ;;  %v4834_v34 = vrot.slane %v4833_v45, 2 }
 0x4d6   :  { %3520 = vst.msk [vmem:[#allocation2 + $0xf0] sm:$0xff] %vm12081_vm3, %v3487_v56  ;;  %v4010_v59 = vld [vmem:[#allocation2 + $0xe0] sm:$0xff]  ;;  %v4848_v56 = vrot.slane %v4847_v39, 2  ;;  %vm12084_vm8 = vmmov %vm12078_vm2  ;;  %vm5172_vm2 = vcmask 1041409   ;;  %vm5178_vm3 = vcmask 1047559  }
 0x4d7   :  { %v4204_v12 = vpop.f32.mrf.mxu1  ;;  %4228 = vmatmul.mubr.f32.gmra.mxu1 %v4010_v59  ;;  %v4835_v54 = vmax.f32 %v4833_v45, %v4834_v34 }
 0x4d8   :  { %v4205_v17 = vadd.f32 %v10517_v31, %v4204_v12  ;;  %v3948_v61 = vpop.permute.xlu1 %3947  ;;  %v4849_v59 = vmax.f32 %v4847_v39, %v4848_v56  ;;  %v4843_v39 = vrot.slane %v4842_v37, 1 }
 0x4d9   :  { %3981 = vst.msk [vmem:[#allocation2 + $0xf8] sm:$0xff] %vm12082_vm14, %v3948_v61  ;;  %v3554_v7 = vpop.permute.xlu0 %3553  ;;  %v4206_v15 = vpop.f32.mrf.mxu1 }
 0x4da   :  { %v4247_v42 = vmax.f32 %v4205_v17, 0.0  ;;  %3587 = vst.msk [vmem:[#allocation2 + $0xf0] sm:$0xff] %vm12083_vm13, %v3554_v7  ;;  %v4850_v56 = vrot.slane %v4849_v59, 1 }
 0x4dc   :  { %v4423_v2 = vcombine.high %v4247_v42, %v4247_v42  ;;  %v4430_v9 = vrot.slane %v4247_v42, %v9982_v35 }
 0x4dd   :  { %v3621_v46 = vpop.permute.xlu0 %3620 }
 0x4de   :  { %v4437_v48 = vrot.slane %v4423_v2, %v9982_v35  ;;  %v4438_v31 = vcombine.high %v4430_v9, %v4430_v9  ;;  %v4859_v10 = vsel %vm4606_vm1, %v4430_v9, -inf  ;;  %3654 = vst.msk [vmem:[#allocation2 + $0xf0] sm:$0xff] %vm12084_vm8, %v3621_v46  ;;  %v4856_v9 = vmax.f32 %v4854_v51, %v4855_v16 }
 0x4df   :  { %v4860_v40 = vrot.slane %v4859_v10, 4  ;;  %3751 = vst.msk [vmem:[#allocation2 + $0xf0] sm:$0xff] %vm3719_vm0, %v3702_v41  ;;  %v4836_v41 = vrot.slane %v4835_v54, 1  ;;  %v4844_v16 = vmax.f32 %v4842_v37, %v4843_v39  ;;  %vm12085_vm0 = vmmov %vm12071_vm4 }
 0x4e0   :  { %v4439_v12 = vcombine.high %v4437_v48, %v4437_v48  ;;  %v4866_v17 = vsel %vm4606_vm1, %v4438_v31, -inf  ;;  %v4873_v61 = vsel %vm4606_vm1, %v4437_v48, -inf  ;;  %v4013_v7 = vld [vmem:[#allocation2 + $0xf8] sm:$0xff]  ;;  %v4857_v36 = vrot.slane %v4856_v9, 1  ;;  %vm12087_vm4 = vmmov %vm12085_vm0 }
 0x4e1   :  { %v4861_v15 = vmax.f32 %v4859_v10, %v4860_v40  ;;  %v4867_v42 = vrot.slane %v4866_v17, 4  ;;  %v4874_v2 = vrot.slane %v4873_v61, 4  ;;  %6161 = vmatprep.mubr.msk.f32.mxu1 %vm4040_vm11, %v4013_v7  ;;  %v4837_v51 = vmax.f32 %v4835_v54, %v4836_v41  ;;  %vm12086_vm11 = vmmov %vm12085_vm0 }
 0x4e2   :  { %v4880_v46 = vsel %vm4606_vm1, %v4439_v12, -inf  ;;  %v4851_v12 = vmax.f32 %v4849_v59, %v4850_v56  ;;  %v4858_v23 = vmax.f32 %v4856_v9, %v4857_v36  ;;  %vm12088_vm15 = vmmov %vm12085_vm0 }
 0x4e3   :  { %v4862_v45 = vrot.slane %v4861_v15, 2  ;;  %v4868_v8 = vmax.f32 %v4866_v17, %v4867_v42  ;;  %v4875_v21 = vmax.f32 %v4873_v61, %v4874_v2  ;;  %v4881_v34 = vrot.slane %v4880_v46, 4  ;;  %vm12089_vm12 = vmmov %vm12085_vm0 }
 0x4e4   :  { %vm12090_vm5 = vmmov %vm12085_vm0 }
 0x4e5   :  { %v4863_v49 = vmax.f32 %v4861_v15, %v4862_v45  ;;  %v4869_v31 = vrot.slane %v4868_v8, 2  ;;  %v4876_v60 = vrot.slane %v4875_v21, 2  ;;  %v4882_v48 = vmax.f32 %v4880_v46, %v4881_v34  ;;  %vm12091_vm6 = vmmov %vm12085_vm0 }
 0x4e6   :  { %v4012_v10 = vld [vmem:[#allocation2 + $0xf0] sm:$0xff]  ;;  %v5104_v34 = vsel %vm12086_vm11, %v4837_v51, -inf  ;;  %v5113_v36 = vsel %vm12091_vm6, %v4858_v23, -inf  ;;  %vm12092_vm10 = vmmov %vm12085_vm0  ;;  %v12095_v51 = vmax.f32 %v10100_v11, %v10103_v58  ;;  %vm5236_vm6 = vcmask 287936  }
 0x4e7   :  { %v4864_v40 = vrot.slane %v4863_v49, 1  ;;  %v4870_v30 = vmax.f32 %v4868_v8, %v4869_v31  ;;  %v4877_v53 = vmax.f32 %v4875_v21, %v4876_v60  ;;  %v4883_v7 = vrot.slane %v4882_v48, 2  ;;  %4233 = vmatmul.mubr.f32.gmra.mxu1 %v4012_v10  ;;  %vm12097_vm14 = vmmov %vm12085_vm0 }
 0x4e8   :  { %v5107_v8 = vsel %vm12087_vm4, %v4844_v16, -inf  ;;  %v5110_v60 = vsel %vm12088_vm15, %v4851_v12, -inf  ;;  %v12093_v31 = vmax.f32 %v10110_v3, %v10116_v29  ;;  %v12094_v10 = vmax.f32 %v10113_v47, %v10119_v5  ;;  %vm12098_vm13 = vmmov %vm12085_vm0 }
 0x4e9   :  { %v4865_v17 = vmax.f32 %v4863_v49, %v4864_v40  ;;  %v4871_v61 = vrot.slane %v4870_v30, 1  ;;  %v4878_v42 = vrot.slane %v4877_v53, 1  ;;  %v4884_v2 = vmax.f32 %v4882_v48, %v4883_v7  ;;  %vm12099_vm8 = vmmov %vm12085_vm0 }
 0x4ea   :  { %v5218_v23 = vrot.slane %v12094_v10, %v9982_v35  ;;  %v5160_v16 = vrot.slane %v12095_v51, %v9982_v35  ;;  %v12096_v3 = vmax.f32 %v10291_v19, %v10286_v25  ;;  %vm12100_vm11 = vmmov %vm12085_vm0 }
 0x4eb   :  { %v4872_v1 = vmax.f32 %v4870_v30, %v4871_v61  ;;  %v4879_v15 = vmax.f32 %v4877_v53, %v4878_v42  ;;  %v4885_v45 = vrot.slane %v4884_v2, 1  ;;  %v5105_v46 = vsel %vm12085_vm0, %v4865_v17, -inf  ;;  %vm12101_vm4 = vmmov %vm12085_vm0 }
 0x4ec   :  { %v5106_v54 = vmax.f32 %v5104_v34, %v5105_v46  ;;  %v5246_v29 = vrot.slane %v12096_v3, %v9982_v35  ;;  %vm12103_vm15 = vmmov %vm12085_vm0 }
 0x4ed   :  { %v4886_v21 = vmax.f32 %v4884_v2, %v4885_v45  ;;  %v5108_v37 = vsel %vm12089_vm12, %v4872_v1, -inf  ;;  %v5111_v49 = vsel %vm12090_vm5, %v4879_v15, -inf  ;;  %v5190_v1 = vrot.slane %v12093_v31, %v9982_v35  ;;  %vm12104_vm12 = vmmov %vm12085_vm0 }
 0x4ee   :  { %v5109_v59 = vmax.f32 %v5107_v8, %v5108_v37  ;;  %v5112_v41 = vmax.f32 %v5110_v60, %v5111_v49  ;;  %v5167_v56 = vrot.slane %v5106_v54, %v9982_v35  ;;  %v10927_v49 = vld [vmem:[%s11355_s4] ss:$0 sm:$0xff]  ;;  %vm5208_vm5 = vcmask 189536   ;;  %s6737_s4 = smov [#allocation4]  }
 0x4ef   :  { %v5114_v53 = vsel %vm12092_vm10, %v4886_v21, -inf  ;;  %vm5264_vm10 = vcmask 386336  }
 0x4f0   :  { %v5197_v30 = vrot.slane %v5109_v59, %v9982_v35  ;;  %v5225_v9 = vrot.slane %v5112_v41, %v9982_v35  ;;  %v5115_v39 = vmax.f32 %v5113_v36, %v5114_v53  ;;  %v5171_v42 = vrot.slane %v5167_v56, 7 }
 0x4f2   :  { %v5200_v48 = vrot.slane %v5197_v30, 7  ;;  %v5228_v40 = vrot.slane %v5225_v9, 7  ;;  %v5253_v7 = vrot.slane %v5115_v39, %v9982_v35  ;;  %v5173_v45 = vsel %vm5172_vm2, %v5171_v42, %v5160_v16 }
 0x4f3   :  { %v5175_v34 = vsel %vm5174_vm7, %v5171_v42, %v5173_v45 }
 0x4f4   :  { %v5201_v12 = vsel %vm5172_vm2, %v5200_v48, %v5190_v1  ;;  %v5229_v47 = vsel %vm5172_vm2, %v5228_v40, %v5218_v23  ;;  %v5256_v5 = vrot.slane %v5253_v7, 7  ;;  %v5177_v8 = vsel %vm5176_vm9, %v5171_v42, %v5175_v34 }
 0x4f5   :  { %v5202_v17 = vsel %vm5174_vm7, %v5200_v48, %v5201_v12  ;;  %v5230_v61 = vsel %vm5174_vm7, %v5228_v40, %v5229_v47  ;;  %v5179_v60 = vsel %vm5178_vm3, %v5171_v42, %v5177_v8 }
 0x4f6   :  { %v5203_v11 = vsel %vm5176_vm9, %v5200_v48, %v5202_v17  ;;  %v5231_v58 = vsel %vm5176_vm9, %v5228_v40, %v5230_v61  ;;  %v5257_v25 = vsel %vm5172_vm2, %v5256_v5, %v5246_v29  ;;  %5181 = vst.msk [vmem:[#allocation3] sm:$0x3] %vm4606_vm1, %v5179_v60 }
 0x4f7   :  { %v5204_v19 = vsel %vm5178_vm3, %v5200_v48, %v5203_v11  ;;  %v5232_v2 = vsel %vm5178_vm3, %v5228_v40, %v5231_v58  ;;  %v5258_v15 = vsel %vm5174_vm7, %v5256_v5, %v5257_v25 }
 0x4f8   :  { %5205 = vrot.lane.b32.xlu0 %v5204_v19, %s6713_s20  ;;  %5233 = vrot.lane.b32.xlu1 %v5232_v2, %s11773_s23  ;;  %v5259_v46 = vsel %vm5176_vm9, %v5256_v5, %v5258_v15 }
 0x4f9   :  { %v5260_v21 = vsel %vm5178_vm3, %v5256_v5, %v5259_v46 }
 0x4fc   :  { %5261 = vrot.lane.b32.xlu0 %v5260_v21, %s11893_s12 }
 0x507   :  { %v4209_v54 = vpop.f32.mrf.mxu1 }
 0x508   :  { %v4210_v59 = vadd.f32 %v10927_v49, %v4209_v54 }
 0x509   :  { %v4211_v37 = vpop.f32.mrf.mxu1 }
 0x50a   :  { %v4248_v41 = vmax.f32 %v4210_v59, 0.0 }
 0x50c   :  { %v4440_v36 = vcombine.high %v4248_v41, %v4248_v41  ;;  %v4447_v53 = vrot.slane %v4248_v41, %v9982_v35 }
 0x50e   :  { %v4454_v30 = vrot.slane %v4440_v36, %v9982_v35  ;;  %v4455_v9 = vcombine.high %v4447_v53, %v4447_v53  ;;  %v4887_v39 = vsel %vm4606_vm1, %v4447_v53, -inf }
 0x50f   :  { %v4888_v1 = vrot.slane %v4887_v39, 4 }
 0x510   :  { %v4456_v56 = vcombine.high %v4454_v30, %v4454_v30  ;;  %v4894_v31 = vsel %vm4606_vm1, %v4455_v9, -inf  ;;  %v4901_v48 = vsel %vm4606_vm1, %v4454_v30, -inf }
 0x511   :  { %v4895_v10 = vrot.slane %v4894_v31, 4  ;;  %v4902_v40 = vrot.slane %v4901_v48, 4  ;;  %v4889_v7 = vmax.f32 %v4887_v39, %v4888_v1 }
 0x512   :  { %v4908_v23 = vsel %vm4606_vm1, %v4456_v56, -inf }
 0x513   :  { %v4909_v51 = vrot.slane %v4908_v23, 4  ;;  %v4896_v16 = vmax.f32 %v4894_v31, %v4895_v10  ;;  %v4903_v29 = vmax.f32 %v4901_v48, %v4902_v40  ;;  %v4890_v47 = vrot.slane %v4889_v7, 2 }
 0x515   :  { %v4910_v17 = vmax.f32 %v4908_v23, %v4909_v51  ;;  %v4897_v42 = vrot.slane %v4896_v16, 2  ;;  %v4904_v11 = vrot.slane %v4903_v29, 2  ;;  %v4891_v19 = vmax.f32 %v4889_v7, %v4890_v47 }
 0x517   :  { %v4911_v2 = vrot.slane %v4910_v17, 2  ;;  %v4898_v34 = vmax.f32 %v4896_v16, %v4897_v42  ;;  %v4905_v60 = vmax.f32 %v4903_v29, %v4904_v11  ;;  %v4892_v53 = vrot.slane %v4891_v19, 1 }
 0x519   :  { %v4912_v30 = vmax.f32 %v4910_v17, %v4911_v2  ;;  %v4899_v48 = vrot.slane %v4898_v34, 1  ;;  %v4906_v10 = vrot.slane %v4905_v60, 1  ;;  %v4893_v16 = vmax.f32 %v4891_v19, %v4892_v53 }
 0x51b   :  { %v4907_v17 = vmax.f32 %v4905_v60, %v4906_v10 }
 0x537   :  { %v4214_v3 = vpop.f32.mrf.mxu1 }
 0x538   :  { %v4215_v12 = vadd.f32 %v10927_v49, %v4214_v3  ;;  %v4913_v3 = vrot.slane %v4912_v30, 1 }
 0x539   :  { %v4216_v5 = vpop.f32.mrf.mxu1 }
 0x53a   :  { %v4249_v61 = vmax.f32 %v4215_v12, 0.0  ;;  %v4914_v2 = vmax.f32 %v4912_v30, %v4913_v3  ;;  %v12102_v30 = vmax.f32 %v10319_v22, %v10322_v18  ;;  %v12105_v22 = vmax.f32 %v10334_v4, %v10340_v38  ;;  %v5621_v3 = vld [vmem:[%s11356_s5 + $0x68] sm:$0xff] }
 0x53c   :  { %v4457_v58 = vcombine.high %v4249_v61, %v4249_v61  ;;  %v4464_v25 = vrot.slane %v4249_v61, %v9982_v35  ;;  %v4900_v61 = vmax.f32 %v4898_v34, %v4899_v48  ;;  %v5302_v18 = vrot.slane %v12105_v22, %v9982_v35 }
 0x53e   :  { %v4471_v15 = vrot.slane %v4457_v58, %v9982_v35  ;;  %v4472_v45 = vcombine.high %v4464_v25, %v4464_v25  ;;  %v4915_v46 = vsel %vm4606_vm1, %v4464_v25, -inf  ;;  %v5119_v19 = vsel %vm12099_vm8, %v4900_v61, -inf  ;;  %vm12111_vm8 = vmmov %vm12085_vm0 }
 0x53f   :  { %v4916_v8 = vrot.slane %v4915_v46, 4 }
 0x540   :  { %v4473_v21 = vcombine.high %v4471_v15, %v4471_v15  ;;  %v4922_v54 = vsel %vm4606_vm1, %v4472_v45, -inf  ;;  %v4929_v37 = vsel %vm4606_vm1, %v4471_v15, -inf  ;;  %v5116_v15 = vsel %vm12097_vm14, %v4893_v16, -inf  ;;  %vm12109_vm14 = vmmov %vm12085_vm0 }
 0x541   :  { %v4917_v59 = vmax.f32 %v4915_v46, %v4916_v8  ;;  %v4923_v41 = vrot.slane %v4922_v54, 4  ;;  %v4930_v36 = vrot.slane %v4929_v37, 4  ;;  %v12107_v16 = vmov 0.0  }
 0x542   :  { %v4936_v9 = vsel %vm4606_vm1, %v4473_v21, -inf }
 0x543   :  { %v4918_v39 = vrot.slane %v4917_v59, 2  ;;  %v4924_v56 = vmax.f32 %v4922_v54, %v4923_v41  ;;  %v4931_v31 = vmax.f32 %v4929_v37, %v4930_v36  ;;  %v4937_v1 = vrot.slane %v4936_v9, 4 }
 0x544   :  { %v5122_v37 = vsel %vm12085_vm0, %v4907_v17, -inf }
 0x545   :  { %v4919_v23 = vmax.f32 %v4917_v59, %v4918_v39  ;;  %v4925_v40 = vrot.slane %v4924_v56, 2  ;;  %v4932_v7 = vrot.slane %v4931_v31, 2  ;;  %v4938_v51 = vmax.f32 %v4936_v9, %v4937_v1  ;;  %v5622_v1 = vld [vmem:[%s11356_s5 + $0x70] sm:$0xff] }
 0x546   :  { %v5274_v9 = vrot.slane %v12102_v30, %v9982_v35  ;;  %v5125_v39 = vsel %vm12103_vm15, %v4914_v2, -inf  ;;  %vm12115_vm15 = vmmov %vm12085_vm0 }
 0x547   :  { %v4920_v29 = vrot.slane %v4919_v23, 1  ;;  %v4926_v12 = vmax.f32 %v4924_v56, %v4925_v40  ;;  %v4933_v47 = vmax.f32 %v4931_v31, %v4932_v7  ;;  %v4939_v5 = vrot.slane %v4938_v51, 2  ;;  %v5623_v31 = vld [vmem:[%s11356_s5 + $0x78] sm:$0xff] }
 0x548   :  { %5653 = vmatpush1.msra.mxu1 %v5623_v31  ;;  %v12106_v7 = vmax.f32 %v10337_v24, %v10343_v13  ;;  %v12108_v24 = vmax.f32 %v10495_v32, %v10489_v55 }
 0x549   :  { %v4921_v42 = vmax.f32 %v4919_v23, %v4920_v29  ;;  %v4927_v11 = vrot.slane %v4926_v12, 1  ;;  %v4934_v58 = vrot.slane %v4933_v47, 1  ;;  %v4940_v25 = vmax.f32 %v4938_v51, %v4939_v5  ;;  %5654 = vmatprep.subr.mxu1 %v12107_v16 }
 0x54a   :  { %v5330_v51 = vrot.slane %v12106_v7, %v9982_v35  ;;  %5655 = vmatpush1.msra.mxu1 %v5622_v1  ;;  %v5358_v38 = vrot.slane %v12108_v24, %v9982_v35 }
 0x54b   :  { %v4928_v45 = vmax.f32 %v4926_v12, %v4927_v11  ;;  %v4935_v46 = vmax.f32 %v4933_v47, %v4934_v58  ;;  %v4941_v8 = vrot.slane %v4940_v25, 1  ;;  %v5117_v21 = vsel %vm12098_vm13, %v4921_v42, -inf  ;;  %5656 = vmatprep.subr.mxu1 %v12107_v16  ;;  %vm12110_vm13 = vmmov %vm12085_vm0 }
 0x54c   :  { %v5118_v54 = vmax.f32 %v5116_v15, %v5117_v21  ;;  %5657 = vmatpush1.msra.mxu1 %v5621_v3 }
 0x54d   :  { %v4942_v59 = vmax.f32 %v4940_v25, %v4941_v8  ;;  %v5120_v34 = vsel %vm12100_vm11, %v4928_v45, -inf  ;;  %v5123_v60 = vsel %vm12101_vm4, %v4935_v46, -inf  ;;  %5658 = vmatprep.subr.mxu1 %v12107_v16  ;;  %vm12112_vm11 = vmmov %vm12085_vm0 }
 0x54e   :  { %v5281_v41 = vrot.slane %v5118_v54, %v9982_v35  ;;  %v5121_v36 = vmax.f32 %v5119_v19, %v5120_v34  ;;  %v5124_v53 = vmax.f32 %v5122_v37, %v5123_v60  ;;  %vm12113_vm4 = vmmov %vm12085_vm0 }
 0x54f   :  { %v5126_v56 = vsel %vm12104_vm12, %v4942_v59, -inf  ;;  %vm12116_vm12 = vmmov %vm12085_vm0 }
 0x550   :  { %v5284_v48 = vrot.slane %v5281_v41, 7  ;;  %v5309_v10 = vrot.slane %v5121_v36, %v9982_v35  ;;  %v5337_v23 = vrot.slane %v5124_v53, %v9982_v35  ;;  %v5127_v40 = vmax.f32 %v5125_v39, %v5126_v56 }
 0x552   :  { %v5285_v29 = vsel %vm5172_vm2, %v5284_v48, %v5274_v9  ;;  %v5312_v12 = vrot.slane %v5309_v10, 7  ;;  %v5340_v47 = vrot.slane %v5337_v23, 7  ;;  %v5365_v5 = vrot.slane %v5127_v40, %v9982_v35 }
 0x553   :  { %v5286_v4 = vsel %vm5174_vm7, %v5284_v48, %v5285_v29 }
 0x554   :  { %v5287_v13 = vsel %vm5176_vm9, %v5284_v48, %v5286_v4  ;;  %v5313_v61 = vsel %vm5172_vm2, %v5312_v12, %v5302_v18  ;;  %v5341_v17 = vsel %vm5172_vm2, %v5340_v47, %v5330_v51  ;;  %v5368_v42 = vrot.slane %v5365_v5, 7 }
 0x555   :  { %v5288_v11 = vsel %vm5178_vm3, %v5284_v48, %v5287_v13  ;;  %v5314_v58 = vsel %vm5174_vm7, %v5312_v12, %v5313_v61  ;;  %v5342_v25 = vsel %vm5174_vm7, %v5340_v47, %v5341_v17 }
 0x556   :  { %5289 = vrot.lane.b32.xlu1 %v5288_v11, %s6718_s25  ;;  %v5315_v55 = vsel %vm5176_vm9, %v5312_v12, %v5314_v58  ;;  %v5343_v32 = vsel %vm5176_vm9, %v5340_v47, %v5342_v25  ;;  %v5369_v2 = vsel %vm5172_vm2, %v5368_v42, %v5358_v38 }
 0x557   :  { %v5316_v15 = vsel %vm5178_vm3, %v5312_v12, %v5315_v55  ;;  %v5370_v45 = vsel %vm5174_vm7, %v5368_v42, %v5369_v2  ;;  %v5344_v8 = vsel %vm5178_vm3, %v5340_v47, %v5343_v32 }
 0x558   :  { %5317 = vrot.lane.b32.xlu0 %v5316_v15, %s11725_s17  ;;  %v5371_v46 = vsel %vm5176_vm9, %v5368_v42, %v5370_v45 }
 0x559   :  { %v5372_v21 = vsel %vm5178_vm3, %v5368_v42, %v5371_v46 }
 0x55a   :  { %5345 = vrot.lane.b32.xlu1 %v5344_v8, %s11962_s18 }
 0x55c   :  { %5373 = vrot.lane.b32.xlu0 %v5372_v21, %s6714_s21 }
 0x55f   :  { %v4219_v19 = vpop.f32.mrf.mxu1 }
 0x560   :  { %v4220_v37 = vadd.f32 %v10927_v49, %v4219_v19 }
 0x561   :  { %v4221_v54 = vpop.f32.mrf.mxu1 }
 0x562   :  { %v4250_v60 = vmax.f32 %v4220_v37, 0.0 }
 0x564   :  { %v4474_v36 = vcombine.high %v4250_v60, %v4250_v60  ;;  %v4481_v53 = vrot.slane %v4250_v60, %v9982_v35 }
 0x566   :  { %v4488_v30 = vrot.slane %v4474_v36, %v9982_v35  ;;  %v4489_v9 = vcombine.high %v4481_v53, %v4481_v53  ;;  %v4943_v39 = vsel %vm4606_vm1, %v4481_v53, -inf }
 0x567   :  { %v4944_v1 = vrot.slane %v4943_v39, 4 }
 0x568   :  { %v4490_v56 = vcombine.high %v4488_v30, %v4488_v30  ;;  %v4950_v31 = vsel %vm4606_vm1, %v4489_v9, -inf  ;;  %v4957_v48 = vsel %vm4606_vm1, %v4488_v30, -inf }
 0x569   :  { %v4951_v10 = vrot.slane %v4950_v31, 4  ;;  %v4958_v40 = vrot.slane %v4957_v48, 4  ;;  %v4945_v22 = vmax.f32 %v4943_v39, %v4944_v1 }
 0x56a   :  { %v5206_v59 = vpop.permute.xlu0 %5205  ;;  %v5234_v34 = vpop.permute.xlu1 %5233  ;;  %v4964_v23 = vsel %vm4606_vm1, %v4490_v56, -inf }
 0x56b   :  { %5209 = vst.msk [vmem:[#allocation3] sm:$0x3] %vm5208_vm5, %v5206_v59  ;;  %v4965_v18 = vrot.slane %v4964_v23, 4  ;;  %v4952_v7 = vmax.f32 %v4950_v31, %v4951_v10  ;;  %v4959_v3 = vmax.f32 %v4957_v48, %v4958_v40  ;;  %v4946_v12 = vrot.slane %v4945_v22, 2  ;;  %vm12121_vm5 = vmmov %vm12085_vm0 }
 0x56c   :  { %5237 = vst.msk [vmem:[#allocation3] sm:$0x3] %vm5236_vm6, %v5234_v34  ;;  %vm12122_vm6 = vmmov %vm12085_vm0 }
 0x56d   :  { %v4966_v5 = vmax.f32 %v4964_v23, %v4965_v18  ;;  %v4953_v24 = vrot.slane %v4952_v7, 2  ;;  %v4960_v38 = vrot.slane %v4959_v3, 2  ;;  %v4947_v17 = vmax.f32 %v4945_v22, %v4946_v12 }
 0x56e   :  { %v5262_v41 = vpop.permute.xlu0 %5261 }
 0x56f   :  { %5265 = vst.msk [vmem:[#allocation3] sm:$0x3] %vm5264_vm10, %v5262_v41  ;;  %v4967_v42 = vrot.slane %v4966_v5, 2  ;;  %v4954_v55 = vmax.f32 %v4952_v7, %v4953_v24  ;;  %v4961_v2 = vmax.f32 %v4959_v3, %v4960_v38  ;;  %v4948_v54 = vrot.slane %v4947_v17, 1  ;;  %vm12123_vm10 = vmmov %vm12085_vm0 }
 0x571   :  { %v4968_v37 = vmax.f32 %v4966_v5, %v4967_v42  ;;  %v4955_v53 = vrot.slane %v4954_v55, 1  ;;  %v4962_v30 = vrot.slane %v4961_v2, 1  ;;  %v4949_v1 = vmax.f32 %v4947_v17, %v4948_v54 }
 0x573   :  { %v4969_v48 = vrot.slane %v4968_v37, 1  ;;  %v4956_v18 = vmax.f32 %v4954_v55, %v4955_v53  ;;  %v4963_v7 = vmax.f32 %v4961_v2, %v4962_v30  ;;  %v5617_v30 = vld [vmem:[%s11356_s5 + $0x48] sm:$0xff] }
 0x575   :  { %v4970_v5 = vmax.f32 %v4968_v37, %v4969_v48  ;;  %v5131_v17 = vsel %vm12111_vm8, %v4956_v18, -inf  ;;  %v12119_v48 = vmax.f32 %v10573_v26, %v10579_v0  ;;  %vm12127_vm8 = vmmov %vm12085_vm0 }
 0x57f   :  { %v4224_v51 = vpop.f32.mrf.mxu1 }
 0x580   :  { %v4225_v29 = vadd.f32 %v10927_v49, %v4224_v51 }
 0x581   :  { %v4226_v47 = vpop.f32.mrf.mxu1 }
 0x582   :  { %v4251_v4 = vmax.f32 %v4225_v29, 0.0  ;;  %v5620_v47 = vld [vmem:[%s11356_s5 + $0x60] sm:$0xff] }
 0x583   :  { %5659 = vmatpush1.msra.mxu1 %v5620_v47 }
 0x584   :  { %v4491_v13 = vcombine.high %v4251_v4, %v4251_v4  ;;  %v4498_v61 = vrot.slane %v4251_v4, %v9982_v35  ;;  %v5128_v4 = vsel %vm12109_vm14, %v4949_v1, -inf  ;;  %5660 = vmatprep.subr.mxu1 %v12107_v16  ;;  %vm12124_vm14 = vmmov %vm12085_vm0 }
 0x586   :  { %v4505_v11 = vrot.slane %v4491_v13, %v9982_v35  ;;  %v4506_v58 = vcombine.high %v4498_v61, %v4498_v61  ;;  %v4971_v25 = vsel %vm4606_vm1, %v4498_v61, -inf }
 0x587   :  { %v4972_v32 = vrot.slane %v4971_v25, 4 }
 0x588   :  { %v4507_v15 = vcombine.high %v4505_v11, %v4505_v11  ;;  %v4978_v45 = vsel %vm4606_vm1, %v4506_v58, -inf  ;;  %v4985_v46 = vsel %vm4606_vm1, %v4505_v11, -inf  ;;  %v5134_v11 = vsel %vm12085_vm0, %v4963_v7, -inf }
 0x589   :  { %v4973_v8 = vmax.f32 %v4971_v25, %v4972_v32  ;;  %v4979_v21 = vrot.slane %v4978_v45, 4  ;;  %v4986_v19 = vrot.slane %v4985_v46, 4  ;;  %v5619_v32 = vld [vmem:[%s11356_s5 + $0x58] sm:$0xff] }
 0x58a   :  { %v4992_v59 = vsel %vm4606_vm1, %v4507_v15, -inf  ;;  %5661 = vmatpush1.msra.mxu1 %v5619_v32 }
 0x58b   :  { %v4974_v34 = vrot.slane %v4973_v8, 2  ;;  %v4980_v60 = vmax.f32 %v4978_v45, %v4979_v21  ;;  %v4987_v41 = vmax.f32 %v4985_v46, %v4986_v19  ;;  %v4993_v36 = vrot.slane %v4992_v59, 4  ;;  %5662 = vmatprep.subr.mxu1 %v12107_v16 }
 0x58c   :  { %v5137_v19 = vsel %vm12115_vm15, %v4970_v5, -inf  ;;  %vm5404_vm15 = vcmask 878336  }
 0x58d   :  { %v4975_v9 = vmax.f32 %v4973_v8, %v4974_v34  ;;  %v4981_v39 = vrot.slane %v4980_v60, 2  ;;  %v4988_v56 = vrot.slane %v4987_v41, 2  ;;  %v4994_v31 = vmax.f32 %v4992_v59, %v4993_v36 }
 0x58e   :  { %v12114_v8 = vmax.f32 %v10563_v28, %v10566_v52  ;;  %v12117_v36 = vmax.f32 %v10576_v27, %v10582_v50  ;;  %v5618_v52 = vld [vmem:[%s11356_s5 + $0x50] sm:$0xff]  ;;  %v12118_v50 = vmax.f32 %v10694_v20, %v10689_v63 }
 0x58f   :  { %v4976_v10 = vrot.slane %v4975_v9, 1  ;;  %v4982_v23 = vmax.f32 %v4980_v60, %v4981_v39  ;;  %v4989_v40 = vmax.f32 %v4987_v41, %v4988_v56  ;;  %v4995_v22 = vrot.slane %v4994_v31, 2  ;;  %5663 = vmatpush1.msra.mxu1 %v5618_v52  ;;  %v5609_v52 = vld [vmem:[%s11356_s5 + $0x8] sm:$0xff] }
 0x590   :  { %v5386_v21 = vrot.slane %v12114_v8, %v9982_v35  ;;  %v5442_v53 = vrot.slane %v12117_v36, %v9982_v35  ;;  %v5475_v1 = vrot.slane %v12118_v50, %v9982_v35  ;;  %5664 = vmatprep.subr.mxu1 %v12107_v16 }
 0x591   :  { %v4977_v51 = vmax.f32 %v4975_v9, %v4976_v10  ;;  %v4983_v3 = vrot.slane %v4982_v23, 1  ;;  %v4990_v29 = vrot.slane %v4989_v40, 1  ;;  %v4996_v12 = vmax.f32 %v4994_v31, %v4995_v22  ;;  %5665 = vmatpush1.msra.mxu1 %v5617_v30 }
 0x592   :  { %v5414_v10 = vrot.slane %v12119_v48, %v9982_v35  ;;  %5666 = vmatprep.subr.mxu1 %v12107_v16 }
 0x593   :  { %v4984_v24 = vmax.f32 %v4982_v23, %v4983_v3  ;;  %v4991_v38 = vmax.f32 %v4989_v40, %v4990_v29  ;;  %v4997_v13 = vrot.slane %v4996_v12, 1  ;;  %v5129_v61 = vsel %vm12110_vm13, %v4977_v51, -inf  ;;  %v5616_v40 = vld [vmem:[%s11356_s5 + $0x40] sm:$0xff]  ;;  %v5615_v3 = vld [vmem:[%s11356_s5 + $0x38] sm:$0xff]  ;;  %vm12125_vm13 = vmmov %vm12085_vm0 }
 0x594   :  { %v5130_v42 = vmax.f32 %v5128_v4, %v5129_v61  ;;  %5667 = vmatpush1.msra.mxu1 %v5616_v40 }
 0x595   :  { %v4998_v58 = vmax.f32 %v4996_v12, %v4997_v13  ;;  %v5132_v25 = vsel %vm12112_vm11, %v4984_v24, -inf  ;;  %v5135_v55 = vsel %vm12113_vm4, %v4991_v38, -inf  ;;  %5668 = vmatprep.subr.mxu1 %v12107_v16  ;;  %v5614_v13 = vld [vmem:[%s11356_s5 + $0x30] sm:$0xff]  ;;  %vm5292_vm11 = vcmask 484736  }
 0x596   :  { %v5393_v2 = vrot.slane %v5130_v42, %v9982_v35  ;;  %v5136_v15 = vmax.f32 %v5134_v11, %v5135_v55  ;;  %v5133_v45 = vmax.f32 %v5131_v17, %v5132_v25  ;;  %5669 = vmatpush1.msra.mxu1 %v5615_v3  ;;  %v5613_v55 = vld [vmem:[%s11356_s5 + $0x28] sm:$0xff]  ;;  %vm5320_vm4 = vcmask 583136  }
 0x597   :  { %v4229_v46 = vpop.f32.mrf.mxu1  ;;  %v5138_v54 = vsel %vm12116_vm12, %v4998_v58, -inf  ;;  %5670 = vmatprep.subr.mxu1 %v12107_v16  ;;  %vm5464_vm12 = vcmask 27650  }
 0x598   :  { %v4230_v37 = vadd.f32 %v10927_v49, %v4229_v46  ;;  %v5396_v59 = vrot.slane %v5393_v2, 7  ;;  %v5449_v34 = vrot.slane %v5136_v15, %v9982_v35  ;;  %v5139_v60 = vmax.f32 %v5137_v19, %v5138_v54  ;;  %5671 = vmatpush1.msra.mxu1 %v5614_v13  ;;  %v5612_v46 = vld [vmem:[%s11356_s5 + $0x20] sm:$0xff]  ;;  %v5611_v54 = vld [vmem:[%s11356_s5 + $0x18] sm:$0xff] }
 0x599   :  { %v4231_v41 = vpop.f32.mrf.mxu1  ;;  %v5421_v28 = vrot.slane %v5133_v45, %v9982_v35  ;;  %5672 = vmatprep.subr.mxu1 %v12107_v16 }
 0x59a   :  { %v4252_v9 = vmax.f32 %v4230_v37, 0.0  ;;  %v5397_v39 = vsel %vm5172_vm2, %v5396_v59, %v5386_v21  ;;  %v5452_v56 = vrot.slane %v5449_v34, 7  ;;  %v5482_v31 = vrot.slane %v5139_v60, %v9982_v35  ;;  %5673 = vmatpush1.msra.mxu1 %v5613_v55  ;;  %v5610_v60 = vld [vmem:[%s11356_s5 + $0x10] sm:$0xff] }
 0x59b   :  { %v5398_v27 = vsel %vm5174_vm7, %v5396_v59, %v5397_v39  ;;  %v5424_v23 = vrot.slane %v5421_v28, 7  ;;  %5674 = vmatprep.subr.mxu1 %v12107_v16 }
 0x59c   :  { %v4508_v22 = vcombine.high %v4252_v9, %v4252_v9  ;;  %v4515_v18 = vrot.slane %v4252_v9, %v9982_v35  ;;  %v5399_v7 = vsel %vm5176_vm9, %v5396_v59, %v5398_v27  ;;  %v5453_v63 = vsel %vm5172_vm2, %v5452_v56, %v5442_v53  ;;  %5675 = vmatpush1.msra.mxu1 %v5612_v46 }
 0x59d   :  { %v5400_v20 = vsel %vm5178_vm3, %v5396_v59, %v5399_v7  ;;  %v5454_v26 = vsel %vm5174_vm7, %v5452_v56, %v5453_v63  ;;  %v5485_v0 = vrot.slane %v5482_v31, 7  ;;  %v5425_v51 = vsel %vm5172_vm2, %v5424_v23, %v5414_v10  ;;  %5676 = vmatprep.subr.mxu1 %v12107_v16  ;;  %v5630_v7 = vld [vmem:[%s11356_s5 + $0xb0] sm:$0xff] }
 0x59e   :  { %v4522_v29 = vrot.slane %v4508_v22, %v9982_v35  ;;  %v4523_v12 = vcombine.high %v4515_v18, %v4515_v18  ;;  %v4999_v47 = vsel %vm4606_vm1, %v4515_v18, -inf  ;;  %5401 = vrot.lane.b32.xlu0 %v5400_v20, %s6723_s1  ;;  %v5455_v5 = vsel %vm5176_vm9, %v5452_v56, %v5454_v26  ;;  %5677 = vmatpush1.msra.mxu1 %v5611_v54  ;;  %s5918_s1 = sshll.u32 %s6737_s4, 4  ;;  %s5919_s1 = int_to_ptr.vmem [resolvable:$true] %s5918_s1 }
 0x59f   :  { %v5456_v4 = vsel %vm5178_vm3, %v5452_v56, %v5455_v5  ;;  %v5486_v24 = vsel %vm5172_vm2, %v5485_v0, %v5475_v1  ;;  %v5426_v38 = vsel %vm5174_vm7, %v5424_v23, %v5425_v51  ;;  %v5000_v11 = vrot.slane %v4999_v47, 4  ;;  %5678 = vmatprep.subr.mxu1 %v12107_v16  ;;  %v5608_v56 = vld [vmem:[%s11356_s5] sm:$0xff]  ;;  %v5631_v1 = vld [vmem:[%s11356_s5 + $0xb8] sm:$0xff]  ;;  %p6690_p1 = scmp.lt.s32.totalorder %s5919_s1, %s5919_s1 }
 0x5a0   :  { %v4524_v61 = vcombine.high %v4522_v29, %v4522_v29  ;;  %v5006_v17 = vsel %vm4606_vm1, %v4523_v12, -inf  ;;  %5457 = vrot.lane.b32.xlu1 %v5456_v4, %s11727_s14  ;;  %v5487_v42 = vsel %vm5174_vm7, %v5485_v0, %v5486_v24  ;;  %v5013_v58 = vsel %vm4606_vm1, %v4522_v29, -inf  ;;  %5679 = vmatpush1.msra.mxu1 %v5610_v60 }
 0x5a1   :  { %v5488_v25 = vsel %vm5176_vm9, %v5485_v0, %v5487_v42  ;;  %v5427_v2 = vsel %vm5176_vm9, %v5424_v23, %v5426_v38  ;;  %v5007_v15 = vrot.slane %v5006_v17, 4  ;;  %v5014_v8 = vrot.slane %v5013_v58, 4  ;;  %5680 = vmatprep.subr.mxu1 %v12107_v16 }
 0x5a2   :  { %v5489_v32 = vsel %vm5178_vm3, %v5485_v0, %v5488_v25  ;;  %v5020_v45 = vsel %vm4606_vm1, %v4524_v61, -inf  ;;  %v5428_v21 = vsel %vm5178_vm3, %v5424_v23, %v5427_v2  ;;  %v5001_v19 = vmax.f32 %v4999_v47, %v5000_v11  ;;  %5681 = vmatpush1.msra.mxu1 %v5609_v52 }
 0x5a3   :  { %5490 = vrot.lane.b32.xlu0 %v5489_v32, %s6730_s15  ;;  %v5021_v37 = vrot.slane %v5020_v45, 4  ;;  %v5008_v59 = vmax.f32 %v5006_v17, %v5007_v15  ;;  %v5015_v41 = vmax.f32 %v5013_v58, %v5014_v8  ;;  %5682 = vmatprep.subr.mxu1 %v12107_v16 }
 0x5a4   :  { %5429 = vrot.lane.b32.xlu1 %v5428_v21, %s11719_s13  ;;  %v5002_v53 = vrot.slane %v5001_v19, 2  ;;  %5683 = vmatpush1.msra.mxu1 %v5608_v56 }
 0x5a5   :  { %v5022_v30 = vmax.f32 %v5020_v45, %v5021_v37  ;;  %v5009_v39 = vrot.slane %v5008_v59, 2  ;;  %5700 = vmatprep.subr.mxu1 %v12107_v16 }
 0x5a6   :  { %v5003_v50 = vmax.f32 %v5001_v19, %v5002_v53  ;;  %5701 = vmatpush2.msra.mxu1 %v5631_v1 }
 0x5a7   :  { %v4234_v34 = vpop.f32.mrf.mxu1  ;;  %v5023_v48 = vrot.slane %v5022_v30, 2  ;;  %v5010_v22 = vmax.f32 %v5008_v59, %v5009_v39  ;;  %5702 = vmatprep.subr.mxu1 %v12107_v16 }
 0x5a8   :  { %v4235_v36 = vadd.f32 %v10927_v49, %v4234_v34  ;;  %v5016_v49 = vrot.slane %v5015_v41, 2  ;;  %v5004_v12 = vrot.slane %v5003_v50, 1  ;;  %5703 = vmatpush2.msra.mxu1 %v5630_v7  ;;  %v5629_v34 = vld [vmem:[%s11356_s5 + $0xa8] sm:$0xff]  ;;  %v5626_v7 = vld [vmem:[%s11356_s5 + $0x90] sm:$0xff] }
 0x5a9   :  { %v4236_v28 = vpop.f32.mrf.mxu1  ;;  %v5024_v47 = vmax.f32 %v5022_v30, %v5023_v48  ;;  %5704 = vmatprep.subr.mxu1 %v12107_v16  ;;  %v5011_v61 = vrot.slane %v5010_v22, 1 }
 0x5aa   :  { %v4253_v9 = vmax.f32 %v4235_v36, 0.0  ;;  %v5017_v63 = vmax.f32 %v5015_v41, %v5016_v49  ;;  %v5005_v55 = vmax.f32 %v5003_v50, %v5004_v12  ;;  %5705 = vmatpush2.msra.mxu1 %v5629_v34 }
 0x5ab   :  { %v5025_v32 = vrot.slane %v5024_v47, 1  ;;  %v5012_v8 = vmax.f32 %v5010_v22, %v5011_v61  ;;  %5706 = vmatprep.subr.mxu1 %v12107_v16 }
 0x5ac   :  { %v4525_v31 = vcombine.high %v4253_v9, %v4253_v9  ;;  %v4532_v27 = vrot.slane %v4253_v9, %v9982_v35  ;;  %v5018_v17 = vrot.slane %v5017_v63, 1 }
 0x5ad   :  { %v5026_v60 = vmax.f32 %v5024_v47, %v5025_v32  ;;  %v5143_v30 = vsel %vm12122_vm6, %v5012_v8, -inf }
 0x5ae   :  { %v4539_v10 = vrot.slane %v4525_v31, %v9982_v35  ;;  %v4540_v23 = vcombine.high %v4532_v27, %v4532_v27  ;;  %v5027_v40 = vsel %vm4606_vm1, %v4532_v27, -inf  ;;  %v5019_v21 = vmax.f32 %v5017_v63, %v5018_v17  ;;  %v5628_v27 = vld [vmem:[%s11356_s5 + $0xa0] sm:$0xff] }
 0x5af   :  { %v5028_v18 = vrot.slane %v5027_v40, 4  ;;  %5707 = vmatpush2.msra.mxu1 %v5628_v27  ;;  %v5734_v27 = vld [vmem:[%s11358_s7 + $0x58] sm:$0xff] }
 0x5b0   :  { %v4541_v20 = vcombine.high %v4539_v10, %v4539_v10  ;;  %v5034_v26 = vsel %vm4606_vm1, %v4540_v23, -inf  ;;  %v5041_v0 = vsel %vm4606_vm1, %v4539_v10, -inf  ;;  %v5146_v39 = vsel %vm12123_vm10, %v5019_v21, -inf  ;;  %5708 = vmatprep.subr.mxu1 %v12107_v16 }
 0x5b1   :  { %v5029_v51 = vmax.f32 %v5027_v40, %v5028_v18  ;;  %v5035_v3 = vrot.slane %v5034_v26, 4  ;;  %v5042_v29 = vrot.slane %v5041_v0, 4  ;;  %v12126_v10 = vmax.f32 %v10775_v33, %v10778_v57  ;;  %v5627_v18 = vld [vmem:[%s11356_s5 + $0x98] sm:$0xff] }
 0x5b2   :  { %v5048_v5 = vsel %vm4606_vm1, %v4541_v20, -inf  ;;  %vm12120_vm1 = vmmov %vm12085_vm0  ;;  %v5149_v40 = vsel %vm12127_vm8, %v5026_v60, -inf  ;;  %5709 = vmatpush2.msra.mxu1 %v5627_v18  ;;  %vm5493_vm10 = vcmask 123936   ;;  %vm5605_vm8 = vcmask 517536   ;;  %v5726_v18 = vld [vmem:[%s11358_s7 + $0x18] sm:$0xff] }
 0x5b3   :  { %v5030_v4 = vrot.slane %v5029_v51, 2  ;;  %v5036_v24 = vmax.f32 %v5034_v26, %v5035_v3  ;;  %v5043_v38 = vmax.f32 %v5041_v0, %v5042_v29  ;;  %v5049_v13 = vrot.slane %v5048_v5, 4  ;;  %5710 = vmatprep.subr.mxu1 %v12107_v16  ;;  %v5625_v29 = vld [vmem:[%s11356_s5 + $0x88] sm:$0xff] }
 0x5b4   :  { %v5140_v41 = vsel %vm12120_vm1, %v5005_v55, -inf  ;;  %v5503_v23 = vrot.slane %v12126_v10, %v9982_v35  ;;  %v12128_v26 = vmax.f32 %v10783_v62, %v10789_v14  ;;  %5711 = vmatpush2.msra.mxu1 %v5626_v7  ;;  %v12130_v14 = vld [vmem:[#allocation21_spill] sm:$0xff]  ;;  %vm5460_vm1 = vcmask 982016  }
 0x5b5   :  { %v5031_v42 = vmax.f32 %v5029_v51, %v5030_v4  ;;  %v5037_v11 = vrot.slane %v5036_v24, 2  ;;  %v5044_v58 = vrot.slane %v5043_v38, 2  ;;  %v5050_v25 = vmax.f32 %v5048_v5, %v5049_v13  ;;  %5712 = vmatprep.subr.mxu1 %v12107_v16  ;;  %v5730_v10 = vld [vmem:[%s11358_s7 + $0x38] sm:$0xff]  ;;  %v5725_v7 = vld [vmem:[%s11358_s7 + $0x10] sm:$0xff] }
 0x5b6   :  { %v5531_v0 = vrot.slane %v12128_v26, %v9982_v35  ;;  %v12129_v51 = vmax.f32 %v10786_v44, %v10792_v43  ;;  %v12131_v44 = vmax.f32 %v10843_v6, %v12130_v14  ;;  %5713 = vmatpush2.msra.mxu1 %v5625_v29  ;;  %v5831_v29 = vld [vmem:[%s11360_s9 + $0x70] sm:$0xff]  ;;  %v5825_v14 = vld [vmem:[%s11360_s9 + $0x40] sm:$0xff] }
 0x5b7   :  { %v5032_v2 = vrot.slane %v5031_v42, 1  ;;  %v5038_v15 = vmax.f32 %v5036_v24, %v5037_v11  ;;  %v5045_v45 = vmax.f32 %v5043_v38, %v5044_v58  ;;  %v5051_v46 = vrot.slane %v5050_v25, 2  ;;  %v5624_v24 = vld [vmem:[%s11356_s5 + $0x80] sm:$0xff]  ;;  %5714 = vmatprep.subr.mxu1 %v12107_v16  ;;  %s6733_s5 = smov 28  }
 0x5b8   :  { %v5559_v3 = vrot.slane %v12129_v51, %v9982_v35  ;;  %v5587_v43 = vrot.slane %v12131_v44, %v9982_v35  ;;  %5715 = vmatpush2.msra.mxu1 %v5624_v24  ;;  %v5824_v44 = vld [vmem:[%s11360_s9 + $0x38] sm:$0xff]  ;;  %v5822_v24 = vld [vmem:[%s11360_s9 + $0x28] sm:$0xff] }
 0x5b9   :  { %v5033_v19 = vmax.f32 %v5031_v42, %v5032_v2  ;;  %v5039_v54 = vrot.slane %v5038_v15, 1  ;;  %v5046_v37 = vrot.slane %v5045_v45, 1  ;;  %v5052_v59 = vmax.f32 %v5050_v25, %v5051_v46  ;;  %6573 = vmatprep.subr.mxu1 %v12107_v16 }
 0x5bb   :  { %v5040_v36 = vmax.f32 %v5038_v15, %v5039_v54  ;;  %v5047_v53 = vmax.f32 %v5045_v45, %v5046_v37  ;;  %v5053_v28 = vrot.slane %v5052_v59, 1  ;;  %v5141_v52 = vsel %vm12121_vm5, %v5033_v19, -inf }
 0x5bc   :  { %v5142_v9 = vmax.f32 %v5140_v41, %v5141_v52  ;;  %vm5432_vm5 = vcmask 976736  }
 0x5bd   :  { %v5054_v56 = vmax.f32 %v5052_v59, %v5053_v28  ;;  %v5144_v49 = vsel %vm12124_vm14, %v5040_v36, -inf  ;;  %v5147_v31 = vsel %vm12125_vm13, %v5047_v53, -inf  ;;  %vm5549_vm14 = vcmask 320736  }
 0x5be   :  { %v5510_v50 = vrot.slane %v5142_v9, %v9982_v35  ;;  %v5145_v1 = vmax.f32 %v5143_v30, %v5144_v49  ;;  %v5148_v48 = vmax.f32 %v5146_v39, %v5147_v31  ;;  %vm5577_vm13 = vcmask 419136   ;;  %v5738_v39 = vld [vmem:[%s11358_s7 + $0x78] sm:$0xff]  ;;  %v5736_v49 = vld [vmem:[%s11358_s7 + $0x68] sm:$0xff]  ;;  %v5735_v31 = vld [vmem:[%s11358_s7 + $0x60] sm:$0xff] }
 0x5bf   :  { %v5150_v22 = vsel %vm12085_vm0, %v5054_v56, -inf  ;;  %vm5649_vm0 = vcmask 523264   ;;  %v5737_v56 = vld [vmem:[%s11358_s7 + $0x70] sm:$0xff] }
 0x5c0   :  { %v5513_v63 = vrot.slane %v5510_v50, 7  ;;  %v5538_v20 = vrot.slane %v5145_v1, %v9982_v35  ;;  %v5566_v33 = vrot.slane %v5148_v48, %v9982_v35  ;;  %v5151_v57 = vmax.f32 %v5149_v40, %v5150_v22  ;;  %v5733_v50 = vld [vmem:[%s11358_s7 + $0x50] sm:$0xff]  ;;  %v5732_v1 = vld [vmem:[%s11358_s7 + $0x48] sm:$0xff]  ;;  %v5731_v48 = vld [vmem:[%s11358_s7 + $0x40] sm:$0xff] }
 0x5c1   :  { %v5728_v40 = vld [vmem:[%s11358_s7 + $0x28] sm:$0xff]  ;;  %v5727_v22 = vld [vmem:[%s11358_s7 + $0x20] sm:$0xff] }
 0x5c2   :  { %v5514_v12 = vsel %vm5172_vm2, %v5513_v63, %v5503_v23  ;;  %v5541_v47 = vrot.slane %v5538_v20, 7  ;;  %v5569_v5 = vrot.slane %v5566_v33, 7  ;;  %v5594_v4 = vrot.slane %v5151_v57, %v9982_v35  ;;  %v5729_v23 = vld [vmem:[%s11358_s7 + $0x30] sm:$0xff]  ;;  %v5723_v20 = vld [vmem:[%s11358_s7] sm:$0xff] }
 0x5c3   :  { %v5515_v62 = vsel %vm5174_vm7, %v5513_v63, %v5514_v12  ;;  %v6162_v33 = vld [vmem:[%s11357_s6] ss:$0 sm:$0xff]  ;;  %v5830_v12 = vld [vmem:[%s11360_s9 + $0x68] sm:$0xff] }
 0x5c4   :  { %v5516_v38 = vsel %vm5176_vm9, %v5513_v63, %v5515_v62  ;;  %v5542_v13 = vsel %vm5172_vm2, %v5541_v47, %v5531_v0  ;;  %v5570_v61 = vsel %vm5172_vm2, %v5569_v5, %v5559_v3  ;;  %v5597_v17 = vrot.slane %v5594_v4, 7  ;;  %v5832_v3 = vld [vmem:[%s11360_s9 + $0x78] sm:$0xff]  ;;  %v5827_v4 = vld [vmem:[%s11360_s9 + $0x50] sm:$0xff]  ;;  %v5826_v62 = vld [vmem:[%s11360_s9 + $0x48] sm:$0xff] }
 0x5c5   :  { %v5517_v42 = vsel %vm5178_vm3, %v5513_v63, %v5516_v38  ;;  %v5543_v11 = vsel %vm5174_vm7, %v5541_v47, %v5542_v13  ;;  %v5571_v35 = vsel %vm5174_vm7, %v5569_v5, %v5570_v61  ;;  %v5724_v63 = vld [vmem:[%s11358_s7 + $0x8] sm:$0xff]  ;;  %v5821_v38 = vld [vmem:[%s11360_s9 + $0x20] sm:$0xff]  ;;  %v5820_v13 = vld [vmem:[%s11360_s9 + $0x18] sm:$0xff] }
 0x5c6   :  { %5518 = vrot.lane.b32.xlu1 %v5517_v42, %s6725_s0  ;;  %v5544_v6 = vsel %vm5176_vm9, %v5541_v47, %v5543_v11  ;;  %v5572_v58 = vsel %vm5176_vm9, %v5569_v5, %v5571_v35  ;;  %v5598_v25 = vsel %vm5172_vm2, %v5597_v17, %v5587_v43  ;;  %s6734_s0 = smov 40   ;;  %vm5348_vm2 = vcmask 681536   ;;  %v5823_v43 = vld [vmem:[%s11360_s9 + $0x30] sm:$0xff]  ;;  %v5817_v42 = vld [vmem:[%s11360_s9] sm:$0xff] }
 0x5c7   :  { %v5545_v55 = vsel %vm5178_vm3, %v5541_v47, %v5544_v6  ;;  %v5599_v32 = vsel %vm5174_vm7, %v5597_v17, %v5598_v25  ;;  %v5573_v45 = vsel %vm5178_vm3, %v5569_v5, %v5572_v58  ;;  %vm5376_vm7 = vcmask 779936   ;;  %v5829_v47 = vld [vmem:[%s11360_s9 + $0x60] sm:$0xff]  ;;  %v5828_v5 = vld [vmem:[%s11360_s9 + $0x58] sm:$0xff]  ;;  %v5819_v61 = vld [vmem:[%s11360_s9 + $0x10] sm:$0xff] }
 0x5c8   :  { %v5290_v2 = vpop.permute.xlu1 %5289  ;;  %5546 = vrot.lane.b32.xlu0 %v5545_v55, %s6733_s5  ;;  %v5600_v15 = vsel %vm5176_vm9, %v5597_v17, %v5599_v32  ;;  %vm5463_vm9 = vcmask 1042368   ;;  %v6165_v11 = vld [vmem:[%s11359_s8] ss:$0 sm:$0xff] }
 0x5c9   :  { %5293 = vst.msk [vmem:[#allocation3] sm:$0x3] %vm5292_vm11, %v5290_v2  ;;  %v5601_v8 = vsel %vm5178_vm3, %v5597_v17, %v5600_v15  ;;  %vm5465_vm6 = vmor %vm5464_vm12, %vm5463_vm9  ;;  %vm5521_vm3 = vcmask 222336   ;;  %vm6736_vm11 = vmmov 0   ;;  %v5818_v17 = vld [vmem:[%s11360_s9 + $0x8] sm:$0xff]  ;;  %s6685_s9 = scalar_lea.vmem %s5919_s1, 32 }
 0x5ca   :  { %5574 = vrot.lane.b32.xlu1 %v5573_v45, %s6734_s0  ;;  %v5318_v46 = vpop.permute.xlu0 %5317  ;;  %v6166_v55 = vld [vmem:[%s11361_s10] ss:$0 sm:$0xff]  ;;  %p6686_p0 = scmp.ne.s32.totalorder %s5919_s1, %s6685_s9  ;;  %p6691_p2 = scmp.lt.s32.totalorder %s6685_s9, %s6685_s9 }
 0x5cb   :  { %5321 = vst.msk [vmem:[#allocation3] sm:$0x3] %vm5320_vm4, %v5318_v46  ;;  %vm5910_vm4 = vcmask 74752  }
 0x5cc   :  { %v5346_v21 = vpop.permute.xlu1 %5345  ;;  %5602 = vrot.lane.b32.xlu0 %v5601_v8, %s6735_s28  ;;  %p6692_p3 = por %p6691_p2, %p6690_p1 }
 0x5cd   :  { %5349 = vst.msk [vmem:[#allocation3] sm:$0x3] %vm5348_vm2, %v5346_v21 }
 0x5ce   :  { %v5374_v19 = vpop.permute.xlu0 %5373  ;;  %p6693_p4 = pnand %p6692_p3, %p6686_p0 }
 0x5cf   :  { %5377 = vst.msk [vmem:[#allocation3] sm:$0x3] %vm5376_vm7, %v5374_v19 }
 0x610   :  { %v5402_v54 = vpop.permute.xlu0 %5401 }
 0x611   :  { %5405 = vst.msk [vmem:[#allocation3] sm:$0x3] %vm5404_vm15, %v5402_v54 }
 0x612   :  { %v5458_v37 = vpop.permute.xlu1 %5457 }
 0x613   :  { %v5459_v59 = vrot.slane %v5458_v37, 6 }
 0x615   :  { %v5461_v60 = vsel %vm5460_vm1, %v5459_v59, %v5458_v37  ;;  %v5491_v41 = vpop.permute.xlu0 %5490 }
 0x616   :  { %v5430_v34 = vpop.permute.xlu1 %5429 }
 0x617   :  { %5433 = vst.msk [vmem:[#allocation3] sm:$0x3] %vm5432_vm5, %v5430_v34 }
 0x618   :  { %5466 = vst.msk [vmem:[#allocation3] sm:$0xf] %vm5465_vm6, %v5461_v60 }
 0x619   :  { %5494 = vst.msk [vmem:[#allocation3 + $0x2] sm:$0x3] %vm5493_vm10, %v5491_v41 }
 0x638   :  { %v5519_v36 = vpop.permute.xlu1 %5518 }
 0x639   :  { %5522 = vst.msk [vmem:[#allocation3 + $0x2] sm:$0x3] %vm5521_vm3, %v5519_v36 }
 0x63a   :  { %v5547_v53 = vpop.permute.xlu0 %5546 }
 0x63b   :  { %5550 = vst.msk [vmem:[#allocation3 + $0x2] sm:$0x3] %vm5549_vm14, %v5547_v53 }
 0x63c   :  { %v5575_v28 = vpop.permute.xlu1 %5574 }
 0x63d   :  { %5578 = vst.msk [vmem:[#allocation3 + $0x2] sm:$0x3] %vm5577_vm13, %v5575_v28 }
 0x63e   :  { %v5603_v52 = vpop.permute.xlu0 %5602 }
 0x63f   :  { %5606 = vst.msk [vmem:[#allocation3 + $0x2] sm:$0x3] %vm5605_vm8, %v5603_v52 }
 0x646   :  { %v6163_v30 = vld.sshfl [vmem:[#allocation3] sm:$0x33 pattern:$0x76325410] }
 0x647   :  { %v5647_v9 = vcombine.high %v6163_v30, %v6163_v30 }
 0x649   :  { %6164 = vmatprep.mubr.msk.f32.mxu1 %vm5649_vm0, %v5647_v9 }
 0x64a   :  { %5717 = vmatmul.mubr.f32.vlgmr.msra.gmra.mxu1 %v6163_v30 }
 0x64b   :  { %6574 = vmatpush3.msra.mxu1 %v5738_v39  ;;  %6605 = vmatprep.mubr.msk.f32.mxu1 %vm6736_vm11, %v12107_v16 }
 0x64c   :  { %6575 = vmatprep.subr.mxu1 %v12107_v16 }
 0x64d   :  { %6576 = vmatpush3.msra.mxu1 %v5737_v56 }
 0x64e   :  { %6577 = vmatprep.subr.mxu1 %v12107_v16 }
 0x64f   :  { %6578 = vmatpush3.msra.mxu1 %v5736_v49 }
 0x650   :  { %6579 = vmatprep.subr.mxu1 %v12107_v16 }
 0x651   :  { %6580 = vmatpush3.msra.mxu1 %v5735_v31 }
 0x652   :  { %6581 = vmatprep.subr.mxu1 %v12107_v16 }
 0x653   :  { %6582 = vmatpush3.msra.mxu1 %v5734_v27 }
 0x654   :  { %6583 = vmatprep.subr.mxu1 %v12107_v16 }
 0x655   :  { %6584 = vmatpush3.msra.mxu1 %v5733_v50 }
 0x656   :  { %6585 = vmatprep.subr.mxu1 %v12107_v16 }
 0x657   :  { %6586 = vmatpush3.msra.mxu1 %v5732_v1 }
 0x658   :  { %6587 = vmatprep.subr.mxu1 %v12107_v16 }
 0x659   :  { %6588 = vmatpush3.msra.mxu1 %v5731_v48 }
 0x65a   :  { %6589 = vmatprep.subr.mxu1 %v12107_v16 }
 0x65b   :  { %6590 = vmatpush3.msra.mxu1 %v5730_v10 }
 0x65c   :  { %6591 = vmatprep.subr.mxu1 %v12107_v16 }
 0x65d   :  { %6592 = vmatpush3.msra.mxu1 %v5729_v23 }
 0x65e   :  { %6593 = vmatprep.subr.mxu1 %v12107_v16 }
 0x65f   :  { %6594 = vmatpush3.msra.mxu1 %v5728_v40 }
 0x660   :  { %6595 = vmatprep.subr.mxu1 %v12107_v16 }
 0x661   :  { %6596 = vmatpush3.msra.mxu1 %v5727_v22 }
 0x662   :  { %6597 = vmatprep.subr.mxu1 %v12107_v16 }
 0x663   :  { %6598 = vmatpush3.msra.mxu1 %v5726_v18 }
 0x664   :  { %6599 = vmatprep.subr.mxu1 %v12107_v16 }
 0x665   :  { %6600 = vmatpush3.msra.mxu1 %v5725_v7 }
 0x666   :  { %6601 = vmatprep.subr.mxu1 %v12107_v16 }
 0x667   :  { %6602 = vmatpush3.msra.mxu1 %v5724_v63 }
 0x668   :  { %6603 = vmatprep.subr.mxu1 %v12107_v16 }
 0x669   :  { %6604 = vmatpush3.msra.mxu1 %v5723_v20 }
 0x66a   :  { %6608 = vmatprep.subr.mxu1 %v12107_v16 }
 0x70a   :  { %v5718_v57 = vpop.f32.mrf.mxu1 }
 0x70b   :  { %v5719_v26 = vadd.f32 %v6162_v33, %v5718_v57 }
 0x70c   :  { %v5720_v0 = vpop.f32.mrf.mxu1 }
 0x70d   :  { %v5722_v51 = vmax.f32 %v5719_v26, 0.0 }
 0x70f   :  { %6606 = vmatmul.mubr.f32.vlgmr.msra.gmra.mxu1 %v5722_v51 }
 0x710   :  { %6609 = vmatpush3.msra.mxu1 %v5832_v3  ;;  %6640 = vmatprep.mubr.msk.f32.mxu1 %vm6736_vm11, %v12107_v16 }
 0x711   :  { %6610 = vmatprep.subr.mxu1 %v12107_v16 }
 0x712   :  { %6611 = vmatpush3.msra.mxu1 %v5831_v29 }
 0x713   :  { %6612 = vmatprep.subr.mxu1 %v12107_v16 }
 0x714   :  { %6613 = vmatpush3.msra.mxu1 %v5830_v12 }
 0x715   :  { %6614 = vmatprep.subr.mxu1 %v12107_v16 }
 0x716   :  { %6615 = vmatpush3.msra.mxu1 %v5829_v47 }
 0x717   :  { %6616 = vmatprep.subr.mxu1 %v12107_v16 }
 0x718   :  { %6617 = vmatpush3.msra.mxu1 %v5828_v5 }
 0x719   :  { %6618 = vmatprep.subr.mxu1 %v12107_v16 }
 0x71a   :  { %6619 = vmatpush3.msra.mxu1 %v5827_v4 }
 0x71b   :  { %6620 = vmatprep.subr.mxu1 %v12107_v16 }
 0x71c   :  { %6621 = vmatpush3.msra.mxu1 %v5826_v62 }
 0x71d   :  { %6622 = vmatprep.subr.mxu1 %v12107_v16 }
 0x71e   :  { %6623 = vmatpush3.msra.mxu1 %v5825_v14 }
 0x71f   :  { %6624 = vmatprep.subr.mxu1 %v12107_v16 }
 0x720   :  { %6625 = vmatpush3.msra.mxu1 %v5824_v44 }
 0x721   :  { %6626 = vmatprep.subr.mxu1 %v12107_v16 }
 0x722   :  { %6627 = vmatpush3.msra.mxu1 %v5823_v43 }
 0x723   :  { %6628 = vmatprep.subr.mxu1 %v12107_v16 }
 0x724   :  { %6629 = vmatpush3.msra.mxu1 %v5822_v24 }
 0x725   :  { %6630 = vmatprep.subr.mxu1 %v12107_v16 }
 0x726   :  { %6631 = vmatpush3.msra.mxu1 %v5821_v38 }
 0x727   :  { %6632 = vmatprep.subr.mxu1 %v12107_v16 }
 0x728   :  { %6633 = vmatpush3.msra.mxu1 %v5820_v13 }
 0x729   :  { %6634 = vmatprep.subr.mxu1 %v12107_v16 }
 0x72a   :  { %6635 = vmatpush3.msra.mxu1 %v5819_v61 }
 0x72b   :  { %6636 = vmatprep.subr.mxu1 %v12107_v16 }
 0x72c   :  { %6637 = vmatpush3.msra.mxu1 %v5818_v17 }
 0x72d   :  { %6638 = vmatprep.subr.mxu1 %v12107_v16 }
 0x72e   :  { %6639 = vmatpush3.msra.mxu1 %v5817_v42 }
 0x7cf   :  { %v5812_v35 = vpop.f32.mrf.mxu1 }
 0x7d0   :  { %v5813_v6 = vadd.f32 %v6165_v11, %v5812_v35 }
 0x7d1   :  { %v6607_v58 = vpop.f32.mrf.mxu1 }
 0x7d2   :  { %v5816_v25 = vmax.f32 %v5813_v6, 0.0 }
 0x7d4   :  { %6641 = vmatmul.mubr.f32.vlgmr.msra.gmra.mxu1 %v5816_v25 }
 0x894   :  { %v5906_v32 = vpop.f32.mrf.mxu1 }
 0x895   :  { %v5907_v2 = vadd.f32 %v6166_v55, %v5906_v32 }
 0x896   :  { %v6642_v16 = vpop.f32.mrf.mxu1 }
 0x897   :  { %5911 = vst.msk [vmem:[#allocation4] sm:$0x3] %vm5910_vm4, %v5907_v2 }
 0x898   :  { %6696 = shalt.err (!%p6693_p4)
}
 0x899   :  { %5921 = dma.vmem_to_hbm [thread:$0]  %s5919_s1, 32, %s11362_s11, [#allocation5]  }
 0x89a   :  { %6705 = dma.done.wait [#allocation5], 32  }
 0x89b   :  { %6706 = vsyncadd [#allocation5], 4294967264 }
 0x89c   :  { %5925 = vsyncpa [#allocation5], 1 }

</bundles_post_ra>
